<compile_context>
chip_gen: v7x
topology: tpu7x:2x2x1
jax: 0.10.0
libtpu: 0.0.40
codegen_flags: <defaults>
</compile_context>

<pallas_src>
import functools

import jax
import jax.numpy as jnp
from jax.experimental import pallas as pl
from jax.experimental.pallas import tpu as pltpu

EPS = 1e-5


def _vmem_limit_bytes():
    """Generation-aware scoped-VMEM limit (review item #1)."""
    cap = 128 * 1024 * 1024                      # v5e / v6e physical VMEM
    try:
        info = pltpu.get_tpu_info()
        cap = int(getattr(info, "vmem_capacity_bytes", cap))
    except Exception:
        pass
    return int(cap * 0.75)                       # 96 MiB on v5e/v6e, 48 MiB on v7x


_VMEM_LIMIT = _vmem_limit_bytes()


# ----------------------------------------------------------------------------
# In-kernel helpers
# ----------------------------------------------------------------------------
def _conv3x3_flat(w_ref, src_ref, L, Wp):
    """3x3 conv (padding=1) as 9 accumulating MXU matmuls over shifted
    contiguous views of a zero-padded, row-major flattened image.
      w_ref  : (9, Cout, Cin) tap weights
      src_ref: (Cin, >= 2*Wp + 2 + L) zero-padded flat VMEM scratch
    Returns a (Cout, L) f32 value in "q-layout" (row stride Wp, last two
    columns of every row are junk and get masked by the caller)."""
    acc = None
    for k in range(9):
        dh, dw = divmod(k, 3)
        off = dh * Wp + dw
        t = jnp.dot(w_ref[k].astype(jnp.float32),
                    src_ref[:, off:off + L],
                    preferred_element_type=jnp.float32)
        acc = t if acc is None else acc + t
    return acc


def _masked_moments(y, mask, count):
    """Per-channel mean / biased var over the valid (mask==1) lane positions."""
    mean = jnp.sum(y * mask, axis=1, keepdims=True) / count
    cen = y - mean
    var = jnp.sum(jnp.square(cen) * mask, axis=1, keepdims=True) / count
    return cen, var


# ----------------------------------------------------------------------------
# Wrapper-side helpers (tiny, XLA)
# ----------------------------------------------------------------------------
def _prep_taps(w):
    """(3, 3, Cin, Cout) conv weight -> (9, Cout, Cin) tap matrices."""
    kh, kw, cin, cout = w.shape
    return jnp.transpose(w.reshape(kh * kw, cin, cout), (0, 2, 1))


def _pad_mask(H, W):
    """(1, H*(W+2)) f32 mask: 1 on valid columns, 0 on the 2 pad columns/row."""
    Wp = W + 2
    col = jnp.arange(H * Wp, dtype=jnp.int32) % Wp
    return (col < W).astype(jnp.float32).reshape(1, H * Wp)


# ----------------------------------------------------------------------------
# Fused InstanceNorm BasicBlock (the `upper` branch) -> q-layout output
# ----------------------------------------------------------------------------
def _in_block_q_kernel(x_ref, w1_ref, w2_ref, mask_ref, *rest, H, W, Cin, Cout,
                       conv_shortcut):
    if conv_shortcut:
        wsc_ref, o_ref, xpad, hpad = rest
    else:
        o_ref, xpad, hpad = rest
    f32 = jnp.float32
    Wp = W + 2
    L = H * Wp
    cnt = float(H * W)
    mask = mask_ref[...]                                       # (1, L)

    # Rebuild the zero halo every grid step (megacore-safe on v7x).
    xpad[...] = jnp.zeros_like(xpad)
    hpad[...] = jnp.zeros_like(hpad)
    for i in range(H):
        base = (i + 1) * Wp + 1
        xpad[:, base:base + W] = x_ref[0, :, i, :].astype(f32)

    # conv1 -> InstanceNorm -> ReLU (stats over valid columns only)
    y = _conv3x3_flat(w1_ref, xpad, L, Wp)                     # (Cout, L)
    cen, var = _masked_moments(y, mask, cnt)
    h = jnp.maximum(cen * jax.lax.rsqrt(var + EPS), 0.0) * mask
    hpad[:, Wp + 1:Wp + 1 + L] = h                             # pad cols stay 0

    # conv2 -> InstanceNorm -> (+shortcut) -> ReLU
    y2 = _conv3x3_flat(w2_ref, hpad, L, Wp)
    cen2, var2 = _masked_moments(y2, mask, cnt)
    yn = cen2 * jax.lax.rsqrt(var2 + EPS)
    x_q = xpad[:, Wp + 1:Wp + 1 + L]                           # input in q-layout
    if conv_shortcut:
        yn = yn + jnp.dot(wsc_ref[...].astype(f32), x_q,
                          preferred_element_type=f32)
    else:
        yn = yn + x_q
    o_ref[0] = jnp.maximum(yn, 0.0).astype(o_ref.dtype)        # q-layout output


def fused_in_block_q(x, params):
    """InstanceNorm BasicBlock fused into one pallas_call per sample.
    x: (N, Cin, H, W) NCHW  ->  (N, Cout, H*(W+2)) q-layout (lane-dense)."""
    N, Cin, H, W = x.shape
    Cout = params["w1"].shape[-1]
    conv_shortcut = Cin != Cout
    L, Lp = H * (W + 2), (H + 3) * (W + 2)
    w1 = _prep_taps(params["w1"])
    w2 = _prep_taps(params["w2"])
    mask = _pad_mask(H, W)

    kern = functools.partial(_in_block_q_kernel, H=H, W=W, Cin=Cin, Cout=Cout,
                             conv_shortcut=conv_shortcut)
    in_specs = [
        pl.BlockSpec((1, Cin, H, W), lambda n: (n, 0, 0, 0)),
        pl.BlockSpec((9, Cout, Cin), lambda n: (0, 0, 0)),
        pl.BlockSpec((9, Cout, Cout), lambda n: (0, 0, 0)),
        pl.BlockSpec((1, L), lambda n: (0, 0)),
    ]
    args = [x, w1, w2, mask]
    if conv_shortcut:
        in_specs.append(pl.BlockSpec((Cout, Cin), lambda n: (0, 0)))
        args.append(jnp.transpose(params["wsc"]))     # (Cin,Cout) -> (Cout,Cin)

    return pl.pallas_call(
        kern,
        out_shape=jax.ShapeDtypeStruct((N, Cout, L), x.dtype),
        grid=(N,),
        in_specs=in_specs,
        out_specs=pl.BlockSpec((1, Cout, L), lambda n: (n, 0, 0)),
        scratch_shapes=[pltpu.VMEM((Cin, Lp), jnp.float32),
                        pltpu.VMEM((Cout, Lp), jnp.float32)],
        compiler_params=pltpu.CompilerParams(
            dimension_semantics=("parallel",),
            vmem_limit_bytes=_VMEM_LIMIT),
    )(*args)


# ----------------------------------------------------------------------------
# BatchNorm BasicBlock (low1) with fused in-kernel 2x2 maxpool: 3-pass pipeline
# ----------------------------------------------------------------------------
def _pool_conv1_kernel(x_ref, w1_ref, mask_ref, y_ref, xq_ref, st_ref, xpad,
                       *, H, W, Cin, Cout):
    f32 = jnp.float32
    Ho, Wo = H // 2, W // 2
    Wp = Wo + 2
    L = Ho * Wp
    mask = mask_ref[...]

    xpad[...] = jnp.zeros_like(xpad)
    # even / odd column selectors for the in-kernel 2x2 max-pool
    wi = jax.lax.broadcasted_iota(jnp.int32, (W, Wo), 0)
    ji = jax.lax.broadcasted_iota(jnp.int32, (W, Wo), 1)
    sel_e = (wi == 2 * ji).astype(f32)
    sel_o = (wi == 2 * ji + 1).astype(f32)
    for i in range(Ho):
        rm = jnp.maximum(x_ref[0, :, 2 * i, :].astype(f32),
                         x_ref[0, :, 2 * i + 1, :].astype(f32))      # (Cin, W)
        pooled = jnp.maximum(
            jnp.dot(rm, sel_e, preferred_element_type=f32),
            jnp.dot(rm, sel_o, preferred_element_type=f32))          # (Cin, Wo)
        base = (i + 1) * Wp + 1
        xpad[:, base:base + Wo] = pooled
    # pooled input in q-layout, reused by pass C's 1x1 shortcut
    xq_ref[0] = xpad[:, Wp + 1:Wp + 1 + L].astype(xq_ref.dtype)

    y = _conv3x3_flat(w1_ref, xpad, L, Wp)                           # (Cout, L)
    y_ref[0] = y.astype(y_ref.dtype)
    # per-sample partial BN stats ('parallel'-friendly; reduced in XLA)
    st_ref[0, :, 0:1] = jnp.sum(y * mask, axis=1, keepdims=True)
    st_ref[0, :, 1:2] = jnp.sum(y * y * mask, axis=1, keepdims=True)


def _bn_relu_conv2_kernel(y1_ref, s1_ref, w2_ref, mask_ref, y2_ref, st_ref,
                          hpad, *, Ho, Wo, C, count):
    f32 = jnp.float32
    Wp = Wo + 2
    L = Ho * Wp
    mask = mask_ref[...]
    hpad[...] = jnp.zeros_like(hpad)

    mean = s1_ref[:, 0:1] / count                                    # (C, 1)
    # TODO(synk): sumsq/N - mean^2 can cancel in f32 for large activations;
    # switch to a Welford/two-pass reduction if that regime matters.
    var = jnp.maximum(s1_ref[:, 1:2] / count - mean * mean, 0.0)
    h = (y1_ref[0].astype(f32) - mean) * jax.lax.rsqrt(var + EPS)
    h = jnp.maximum(h, 0.0) * mask
    hpad[:, Wp + 1:Wp + 1 + L] = h

    y2 = _conv3x3_flat(w2_ref, hpad, L, Wp)
    y2_ref[0] = y2.astype(y2_ref.dtype)
    st_ref[0, :, 0:1] = jnp.sum(y2 * mask, axis=1, keepdims=True)
    st_ref[0, :, 1:2] = jnp.sum(y2 * y2 * mask, axis=1, keepdims=True)


def _bn_shortcut_out_kernel(y2_ref, s2_ref, xq_ref, *rest, Ho, Wo, Cin, Cout,
                            count, conv_shortcut):
    if conv_shortcut:
        wsc_ref, o_ref = rest
    else:
        o_ref, = rest
    f32 = jnp.float32
    Wp = Wo + 2

    mean = s2_ref[:, 0:1] / count
    var = jnp.maximum(s2_ref[:, 1:2] / count - mean * mean, 0.0)
    yn = (y2_ref[0].astype(f32) - mean) * jax.lax.rsqrt(var + EPS)
    if conv_shortcut:
        sc = jnp.dot(wsc_ref[...].astype(f32), xq_ref[0].astype(f32),
                     preferred_element_type=f32)
    else:
        sc = xq_ref[0].astype(f32)          # identity add, no eye() matmul
    out = jnp.maximum(yn + sc, 0.0)                                  # (Cout, L)
    # De-stride the q-layout into a standard (Cout, Ho, Wo) NCHW block: the
    # (externally injected) middle network expects the PyTorch layout here.
    for i in range(Ho):
        o_ref[0, :, i, :] = out[:, i * Wp:i * Wp + Wo].astype(o_ref.dtype)


def batchnorm_basic_block_pooled(x, params):
    """MaxPool2x2 + BatchNorm BasicBlock as a 3-pass per-sample pipeline.
    (N, Cin, H, W) NCHW -> (N, Cout, H//2, W//2) NCHW."""
    N, Cin, H, W = x.shape
    Ho, Wo = H // 2, W // 2
    L, Lp = Ho * (Wo + 2), (Ho + 3) * (Wo + 2)
    Cout = params["w1"].shape[-1]
    conv_shortcut = Cin != Cout
    cnt = float(N * Ho * Wo)
    w1 = _prep_taps(params["w1"])
    w2 = _prep_taps(params["w2"])
    mask = _pad_mask(Ho, Wo)
    cp = pltpu.CompilerParams(dimension_semantics=("parallel",),
                              vmem_limit_bytes=_VMEM_LIMIT)

    # ---- pass A: in-kernel 2x2 max-pool + conv1 + per-sample stats ----
    kern_a = functools.partial(_pool_conv1_kernel, H=H, W=W, Cin=Cin, Cout=Cout)
    y1, xq, st1 = pl.pallas_call(
        kern_a,
        out_shape=(jax.ShapeDtypeStruct((N, Cout, L), x.dtype),
                   jax.ShapeDtypeStruct((N, Cin, L), x.dtype),
                   jax.ShapeDtypeStruct((N, Cout, 2), jnp.float32)),
        grid=(N,),
        in_specs=[pl.BlockSpec((1, Cin, H, W), lambda n: (n, 0, 0, 0)),
                  pl.BlockSpec((9, Cout, Cin), lambda n: (0, 0, 0)),
                  pl.BlockSpec((1, L), lambda n: (0, 0))],
        out_specs=(pl.BlockSpec((1, Cout, L), lambda n: (n, 0, 0)),
                   pl.BlockSpec((1, Cin, L), lambda n: (n, 0, 0)),
                   pl.BlockSpec((1, Cout, 2), lambda n: (n, 0, 0))),
        scratch_shapes=[pltpu.VMEM((Cin, Lp), jnp.float32)],
        compiler_params=cp,
    )(x, w1, mask)
    s1 = jnp.sum(st1, axis=0)                       # (Cout, 2) tiny XLA reduce

    # ---- pass B: bn1 + relu + conv2 + per-sample stats ----
    kern_b = functools.partial(_bn_relu_conv2_kernel, Ho=Ho, Wo=Wo, C=Cout,
                               count=cnt)
    y2, st2 = pl.pallas_call(
        kern_b,
        out_shape=(jax.ShapeDtypeStruct((N, Cout, L), x.dtype),
                   jax.ShapeDtypeStruct((N, Cout, 2), jnp.float32)),
        grid=(N,),
        in_specs=[pl.BlockSpec((1, Cout, L), lambda n: (n, 0, 0)),
                  pl.BlockSpec((Cout, 2), lambda n: (0, 0)),
                  pl.BlockSpec((9, Cout, Cout), lambda n: (0, 0, 0)),
                  pl.BlockSpec((1, L), lambda n: (0, 0))],
        out_specs=(pl.BlockSpec((1, Cout, L), lambda n: (n, 0, 0)),
                   pl.BlockSpec((1, Cout, 2), lambda n: (n, 0, 0))),
        scratch_shapes=[pltpu.VMEM((Cout, Lp), jnp.float32)],
        compiler_params=cp,
    )(y1, s1, w2, mask)
    s2 = jnp.sum(st2, axis=0)

    # ---- pass C: bn2 + shortcut + relu, de-strided to NCHW ----
    kern_c = functools.partial(_bn_shortcut_out_kernel, Ho=Ho, Wo=Wo, Cin=Cin,
                               Cout=Cout, count=cnt,
                               conv_shortcut=conv_shortcut)
    in_specs = [pl.BlockSpec((1, Cout, L), lambda n: (n, 0, 0)),
                pl.BlockSpec((Cout, 2), lambda n: (0, 0)),
                pl.BlockSpec((1, Cin, L), lambda n: (n, 0, 0))]
    args = [y2, s2, xq]
    if conv_shortcut:
        in_specs.append(pl.BlockSpec((Cout, Cin), lambda n: (0, 0)))
        args.append(jnp.transpose(params["wsc"]))
    return pl.pallas_call(
        kern_c,
        out_shape=jax.ShapeDtypeStruct((N, Cout, Ho, Wo), x.dtype),
        grid=(N,),
        in_specs=in_specs,
        out_specs=pl.BlockSpec((1, Cout, Ho, Wo), lambda n: (n, 0, 0, 0)),
        compiler_params=cp,
    )(*args)


# ----------------------------------------------------------------------------
# low2 (InstanceNorm block) + fused nearest-2x upsample + optional skip add
# ----------------------------------------------------------------------------
def _low2_upsample_kernel(z_ref, w1_ref, w2_ref, mask_ref, *rest, Ho, Wo, Cin,
                          Cout, conv_shortcut, add_skip):
    rest = list(rest)
    idx = 0
    if conv_shortcut:
        wsc_ref = rest[idx]; idx += 1
    if add_skip:
        up_ref = rest[idx]; idx += 1
    o_ref, xpad, hpad = rest[idx], rest[idx + 1], rest[idx + 2]

    f32 = jnp.float32
    Wp = Wo + 2
    L = Ho * Wp
    H, W = 2 * Ho, 2 * Wo
    WpF = W + 2                       # row stride of the full-res q-layout
    cnt = float(Ho * Wo)
    mask = mask_ref[...]

    xpad[...] = jnp.zeros_like(xpad)
    hpad[...] = jnp.zeros_like(hpad)
    for i in range(Ho):
        base = (i + 1) * Wp + 1
        xpad[:, base:base + Wo] = z_ref[0, :, i, :].astype(f32)

    # conv1 -> InstanceNorm -> ReLU
    y = _conv3x3_flat(w1_ref, xpad, L, Wp)
    cen, var = _masked_moments(y, mask, cnt)
    h = jnp.maximum(cen * jax.lax.rsqrt(var + EPS), 0.0) * mask
    hpad[:, Wp + 1:Wp + 1 + L] = h

    # conv2 -> InstanceNorm -> (+shortcut) -> ReLU
    y2 = _conv3x3_flat(w2_ref, hpad, L, Wp)
    cen2, var2 = _masked_moments(y2, mask, cnt)
    yn = cen2 * jax.lax.rsqrt(var2 + EPS)
    z_q = xpad[:, Wp + 1:Wp + 1 + L]
    if conv_shortcut:
        yn = yn + jnp.dot(wsc_ref[...].astype(f32), z_q,
                          preferred_element_type=f32)
    else:
        yn = yn + z_q
    low = jnp.maximum(yn, 0.0)                                     # (Cout, L)

    # Fused nearest-2x upsample (+ optional skip add from the upper branch):
    # W-doubling via a 0/1 (Wo, W) matmul, H-doubling by writing both rows.
    wi = jax.lax.broadcasted_iota(jnp.int32, (Wo, W), 1)
    ji = jax.lax.broadcasted_iota(jnp.int32, (Wo, W), 0)
    up_w = jnp.logical_or(wi == 2 * ji, wi == 2 * ji + 1).astype(f32)
    for i in range(Ho):
        row = low[:, i * Wp:i * Wp + Wo]                           # (Cout, Wo)
        vW = jnp.dot(row, up_w, preferred_element_type=f32)        # (Cout, W)
        for a in range(2):
            r = 2 * i + a
            val = vW
            if add_skip:
                val = val + up_ref[0, :, r * WpF:r * WpF + W].astype(f32)
            o_ref[0, :, r, :] = val.astype(o_ref.dtype)


def low2_upsample_skip(z, params, upper_q, add_skip):
    """InstanceNorm BasicBlock + nearest-2x upsample (+ skip add with the
    upper branch, read in q-layout) fused into a single pallas_call.
    z: (N, Cin, Ho, Wo) -> out: (N, Cout, 2*Ho, 2*Wo)."""
    N, Cin, Ho, Wo = z.shape
    Cout = params["w1"].shape[-1]
    conv_shortcut = Cin != Cout
    H, W = 2 * Ho, 2 * Wo
    L, Lp = Ho * (Wo + 2), (Ho + 3) * (Wo + 2)
    LF = H * (W + 2)
    w1 = _prep_taps(params["w1"])
    w2 = _prep_taps(params["w2"])
    mask = _pad_mask(Ho, Wo)

    kern = functools.partial(_low2_upsample_kernel, Ho=Ho, Wo=Wo, Cin=Cin,
                             Cout=Cout, conv_shortcut=conv_shortcut,
                             add_skip=add_skip)
    in_specs = [
        pl.BlockSpec((1, Cin, Ho, Wo), lambda n: (n, 0, 0, 0)),
        pl.BlockSpec((9, Cout, Cin), lambda n: (0, 0, 0)),
        pl.BlockSpec((9, Cout, Cout), lambda n: (0, 0, 0)),
        pl.BlockSpec((1, L), lambda n: (0, 0)),
    ]
    args = [z, w1, w2, mask]
    if conv_shortcut:
        in_specs.append(pl.BlockSpec((Cout, Cin), lambda n: (0, 0)))
        args.append(jnp.transpose(params["wsc"]))
    if add_skip:
        in_specs.append(pl.BlockSpec((1, Cout, LF), lambda n: (n, 0, 0)))
        args.append(upper_q)

    return pl.pallas_call(
        kern,
        out_shape=jax.ShapeDtypeStruct((N, Cout, H, W), z.dtype),
        grid=(N,),
        in_specs=in_specs,
        out_specs=pl.BlockSpec((1, Cout, H, W), lambda n: (n, 0, 0, 0)),
        scratch_shapes=[pltpu.VMEM((Cin, Lp), jnp.float32),
                        pltpu.VMEM((Cout, Lp), jnp.float32)],
        compiler_params=pltpu.CompilerParams(
            dimension_semantics=("parallel",),
            vmem_limit_bytes=_VMEM_LIMIT),
    )(*args)


# ----------------------------------------------------------------------------
# HourglassBlock forward (jitted orchestration of the Pallas kernels)
# ----------------------------------------------------------------------------
def middle_identity(x, light, count, skip_count):
    # TODO(synk): `middleNet` is an externally injected submodule in the
    # reference; identity stand-in returning (features, source_face_feats,
    # out_middle).
    return x, x, light


@functools.partial(jax.jit,
                   static_argnames=("count", "skip_count", "skip_layer",
                                    "middle_net"))
def hourglass_block(x_nchw, light, count, skip_count, params,
                    skip_layer=True, middle_net=middle_identity):
    """HourglassBlock.forward; NCHW at the boundary, exactly like PyTorch."""
    add_skip = bool(count >= skip_count and skip_layer)

    # Upper (InstanceNorm) branch; only needed when the skip add is taken.
    # Its result stays in q-layout for the fused upsample+skip tail of low2.
    upper_q = fused_in_block_q(x_nchw, params["upper"]) if add_skip else None

    out_lower = batchnorm_basic_block_pooled(x_nchw, params["low1"])
    out_lower, source_face_feats, out_middle = middle_net(
        out_lower, light, count + 1, skip_count)
    out = low2_upsample_skip(out_lower, params["low2"], upper_q, add_skip)
    return out, source_face_feats, out_middle


# ----------------------------------------------------------------------------
# Deterministic synthetic parameters
# ----------------------------------------------------------------------------
def init_basic_block(key, cin, cout, scale=0.1):
    k1, k2, k3 = jax.random.split(key, 3)
    return {
        # conv weights stored as (kh, kw, Cin, Cout); PyTorch stores
        # (Cout, Cin, kh, kw) -- synthetic weights, same semantics.
        "w1": scale * jax.random.normal(k1, (3, 3, cin, cout), jnp.float32),
        "w2": scale * jax.random.normal(k2, (3, 3, cout, cout), jnp.float32),
        # 1x1 shortcut conv as (Cin, Cout); only used when cin != cout
        "wsc": scale * jax.random.normal(k3, (cin, cout), jnp.float32),
    }


def init_hourglass(key, inplane, mid_plane):
    ku, k1, k2 = jax.random.split(key, 3)
    return {
        "upper": init_basic_block(ku, inplane, inplane),    # InstanceNorm
        "low1": init_basic_block(k1, inplane, mid_plane),   # BatchNorm
        "low2": init_basic_block(k2, mid_plane, inplane),   # InstanceNorm
    }


if __name__ == "__main__":
    N, C, H, W = 2, 4, 16, 16
    MID = 8
    key = jax.random.PRNGKey(0)
    kx, kl, kp = jax.random.split(key, 3)

    x = jax.random.normal(kx, (N, C, H, W), jnp.float32)    # NCHW like PyTorch
    light = jax.random.normal(kl, (N, 9), jnp.float32)
    params = init_hourglass(kp, C, MID)

    out, feats, middle = hourglass_block(
        x, light, count=0, skip_count=0, params=params)

    out = jax.block_until_ready(out)
    jax.block_until_ready(feats)
    jax.block_until_ready(middle)

    assert out.shape == (N, C, H, W)
    assert feats.shape == (N, MID, H // 2, W // 2)
    assert bool(jnp.isfinite(out).all())
    print("KERNEL_OK")
</pallas_src>

<mosaic_0001>
module attributes {stable_mosaic.version = 11 : i64} {
  func.func @_pool_conv1_kernel(%arg0: i32, %arg1: memref<1x4x16x16xf32, #tpu.memory_space<vmem>>, %arg2: memref<9x8x4xf32, #tpu.memory_space<vmem>>, %arg3: memref<1x80xf32, #tpu.memory_space<vmem>>, %arg4: memref<1x8x80xf32, #tpu.memory_space<vmem>>, %arg5: memref<1x4x80xf32, #tpu.memory_space<vmem>>, %arg6: memref<1x8x2xf32, #tpu.memory_space<vmem>>, %arg7: memref<4x110xf32, #tpu.memory_space<vmem>>) attributes {dimension_semantics = [#tpu.dimension_semantics<parallel>], iteration_bounds = array<i64: 2>, scalar_prefetch = 0 : i64, scratch_operands = 1 : i64, tpu.core_type = #tpu.core_type<tc>, window_params = [{transform_indices = @transform_0, window_bounds = array<i64: 1, 4, 16, 16>}, {pipeline_mode = #tpu.pipeline_mode<synchronous>, transform_indices = @transform_1, window_bounds = array<i64: 9, 8, 4>}, {pipeline_mode = #tpu.pipeline_mode<synchronous>, transform_indices = @transform_2, window_bounds = array<i64: 1, 80>}, {transform_indices = @transform_3, window_bounds = array<i64: 1, 8, 80>}, {transform_indices = @transform_4, window_bounds = array<i64: 1, 4, 80>}, {transform_indices = @transform_5, window_bounds = array<i64: 1, 8, 2>}]} {
    %c0 = arith.constant 0 : index
    %c0_0 = arith.constant 0 : index
    %0 = vector.load %arg3[%c0, %c0_0] : memref<1x80xf32, #tpu.memory_space<vmem>>, vector<1x80xf32>
    %cst = arith.constant 0.000000e+00 : f32
    %1 = vector.broadcast %cst : f32 to vector<4x110xf32>
    %c0_1 = arith.constant 0 : index
    %c0_2 = arith.constant 0 : index
    %2 = vector.load %arg7[%c0_1, %c0_2] : memref<4x110xf32, #tpu.memory_space<vmem>>, vector<4x110xf32>
    tpu.vector_store %arg7[%c0_1, %c0_2], %1 {strides = array<i32>} : memref<4x110xf32, #tpu.memory_space<vmem>>, vector<4x110xf32>,
    %3 = tpu.iota {dimensions = array<i32: 0>} : vector<16x8xi32>
    %4 = tpu.iota {dimensions = array<i32: 1>} : vector<16x8xi32>
    %c2_i32 = arith.constant 2 : i32
    %5 = vector.broadcast %c2_i32 : i32 to vector<16x8xi32>
    %6 = arith.muli %5, %4 : vector<16x8xi32>
    %7 = arith.cmpi eq, %3, %6 : vector<16x8xi32>
    %8 = arith.extui %7 : vector<16x8xi1> to vector<16x8xi32>
    %9 = arith.sitofp %8 : vector<16x8xi32> to vector<16x8xf32>
    %c2_i32_3 = arith.constant 2 : i32
    %10 = vector.broadcast %c2_i32_3 : i32 to vector<16x8xi32>
    %11 = arith.muli %10, %4 : vector<16x8xi32>
    %c1_i32 = arith.constant 1 : i32
    %12 = vector.broadcast %c1_i32 : i32 to vector<16x8xi32>
    %13 = arith.addi %11, %12 : vector<16x8xi32>
    %14 = arith.cmpi eq, %3, %13 : vector<16x8xi32>
    %15 = arith.extui %14 : vector<16x8xi1> to vector<16x8xi32>
    %16 = arith.sitofp %15 : vector<16x8xi32> to vector<16x8xf32>
    %c0_4 = arith.constant 0 : index
    %c0_5 = arith.constant 0 : index
    %c0_6 = arith.constant 0 : index
    %c0_7 = arith.constant 0 : index
    %17 = vector.load %arg1[%c0_4, %c0_5, %c0_6, %c0_7] : memref<1x4x16x16xf32, #tpu.memory_space<vmem>>, vector<1x4x1x16xf32>
    %18 = vector.shape_cast %17 : vector<1x4x1x16xf32> to vector<4x16xf32>
    %c0_8 = arith.constant 0 : index
    %c0_9 = arith.constant 0 : index
    %c1 = arith.constant 1 : index
    %c0_10 = arith.constant 0 : index
    %19 = vector.load %arg1[%c0_8, %c0_9, %c1, %c0_10] : memref<1x4x16x16xf32, #tpu.memory_space<vmem>>, vector<1x4x1x16xf32>
    %20 = vector.shape_cast %19 : vector<1x4x1x16xf32> to vector<4x16xf32>
    %21 = arith.maximumf %18, %20 : vector<4x16xf32>
    %cst_11 = arith.constant dense<0.000000e+00> : vector<4x8xf32>
    %22 = tpu.matmul %21, %9, %cst_11 {dimension_numbers = #tpu.dot_dimension_numbers<[1], [0], [0], [1], [0, 0, 1, 1], [], []>} : vector<4x16xf32>, vector<16x8xf32>, vector<4x8xf32> -> vector<4x8xf32>
    %cst_12 = arith.constant dense<0.000000e+00> : vector<4x8xf32>
    %23 = tpu.matmul %21, %16, %cst_12 {dimension_numbers = #tpu.dot_dimension_numbers<[1], [0], [0], [1], [0, 0, 1, 1], [], []>} : vector<4x16xf32>, vector<16x8xf32>, vector<4x8xf32> -> vector<4x8xf32>
    %24 = arith.maximumf %22, %23 : vector<4x8xf32>
    %c0_13 = arith.constant 0 : index
    %c11 = arith.constant 11 : index
    %25 = vector.load %arg7[%c0_13, %c11] : memref<4x110xf32, #tpu.memory_space<vmem>>, vector<4x8xf32>
    tpu.vector_store %arg7[%c0_13, %c11], %24 {strides = array<i32>} : memref<4x110xf32, #tpu.memory_space<vmem>>, vector<4x8xf32>,
    %c0_14 = arith.constant 0 : index
    %c0_15 = arith.constant 0 : index
    %c2 = arith.constant 2 : index
    %c0_16 = arith.constant 0 : index
    %26 = vector.load %arg1[%c0_14, %c0_15, %c2, %c0_16] : memref<1x4x16x16xf32, #tpu.memory_space<vmem>>, vector<1x4x1x16xf32>
    %27 = vector.shape_cast %26 : vector<1x4x1x16xf32> to vector<4x16xf32>
    %c0_17 = arith.constant 0 : index
    %c0_18 = arith.constant 0 : index
    %c3 = arith.constant 3 : index
    %c0_19 = arith.constant 0 : index
    %28 = vector.load %arg1[%c0_17, %c0_18, %c3, %c0_19] : memref<1x4x16x16xf32, #tpu.memory_space<vmem>>, vector<1x4x1x16xf32>
    %29 = vector.shape_cast %28 : vector<1x4x1x16xf32> to vector<4x16xf32>
    %30 = arith.maximumf %27, %29 : vector<4x16xf32>
    %cst_20 = arith.constant dense<0.000000e+00> : vector<4x8xf32>
    %31 = tpu.matmul %30, %9, %cst_20 {dimension_numbers = #tpu.dot_dimension_numbers<[1], [0], [0], [1], [0, 0, 1, 1], [], []>} : vector<4x16xf32>, vector<16x8xf32>, vector<4x8xf32> -> vector<4x8xf32>
    %cst_21 = arith.constant dense<0.000000e+00> : vector<4x8xf32>
    %32 = tpu.matmul %30, %16, %cst_21 {dimension_numbers = #tpu.dot_dimension_numbers<[1], [0], [0], [1], [0, 0, 1, 1], [], []>} : vector<4x16xf32>, vector<16x8xf32>, vector<4x8xf32> -> vector<4x8xf32>
    %33 = arith.maximumf %31, %32 : vector<4x8xf32>
    %c0_22 = arith.constant 0 : index
    %c21 = arith.constant 21 : index
    %34 = vector.load %arg7[%c0_22, %c21] : memref<4x110xf32, #tpu.memory_space<vmem>>, vector<4x8xf32>
    tpu.vector_store %arg7[%c0_22, %c21], %33 {strides = array<i32>} : memref<4x110xf32, #tpu.memory_space<vmem>>, vector<4x8xf32>,
    %c0_23 = arith.constant 0 : index
    %c0_24 = arith.constant 0 : index
    %c4 = arith.constant 4 : index
    %c0_25 = arith.constant 0 : index
    %35 = vector.load %arg1[%c0_23, %c0_24, %c4, %c0_25] : memref<1x4x16x16xf32, #tpu.memory_space<vmem>>, vector<1x4x1x16xf32>
    %36 = vector.shape_cast %35 : vector<1x4x1x16xf32> to vector<4x16xf32>
    %c0_26 = arith.constant 0 : index
    %c0_27 = arith.constant 0 : index
    %c5 = arith.constant 5 : index
    %c0_28 = arith.constant 0 : index
    %37 = vector.load %arg1[%c0_26, %c0_27, %c5, %c0_28] : memref<1x4x16x16xf32, #tpu.memory_space<vmem>>, vector<1x4x1x16xf32>
    %38 = vector.shape_cast %37 : vector<1x4x1x16xf32> to vector<4x16xf32>
    %39 = arith.maximumf %36, %38 : vector<4x16xf32>
    %cst_29 = arith.constant dense<0.000000e+00> : vector<4x8xf32>
    %40 = tpu.matmul %39, %9, %cst_29 {dimension_numbers = #tpu.dot_dimension_numbers<[1], [0], [0], [1], [0, 0, 1, 1], [], []>} : vector<4x16xf32>, vector<16x8xf32>, vector<4x8xf32> -> vector<4x8xf32>
    %cst_30 = arith.constant dense<0.000000e+00> : vector<4x8xf32>
    %41 = tpu.matmul %39, %16, %cst_30 {dimension_numbers = #tpu.dot_dimension_numbers<[1], [0], [0], [1], [0, 0, 1, 1], [], []>} : vector<4x16xf32>, vector<16x8xf32>, vector<4x8xf32> -> vector<4x8xf32>
    %42 = arith.maximumf %40, %41 : vector<4x8xf32>
    %c0_31 = arith.constant 0 : index
    %c31 = arith.constant 31 : index
    %43 = vector.load %arg7[%c0_31, %c31] : memref<4x110xf32, #tpu.memory_space<vmem>>, vector<4x8xf32>
    tpu.vector_store %arg7[%c0_31, %c31], %42 {strides = array<i32>} : memref<4x110xf32, #tpu.memory_space<vmem>>, vector<4x8xf32>,
    %c0_32 = arith.constant 0 : index
    %c0_33 = arith.constant 0 : index
    %c6 = arith.constant 6 : index
    %c0_34 = arith.constant 0 : index
    %44 = vector.load %arg1[%c0_32, %c0_33, %c6, %c0_34] : memref<1x4x16x16xf32, #tpu.memory_space<vmem>>, vector<1x4x1x16xf32>
    %45 = vector.shape_cast %44 : vector<1x4x1x16xf32> to vector<4x16xf32>
    %c0_35 = arith.constant 0 : index
    %c0_36 = arith.constant 0 : index
    %c7 = arith.constant 7 : index
    %c0_37 = arith.constant 0 : index
    %46 = vector.load %arg1[%c0_35, %c0_36, %c7, %c0_37] : memref<1x4x16x16xf32, #tpu.memory_space<vmem>>, vector<1x4x1x16xf32>
    %47 = vector.shape_cast %46 : vector<1x4x1x16xf32> to vector<4x16xf32>
    %48 = arith.maximumf %45, %47 : vector<4x16xf32>
    %cst_38 = arith.constant dense<0.000000e+00> : vector<4x8xf32>
    %49 = tpu.matmul %48, %9, %cst_38 {dimension_numbers = #tpu.dot_dimension_numbers<[1], [0], [0], [1], [0, 0, 1, 1], [], []>} : vector<4x16xf32>, vector<16x8xf32>, vector<4x8xf32> -> vector<4x8xf32>
    %cst_39 = arith.constant dense<0.000000e+00> : vector<4x8xf32>
    %50 = tpu.matmul %48, %16, %cst_39 {dimension_numbers = #tpu.dot_dimension_numbers<[1], [0], [0], [1], [0, 0, 1, 1], [], []>} : vector<4x16xf32>, vector<16x8xf32>, vector<4x8xf32> -> vector<4x8xf32>
    %51 = arith.maximumf %49, %50 : vector<4x8xf32>
    %c0_40 = arith.constant 0 : index
    %c41 = arith.constant 41 : index
    %52 = vector.load %arg7[%c0_40, %c41] : memref<4x110xf32, #tpu.memory_space<vmem>>, vector<4x8xf32>
    tpu.vector_store %arg7[%c0_40, %c41], %51 {strides = array<i32>} : memref<4x110xf32, #tpu.memory_space<vmem>>, vector<4x8xf32>,
    %c0_41 = arith.constant 0 : index
    %c0_42 = arith.constant 0 : index
    %c8 = arith.constant 8 : index
    %c0_43 = arith.constant 0 : index
    %53 = vector.load %arg1[%c0_41, %c0_42, %c8, %c0_43] : memref<1x4x16x16xf32, #tpu.memory_space<vmem>>, vector<1x4x1x16xf32>
    %54 = vector.shape_cast %53 : vector<1x4x1x16xf32> to vector<4x16xf32>
    %c0_44 = arith.constant 0 : index
    %c0_45 = arith.constant 0 : index
    %c9 = arith.constant 9 : index
    %c0_46 = arith.constant 0 : index
    %55 = vector.load %arg1[%c0_44, %c0_45, %c9, %c0_46] : memref<1x4x16x16xf32, #tpu.memory_space<vmem>>, vector<1x4x1x16xf32>
    %56 = vector.shape_cast %55 : vector<1x4x1x16xf32> to vector<4x16xf32>
    %57 = arith.maximumf %54, %56 : vector<4x16xf32>
    %cst_47 = arith.constant dense<0.000000e+00> : vector<4x8xf32>
    %58 = tpu.matmul %57, %9, %cst_47 {dimension_numbers = #tpu.dot_dimension_numbers<[1], [0], [0], [1], [0, 0, 1, 1], [], []>} : vector<4x16xf32>, vector<16x8xf32>, vector<4x8xf32> -> vector<4x8xf32>
    %cst_48 = arith.constant dense<0.000000e+00> : vector<4x8xf32>
    %59 = tpu.matmul %57, %16, %cst_48 {dimension_numbers = #tpu.dot_dimension_numbers<[1], [0], [0], [1], [0, 0, 1, 1], [], []>} : vector<4x16xf32>, vector<16x8xf32>, vector<4x8xf32> -> vector<4x8xf32>
    %60 = arith.maximumf %58, %59 : vector<4x8xf32>
    %c0_49 = arith.constant 0 : index
    %c51 = arith.constant 51 : index
    %61 = vector.load %arg7[%c0_49, %c51] : memref<4x110xf32, #tpu.memory_space<vmem>>, vector<4x8xf32>
    tpu.vector_store %arg7[%c0_49, %c51], %60 {strides = array<i32>} : memref<4x110xf32, #tpu.memory_space<vmem>>, vector<4x8xf32>,
    %c0_50 = arith.constant 0 : index
    %c0_51 = arith.constant 0 : index
    %c10 = arith.constant 10 : index
    %c0_52 = arith.constant 0 : index
    %62 = vector.load %arg1[%c0_50, %c0_51, %c10, %c0_52] : memref<1x4x16x16xf32, #tpu.memory_space<vmem>>, vector<1x4x1x16xf32>
    %63 = vector.shape_cast %62 : vector<1x4x1x16xf32> to vector<4x16xf32>
    %c0_53 = arith.constant 0 : index
    %c0_54 = arith.constant 0 : index
    %c11_55 = arith.constant 11 : index
    %c0_56 = arith.constant 0 : index
    %64 = vector.load %arg1[%c0_53, %c0_54, %c11_55, %c0_56] : memref<1x4x16x16xf32, #tpu.memory_space<vmem>>, vector<1x4x1x16xf32>
    %65 = vector.shape_cast %64 : vector<1x4x1x16xf32> to vector<4x16xf32>
    %66 = arith.maximumf %63, %65 : vector<4x16xf32>
    %cst_57 = arith.constant dense<0.000000e+00> : vector<4x8xf32>
    %67 = tpu.matmul %66, %9, %cst_57 {dimension_numbers = #tpu.dot_dimension_numbers<[1], [0], [0], [1], [0, 0, 1, 1], [], []>} : vector<4x16xf32>, vector<16x8xf32>, vector<4x8xf32> -> vector<4x8xf32>
    %cst_58 = arith.constant dense<0.000000e+00> : vector<4x8xf32>
    %68 = tpu.matmul %66, %16, %cst_58 {dimension_numbers = #tpu.dot_dimension_numbers<[1], [0], [0], [1], [0, 0, 1, 1], [], []>} : vector<4x16xf32>, vector<16x8xf32>, vector<4x8xf32> -> vector<4x8xf32>
    %69 = arith.maximumf %67, %68 : vector<4x8xf32>
    %c0_59 = arith.constant 0 : index
    %c61 = arith.constant 61 : index
    %70 = vector.load %arg7[%c0_59, %c61] : memref<4x110xf32, #tpu.memory_space<vmem>>, vector<4x8xf32>
    tpu.vector_store %arg7[%c0_59, %c61], %69 {strides = array<i32>} : memref<4x110xf32, #tpu.memory_space<vmem>>, vector<4x8xf32>,
    %c0_60 = arith.constant 0 : index
    %c0_61 = arith.constant 0 : index
    %c12 = arith.constant 12 : index
    %c0_62 = arith.constant 0 : index
    %71 = vector.load %arg1[%c0_60, %c0_61, %c12, %c0_62] : memref<1x4x16x16xf32, #tpu.memory_space<vmem>>, vector<1x4x1x16xf32>
    %72 = vector.shape_cast %71 : vector<1x4x1x16xf32> to vector<4x16xf32>
    %c0_63 = arith.constant 0 : index
    %c0_64 = arith.constant 0 : index
    %c13 = arith.constant 13 : index
    %c0_65 = arith.constant 0 : index
    %73 = vector.load %arg1[%c0_63, %c0_64, %c13, %c0_65] : memref<1x4x16x16xf32, #tpu.memory_space<vmem>>, vector<1x4x1x16xf32>
    %74 = vector.shape_cast %73 : vector<1x4x1x16xf32> to vector<4x16xf32>
    %75 = arith.maximumf %72, %74 : vector<4x16xf32>
    %cst_66 = arith.constant dense<0.000000e+00> : vector<4x8xf32>
    %76 = tpu.matmul %75, %9, %cst_66 {dimension_numbers = #tpu.dot_dimension_numbers<[1], [0], [0], [1], [0, 0, 1, 1], [], []>} : vector<4x16xf32>, vector<16x8xf32>, vector<4x8xf32> -> vector<4x8xf32>
    %cst_67 = arith.constant dense<0.000000e+00> : vector<4x8xf32>
    %77 = tpu.matmul %75, %16, %cst_67 {dimension_numbers = #tpu.dot_dimension_numbers<[1], [0], [0], [1], [0, 0, 1, 1], [], []>} : vector<4x16xf32>, vector<16x8xf32>, vector<4x8xf32> -> vector<4x8xf32>
    %78 = arith.maximumf %76, %77 : vector<4x8xf32>
    %c0_68 = arith.constant 0 : index
    %c71 = arith.constant 71 : index
    %79 = vector.load %arg7[%c0_68, %c71] : memref<4x110xf32, #tpu.memory_space<vmem>>, vector<4x8xf32>
    tpu.vector_store %arg7[%c0_68, %c71], %78 {strides = array<i32>} : memref<4x110xf32, #tpu.memory_space<vmem>>, vector<4x8xf32>,
    %c0_69 = arith.constant 0 : index
    %c0_70 = arith.constant 0 : index
    %c14 = arith.constant 14 : index
    %c0_71 = arith.constant 0 : index
    %80 = vector.load %arg1[%c0_69, %c0_70, %c14, %c0_71] : memref<1x4x16x16xf32, #tpu.memory_space<vmem>>, vector<1x4x1x16xf32>
    %81 = vector.shape_cast %80 : vector<1x4x1x16xf32> to vector<4x16xf32>
    %c0_72 = arith.constant 0 : index
    %c0_73 = arith.constant 0 : index
    %c15 = arith.constant 15 : index
    %c0_74 = arith.constant 0 : index
    %82 = vector.load %arg1[%c0_72, %c0_73, %c15, %c0_74] : memref<1x4x16x16xf32, #tpu.memory_space<vmem>>, vector<1x4x1x16xf32>
    %83 = vector.shape_cast %82 : vector<1x4x1x16xf32> to vector<4x16xf32>
    %84 = arith.maximumf %81, %83 : vector<4x16xf32>
    %cst_75 = arith.constant dense<0.000000e+00> : vector<4x8xf32>
    %85 = tpu.matmul %84, %9, %cst_75 {dimension_numbers = #tpu.dot_dimension_numbers<[1], [0], [0], [1], [0, 0, 1, 1], [], []>} : vector<4x16xf32>, vector<16x8xf32>, vector<4x8xf32> -> vector<4x8xf32>
    %cst_76 = arith.constant dense<0.000000e+00> : vector<4x8xf32>
    %86 = tpu.matmul %84, %16, %cst_76 {dimension_numbers = #tpu.dot_dimension_numbers<[1], [0], [0], [1], [0, 0, 1, 1], [], []>} : vector<4x16xf32>, vector<16x8xf32>, vector<4x8xf32> -> vector<4x8xf32>
    %87 = arith.maximumf %85, %86 : vector<4x8xf32>
    %c0_77 = arith.constant 0 : index
    %c81 = arith.constant 81 : index
    %88 = vector.load %arg7[%c0_77, %c81] : memref<4x110xf32, #tpu.memory_space<vmem>>, vector<4x8xf32>
    tpu.vector_store %arg7[%c0_77, %c81], %87 {strides = array<i32>} : memref<4x110xf32, #tpu.memory_space<vmem>>, vector<4x8xf32>,
    %c0_78 = arith.constant 0 : index
    %c11_79 = arith.constant 11 : index
    %89 = vector.load %arg7[%c0_78, %c11_79] : memref<4x110xf32, #tpu.memory_space<vmem>>, vector<4x80xf32>
    %c0_80 = arith.constant 0 : index
    %c0_81 = arith.constant 0 : index
    %c0_82 = arith.constant 0 : index
    %90 = vector.load %arg5[%c0_80, %c0_81, %c0_82] : memref<1x4x80xf32, #tpu.memory_space<vmem>>, vector<1x4x80xf32>
    %91 = vector.shape_cast %90 : vector<1x4x80xf32> to vector<4x80xf32>
    %92 = vector.shape_cast %89 : vector<4x80xf32> to vector<1x4x80xf32>
    tpu.vector_store %arg5[%c0_80, %c0_81, %c0_82], %92 {strides = array<i32>} : memref<1x4x80xf32, #tpu.memory_space<vmem>>, vector<1x4x80xf32>,
    %c0_83 = arith.constant 0 : index
    %c0_84 = arith.constant 0 : index
    %c0_85 = arith.constant 0 : index
    %93 = vector.load %arg2[%c0_83, %c0_84, %c0_85] : memref<9x8x4xf32, #tpu.memory_space<vmem>>, vector<1x8x4xf32>
    %94 = vector.shape_cast %93 : vector<1x8x4xf32> to vector<8x4xf32>
    %c0_86 = arith.constant 0 : index
    %c0_87 = arith.constant 0 : index
    %95 = vector.load %arg7[%c0_86, %c0_87] : memref<4x110xf32, #tpu.memory_space<vmem>>, vector<4x80xf32>
    %cst_88 = arith.constant dense<0.000000e+00> : vector<8x80xf32>
    %96 = tpu.matmul %94, %95, %cst_88 {dimension_numbers = #tpu.dot_dimension_numbers<[1], [0], [0], [1], [0, 0, 1, 1], [], []>} : vector<8x4xf32>, vector<4x80xf32>, vector<8x80xf32> -> vector<8x80xf32>
    %c1_89 = arith.constant 1 : index
    %c0_90 = arith.constant 0 : index
    %c0_91 = arith.constant 0 : index
    %97 = vector.load %arg2[%c1_89, %c0_90, %c0_91] : memref<9x8x4xf32, #tpu.memory_space<vmem>>, vector<1x8x4xf32>
    %98 = vector.shape_cast %97 : vector<1x8x4xf32> to vector<8x4xf32>
    %c0_92 = arith.constant 0 : index
    %c1_93 = arith.constant 1 : index
    %99 = vector.load %arg7[%c0_92, %c1_93] : memref<4x110xf32, #tpu.memory_space<vmem>>, vector<4x80xf32>
    %cst_94 = arith.constant dense<0.000000e+00> : vector<8x80xf32>
    %100 = tpu.matmul %98, %99, %cst_94 {dimension_numbers = #tpu.dot_dimension_numbers<[1], [0], [0], [1], [0, 0, 1, 1], [], []>} : vector<8x4xf32>, vector<4x80xf32>, vector<8x80xf32> -> vector<8x80xf32>
    %101 = arith.addf %96, %100 : vector<8x80xf32>
    %c2_95 = arith.constant 2 : index
    %c0_96 = arith.constant 0 : index
    %c0_97 = arith.constant 0 : index
    %102 = vector.load %arg2[%c2_95, %c0_96, %c0_97] : memref<9x8x4xf32, #tpu.memory_space<vmem>>, vector<1x8x4xf32>
    %103 = vector.shape_cast %102 : vector<1x8x4xf32> to vector<8x4xf32>
    %c0_98 = arith.constant 0 : index
    %c2_99 = arith.constant 2 : index
    %104 = vector.load %arg7[%c0_98, %c2_99] : memref<4x110xf32, #tpu.memory_space<vmem>>, vector<4x80xf32>
    %cst_100 = arith.constant dense<0.000000e+00> : vector<8x80xf32>
    %105 = tpu.matmul %103, %104, %cst_100 {dimension_numbers = #tpu.dot_dimension_numbers<[1], [0], [0], [1], [0, 0, 1, 1], [], []>} : vector<8x4xf32>, vector<4x80xf32>, vector<8x80xf32> -> vector<8x80xf32>
    %106 = arith.addf %101, %105 : vector<8x80xf32>
    %c3_101 = arith.constant 3 : index
    %c0_102 = arith.constant 0 : index
    %c0_103 = arith.constant 0 : index
    %107 = vector.load %arg2[%c3_101, %c0_102, %c0_103] : memref<9x8x4xf32, #tpu.memory_space<vmem>>, vector<1x8x4xf32>
    %108 = vector.shape_cast %107 : vector<1x8x4xf32> to vector<8x4xf32>
    %c0_104 = arith.constant 0 : index
    %c10_105 = arith.constant 10 : index
    %109 = vector.load %arg7[%c0_104, %c10_105] : memref<4x110xf32, #tpu.memory_space<vmem>>, vector<4x80xf32>
    %cst_106 = arith.constant dense<0.000000e+00> : vector<8x80xf32>
    %110 = tpu.matmul %108, %109, %cst_106 {dimension_numbers = #tpu.dot_dimension_numbers<[1], [0], [0], [1], [0, 0, 1, 1], [], []>} : vector<8x4xf32>, vector<4x80xf32>, vector<8x80xf32> -> vector<8x80xf32>
    %111 = arith.addf %106, %110 : vector<8x80xf32>
    %c4_107 = arith.constant 4 : index
    %c0_108 = arith.constant 0 : index
    %c0_109 = arith.constant 0 : index
    %112 = vector.load %arg2[%c4_107, %c0_108, %c0_109] : memref<9x8x4xf32, #tpu.memory_space<vmem>>, vector<1x8x4xf32>
    %113 = vector.shape_cast %112 : vector<1x8x4xf32> to vector<8x4xf32>
    %c0_110 = arith.constant 0 : index
    %c11_111 = arith.constant 11 : index
    %114 = vector.load %arg7[%c0_110, %c11_111] : memref<4x110xf32, #tpu.memory_space<vmem>>, vector<4x80xf32>
    %cst_112 = arith.constant dense<0.000000e+00> : vector<8x80xf32>
    %115 = tpu.matmul %113, %114, %cst_112 {dimension_numbers = #tpu.dot_dimension_numbers<[1], [0], [0], [1], [0, 0, 1, 1], [], []>} : vector<8x4xf32>, vector<4x80xf32>, vector<8x80xf32> -> vector<8x80xf32>
    %116 = arith.addf %111, %115 : vector<8x80xf32>
    %c5_113 = arith.constant 5 : index
    %c0_114 = arith.constant 0 : index
    %c0_115 = arith.constant 0 : index
    %117 = vector.load %arg2[%c5_113, %c0_114, %c0_115] : memref<9x8x4xf32, #tpu.memory_space<vmem>>, vector<1x8x4xf32>
    %118 = vector.shape_cast %117 : vector<1x8x4xf32> to vector<8x4xf32>
    %c0_116 = arith.constant 0 : index
    %c12_117 = arith.constant 12 : index
    %119 = vector.load %arg7[%c0_116, %c12_117] : memref<4x110xf32, #tpu.memory_space<vmem>>, vector<4x80xf32>
    %cst_118 = arith.constant dense<0.000000e+00> : vector<8x80xf32>
    %120 = tpu.matmul %118, %119, %cst_118 {dimension_numbers = #tpu.dot_dimension_numbers<[1], [0], [0], [1], [0, 0, 1, 1], [], []>} : vector<8x4xf32>, vector<4x80xf32>, vector<8x80xf32> -> vector<8x80xf32>
    %121 = arith.addf %116, %120 : vector<8x80xf32>
    %c6_119 = arith.constant 6 : index
    %c0_120 = arith.constant 0 : index
    %c0_121 = arith.constant 0 : index
    %122 = vector.load %arg2[%c6_119, %c0_120, %c0_121] : memref<9x8x4xf32, #tpu.memory_space<vmem>>, vector<1x8x4xf32>
    %123 = vector.shape_cast %122 : vector<1x8x4xf32> to vector<8x4xf32>
    %c0_122 = arith.constant 0 : index
    %c20 = arith.constant 20 : index
    %124 = vector.load %arg7[%c0_122, %c20] : memref<4x110xf32, #tpu.memory_space<vmem>>, vector<4x80xf32>
    %cst_123 = arith.constant dense<0.000000e+00> : vector<8x80xf32>
    %125 = tpu.matmul %123, %124, %cst_123 {dimension_numbers = #tpu.dot_dimension_numbers<[1], [0], [0], [1], [0, 0, 1, 1], [], []>} : vector<8x4xf32>, vector<4x80xf32>, vector<8x80xf32> -> vector<8x80xf32>
    %126 = arith.addf %121, %125 : vector<8x80xf32>
    %c7_124 = arith.constant 7 : index
    %c0_125 = arith.constant 0 : index
    %c0_126 = arith.constant 0 : index
    %127 = vector.load %arg2[%c7_124, %c0_125, %c0_126] : memref<9x8x4xf32, #tpu.memory_space<vmem>>, vector<1x8x4xf32>
    %128 = vector.shape_cast %127 : vector<1x8x4xf32> to vector<8x4xf32>
    %c0_127 = arith.constant 0 : index
    %c21_128 = arith.constant 21 : index
    %129 = vector.load %arg7[%c0_127, %c21_128] : memref<4x110xf32, #tpu.memory_space<vmem>>, vector<4x80xf32>
    %cst_129 = arith.constant dense<0.000000e+00> : vector<8x80xf32>
    %130 = tpu.matmul %128, %129, %cst_129 {dimension_numbers = #tpu.dot_dimension_numbers<[1], [0], [0], [1], [0, 0, 1, 1], [], []>} : vector<8x4xf32>, vector<4x80xf32>, vector<8x80xf32> -> vector<8x80xf32>
    %131 = arith.addf %126, %130 : vector<8x80xf32>
    %c8_130 = arith.constant 8 : index
    %c0_131 = arith.constant 0 : index
    %c0_132 = arith.constant 0 : index
    %132 = vector.load %arg2[%c8_130, %c0_131, %c0_132] : memref<9x8x4xf32, #tpu.memory_space<vmem>>, vector<1x8x4xf32>
    %133 = vector.shape_cast %132 : vector<1x8x4xf32> to vector<8x4xf32>
    %c0_133 = arith.constant 0 : index
    %c22 = arith.constant 22 : index
    %134 = vector.load %arg7[%c0_133, %c22] : memref<4x110xf32, #tpu.memory_space<vmem>>, vector<4x80xf32>
    %cst_134 = arith.constant dense<0.000000e+00> : vector<8x80xf32>
    %135 = tpu.matmul %133, %134, %cst_134 {dimension_numbers = #tpu.dot_dimension_numbers<[1], [0], [0], [1], [0, 0, 1, 1], [], []>} : vector<8x4xf32>, vector<4x80xf32>, vector<8x80xf32> -> vector<8x80xf32>
    %136 = arith.addf %131, %135 : vector<8x80xf32>
    %c0_135 = arith.constant 0 : index
    %c0_136 = arith.constant 0 : index
    %c0_137 = arith.constant 0 : index
    %137 = vector.load %arg4[%c0_135, %c0_136, %c0_137] : memref<1x8x80xf32, #tpu.memory_space<vmem>>, vector<1x8x80xf32>
    %138 = vector.shape_cast %137 : vector<1x8x80xf32> to vector<8x80xf32>
    %139 = vector.shape_cast %136 : vector<8x80xf32> to vector<1x8x80xf32>
    tpu.vector_store %arg4[%c0_135, %c0_136, %c0_137], %139 {strides = array<i32>} : memref<1x8x80xf32, #tpu.memory_space<vmem>>, vector<1x8x80xf32>,
    %140 = vector.broadcast %0 : vector<1x80xf32> to vector<8x80xf32>
    %141 = arith.mulf %136, %140 : vector<8x80xf32>
    %cst_138 = arith.constant dense<0.000000e+00> : vector<8xf32>
    %142 = vector.multi_reduction <add>, %141, %cst_138 [1] : vector<8x80xf32> to vector<8xf32>
    %143 = vector.shape_cast %142 : vector<8xf32> to vector<8x1xf32>
    %c0_139 = arith.constant 0 : index
    %c0_140 = arith.constant 0 : index
    %c0_141 = arith.constant 0 : index
    %144 = vector.load %arg6[%c0_139, %c0_140, %c0_141] : memref<1x8x2xf32, #tpu.memory_space<vmem>>, vector<1x8x1xf32>
    %145 = vector.shape_cast %144 : vector<1x8x1xf32> to vector<8x1xf32>
    %146 = vector.shape_cast %143 : vector<8x1xf32> to vector<1x8x1xf32>
    tpu.vector_store %arg6[%c0_139, %c0_140, %c0_141], %146 {strides = array<i32>} : memref<1x8x2xf32, #tpu.memory_space<vmem>>, vector<1x8x1xf32>,
    %147 = arith.mulf %136, %136 : vector<8x80xf32>
    %148 = vector.broadcast %0 : vector<1x80xf32> to vector<8x80xf32>
    %149 = arith.mulf %147, %148 : vector<8x80xf32>
    %cst_142 = arith.constant dense<0.000000e+00> : vector<8xf32>
    %150 = vector.multi_reduction <add>, %149, %cst_142 [1] : vector<8x80xf32> to vector<8xf32>
    %151 = vector.shape_cast %150 : vector<8xf32> to vector<8x1xf32>
    %c0_143 = arith.constant 0 : index
    %c0_144 = arith.constant 0 : index
    %c1_145 = arith.constant 1 : index
    %152 = vector.load %arg6[%c0_143, %c0_144, %c1_145] : memref<1x8x2xf32, #tpu.memory_space<vmem>>, vector<1x8x1xf32>
    %153 = vector.shape_cast %152 : vector<1x8x1xf32> to vector<8x1xf32>
    %154 = vector.shape_cast %151 : vector<8x1xf32> to vector<1x8x1xf32>
    tpu.vector_store %arg6[%c0_143, %c0_144, %c1_145], %154 {strides = array<i32>} : memref<1x8x2xf32, #tpu.memory_space<vmem>>, vector<1x8x1xf32>,
    return
  }
  func.func @transform_0(%arg0: i32) -> (i32, i32, i32, i32) {
    %c0_i32 = arith.constant 0 : i32
    %c0_i32_0 = arith.constant 0 : i32
    %c0_i32_1 = arith.constant 0 : i32
    %c0_i32_2 = arith.constant 0 : i32
    return %arg0, %c0_i32, %c0_i32_0, %c0_i32_1 : i32, i32, i32, i32
  }
  func.func @transform_1(%arg0: i32) -> (i32, i32, i32) {
    %c0_i32 = arith.constant 0 : i32
    %c0_i32_0 = arith.constant 0 : i32
    %c0_i32_1 = arith.constant 0 : i32
    %c0_i32_2 = arith.constant 0 : i32
    return %c0_i32, %c0_i32_0, %c0_i32_1 : i32, i32, i32
  }
  func.func @transform_2(%arg0: i32) -> (i32, i32) {
    %c0_i32 = arith.constant 0 : i32
    %c0_i32_0 = arith.constant 0 : i32
    %c0_i32_1 = arith.constant 0 : i32
    return %c0_i32, %c0_i32_0 : i32, i32
  }
  func.func @transform_3(%arg0: i32) -> (i32, i32, i32) {
    %c0_i32 = arith.constant 0 : i32
    %c0_i32_0 = arith.constant 0 : i32
    %c0_i32_1 = arith.constant 0 : i32
    return %arg0, %c0_i32, %c0_i32_0 : i32, i32, i32
  }
  func.func @transform_4(%arg0: i32) -> (i32, i32, i32) {
    %c0_i32 = arith.constant 0 : i32
    %c0_i32_0 = arith.constant 0 : i32
    %c0_i32_1 = arith.constant 0 : i32
    return %arg0, %c0_i32, %c0_i32_0 : i32, i32, i32
  }
  func.func @transform_5(%arg0: i32) -> (i32, i32, i32) {
    %c0_i32 = arith.constant 0 : i32
    %c0_i32_0 = arith.constant 0 : i32
    %c0_i32_1 = arith.constant 0 : i32
    return %arg0, %c0_i32, %c0_i32_0 : i32, i32, i32
  }
}

module attributes {stable_mosaic.version = 11 : i64} {
  func.func @_bn_relu_conv2_kernel(%arg0: i32, %arg1: memref<1x8x80xf32, #tpu.memory_space<vmem>>, %arg2: memref<8x2xf32, #tpu.memory_space<vmem>>, %arg3: memref<9x8x8xf32, #tpu.memory_space<vmem>>, %arg4: memref<1x80xf32, #tpu.memory_space<vmem>>, %arg5: memref<1x8x80xf32, #tpu.memory_space<vmem>>, %arg6: memref<1x8x2xf32, #tpu.memory_space<vmem>>, %arg7: memref<8x110xf32, #tpu.memory_space<vmem>>) attributes {dimension_semantics = [#tpu.dimension_semantics<parallel>], iteration_bounds = array<i64: 2>, scalar_prefetch = 0 : i64, scratch_operands = 1 : i64, tpu.core_type = #tpu.core_type<tc>, window_params = [{transform_indices = @transform_0, window_bounds = array<i64: 1, 8, 80>}, {pipeline_mode = #tpu.pipeline_mode<synchronous>, transform_indices = @transform_1, window_bounds = array<i64: 8, 2>}, {pipeline_mode = #tpu.pipeline_mode<synchronous>, transform_indices = @transform_2, window_bounds = array<i64: 9, 8, 8>}, {pipeline_mode = #tpu.pipeline_mode<synchronous>, transform_indices = @transform_3, window_bounds = array<i64: 1, 80>}, {transform_indices = @transform_4, window_bounds = array<i64: 1, 8, 80>}, {transform_indices = @transform_5, window_bounds = array<i64: 1, 8, 2>}]} {
    %c0 = arith.constant 0 : index
    %c0_0 = arith.constant 0 : index
    %0 = vector.load %arg4[%c0, %c0_0] : memref<1x80xf32, #tpu.memory_space<vmem>>, vector<1x80xf32>
    %cst = arith.constant 0.000000e+00 : f32
    %1 = vector.broadcast %cst : f32 to vector<8x110xf32>
    %c0_1 = arith.constant 0 : index
    %c0_2 = arith.constant 0 : index
    %2 = vector.load %arg7[%c0_1, %c0_2] : memref<8x110xf32, #tpu.memory_space<vmem>>, vector<8x110xf32>
    tpu.vector_store %arg7[%c0_1, %c0_2], %1 {strides = array<i32>} : memref<8x110xf32, #tpu.memory_space<vmem>>, vector<8x110xf32>,
    %c0_3 = arith.constant 0 : index
    %c0_4 = arith.constant 0 : index
    %3 = vector.load %arg2[%c0_3, %c0_4] : memref<8x2xf32, #tpu.memory_space<vmem>>, vector<8x1xf32>
    %cst_5 = arith.constant 1.280000e+02 : f32
    %4 = vector.broadcast %cst_5 : f32 to vector<8x1xf32>
    %5 = arith.divf %3, %4 : vector<8x1xf32>
    %c0_6 = arith.constant 0 : index
    %c1 = arith.constant 1 : index
    %6 = vector.load %arg2[%c0_6, %c1] : memref<8x2xf32, #tpu.memory_space<vmem>>, vector<8x1xf32>
    %cst_7 = arith.constant 1.280000e+02 : f32
    %7 = vector.broadcast %cst_7 : f32 to vector<8x1xf32>
    %8 = arith.divf %6, %7 : vector<8x1xf32>
    %9 = arith.mulf %5, %5 : vector<8x1xf32>
    %10 = arith.subf %8, %9 : vector<8x1xf32>
    %cst_8 = arith.constant 0.000000e+00 : f32
    %11 = vector.broadcast %cst_8 : f32 to vector<8x1xf32>
    %12 = arith.maximumf %10, %11 : vector<8x1xf32>
    %c0_9 = arith.constant 0 : index
    %c0_10 = arith.constant 0 : index
    %c0_11 = arith.constant 0 : index
    %13 = vector.load %arg1[%c0_9, %c0_10, %c0_11] : memref<1x8x80xf32, #tpu.memory_space<vmem>>, vector<1x8x80xf32>
    %14 = vector.shape_cast %13 : vector<1x8x80xf32> to vector<8x80xf32>
    %15 = vector.broadcast %5 : vector<8x1xf32> to vector<8x80xf32>
    %16 = arith.subf %14, %15 : vector<8x80xf32>
    %cst_12 = arith.constant 9.99999974E-6 : f32
    %17 = vector.broadcast %cst_12 : f32 to vector<8x1xf32>
    %18 = arith.addf %12, %17 : vector<8x1xf32>
    %19 = math.rsqrt %18 : vector<8x1xf32>
    %20 = vector.broadcast %19 : vector<8x1xf32> to vector<8x80xf32>
    %21 = arith.mulf %16, %20 : vector<8x80xf32>
    %cst_13 = arith.constant 0.000000e+00 : f32
    %22 = vector.broadcast %cst_13 : f32 to vector<8x80xf32>
    %23 = arith.maximumf %21, %22 : vector<8x80xf32>
    %24 = vector.broadcast %0 : vector<1x80xf32> to vector<8x80xf32>
    %25 = arith.mulf %23, %24 : vector<8x80xf32>
    %c0_14 = arith.constant 0 : index
    %c11 = arith.constant 11 : index
    %26 = vector.load %arg7[%c0_14, %c11] : memref<8x110xf32, #tpu.memory_space<vmem>>, vector<8x80xf32>
    tpu.vector_store %arg7[%c0_14, %c11], %25 {strides = array<i32>} : memref<8x110xf32, #tpu.memory_space<vmem>>, vector<8x80xf32>,
    %c0_15 = arith.constant 0 : index
    %c0_16 = arith.constant 0 : index
    %c0_17 = arith.constant 0 : index
    %27 = vector.load %arg3[%c0_15, %c0_16, %c0_17] : memref<9x8x8xf32, #tpu.memory_space<vmem>>, vector<1x8x8xf32>
    %28 = vector.shape_cast %27 : vector<1x8x8xf32> to vector<8x8xf32>
    %c0_18 = arith.constant 0 : index
    %c0_19 = arith.constant 0 : index
    %29 = vector.load %arg7[%c0_18, %c0_19] : memref<8x110xf32, #tpu.memory_space<vmem>>, vector<8x80xf32>
    %cst_20 = arith.constant dense<0.000000e+00> : vector<8x80xf32>
    %30 = tpu.matmul %28, %29, %cst_20 {dimension_numbers = #tpu.dot_dimension_numbers<[1], [0], [0], [1], [0, 0, 1, 1], [], []>} : vector<8x8xf32>, vector<8x80xf32>, vector<8x80xf32> -> vector<8x80xf32>
    %c1_21 = arith.constant 1 : index
    %c0_22 = arith.constant 0 : index
    %c0_23 = arith.constant 0 : index
    %31 = vector.load %arg3[%c1_21, %c0_22, %c0_23] : memref<9x8x8xf32, #tpu.memory_space<vmem>>, vector<1x8x8xf32>
    %32 = vector.shape_cast %31 : vector<1x8x8xf32> to vector<8x8xf32>
    %c0_24 = arith.constant 0 : index
    %c1_25 = arith.constant 1 : index
    %33 = vector.load %arg7[%c0_24, %c1_25] : memref<8x110xf32, #tpu.memory_space<vmem>>, vector<8x80xf32>
    %cst_26 = arith.constant dense<0.000000e+00> : vector<8x80xf32>
    %34 = tpu.matmul %32, %33, %cst_26 {dimension_numbers = #tpu.dot_dimension_numbers<[1], [0], [0], [1], [0, 0, 1, 1], [], []>} : vector<8x8xf32>, vector<8x80xf32>, vector<8x80xf32> -> vector<8x80xf32>
    %35 = arith.addf %30, %34 : vector<8x80xf32>
    %c2 = arith.constant 2 : index
    %c0_27 = arith.constant 0 : index
    %c0_28 = arith.constant 0 : index
    %36 = vector.load %arg3[%c2, %c0_27, %c0_28] : memref<9x8x8xf32, #tpu.memory_space<vmem>>, vector<1x8x8xf32>
    %37 = vector.shape_cast %36 : vector<1x8x8xf32> to vector<8x8xf32>
    %c0_29 = arith.constant 0 : index
    %c2_30 = arith.constant 2 : index
    %38 = vector.load %arg7[%c0_29, %c2_30] : memref<8x110xf32, #tpu.memory_space<vmem>>, vector<8x80xf32>
    %cst_31 = arith.constant dense<0.000000e+00> : vector<8x80xf32>
    %39 = tpu.matmul %37, %38, %cst_31 {dimension_numbers = #tpu.dot_dimension_numbers<[1], [0], [0], [1], [0, 0, 1, 1], [], []>} : vector<8x8xf32>, vector<8x80xf32>, vector<8x80xf32> -> vector<8x80xf32>
    %40 = arith.addf %35, %39 : vector<8x80xf32>
    %c3 = arith.constant 3 : index
    %c0_32 = arith.constant 0 : index
    %c0_33 = arith.constant 0 : index
    %41 = vector.load %arg3[%c3, %c0_32, %c0_33] : memref<9x8x8xf32, #tpu.memory_space<vmem>>, vector<1x8x8xf32>
    %42 = vector.shape_cast %41 : vector<1x8x8xf32> to vector<8x8xf32>
    %c0_34 = arith.constant 0 : index
    %c10 = arith.constant 10 : index
    %43 = vector.load %arg7[%c0_34, %c10] : memref<8x110xf32, #tpu.memory_space<vmem>>, vector<8x80xf32>
    %cst_35 = arith.constant dense<0.000000e+00> : vector<8x80xf32>
    %44 = tpu.matmul %42, %43, %cst_35 {dimension_numbers = #tpu.dot_dimension_numbers<[1], [0], [0], [1], [0, 0, 1, 1], [], []>} : vector<8x8xf32>, vector<8x80xf32>, vector<8x80xf32> -> vector<8x80xf32>
    %45 = arith.addf %40, %44 : vector<8x80xf32>
    %c4 = arith.constant 4 : index
    %c0_36 = arith.constant 0 : index
    %c0_37 = arith.constant 0 : index
    %46 = vector.load %arg3[%c4, %c0_36, %c0_37] : memref<9x8x8xf32, #tpu.memory_space<vmem>>, vector<1x8x8xf32>
    %47 = vector.shape_cast %46 : vector<1x8x8xf32> to vector<8x8xf32>
    %c0_38 = arith.constant 0 : index
    %c11_39 = arith.constant 11 : index
    %48 = vector.load %arg7[%c0_38, %c11_39] : memref<8x110xf32, #tpu.memory_space<vmem>>, vector<8x80xf32>
    %cst_40 = arith.constant dense<0.000000e+00> : vector<8x80xf32>
    %49 = tpu.matmul %47, %48, %cst_40 {dimension_numbers = #tpu.dot_dimension_numbers<[1], [0], [0], [1], [0, 0, 1, 1], [], []>} : vector<8x8xf32>, vector<8x80xf32>, vector<8x80xf32> -> vector<8x80xf32>
    %50 = arith.addf %45, %49 : vector<8x80xf32>
    %c5 = arith.constant 5 : index
    %c0_41 = arith.constant 0 : index
    %c0_42 = arith.constant 0 : index
    %51 = vector.load %arg3[%c5, %c0_41, %c0_42] : memref<9x8x8xf32, #tpu.memory_space<vmem>>, vector<1x8x8xf32>
    %52 = vector.shape_cast %51 : vector<1x8x8xf32> to vector<8x8xf32>
    %c0_43 = arith.constant 0 : index
    %c12 = arith.constant 12 : index
    %53 = vector.load %arg7[%c0_43, %c12] : memref<8x110xf32, #tpu.memory_space<vmem>>, vector<8x80xf32>
    %cst_44 = arith.constant dense<0.000000e+00> : vector<8x80xf32>
    %54 = tpu.matmul %52, %53, %cst_44 {dimension_numbers = #tpu.dot_dimension_numbers<[1], [0], [0], [1], [0, 0, 1, 1], [], []>} : vector<8x8xf32>, vector<8x80xf32>, vector<8x80xf32> -> vector<8x80xf32>
    %55 = arith.addf %50, %54 : vector<8x80xf32>
    %c6 = arith.constant 6 : index
    %c0_45 = arith.constant 0 : index
    %c0_46 = arith.constant 0 : index
    %56 = vector.load %arg3[%c6, %c0_45, %c0_46] : memref<9x8x8xf32, #tpu.memory_space<vmem>>, vector<1x8x8xf32>
    %57 = vector.shape_cast %56 : vector<1x8x8xf32> to vector<8x8xf32>
    %c0_47 = arith.constant 0 : index
    %c20 = arith.constant 20 : index
    %58 = vector.load %arg7[%c0_47, %c20] : memref<8x110xf32, #tpu.memory_space<vmem>>, vector<8x80xf32>
    %cst_48 = arith.constant dense<0.000000e+00> : vector<8x80xf32>
    %59 = tpu.matmul %57, %58, %cst_48 {dimension_numbers = #tpu.dot_dimension_numbers<[1], [0], [0], [1], [0, 0, 1, 1], [], []>} : vector<8x8xf32>, vector<8x80xf32>, vector<8x80xf32> -> vector<8x80xf32>
    %60 = arith.addf %55, %59 : vector<8x80xf32>
    %c7 = arith.constant 7 : index
    %c0_49 = arith.constant 0 : index
    %c0_50 = arith.constant 0 : index
    %61 = vector.load %arg3[%c7, %c0_49, %c0_50] : memref<9x8x8xf32, #tpu.memory_space<vmem>>, vector<1x8x8xf32>
    %62 = vector.shape_cast %61 : vector<1x8x8xf32> to vector<8x8xf32>
    %c0_51 = arith.constant 0 : index
    %c21 = arith.constant 21 : index
    %63 = vector.load %arg7[%c0_51, %c21] : memref<8x110xf32, #tpu.memory_space<vmem>>, vector<8x80xf32>
    %cst_52 = arith.constant dense<0.000000e+00> : vector<8x80xf32>
    %64 = tpu.matmul %62, %63, %cst_52 {dimension_numbers = #tpu.dot_dimension_numbers<[1], [0], [0], [1], [0, 0, 1, 1], [], []>} : vector<8x8xf32>, vector<8x80xf32>, vector<8x80xf32> -> vector<8x80xf32>
    %65 = arith.addf %60, %64 : vector<8x80xf32>
    %c8 = arith.constant 8 : index
    %c0_53 = arith.constant 0 : index
    %c0_54 = arith.constant 0 : index
    %66 = vector.load %arg3[%c8, %c0_53, %c0_54] : memref<9x8x8xf32, #tpu.memory_space<vmem>>, vector<1x8x8xf32>
    %67 = vector.shape_cast %66 : vector<1x8x8xf32> to vector<8x8xf32>
    %c0_55 = arith.constant 0 : index
    %c22 = arith.constant 22 : index
    %68 = vector.load %arg7[%c0_55, %c22] : memref<8x110xf32, #tpu.memory_space<vmem>>, vector<8x80xf32>
    %cst_56 = arith.constant dense<0.000000e+00> : vector<8x80xf32>
    %69 = tpu.matmul %67, %68, %cst_56 {dimension_numbers = #tpu.dot_dimension_numbers<[1], [0], [0], [1], [0, 0, 1, 1], [], []>} : vector<8x8xf32>, vector<8x80xf32>, vector<8x80xf32> -> vector<8x80xf32>
    %70 = arith.addf %65, %69 : vector<8x80xf32>
    %c0_57 = arith.constant 0 : index
    %c0_58 = arith.constant 0 : index
    %c0_59 = arith.constant 0 : index
    %71 = vector.load %arg5[%c0_57, %c0_58, %c0_59] : memref<1x8x80xf32, #tpu.memory_space<vmem>>, vector<1x8x80xf32>
    %72 = vector.shape_cast %71 : vector<1x8x80xf32> to vector<8x80xf32>
    %73 = vector.shape_cast %70 : vector<8x80xf32> to vector<1x8x80xf32>
    tpu.vector_store %arg5[%c0_57, %c0_58, %c0_59], %73 {strides = array<i32>} : memref<1x8x80xf32, #tpu.memory_space<vmem>>, vector<1x8x80xf32>,
    %74 = vector.broadcast %0 : vector<1x80xf32> to vector<8x80xf32>
    %75 = arith.mulf %70, %74 : vector<8x80xf32>
    %cst_60 = arith.constant dense<0.000000e+00> : vector<8xf32>
    %76 = vector.multi_reduction <add>, %75, %cst_60 [1] : vector<8x80xf32> to vector<8xf32>
    %77 = vector.shape_cast %76 : vector<8xf32> to vector<8x1xf32>
    %c0_61 = arith.constant 0 : index
    %c0_62 = arith.constant 0 : index
    %c0_63 = arith.constant 0 : index
    %78 = vector.load %arg6[%c0_61, %c0_62, %c0_63] : memref<1x8x2xf32, #tpu.memory_space<vmem>>, vector<1x8x1xf32>
    %79 = vector.shape_cast %78 : vector<1x8x1xf32> to vector<8x1xf32>
    %80 = vector.shape_cast %77 : vector<8x1xf32> to vector<1x8x1xf32>
    tpu.vector_store %arg6[%c0_61, %c0_62, %c0_63], %80 {strides = array<i32>} : memref<1x8x2xf32, #tpu.memory_space<vmem>>, vector<1x8x1xf32>,
    %81 = arith.mulf %70, %70 : vector<8x80xf32>
    %82 = vector.broadcast %0 : vector<1x80xf32> to vector<8x80xf32>
    %83 = arith.mulf %81, %82 : vector<8x80xf32>
    %cst_64 = arith.constant dense<0.000000e+00> : vector<8xf32>
    %84 = vector.multi_reduction <add>, %83, %cst_64 [1] : vector<8x80xf32> to vector<8xf32>
    %85 = vector.shape_cast %84 : vector<8xf32> to vector<8x1xf32>
    %c0_65 = arith.constant 0 : index
    %c0_66 = arith.constant 0 : index
    %c1_67 = arith.constant 1 : index
    %86 = vector.load %arg6[%c0_65, %c0_66, %c1_67] : memref<1x8x2xf32, #tpu.memory_space<vmem>>, vector<1x8x1xf32>
    %87 = vector.shape_cast %86 : vector<1x8x1xf32> to vector<8x1xf32>
    %88 = vector.shape_cast %85 : vector<8x1xf32> to vector<1x8x1xf32>
    tpu.vector_store %arg6[%c0_65, %c0_66, %c1_67], %88 {strides = array<i32>} : memref<1x8x2xf32, #tpu.memory_space<vmem>>, vector<1x8x1xf32>,
    return
  }
  func.func @transform_0(%arg0: i32) -> (i32, i32, i32) {
    %c0_i32 = arith.constant 0 : i32
    %c0_i32_0 = arith.constant 0 : i32
    %c0_i32_1 = arith.constant 0 : i32
    return %arg0, %c0_i32, %c0_i32_0 : i32, i32, i32
  }
  func.func @transform_1(%arg0: i32) -> (i32, i32) {
    %c0_i32 = arith.constant 0 : i32
    %c0_i32_0 = arith.constant 0 : i32
    %c0_i32_1 = arith.constant 0 : i32
    return %c0_i32, %c0_i32_0 : i32, i32
  }
  func.func @transform_2(%arg0: i32) -> (i32, i32, i32) {
    %c0_i32 = arith.constant 0 : i32
    %c0_i32_0 = arith.constant 0 : i32
    %c0_i32_1 = arith.constant 0 : i32
    %c0_i32_2 = arith.constant 0 : i32
    return %c0_i32, %c0_i32_0, %c0_i32_1 : i32, i32, i32
  }
  func.func @transform_3(%arg0: i32) -> (i32, i32) {
    %c0_i32 = arith.constant 0 : i32
    %c0_i32_0 = arith.constant 0 : i32
    %c0_i32_1 = arith.constant 0 : i32
    return %c0_i32, %c0_i32_0 : i32, i32
  }
  func.func @transform_4(%arg0: i32) -> (i32, i32, i32) {
    %c0_i32 = arith.constant 0 : i32
    %c0_i32_0 = arith.constant 0 : i32
    %c0_i32_1 = arith.constant 0 : i32
    return %arg0, %c0_i32, %c0_i32_0 : i32, i32, i32
  }
  func.func @transform_5(%arg0: i32) -> (i32, i32, i32) {
    %c0_i32 = arith.constant 0 : i32
    %c0_i32_0 = arith.constant 0 : i32
    %c0_i32_1 = arith.constant 0 : i32
    return %arg0, %c0_i32, %c0_i32_0 : i32, i32, i32
  }
}

module attributes {stable_mosaic.version = 11 : i64} {
  func.func @_bn_shortcut_out_kernel(%arg0: i32, %arg1: memref<1x8x80xf32, #tpu.memory_space<vmem>>, %arg2: memref<8x2xf32, #tpu.memory_space<vmem>>, %arg3: memref<1x4x80xf32, #tpu.memory_space<vmem>>, %arg4: memref<8x4xf32, #tpu.memory_space<vmem>>, %arg5: memref<1x8x8x8xf32, #tpu.memory_space<vmem>>) attributes {dimension_semantics = [#tpu.dimension_semantics<parallel>], iteration_bounds = array<i64: 2>, scalar_prefetch = 0 : i64, scratch_operands = 0 : i64, tpu.core_type = #tpu.core_type<tc>, window_params = [{transform_indices = @transform_0, window_bounds = array<i64: 1, 8, 80>}, {pipeline_mode = #tpu.pipeline_mode<synchronous>, transform_indices = @transform_1, window_bounds = array<i64: 8, 2>}, {transform_indices = @transform_2, window_bounds = array<i64: 1, 4, 80>}, {pipeline_mode = #tpu.pipeline_mode<synchronous>, transform_indices = @transform_3, window_bounds = array<i64: 8, 4>}, {transform_indices = @transform_4, window_bounds = array<i64: 1, 8, 8, 8>}]} {
    %c0 = arith.constant 0 : index
    %c0_0 = arith.constant 0 : index
    %0 = vector.load %arg2[%c0, %c0_0] : memref<8x2xf32, #tpu.memory_space<vmem>>, vector<8x1xf32>
    %cst = arith.constant 1.280000e+02 : f32
    %1 = vector.broadcast %cst : f32 to vector<8x1xf32>
    %2 = arith.divf %0, %1 : vector<8x1xf32>
    %c0_1 = arith.constant 0 : index
    %c1 = arith.constant 1 : index
    %3 = vector.load %arg2[%c0_1, %c1] : memref<8x2xf32, #tpu.memory_space<vmem>>, vector<8x1xf32>
    %cst_2 = arith.constant 1.280000e+02 : f32
    %4 = vector.broadcast %cst_2 : f32 to vector<8x1xf32>
    %5 = arith.divf %3, %4 : vector<8x1xf32>
    %6 = arith.mulf %2, %2 : vector<8x1xf32>
    %7 = arith.subf %5, %6 : vector<8x1xf32>
    %cst_3 = arith.constant 0.000000e+00 : f32
    %8 = vector.broadcast %cst_3 : f32 to vector<8x1xf32>
    %9 = arith.maximumf %7, %8 : vector<8x1xf32>
    %c0_4 = arith.constant 0 : index
    %c0_5 = arith.constant 0 : index
    %c0_6 = arith.constant 0 : index
    %10 = vector.load %arg1[%c0_4, %c0_5, %c0_6] : memref<1x8x80xf32, #tpu.memory_space<vmem>>, vector<1x8x80xf32>
    %11 = vector.shape_cast %10 : vector<1x8x80xf32> to vector<8x80xf32>
    %12 = vector.broadcast %2 : vector<8x1xf32> to vector<8x80xf32>
    %13 = arith.subf %11, %12 : vector<8x80xf32>
    %cst_7 = arith.constant 9.99999974E-6 : f32
    %14 = vector.broadcast %cst_7 : f32 to vector<8x1xf32>
    %15 = arith.addf %9, %14 : vector<8x1xf32>
    %16 = math.rsqrt %15 : vector<8x1xf32>
    %17 = vector.broadcast %16 : vector<8x1xf32> to vector<8x80xf32>
    %18 = arith.mulf %13, %17 : vector<8x80xf32>
    %c0_8 = arith.constant 0 : index
    %c0_9 = arith.constant 0 : index
    %19 = vector.load %arg4[%c0_8, %c0_9] : memref<8x4xf32, #tpu.memory_space<vmem>>, vector<8x4xf32>
    %c0_10 = arith.constant 0 : index
    %c0_11 = arith.constant 0 : index
    %c0_12 = arith.constant 0 : index
    %20 = vector.load %arg3[%c0_10, %c0_11, %c0_12] : memref<1x4x80xf32, #tpu.memory_space<vmem>>, vector<1x4x80xf32>
    %21 = vector.shape_cast %20 : vector<1x4x80xf32> to vector<4x80xf32>
    %cst_13 = arith.constant dense<0.000000e+00> : vector<8x80xf32>
    %22 = tpu.matmul %19, %21, %cst_13 {dimension_numbers = #tpu.dot_dimension_numbers<[1], [0], [0], [1], [0, 0, 1, 1], [], []>} : vector<8x4xf32>, vector<4x80xf32>, vector<8x80xf32> -> vector<8x80xf32>
    %23 = arith.addf %18, %22 : vector<8x80xf32>
    %cst_14 = arith.constant 0.000000e+00 : f32
    %24 = vector.broadcast %cst_14 : f32 to vector<8x80xf32>
    %25 = arith.maximumf %23, %24 : vector<8x80xf32>
    %26 = vector.extract_strided_slice %25 {offsets = [0, 0], sizes = [8, 8], strides = [1, 1]} : vector<8x80xf32> to vector<8x8xf32>
    %c0_15 = arith.constant 0 : index
    %c0_16 = arith.constant 0 : index
    %c0_17 = arith.constant 0 : index
    %c0_18 = arith.constant 0 : index
    %27 = vector.load %arg5[%c0_15, %c0_16, %c0_17, %c0_18] : memref<1x8x8x8xf32, #tpu.memory_space<vmem>>, vector<1x8x1x8xf32>
    %28 = vector.shape_cast %27 : vector<1x8x1x8xf32> to vector<8x8xf32>
    %29 = vector.shape_cast %26 : vector<8x8xf32> to vector<1x8x1x8xf32>
    tpu.vector_store %arg5[%c0_15, %c0_16, %c0_17, %c0_18], %29 {strides = array<i32>} : memref<1x8x8x8xf32, #tpu.memory_space<vmem>>, vector<1x8x1x8xf32>,
    %30 = vector.extract_strided_slice %25 {offsets = [0, 10], sizes = [8, 8], strides = [1, 1]} : vector<8x80xf32> to vector<8x8xf32>
    %c0_19 = arith.constant 0 : index
    %c0_20 = arith.constant 0 : index
    %c1_21 = arith.constant 1 : index
    %c0_22 = arith.constant 0 : index
    %31 = vector.load %arg5[%c0_19, %c0_20, %c1_21, %c0_22] : memref<1x8x8x8xf32, #tpu.memory_space<vmem>>, vector<1x8x1x8xf32>
    %32 = vector.shape_cast %31 : vector<1x8x1x8xf32> to vector<8x8xf32>
    %33 = vector.shape_cast %30 : vector<8x8xf32> to vector<1x8x1x8xf32>
    tpu.vector_store %arg5[%c0_19, %c0_20, %c1_21, %c0_22], %33 {strides = array<i32>} : memref<1x8x8x8xf32, #tpu.memory_space<vmem>>, vector<1x8x1x8xf32>,
    %34 = vector.extract_strided_slice %25 {offsets = [0, 20], sizes = [8, 8], strides = [1, 1]} : vector<8x80xf32> to vector<8x8xf32>
    %c0_23 = arith.constant 0 : index
    %c0_24 = arith.constant 0 : index
    %c2 = arith.constant 2 : index
    %c0_25 = arith.constant 0 : index
    %35 = vector.load %arg5[%c0_23, %c0_24, %c2, %c0_25] : memref<1x8x8x8xf32, #tpu.memory_space<vmem>>, vector<1x8x1x8xf32>
    %36 = vector.shape_cast %35 : vector<1x8x1x8xf32> to vector<8x8xf32>
    %37 = vector.shape_cast %34 : vector<8x8xf32> to vector<1x8x1x8xf32>
    tpu.vector_store %arg5[%c0_23, %c0_24, %c2, %c0_25], %37 {strides = array<i32>} : memref<1x8x8x8xf32, #tpu.memory_space<vmem>>, vector<1x8x1x8xf32>,
    %38 = vector.extract_strided_slice %25 {offsets = [0, 30], sizes = [8, 8], strides = [1, 1]} : vector<8x80xf32> to vector<8x8xf32>
    %c0_26 = arith.constant 0 : index
    %c0_27 = arith.constant 0 : index
    %c3 = arith.constant 3 : index
    %c0_28 = arith.constant 0 : index
    %39 = vector.load %arg5[%c0_26, %c0_27, %c3, %c0_28] : memref<1x8x8x8xf32, #tpu.memory_space<vmem>>, vector<1x8x1x8xf32>
    %40 = vector.shape_cast %39 : vector<1x8x1x8xf32> to vector<8x8xf32>
    %41 = vector.shape_cast %38 : vector<8x8xf32> to vector<1x8x1x8xf32>
    tpu.vector_store %arg5[%c0_26, %c0_27, %c3, %c0_28], %41 {strides = array<i32>} : memref<1x8x8x8xf32, #tpu.memory_space<vmem>>, vector<1x8x1x8xf32>,
    %42 = vector.extract_strided_slice %25 {offsets = [0, 40], sizes = [8, 8], strides = [1, 1]} : vector<8x80xf32> to vector<8x8xf32>
    %c0_29 = arith.constant 0 : index
    %c0_30 = arith.constant 0 : index
    %c4 = arith.constant 4 : index
    %c0_31 = arith.constant 0 : index
    %43 = vector.load %arg5[%c0_29, %c0_30, %c4, %c0_31] : memref<1x8x8x8xf32, #tpu.memory_space<vmem>>, vector<1x8x1x8xf32>
    %44 = vector.shape_cast %43 : vector<1x8x1x8xf32> to vector<8x8xf32>
    %45 = vector.shape_cast %42 : vector<8x8xf32> to vector<1x8x1x8xf32>
    tpu.vector_store %arg5[%c0_29, %c0_30, %c4, %c0_31], %45 {strides = array<i32>} : memref<1x8x8x8xf32, #tpu.memory_space<vmem>>, vector<1x8x1x8xf32>,
    %46 = vector.extract_strided_slice %25 {offsets = [0, 50], sizes = [8, 8], strides = [1, 1]} : vector<8x80xf32> to vector<8x8xf32>
    %c0_32 = arith.constant 0 : index
    %c0_33 = arith.constant 0 : index
    %c5 = arith.constant 5 : index
    %c0_34 = arith.constant 0 : index
    %47 = vector.load %arg5[%c0_32, %c0_33, %c5, %c0_34] : memref<1x8x8x8xf32, #tpu.memory_space<vmem>>, vector<1x8x1x8xf32>
    %48 = vector.shape_cast %47 : vector<1x8x1x8xf32> to vector<8x8xf32>
    %49 = vector.shape_cast %46 : vector<8x8xf32> to vector<1x8x1x8xf32>
    tpu.vector_store %arg5[%c0_32, %c0_33, %c5, %c0_34], %49 {strides = array<i32>} : memref<1x8x8x8xf32, #tpu.memory_space<vmem>>, vector<1x8x1x8xf32>,
    %50 = vector.extract_strided_slice %25 {offsets = [0, 60], sizes = [8, 8], strides = [1, 1]} : vector<8x80xf32> to vector<8x8xf32>
    %c0_35 = arith.constant 0 : index
    %c0_36 = arith.constant 0 : index
    %c6 = arith.constant 6 : index
    %c0_37 = arith.constant 0 : index
    %51 = vector.load %arg5[%c0_35, %c0_36, %c6, %c0_37] : memref<1x8x8x8xf32, #tpu.memory_space<vmem>>, vector<1x8x1x8xf32>
    %52 = vector.shape_cast %51 : vector<1x8x1x8xf32> to vector<8x8xf32>
    %53 = vector.shape_cast %50 : vector<8x8xf32> to vector<1x8x1x8xf32>
    tpu.vector_store %arg5[%c0_35, %c0_36, %c6, %c0_37], %53 {strides = array<i32>} : memref<1x8x8x8xf32, #tpu.memory_space<vmem>>, vector<1x8x1x8xf32>,
    %54 = vector.extract_strided_slice %25 {offsets = [0, 70], sizes = [8, 8], strides = [1, 1]} : vector<8x80xf32> to vector<8x8xf32>
    %c0_38 = arith.constant 0 : index
    %c0_39 = arith.constant 0 : index
    %c7 = arith.constant 7 : index
    %c0_40 = arith.constant 0 : index
    %55 = vector.load %arg5[%c0_38, %c0_39, %c7, %c0_40] : memref<1x8x8x8xf32, #tpu.memory_space<vmem>>, vector<1x8x1x8xf32>
    %56 = vector.shape_cast %55 : vector<1x8x1x8xf32> to vector<8x8xf32>
    %57 = vector.shape_cast %54 : vector<8x8xf32> to vector<1x8x1x8xf32>
    tpu.vector_store %arg5[%c0_38, %c0_39, %c7, %c0_40], %57 {strides = array<i32>} : memref<1x8x8x8xf32, #tpu.memory_space<vmem>>, vector<1x8x1x8xf32>,
    return
  }
  func.func @transform_0(%arg0: i32) -> (i32, i32, i32) {
    %c0_i32 = arith.constant 0 : i32
    %c0_i32_0 = arith.constant 0 : i32
    %c0_i32_1 = arith.constant 0 : i32
    return %arg0, %c0_i32, %c0_i32_0 : i32, i32, i32
  }
  func.func @transform_1(%arg0: i32) -> (i32, i32) {
    %c0_i32 = arith.constant 0 : i32
    %c0_i32_0 = arith.constant 0 : i32
    %c0_i32_1 = arith.constant 0 : i32
    return %c0_i32, %c0_i32_0 : i32, i32
  }
  func.func @transform_2(%arg0: i32) -> (i32, i32, i32) {
    %c0_i32 = arith.constant 0 : i32
    %c0_i32_0 = arith.constant 0 : i32
    %c0_i32_1 = arith.constant 0 : i32
    return %arg0, %c0_i32, %c0_i32_0 : i32, i32, i32
  }
  func.func @transform_3(%arg0: i32) -> (i32, i32) {
    %c0_i32 = arith.constant 0 : i32
    %c0_i32_0 = arith.constant 0 : i32
    %c0_i32_1 = arith.constant 0 : i32
    return %c0_i32, %c0_i32_0 : i32, i32
  }
  func.func @transform_4(%arg0: i32) -> (i32, i32, i32, i32) {
    %c0_i32 = arith.constant 0 : i32
    %c0_i32_0 = arith.constant 0 : i32
    %c0_i32_1 = arith.constant 0 : i32
    %c0_i32_2 = arith.constant 0 : i32
    return %arg0, %c0_i32, %c0_i32_0, %c0_i32_1 : i32, i32, i32, i32
  }
}

module attributes {stable_mosaic.version = 11 : i64} {
  func.func @_in_block_q_kernel(%arg0: i32, %arg1: memref<1x4x16x16xf32, #tpu.memory_space<vmem>>, %arg2: memref<9x4x4xf32, #tpu.memory_space<vmem>>, %arg3: memref<9x4x4xf32, #tpu.memory_space<vmem>>, %arg4: memref<1x288xf32, #tpu.memory_space<vmem>>, %arg5: memref<1x4x288xf32, #tpu.memory_space<vmem>>, %arg6: memref<4x342xf32, #tpu.memory_space<vmem>>, %arg7: memref<4x342xf32, #tpu.memory_space<vmem>>) attributes {dimension_semantics = [#tpu.dimension_semantics<parallel>], iteration_bounds = array<i64: 2>, scalar_prefetch = 0 : i64, scratch_operands = 2 : i64, tpu.core_type = #tpu.core_type<tc>, window_params = [{transform_indices = @transform_0, window_bounds = array<i64: 1, 4, 16, 16>}, {pipeline_mode = #tpu.pipeline_mode<synchronous>, transform_indices = @transform_1, window_bounds = array<i64: 9, 4, 4>}, {pipeline_mode = #tpu.pipeline_mode<synchronous>, transform_indices = @transform_2, window_bounds = array<i64: 9, 4, 4>}, {pipeline_mode = #tpu.pipeline_mode<synchronous>, transform_indices = @transform_3, window_bounds = array<i64: 1, 288>}, {transform_indices = @transform_4, window_bounds = array<i64: 1, 4, 288>}]} {
    %c0 = arith.constant 0 : index
    %c0_0 = arith.constant 0 : index
    %0 = vector.load %arg4[%c0, %c0_0] : memref<1x288xf32, #tpu.memory_space<vmem>>, vector<1x288xf32>
    %cst = arith.constant 0.000000e+00 : f32
    %1 = vector.broadcast %cst : f32 to vector<4x342xf32>
    %c0_1 = arith.constant 0 : index
    %c0_2 = arith.constant 0 : index
    %2 = vector.load %arg6[%c0_1, %c0_2] : memref<4x342xf32, #tpu.memory_space<vmem>>, vector<4x342xf32>
    tpu.vector_store %arg6[%c0_1, %c0_2], %1 {strides = array<i32>} : memref<4x342xf32, #tpu.memory_space<vmem>>, vector<4x342xf32>,
    %cst_3 = arith.constant 0.000000e+00 : f32
    %3 = vector.broadcast %cst_3 : f32 to vector<4x342xf32>
    %c0_4 = arith.constant 0 : index
    %c0_5 = arith.constant 0 : index
    %4 = vector.load %arg7[%c0_4, %c0_5] : memref<4x342xf32, #tpu.memory_space<vmem>>, vector<4x342xf32>
    tpu.vector_store %arg7[%c0_4, %c0_5], %3 {strides = array<i32>} : memref<4x342xf32, #tpu.memory_space<vmem>>, vector<4x342xf32>,
    %c0_6 = arith.constant 0 : index
    %c0_7 = arith.constant 0 : index
    %c0_8 = arith.constant 0 : index
    %c0_9 = arith.constant 0 : index
    %5 = vector.load %arg1[%c0_6, %c0_7, %c0_8, %c0_9] : memref<1x4x16x16xf32, #tpu.memory_space<vmem>>, vector<1x4x1x16xf32>
    %6 = vector.shape_cast %5 : vector<1x4x1x16xf32> to vector<4x16xf32>
    %c0_10 = arith.constant 0 : index
    %c19 = arith.constant 19 : index
    %7 = vector.load %arg6[%c0_10, %c19] : memref<4x342xf32, #tpu.memory_space<vmem>>, vector<4x16xf32>
    tpu.vector_store %arg6[%c0_10, %c19], %6 {strides = array<i32>} : memref<4x342xf32, #tpu.memory_space<vmem>>, vector<4x16xf32>,
    %c0_11 = arith.constant 0 : index
    %c0_12 = arith.constant 0 : index
    %c1 = arith.constant 1 : index
    %c0_13 = arith.constant 0 : index
    %8 = vector.load %arg1[%c0_11, %c0_12, %c1, %c0_13] : memref<1x4x16x16xf32, #tpu.memory_space<vmem>>, vector<1x4x1x16xf32>
    %9 = vector.shape_cast %8 : vector<1x4x1x16xf32> to vector<4x16xf32>
    %c0_14 = arith.constant 0 : index
    %c37 = arith.constant 37 : index
    %10 = vector.load %arg6[%c0_14, %c37] : memref<4x342xf32, #tpu.memory_space<vmem>>, vector<4x16xf32>
    tpu.vector_store %arg6[%c0_14, %c37], %9 {strides = array<i32>} : memref<4x342xf32, #tpu.memory_space<vmem>>, vector<4x16xf32>,
    %c0_15 = arith.constant 0 : index
    %c0_16 = arith.constant 0 : index
    %c2 = arith.constant 2 : index
    %c0_17 = arith.constant 0 : index
    %11 = vector.load %arg1[%c0_15, %c0_16, %c2, %c0_17] : memref<1x4x16x16xf32, #tpu.memory_space<vmem>>, vector<1x4x1x16xf32>
    %12 = vector.shape_cast %11 : vector<1x4x1x16xf32> to vector<4x16xf32>
    %c0_18 = arith.constant 0 : index
    %c55 = arith.constant 55 : index
    %13 = vector.load %arg6[%c0_18, %c55] : memref<4x342xf32, #tpu.memory_space<vmem>>, vector<4x16xf32>
    tpu.vector_store %arg6[%c0_18, %c55], %12 {strides = array<i32>} : memref<4x342xf32, #tpu.memory_space<vmem>>, vector<4x16xf32>,
    %c0_19 = arith.constant 0 : index
    %c0_20 = arith.constant 0 : index
    %c3 = arith.constant 3 : index
    %c0_21 = arith.constant 0 : index
    %14 = vector.load %arg1[%c0_19, %c0_20, %c3, %c0_21] : memref<1x4x16x16xf32, #tpu.memory_space<vmem>>, vector<1x4x1x16xf32>
    %15 = vector.shape_cast %14 : vector<1x4x1x16xf32> to vector<4x16xf32>
    %c0_22 = arith.constant 0 : index
    %c73 = arith.constant 73 : index
    %16 = vector.load %arg6[%c0_22, %c73] : memref<4x342xf32, #tpu.memory_space<vmem>>, vector<4x16xf32>
    tpu.vector_store %arg6[%c0_22, %c73], %15 {strides = array<i32>} : memref<4x342xf32, #tpu.memory_space<vmem>>, vector<4x16xf32>,
    %c0_23 = arith.constant 0 : index
    %c0_24 = arith.constant 0 : index
    %c4 = arith.constant 4 : index
    %c0_25 = arith.constant 0 : index
    %17 = vector.load %arg1[%c0_23, %c0_24, %c4, %c0_25] : memref<1x4x16x16xf32, #tpu.memory_space<vmem>>, vector<1x4x1x16xf32>
    %18 = vector.shape_cast %17 : vector<1x4x1x16xf32> to vector<4x16xf32>
    %c0_26 = arith.constant 0 : index
    %c91 = arith.constant 91 : index
    %19 = vector.load %arg6[%c0_26, %c91] : memref<4x342xf32, #tpu.memory_space<vmem>>, vector<4x16xf32>
    tpu.vector_store %arg6[%c0_26, %c91], %18 {strides = array<i32>} : memref<4x342xf32, #tpu.memory_space<vmem>>, vector<4x16xf32>,
    %c0_27 = arith.constant 0 : index
    %c0_28 = arith.constant 0 : index
    %c5 = arith.constant 5 : index
    %c0_29 = arith.constant 0 : index
    %20 = vector.load %arg1[%c0_27, %c0_28, %c5, %c0_29] : memref<1x4x16x16xf32, #tpu.memory_space<vmem>>, vector<1x4x1x16xf32>
    %21 = vector.shape_cast %20 : vector<1x4x1x16xf32> to vector<4x16xf32>
    %c0_30 = arith.constant 0 : index
    %c109 = arith.constant 109 : index
    %22 = vector.load %arg6[%c0_30, %c109] : memref<4x342xf32, #tpu.memory_space<vmem>>, vector<4x16xf32>
    tpu.vector_store %arg6[%c0_30, %c109], %21 {strides = array<i32>} : memref<4x342xf32, #tpu.memory_space<vmem>>, vector<4x16xf32>,
    %c0_31 = arith.constant 0 : index
    %c0_32 = arith.constant 0 : index
    %c6 = arith.constant 6 : index
    %c0_33 = arith.constant 0 : index
    %23 = vector.load %arg1[%c0_31, %c0_32, %c6, %c0_33] : memref<1x4x16x16xf32, #tpu.memory_space<vmem>>, vector<1x4x1x16xf32>
    %24 = vector.shape_cast %23 : vector<1x4x1x16xf32> to vector<4x16xf32>
    %c0_34 = arith.constant 0 : index
    %c127 = arith.constant 127 : index
    %25 = vector.load %arg6[%c0_34, %c127] : memref<4x342xf32, #tpu.memory_space<vmem>>, vector<4x16xf32>
    tpu.vector_store %arg6[%c0_34, %c127], %24 {strides = array<i32>} : memref<4x342xf32, #tpu.memory_space<vmem>>, vector<4x16xf32>,
    %c0_35 = arith.constant 0 : index
    %c0_36 = arith.constant 0 : index
    %c7 = arith.constant 7 : index
    %c0_37 = arith.constant 0 : index
    %26 = vector.load %arg1[%c0_35, %c0_36, %c7, %c0_37] : memref<1x4x16x16xf32, #tpu.memory_space<vmem>>, vector<1x4x1x16xf32>
    %27 = vector.shape_cast %26 : vector<1x4x1x16xf32> to vector<4x16xf32>
    %c0_38 = arith.constant 0 : index
    %c145 = arith.constant 145 : index
    %28 = vector.load %arg6[%c0_38, %c145] : memref<4x342xf32, #tpu.memory_space<vmem>>, vector<4x16xf32>
    tpu.vector_store %arg6[%c0_38, %c145], %27 {strides = array<i32>} : memref<4x342xf32, #tpu.memory_space<vmem>>, vector<4x16xf32>,
    %c0_39 = arith.constant 0 : index
    %c0_40 = arith.constant 0 : index
    %c8 = arith.constant 8 : index
    %c0_41 = arith.constant 0 : index
    %29 = vector.load %arg1[%c0_39, %c0_40, %c8, %c0_41] : memref<1x4x16x16xf32, #tpu.memory_space<vmem>>, vector<1x4x1x16xf32>
    %30 = vector.shape_cast %29 : vector<1x4x1x16xf32> to vector<4x16xf32>
    %c0_42 = arith.constant 0 : index
    %c163 = arith.constant 163 : index
    %31 = vector.load %arg6[%c0_42, %c163] : memref<4x342xf32, #tpu.memory_space<vmem>>, vector<4x16xf32>
    tpu.vector_store %arg6[%c0_42, %c163], %30 {strides = array<i32>} : memref<4x342xf32, #tpu.memory_space<vmem>>, vector<4x16xf32>,
    %c0_43 = arith.constant 0 : index
    %c0_44 = arith.constant 0 : index
    %c9 = arith.constant 9 : index
    %c0_45 = arith.constant 0 : index
    %32 = vector.load %arg1[%c0_43, %c0_44, %c9, %c0_45] : memref<1x4x16x16xf32, #tpu.memory_space<vmem>>, vector<1x4x1x16xf32>
    %33 = vector.shape_cast %32 : vector<1x4x1x16xf32> to vector<4x16xf32>
    %c0_46 = arith.constant 0 : index
    %c181 = arith.constant 181 : index
    %34 = vector.load %arg6[%c0_46, %c181] : memref<4x342xf32, #tpu.memory_space<vmem>>, vector<4x16xf32>
    tpu.vector_store %arg6[%c0_46, %c181], %33 {strides = array<i32>} : memref<4x342xf32, #tpu.memory_space<vmem>>, vector<4x16xf32>,
    %c0_47 = arith.constant 0 : index
    %c0_48 = arith.constant 0 : index
    %c10 = arith.constant 10 : index
    %c0_49 = arith.constant 0 : index
    %35 = vector.load %arg1[%c0_47, %c0_48, %c10, %c0_49] : memref<1x4x16x16xf32, #tpu.memory_space<vmem>>, vector<1x4x1x16xf32>
    %36 = vector.shape_cast %35 : vector<1x4x1x16xf32> to vector<4x16xf32>
    %c0_50 = arith.constant 0 : index
    %c199 = arith.constant 199 : index
    %37 = vector.load %arg6[%c0_50, %c199] : memref<4x342xf32, #tpu.memory_space<vmem>>, vector<4x16xf32>
    tpu.vector_store %arg6[%c0_50, %c199], %36 {strides = array<i32>} : memref<4x342xf32, #tpu.memory_space<vmem>>, vector<4x16xf32>,
    %c0_51 = arith.constant 0 : index
    %c0_52 = arith.constant 0 : index
    %c11 = arith.constant 11 : index
    %c0_53 = arith.constant 0 : index
    %38 = vector.load %arg1[%c0_51, %c0_52, %c11, %c0_53] : memref<1x4x16x16xf32, #tpu.memory_space<vmem>>, vector<1x4x1x16xf32>
    %39 = vector.shape_cast %38 : vector<1x4x1x16xf32> to vector<4x16xf32>
    %c0_54 = arith.constant 0 : index
    %c217 = arith.constant 217 : index
    %40 = vector.load %arg6[%c0_54, %c217] : memref<4x342xf32, #tpu.memory_space<vmem>>, vector<4x16xf32>
    tpu.vector_store %arg6[%c0_54, %c217], %39 {strides = array<i32>} : memref<4x342xf32, #tpu.memory_space<vmem>>, vector<4x16xf32>,
    %c0_55 = arith.constant 0 : index
    %c0_56 = arith.constant 0 : index
    %c12 = arith.constant 12 : index
    %c0_57 = arith.constant 0 : index
    %41 = vector.load %arg1[%c0_55, %c0_56, %c12, %c0_57] : memref<1x4x16x16xf32, #tpu.memory_space<vmem>>, vector<1x4x1x16xf32>
    %42 = vector.shape_cast %41 : vector<1x4x1x16xf32> to vector<4x16xf32>
    %c0_58 = arith.constant 0 : index
    %c235 = arith.constant 235 : index
    %43 = vector.load %arg6[%c0_58, %c235] : memref<4x342xf32, #tpu.memory_space<vmem>>, vector<4x16xf32>
    tpu.vector_store %arg6[%c0_58, %c235], %42 {strides = array<i32>} : memref<4x342xf32, #tpu.memory_space<vmem>>, vector<4x16xf32>,
    %c0_59 = arith.constant 0 : index
    %c0_60 = arith.constant 0 : index
    %c13 = arith.constant 13 : index
    %c0_61 = arith.constant 0 : index
    %44 = vector.load %arg1[%c0_59, %c0_60, %c13, %c0_61] : memref<1x4x16x16xf32, #tpu.memory_space<vmem>>, vector<1x4x1x16xf32>
    %45 = vector.shape_cast %44 : vector<1x4x1x16xf32> to vector<4x16xf32>
    %c0_62 = arith.constant 0 : index
    %c253 = arith.constant 253 : index
    %46 = vector.load %arg6[%c0_62, %c253] : memref<4x342xf32, #tpu.memory_space<vmem>>, vector<4x16xf32>
    tpu.vector_store %arg6[%c0_62, %c253], %45 {strides = array<i32>} : memref<4x342xf32, #tpu.memory_space<vmem>>, vector<4x16xf32>,
    %c0_63 = arith.constant 0 : index
    %c0_64 = arith.constant 0 : index
    %c14 = arith.constant 14 : index
    %c0_65 = arith.constant 0 : index
    %47 = vector.load %arg1[%c0_63, %c0_64, %c14, %c0_65] : memref<1x4x16x16xf32, #tpu.memory_space<vmem>>, vector<1x4x1x16xf32>
    %48 = vector.shape_cast %47 : vector<1x4x1x16xf32> to vector<4x16xf32>
    %c0_66 = arith.constant 0 : index
    %c271 = arith.constant 271 : index
    %49 = vector.load %arg6[%c0_66, %c271] : memref<4x342xf32, #tpu.memory_space<vmem>>, vector<4x16xf32>
    tpu.vector_store %arg6[%c0_66, %c271], %48 {strides = array<i32>} : memref<4x342xf32, #tpu.memory_space<vmem>>, vector<4x16xf32>,
    %c0_67 = arith.constant 0 : index
    %c0_68 = arith.constant 0 : index
    %c15 = arith.constant 15 : index
    %c0_69 = arith.constant 0 : index
    %50 = vector.load %arg1[%c0_67, %c0_68, %c15, %c0_69] : memref<1x4x16x16xf32, #tpu.memory_space<vmem>>, vector<1x4x1x16xf32>
    %51 = vector.shape_cast %50 : vector<1x4x1x16xf32> to vector<4x16xf32>
    %c0_70 = arith.constant 0 : index
    %c289 = arith.constant 289 : index
    %52 = vector.load %arg6[%c0_70, %c289] : memref<4x342xf32, #tpu.memory_space<vmem>>, vector<4x16xf32>
    tpu.vector_store %arg6[%c0_70, %c289], %51 {strides = array<i32>} : memref<4x342xf32, #tpu.memory_space<vmem>>, vector<4x16xf32>,
    %c0_71 = arith.constant 0 : index
    %c0_72 = arith.constant 0 : index
    %c0_73 = arith.constant 0 : index
    %53 = vector.load %arg2[%c0_71, %c0_72, %c0_73] : memref<9x4x4xf32, #tpu.memory_space<vmem>>, vector<1x4x4xf32>
    %54 = vector.shape_cast %53 : vector<1x4x4xf32> to vector<4x4xf32>
    %c0_74 = arith.constant 0 : index
    %c0_75 = arith.constant 0 : index
    %55 = vector.load %arg6[%c0_74, %c0_75] : memref<4x342xf32, #tpu.memory_space<vmem>>, vector<4x288xf32>
    %cst_76 = arith.constant dense<0.000000e+00> : vector<4x288xf32>
    %56 = tpu.matmul %54, %55, %cst_76 {dimension_numbers = #tpu.dot_dimension_numbers<[1], [0], [0], [1], [0, 0, 1, 1], [], []>} : vector<4x4xf32>, vector<4x288xf32>, vector<4x288xf32> -> vector<4x288xf32>
    %c1_77 = arith.constant 1 : index
    %c0_78 = arith.constant 0 : index
    %c0_79 = arith.constant 0 : index
    %57 = vector.load %arg2[%c1_77, %c0_78, %c0_79] : memref<9x4x4xf32, #tpu.memory_space<vmem>>, vector<1x4x4xf32>
    %58 = vector.shape_cast %57 : vector<1x4x4xf32> to vector<4x4xf32>
    %c0_80 = arith.constant 0 : index
    %c1_81 = arith.constant 1 : index
    %59 = vector.load %arg6[%c0_80, %c1_81] : memref<4x342xf32, #tpu.memory_space<vmem>>, vector<4x288xf32>
    %cst_82 = arith.constant dense<0.000000e+00> : vector<4x288xf32>
    %60 = tpu.matmul %58, %59, %cst_82 {dimension_numbers = #tpu.dot_dimension_numbers<[1], [0], [0], [1], [0, 0, 1, 1], [], []>} : vector<4x4xf32>, vector<4x288xf32>, vector<4x288xf32> -> vector<4x288xf32>
    %61 = arith.addf %56, %60 : vector<4x288xf32>
    %c2_83 = arith.constant 2 : index
    %c0_84 = arith.constant 0 : index
    %c0_85 = arith.constant 0 : index
    %62 = vector.load %arg2[%c2_83, %c0_84, %c0_85] : memref<9x4x4xf32, #tpu.memory_space<vmem>>, vector<1x4x4xf32>
    %63 = vector.shape_cast %62 : vector<1x4x4xf32> to vector<4x4xf32>
    %c0_86 = arith.constant 0 : index
    %c2_87 = arith.constant 2 : index
    %64 = vector.load %arg6[%c0_86, %c2_87] : memref<4x342xf32, #tpu.memory_space<vmem>>, vector<4x288xf32>
    %cst_88 = arith.constant dense<0.000000e+00> : vector<4x288xf32>
    %65 = tpu.matmul %63, %64, %cst_88 {dimension_numbers = #tpu.dot_dimension_numbers<[1], [0], [0], [1], [0, 0, 1, 1], [], []>} : vector<4x4xf32>, vector<4x288xf32>, vector<4x288xf32> -> vector<4x288xf32>
    %66 = arith.addf %61, %65 : vector<4x288xf32>
    %c3_89 = arith.constant 3 : index
    %c0_90 = arith.constant 0 : index
    %c0_91 = arith.constant 0 : index
    %67 = vector.load %arg2[%c3_89, %c0_90, %c0_91] : memref<9x4x4xf32, #tpu.memory_space<vmem>>, vector<1x4x4xf32>
    %68 = vector.shape_cast %67 : vector<1x4x4xf32> to vector<4x4xf32>
    %c0_92 = arith.constant 0 : index
    %c18 = arith.constant 18 : index
    %69 = vector.load %arg6[%c0_92, %c18] : memref<4x342xf32, #tpu.memory_space<vmem>>, vector<4x288xf32>
    %cst_93 = arith.constant dense<0.000000e+00> : vector<4x288xf32>
    %70 = tpu.matmul %68, %69, %cst_93 {dimension_numbers = #tpu.dot_dimension_numbers<[1], [0], [0], [1], [0, 0, 1, 1], [], []>} : vector<4x4xf32>, vector<4x288xf32>, vector<4x288xf32> -> vector<4x288xf32>
    %71 = arith.addf %66, %70 : vector<4x288xf32>
    %c4_94 = arith.constant 4 : index
    %c0_95 = arith.constant 0 : index
    %c0_96 = arith.constant 0 : index
    %72 = vector.load %arg2[%c4_94, %c0_95, %c0_96] : memref<9x4x4xf32, #tpu.memory_space<vmem>>, vector<1x4x4xf32>
    %73 = vector.shape_cast %72 : vector<1x4x4xf32> to vector<4x4xf32>
    %c0_97 = arith.constant 0 : index
    %c19_98 = arith.constant 19 : index
    %74 = vector.load %arg6[%c0_97, %c19_98] : memref<4x342xf32, #tpu.memory_space<vmem>>, vector<4x288xf32>
    %cst_99 = arith.constant dense<0.000000e+00> : vector<4x288xf32>
    %75 = tpu.matmul %73, %74, %cst_99 {dimension_numbers = #tpu.dot_dimension_numbers<[1], [0], [0], [1], [0, 0, 1, 1], [], []>} : vector<4x4xf32>, vector<4x288xf32>, vector<4x288xf32> -> vector<4x288xf32>
    %76 = arith.addf %71, %75 : vector<4x288xf32>
    %c5_100 = arith.constant 5 : index
    %c0_101 = arith.constant 0 : index
    %c0_102 = arith.constant 0 : index
    %77 = vector.load %arg2[%c5_100, %c0_101, %c0_102] : memref<9x4x4xf32, #tpu.memory_space<vmem>>, vector<1x4x4xf32>
    %78 = vector.shape_cast %77 : vector<1x4x4xf32> to vector<4x4xf32>
    %c0_103 = arith.constant 0 : index
    %c20 = arith.constant 20 : index
    %79 = vector.load %arg6[%c0_103, %c20] : memref<4x342xf32, #tpu.memory_space<vmem>>, vector<4x288xf32>
    %cst_104 = arith.constant dense<0.000000e+00> : vector<4x288xf32>
    %80 = tpu.matmul %78, %79, %cst_104 {dimension_numbers = #tpu.dot_dimension_numbers<[1], [0], [0], [1], [0, 0, 1, 1], [], []>} : vector<4x4xf32>, vector<4x288xf32>, vector<4x288xf32> -> vector<4x288xf32>
    %81 = arith.addf %76, %80 : vector<4x288xf32>
    %c6_105 = arith.constant 6 : index
    %c0_106 = arith.constant 0 : index
    %c0_107 = arith.constant 0 : index
    %82 = vector.load %arg2[%c6_105, %c0_106, %c0_107] : memref<9x4x4xf32, #tpu.memory_space<vmem>>, vector<1x4x4xf32>
    %83 = vector.shape_cast %82 : vector<1x4x4xf32> to vector<4x4xf32>
    %c0_108 = arith.constant 0 : index
    %c36 = arith.constant 36 : index
    %84 = vector.load %arg6[%c0_108, %c36] : memref<4x342xf32, #tpu.memory_space<vmem>>, vector<4x288xf32>
    %cst_109 = arith.constant dense<0.000000e+00> : vector<4x288xf32>
    %85 = tpu.matmul %83, %84, %cst_109 {dimension_numbers = #tpu.dot_dimension_numbers<[1], [0], [0], [1], [0, 0, 1, 1], [], []>} : vector<4x4xf32>, vector<4x288xf32>, vector<4x288xf32> -> vector<4x288xf32>
    %86 = arith.addf %81, %85 : vector<4x288xf32>
    %c7_110 = arith.constant 7 : index
    %c0_111 = arith.constant 0 : index
    %c0_112 = arith.constant 0 : index
    %87 = vector.load %arg2[%c7_110, %c0_111, %c0_112] : memref<9x4x4xf32, #tpu.memory_space<vmem>>, vector<1x4x4xf32>
    %88 = vector.shape_cast %87 : vector<1x4x4xf32> to vector<4x4xf32>
    %c0_113 = arith.constant 0 : index
    %c37_114 = arith.constant 37 : index
    %89 = vector.load %arg6[%c0_113, %c37_114] : memref<4x342xf32, #tpu.memory_space<vmem>>, vector<4x288xf32>
    %cst_115 = arith.constant dense<0.000000e+00> : vector<4x288xf32>
    %90 = tpu.matmul %88, %89, %cst_115 {dimension_numbers = #tpu.dot_dimension_numbers<[1], [0], [0], [1], [0, 0, 1, 1], [], []>} : vector<4x4xf32>, vector<4x288xf32>, vector<4x288xf32> -> vector<4x288xf32>
    %91 = arith.addf %86, %90 : vector<4x288xf32>
    %c8_116 = arith.constant 8 : index
    %c0_117 = arith.constant 0 : index
    %c0_118 = arith.constant 0 : index
    %92 = vector.load %arg2[%c8_116, %c0_117, %c0_118] : memref<9x4x4xf32, #tpu.memory_space<vmem>>, vector<1x4x4xf32>
    %93 = vector.shape_cast %92 : vector<1x4x4xf32> to vector<4x4xf32>
    %c0_119 = arith.constant 0 : index
    %c38 = arith.constant 38 : index
    %94 = vector.load %arg6[%c0_119, %c38] : memref<4x342xf32, #tpu.memory_space<vmem>>, vector<4x288xf32>
    %cst_120 = arith.constant dense<0.000000e+00> : vector<4x288xf32>
    %95 = tpu.matmul %93, %94, %cst_120 {dimension_numbers = #tpu.dot_dimension_numbers<[1], [0], [0], [1], [0, 0, 1, 1], [], []>} : vector<4x4xf32>, vector<4x288xf32>, vector<4x288xf32> -> vector<4x288xf32>
    %96 = arith.addf %91, %95 : vector<4x288xf32>
    %97 = vector.broadcast %0 : vector<1x288xf32> to vector<4x288xf32>
    %98 = arith.mulf %96, %97 : vector<4x288xf32>
    %cst_121 = arith.constant dense<0.000000e+00> : vector<4xf32>
    %99 = vector.multi_reduction <add>, %98, %cst_121 [1] : vector<4x288xf32> to vector<4xf32>
    %100 = vector.shape_cast %99 : vector<4xf32> to vector<4x1xf32>
    %cst_122 = arith.constant 2.560000e+02 : f32
    %101 = vector.broadcast %cst_122 : f32 to vector<4x1xf32>
    %102 = arith.divf %100, %101 : vector<4x1xf32>
    %103 = vector.broadcast %102 : vector<4x1xf32> to vector<4x288xf32>
    %104 = arith.subf %96, %103 : vector<4x288xf32>
    %105 = arith.mulf %104, %104 : vector<4x288xf32>
    %106 = vector.broadcast %0 : vector<1x288xf32> to vector<4x288xf32>
    %107 = arith.mulf %105, %106 : vector<4x288xf32>
    %cst_123 = arith.constant dense<0.000000e+00> : vector<4xf32>
    %108 = vector.multi_reduction <add>, %107, %cst_123 [1] : vector<4x288xf32> to vector<4xf32>
    %109 = vector.shape_cast %108 : vector<4xf32> to vector<4x1xf32>
    %cst_124 = arith.constant 2.560000e+02 : f32
    %110 = vector.broadcast %cst_124 : f32 to vector<4x1xf32>
    %111 = arith.divf %109, %110 : vector<4x1xf32>
    %cst_125 = arith.constant 9.99999974E-6 : f32
    %112 = vector.broadcast %cst_125 : f32 to vector<4x1xf32>
    %113 = arith.addf %111, %112 : vector<4x1xf32>
    %114 = math.rsqrt %113 : vector<4x1xf32>
    %115 = vector.broadcast %114 : vector<4x1xf32> to vector<4x288xf32>
    %116 = arith.mulf %104, %115 : vector<4x288xf32>
    %cst_126 = arith.constant 0.000000e+00 : f32
    %117 = vector.broadcast %cst_126 : f32 to vector<4x288xf32>
    %118 = arith.maximumf %116, %117 : vector<4x288xf32>
    %119 = vector.broadcast %0 : vector<1x288xf32> to vector<4x288xf32>
    %120 = arith.mulf %118, %119 : vector<4x288xf32>
    %c0_127 = arith.constant 0 : index
    %c19_128 = arith.constant 19 : index
    %121 = vector.load %arg7[%c0_127, %c19_128] : memref<4x342xf32, #tpu.memory_space<vmem>>, vector<4x288xf32>
    tpu.vector_store %arg7[%c0_127, %c19_128], %120 {strides = array<i32>} : memref<4x342xf32, #tpu.memory_space<vmem>>, vector<4x288xf32>,
    %c0_129 = arith.constant 0 : index
    %c0_130 = arith.constant 0 : index
    %c0_131 = arith.constant 0 : index
    %122 = vector.load %arg3[%c0_129, %c0_130, %c0_131] : memref<9x4x4xf32, #tpu.memory_space<vmem>>, vector<1x4x4xf32>
    %123 = vector.shape_cast %122 : vector<1x4x4xf32> to vector<4x4xf32>
    %c0_132 = arith.constant 0 : index
    %c0_133 = arith.constant 0 : index
    %124 = vector.load %arg7[%c0_132, %c0_133] : memref<4x342xf32, #tpu.memory_space<vmem>>, vector<4x288xf32>
    %cst_134 = arith.constant dense<0.000000e+00> : vector<4x288xf32>
    %125 = tpu.matmul %123, %124, %cst_134 {dimension_numbers = #tpu.dot_dimension_numbers<[1], [0], [0], [1], [0, 0, 1, 1], [], []>} : vector<4x4xf32>, vector<4x288xf32>, vector<4x288xf32> -> vector<4x288xf32>
    %c1_135 = arith.constant 1 : index
    %c0_136 = arith.constant 0 : index
    %c0_137 = arith.constant 0 : index
    %126 = vector.load %arg3[%c1_135, %c0_136, %c0_137] : memref<9x4x4xf32, #tpu.memory_space<vmem>>, vector<1x4x4xf32>
    %127 = vector.shape_cast %126 : vector<1x4x4xf32> to vector<4x4xf32>
    %c0_138 = arith.constant 0 : index
    %c1_139 = arith.constant 1 : index
    %128 = vector.load %arg7[%c0_138, %c1_139] : memref<4x342xf32, #tpu.memory_space<vmem>>, vector<4x288xf32>
    %cst_140 = arith.constant dense<0.000000e+00> : vector<4x288xf32>
    %129 = tpu.matmul %127, %128, %cst_140 {dimension_numbers = #tpu.dot_dimension_numbers<[1], [0], [0], [1], [0, 0, 1, 1], [], []>} : vector<4x4xf32>, vector<4x288xf32>, vector<4x288xf32> -> vector<4x288xf32>
    %130 = arith.addf %125, %129 : vector<4x288xf32>
    %c2_141 = arith.constant 2 : index
    %c0_142 = arith.constant 0 : index
    %c0_143 = arith.constant 0 : index
    %131 = vector.load %arg3[%c2_141, %c0_142, %c0_143] : memref<9x4x4xf32, #tpu.memory_space<vmem>>, vector<1x4x4xf32>
    %132 = vector.shape_cast %131 : vector<1x4x4xf32> to vector<4x4xf32>
    %c0_144 = arith.constant 0 : index
    %c2_145 = arith.constant 2 : index
    %133 = vector.load %arg7[%c0_144, %c2_145] : memref<4x342xf32, #tpu.memory_space<vmem>>, vector<4x288xf32>
    %cst_146 = arith.constant dense<0.000000e+00> : vector<4x288xf32>
    %134 = tpu.matmul %132, %133, %cst_146 {dimension_numbers = #tpu.dot_dimension_numbers<[1], [0], [0], [1], [0, 0, 1, 1], [], []>} : vector<4x4xf32>, vector<4x288xf32>, vector<4x288xf32> -> vector<4x288xf32>
    %135 = arith.addf %130, %134 : vector<4x288xf32>
    %c3_147 = arith.constant 3 : index
    %c0_148 = arith.constant 0 : index
    %c0_149 = arith.constant 0 : index
    %136 = vector.load %arg3[%c3_147, %c0_148, %c0_149] : memref<9x4x4xf32, #tpu.memory_space<vmem>>, vector<1x4x4xf32>
    %137 = vector.shape_cast %136 : vector<1x4x4xf32> to vector<4x4xf32>
    %c0_150 = arith.constant 0 : index
    %c18_151 = arith.constant 18 : index
    %138 = vector.load %arg7[%c0_150, %c18_151] : memref<4x342xf32, #tpu.memory_space<vmem>>, vector<4x288xf32>
    %cst_152 = arith.constant dense<0.000000e+00> : vector<4x288xf32>
    %139 = tpu.matmul %137, %138, %cst_152 {dimension_numbers = #tpu.dot_dimension_numbers<[1], [0], [0], [1], [0, 0, 1, 1], [], []>} : vector<4x4xf32>, vector<4x288xf32>, vector<4x288xf32> -> vector<4x288xf32>
    %140 = arith.addf %135, %139 : vector<4x288xf32>
    %c4_153 = arith.constant 4 : index
    %c0_154 = arith.constant 0 : index
    %c0_155 = arith.constant 0 : index
    %141 = vector.load %arg3[%c4_153, %c0_154, %c0_155] : memref<9x4x4xf32, #tpu.memory_space<vmem>>, vector<1x4x4xf32>
    %142 = vector.shape_cast %141 : vector<1x4x4xf32> to vector<4x4xf32>
    %c0_156 = arith.constant 0 : index
    %c19_157 = arith.constant 19 : index
    %143 = vector.load %arg7[%c0_156, %c19_157] : memref<4x342xf32, #tpu.memory_space<vmem>>, vector<4x288xf32>
    %cst_158 = arith.constant dense<0.000000e+00> : vector<4x288xf32>
    %144 = tpu.matmul %142, %143, %cst_158 {dimension_numbers = #tpu.dot_dimension_numbers<[1], [0], [0], [1], [0, 0, 1, 1], [], []>} : vector<4x4xf32>, vector<4x288xf32>, vector<4x288xf32> -> vector<4x288xf32>
    %145 = arith.addf %140, %144 : vector<4x288xf32>
    %c5_159 = arith.constant 5 : index
    %c0_160 = arith.constant 0 : index
    %c0_161 = arith.constant 0 : index
    %146 = vector.load %arg3[%c5_159, %c0_160, %c0_161] : memref<9x4x4xf32, #tpu.memory_space<vmem>>, vector<1x4x4xf32>
    %147 = vector.shape_cast %146 : vector<1x4x4xf32> to vector<4x4xf32>
    %c0_162 = arith.constant 0 : index
    %c20_163 = arith.constant 20 : index
    %148 = vector.load %arg7[%c0_162, %c20_163] : memref<4x342xf32, #tpu.memory_space<vmem>>, vector<4x288xf32>
    %cst_164 = arith.constant dense<0.000000e+00> : vector<4x288xf32>
    %149 = tpu.matmul %147, %148, %cst_164 {dimension_numbers = #tpu.dot_dimension_numbers<[1], [0], [0], [1], [0, 0, 1, 1], [], []>} : vector<4x4xf32>, vector<4x288xf32>, vector<4x288xf32> -> vector<4x288xf32>
    %150 = arith.addf %145, %149 : vector<4x288xf32>
    %c6_165 = arith.constant 6 : index
    %c0_166 = arith.constant 0 : index
    %c0_167 = arith.constant 0 : index
    %151 = vector.load %arg3[%c6_165, %c0_166, %c0_167] : memref<9x4x4xf32, #tpu.memory_space<vmem>>, vector<1x4x4xf32>
    %152 = vector.shape_cast %151 : vector<1x4x4xf32> to vector<4x4xf32>
    %c0_168 = arith.constant 0 : index
    %c36_169 = arith.constant 36 : index
    %153 = vector.load %arg7[%c0_168, %c36_169] : memref<4x342xf32, #tpu.memory_space<vmem>>, vector<4x288xf32>
    %cst_170 = arith.constant dense<0.000000e+00> : vector<4x288xf32>
    %154 = tpu.matmul %152, %153, %cst_170 {dimension_numbers = #tpu.dot_dimension_numbers<[1], [0], [0], [1], [0, 0, 1, 1], [], []>} : vector<4x4xf32>, vector<4x288xf32>, vector<4x288xf32> -> vector<4x288xf32>
    %155 = arith.addf %150, %154 : vector<4x288xf32>
    %c7_171 = arith.constant 7 : index
    %c0_172 = arith.constant 0 : index
    %c0_173 = arith.constant 0 : index
    %156 = vector.load %arg3[%c7_171, %c0_172, %c0_173] : memref<9x4x4xf32, #tpu.memory_space<vmem>>, vector<1x4x4xf32>
    %157 = vector.shape_cast %156 : vector<1x4x4xf32> to vector<4x4xf32>
    %c0_174 = arith.constant 0 : index
    %c37_175 = arith.constant 37 : index
    %158 = vector.load %arg7[%c0_174, %c37_175] : memref<4x342xf32, #tpu.memory_space<vmem>>, vector<4x288xf32>
    %cst_176 = arith.constant dense<0.000000e+00> : vector<4x288xf32>
    %159 = tpu.matmul %157, %158, %cst_176 {dimension_numbers = #tpu.dot_dimension_numbers<[1], [0], [0], [1], [0, 0, 1, 1], [], []>} : vector<4x4xf32>, vector<4x288xf32>, vector<4x288xf32> -> vector<4x288xf32>
    %160 = arith.addf %155, %159 : vector<4x288xf32>
    %c8_177 = arith.constant 8 : index
    %c0_178 = arith.constant 0 : index
    %c0_179 = arith.constant 0 : index
    %161 = vector.load %arg3[%c8_177, %c0_178, %c0_179] : memref<9x4x4xf32, #tpu.memory_space<vmem>>, vector<1x4x4xf32>
    %162 = vector.shape_cast %161 : vector<1x4x4xf32> to vector<4x4xf32>
    %c0_180 = arith.constant 0 : index
    %c38_181 = arith.constant 38 : index
    %163 = vector.load %arg7[%c0_180, %c38_181] : memref<4x342xf32, #tpu.memory_space<vmem>>, vector<4x288xf32>
    %cst_182 = arith.constant dense<0.000000e+00> : vector<4x288xf32>
    %164 = tpu.matmul %162, %163, %cst_182 {dimension_numbers = #tpu.dot_dimension_numbers<[1], [0], [0], [1], [0, 0, 1, 1], [], []>} : vector<4x4xf32>, vector<4x288xf32>, vector<4x288xf32> -> vector<4x288xf32>
    %165 = arith.addf %160, %164 : vector<4x288xf32>
    %166 = vector.broadcast %0 : vector<1x288xf32> to vector<4x288xf32>
    %167 = arith.mulf %165, %166 : vector<4x288xf32>
    %cst_183 = arith.constant dense<0.000000e+00> : vector<4xf32>
    %168 = vector.multi_reduction <add>, %167, %cst_183 [1] : vector<4x288xf32> to vector<4xf32>
    %169 = vector.shape_cast %168 : vector<4xf32> to vector<4x1xf32>
    %cst_184 = arith.constant 2.560000e+02 : f32
    %170 = vector.broadcast %cst_184 : f32 to vector<4x1xf32>
    %171 = arith.divf %169, %170 : vector<4x1xf32>
    %172 = vector.broadcast %171 : vector<4x1xf32> to vector<4x288xf32>
    %173 = arith.subf %165, %172 : vector<4x288xf32>
    %174 = arith.mulf %173, %173 : vector<4x288xf32>
    %175 = vector.broadcast %0 : vector<1x288xf32> to vector<4x288xf32>
    %176 = arith.mulf %174, %175 : vector<4x288xf32>
    %cst_185 = arith.constant dense<0.000000e+00> : vector<4xf32>
    %177 = vector.multi_reduction <add>, %176, %cst_185 [1] : vector<4x288xf32> to vector<4xf32>
    %178 = vector.shape_cast %177 : vector<4xf32> to vector<4x1xf32>
    %cst_186 = arith.constant 2.560000e+02 : f32
    %179 = vector.broadcast %cst_186 : f32 to vector<4x1xf32>
    %180 = arith.divf %178, %179 : vector<4x1xf32>
    %cst_187 = arith.constant 9.99999974E-6 : f32
    %181 = vector.broadcast %cst_187 : f32 to vector<4x1xf32>
    %182 = arith.addf %180, %181 : vector<4x1xf32>
    %183 = math.rsqrt %182 : vector<4x1xf32>
    %184 = vector.broadcast %183 : vector<4x1xf32> to vector<4x288xf32>
    %185 = arith.mulf %173, %184 : vector<4x288xf32>
    %c0_188 = arith.constant 0 : index
    %c19_189 = arith.constant 19 : index
    %186 = vector.load %arg6[%c0_188, %c19_189] : memref<4x342xf32, #tpu.memory_space<vmem>>, vector<4x288xf32>
    %187 = arith.addf %185, %186 : vector<4x288xf32>
    %cst_190 = arith.constant 0.000000e+00 : f32
    %188 = vector.broadcast %cst_190 : f32 to vector<4x288xf32>
    %189 = arith.maximumf %187, %188 : vector<4x288xf32>
    %c0_191 = arith.constant 0 : index
    %c0_192 = arith.constant 0 : index
    %c0_193 = arith.constant 0 : index
    %190 = vector.load %arg5[%c0_191, %c0_192, %c0_193] : memref<1x4x288xf32, #tpu.memory_space<vmem>>, vector<1x4x288xf32>
    %191 = vector.shape_cast %190 : vector<1x4x288xf32> to vector<4x288xf32>
    %192 = vector.shape_cast %189 : vector<4x288xf32> to vector<1x4x288xf32>
    tpu.vector_store %arg5[%c0_191, %c0_192, %c0_193], %192 {strides = array<i32>} : memref<1x4x288xf32, #tpu.memory_space<vmem>>, vector<1x4x288xf32>,
    return
  }
  func.func @transform_0(%arg0: i32) -> (i32, i32, i32, i32) {
    %c0_i32 = arith.constant 0 : i32
    %c0_i32_0 = arith.constant 0 : i32
    %c0_i32_1 = arith.constant 0 : i32
    %c0_i32_2 = arith.constant 0 : i32
    return %arg0, %c0_i32, %c0_i32_0, %c0_i32_1 : i32, i32, i32, i32
  }
  func.func @transform_1(%arg0: i32) -> (i32, i32, i32) {
    %c0_i32 = arith.constant 0 : i32
    %c0_i32_0 = arith.constant 0 : i32
    %c0_i32_1 = arith.constant 0 : i32
    %c0_i32_2 = arith.constant 0 : i32
    return %c0_i32, %c0_i32_0, %c0_i32_1 : i32, i32, i32
  }
  func.func @transform_2(%arg0: i32) -> (i32, i32, i32) {
    %c0_i32 = arith.constant 0 : i32
    %c0_i32_0 = arith.constant 0 : i32
    %c0_i32_1 = arith.constant 0 : i32
    %c0_i32_2 = arith.constant 0 : i32
    return %c0_i32, %c0_i32_0, %c0_i32_1 : i32, i32, i32
  }
  func.func @transform_3(%arg0: i32) -> (i32, i32) {
    %c0_i32 = arith.constant 0 : i32
    %c0_i32_0 = arith.constant 0 : i32
    %c0_i32_1 = arith.constant 0 : i32
    return %c0_i32, %c0_i32_0 : i32, i32
  }
  func.func @transform_4(%arg0: i32) -> (i32, i32, i32) {
    %c0_i32 = arith.constant 0 : i32
    %c0_i32_0 = arith.constant 0 : i32
    %c0_i32_1 = arith.constant 0 : i32
    return %arg0, %c0_i32, %c0_i32_0 : i32, i32, i32
  }
}

module attributes {stable_mosaic.version = 11 : i64} {
  func.func @_low2_upsample_kernel(%arg0: i32, %arg1: memref<1x8x8x8xf32, #tpu.memory_space<vmem>>, %arg2: memref<9x4x8xf32, #tpu.memory_space<vmem>>, %arg3: memref<9x4x4xf32, #tpu.memory_space<vmem>>, %arg4: memref<1x80xf32, #tpu.memory_space<vmem>>, %arg5: memref<4x8xf32, #tpu.memory_space<vmem>>, %arg6: memref<1x4x288xf32, #tpu.memory_space<vmem>>, %arg7: memref<1x4x16x16xf32, #tpu.memory_space<vmem>>, %arg8: memref<8x110xf32, #tpu.memory_space<vmem>>, %arg9: memref<4x110xf32, #tpu.memory_space<vmem>>) attributes {dimension_semantics = [#tpu.dimension_semantics<parallel>], iteration_bounds = array<i64: 2>, scalar_prefetch = 0 : i64, scratch_operands = 2 : i64, tpu.core_type = #tpu.core_type<tc>, window_params = [{transform_indices = @transform_0, window_bounds = array<i64: 1, 8, 8, 8>}, {pipeline_mode = #tpu.pipeline_mode<synchronous>, transform_indices = @transform_1, window_bounds = array<i64: 9, 4, 8>}, {pipeline_mode = #tpu.pipeline_mode<synchronous>, transform_indices = @transform_2, window_bounds = array<i64: 9, 4, 4>}, {pipeline_mode = #tpu.pipeline_mode<synchronous>, transform_indices = @transform_3, window_bounds = array<i64: 1, 80>}, {pipeline_mode = #tpu.pipeline_mode<synchronous>, transform_indices = @transform_4, window_bounds = array<i64: 4, 8>}, {transform_indices = @transform_5, window_bounds = array<i64: 1, 4, 288>}, {transform_indices = @transform_6, window_bounds = array<i64: 1, 4, 16, 16>}]} {
    %c0 = arith.constant 0 : index
    %c0_0 = arith.constant 0 : index
    %0 = vector.load %arg4[%c0, %c0_0] : memref<1x80xf32, #tpu.memory_space<vmem>>, vector<1x80xf32>
    %cst = arith.constant 0.000000e+00 : f32
    %1 = vector.broadcast %cst : f32 to vector<8x110xf32>
    %c0_1 = arith.constant 0 : index
    %c0_2 = arith.constant 0 : index
    %2 = vector.load %arg8[%c0_1, %c0_2] : memref<8x110xf32, #tpu.memory_space<vmem>>, vector<8x110xf32>
    tpu.vector_store %arg8[%c0_1, %c0_2], %1 {strides = array<i32>} : memref<8x110xf32, #tpu.memory_space<vmem>>, vector<8x110xf32>,
    %cst_3 = arith.constant 0.000000e+00 : f32
    %3 = vector.broadcast %cst_3 : f32 to vector<4x110xf32>
    %c0_4 = arith.constant 0 : index
    %c0_5 = arith.constant 0 : index
    %4 = vector.load %arg9[%c0_4, %c0_5] : memref<4x110xf32, #tpu.memory_space<vmem>>, vector<4x110xf32>
    tpu.vector_store %arg9[%c0_4, %c0_5], %3 {strides = array<i32>} : memref<4x110xf32, #tpu.memory_space<vmem>>, vector<4x110xf32>,
    %c0_6 = arith.constant 0 : index
    %c0_7 = arith.constant 0 : index
    %c0_8 = arith.constant 0 : index
    %c0_9 = arith.constant 0 : index
    %5 = vector.load %arg1[%c0_6, %c0_7, %c0_8, %c0_9] : memref<1x8x8x8xf32, #tpu.memory_space<vmem>>, vector<1x8x1x8xf32>
    %6 = vector.shape_cast %5 : vector<1x8x1x8xf32> to vector<8x8xf32>
    %c0_10 = arith.constant 0 : index
    %c11 = arith.constant 11 : index
    %7 = vector.load %arg8[%c0_10, %c11] : memref<8x110xf32, #tpu.memory_space<vmem>>, vector<8x8xf32>
    tpu.vector_store %arg8[%c0_10, %c11], %6 {strides = array<i32>} : memref<8x110xf32, #tpu.memory_space<vmem>>, vector<8x8xf32>,
    %c0_11 = arith.constant 0 : index
    %c0_12 = arith.constant 0 : index
    %c1 = arith.constant 1 : index
    %c0_13 = arith.constant 0 : index
    %8 = vector.load %arg1[%c0_11, %c0_12, %c1, %c0_13] : memref<1x8x8x8xf32, #tpu.memory_space<vmem>>, vector<1x8x1x8xf32>
    %9 = vector.shape_cast %8 : vector<1x8x1x8xf32> to vector<8x8xf32>
    %c0_14 = arith.constant 0 : index
    %c21 = arith.constant 21 : index
    %10 = vector.load %arg8[%c0_14, %c21] : memref<8x110xf32, #tpu.memory_space<vmem>>, vector<8x8xf32>
    tpu.vector_store %arg8[%c0_14, %c21], %9 {strides = array<i32>} : memref<8x110xf32, #tpu.memory_space<vmem>>, vector<8x8xf32>,
    %c0_15 = arith.constant 0 : index
    %c0_16 = arith.constant 0 : index
    %c2 = arith.constant 2 : index
    %c0_17 = arith.constant 0 : index
    %11 = vector.load %arg1[%c0_15, %c0_16, %c2, %c0_17] : memref<1x8x8x8xf32, #tpu.memory_space<vmem>>, vector<1x8x1x8xf32>
    %12 = vector.shape_cast %11 : vector<1x8x1x8xf32> to vector<8x8xf32>
    %c0_18 = arith.constant 0 : index
    %c31 = arith.constant 31 : index
    %13 = vector.load %arg8[%c0_18, %c31] : memref<8x110xf32, #tpu.memory_space<vmem>>, vector<8x8xf32>
    tpu.vector_store %arg8[%c0_18, %c31], %12 {strides = array<i32>} : memref<8x110xf32, #tpu.memory_space<vmem>>, vector<8x8xf32>,
    %c0_19 = arith.constant 0 : index
    %c0_20 = arith.constant 0 : index
    %c3 = arith.constant 3 : index
    %c0_21 = arith.constant 0 : index
    %14 = vector.load %arg1[%c0_19, %c0_20, %c3, %c0_21] : memref<1x8x8x8xf32, #tpu.memory_space<vmem>>, vector<1x8x1x8xf32>
    %15 = vector.shape_cast %14 : vector<1x8x1x8xf32> to vector<8x8xf32>
    %c0_22 = arith.constant 0 : index
    %c41 = arith.constant 41 : index
    %16 = vector.load %arg8[%c0_22, %c41] : memref<8x110xf32, #tpu.memory_space<vmem>>, vector<8x8xf32>
    tpu.vector_store %arg8[%c0_22, %c41], %15 {strides = array<i32>} : memref<8x110xf32, #tpu.memory_space<vmem>>, vector<8x8xf32>,
    %c0_23 = arith.constant 0 : index
    %c0_24 = arith.constant 0 : index
    %c4 = arith.constant 4 : index
    %c0_25 = arith.constant 0 : index
    %17 = vector.load %arg1[%c0_23, %c0_24, %c4, %c0_25] : memref<1x8x8x8xf32, #tpu.memory_space<vmem>>, vector<1x8x1x8xf32>
    %18 = vector.shape_cast %17 : vector<1x8x1x8xf32> to vector<8x8xf32>
    %c0_26 = arith.constant 0 : index
    %c51 = arith.constant 51 : index
    %19 = vector.load %arg8[%c0_26, %c51] : memref<8x110xf32, #tpu.memory_space<vmem>>, vector<8x8xf32>
    tpu.vector_store %arg8[%c0_26, %c51], %18 {strides = array<i32>} : memref<8x110xf32, #tpu.memory_space<vmem>>, vector<8x8xf32>,
    %c0_27 = arith.constant 0 : index
    %c0_28 = arith.constant 0 : index
    %c5 = arith.constant 5 : index
    %c0_29 = arith.constant 0 : index
    %20 = vector.load %arg1[%c0_27, %c0_28, %c5, %c0_29] : memref<1x8x8x8xf32, #tpu.memory_space<vmem>>, vector<1x8x1x8xf32>
    %21 = vector.shape_cast %20 : vector<1x8x1x8xf32> to vector<8x8xf32>
    %c0_30 = arith.constant 0 : index
    %c61 = arith.constant 61 : index
    %22 = vector.load %arg8[%c0_30, %c61] : memref<8x110xf32, #tpu.memory_space<vmem>>, vector<8x8xf32>
    tpu.vector_store %arg8[%c0_30, %c61], %21 {strides = array<i32>} : memref<8x110xf32, #tpu.memory_space<vmem>>, vector<8x8xf32>,
    %c0_31 = arith.constant 0 : index
    %c0_32 = arith.constant 0 : index
    %c6 = arith.constant 6 : index
    %c0_33 = arith.constant 0 : index
    %23 = vector.load %arg1[%c0_31, %c0_32, %c6, %c0_33] : memref<1x8x8x8xf32, #tpu.memory_space<vmem>>, vector<1x8x1x8xf32>
    %24 = vector.shape_cast %23 : vector<1x8x1x8xf32> to vector<8x8xf32>
    %c0_34 = arith.constant 0 : index
    %c71 = arith.constant 71 : index
    %25 = vector.load %arg8[%c0_34, %c71] : memref<8x110xf32, #tpu.memory_space<vmem>>, vector<8x8xf32>
    tpu.vector_store %arg8[%c0_34, %c71], %24 {strides = array<i32>} : memref<8x110xf32, #tpu.memory_space<vmem>>, vector<8x8xf32>,
    %c0_35 = arith.constant 0 : index
    %c0_36 = arith.constant 0 : index
    %c7 = arith.constant 7 : index
    %c0_37 = arith.constant 0 : index
    %26 = vector.load %arg1[%c0_35, %c0_36, %c7, %c0_37] : memref<1x8x8x8xf32, #tpu.memory_space<vmem>>, vector<1x8x1x8xf32>
    %27 = vector.shape_cast %26 : vector<1x8x1x8xf32> to vector<8x8xf32>
    %c0_38 = arith.constant 0 : index
    %c81 = arith.constant 81 : index
    %28 = vector.load %arg8[%c0_38, %c81] : memref<8x110xf32, #tpu.memory_space<vmem>>, vector<8x8xf32>
    tpu.vector_store %arg8[%c0_38, %c81], %27 {strides = array<i32>} : memref<8x110xf32, #tpu.memory_space<vmem>>, vector<8x8xf32>,
    %c0_39 = arith.constant 0 : index
    %c0_40 = arith.constant 0 : index
    %c0_41 = arith.constant 0 : index
    %29 = vector.load %arg2[%c0_39, %c0_40, %c0_41] : memref<9x4x8xf32, #tpu.memory_space<vmem>>, vector<1x4x8xf32>
    %30 = vector.shape_cast %29 : vector<1x4x8xf32> to vector<4x8xf32>
    %c0_42 = arith.constant 0 : index
    %c0_43 = arith.constant 0 : index
    %31 = vector.load %arg8[%c0_42, %c0_43] : memref<8x110xf32, #tpu.memory_space<vmem>>, vector<8x80xf32>
    %cst_44 = arith.constant dense<0.000000e+00> : vector<4x80xf32>
    %32 = tpu.matmul %30, %31, %cst_44 {dimension_numbers = #tpu.dot_dimension_numbers<[1], [0], [0], [1], [0, 0, 1, 1], [], []>} : vector<4x8xf32>, vector<8x80xf32>, vector<4x80xf32> -> vector<4x80xf32>
    %c1_45 = arith.constant 1 : index
    %c0_46 = arith.constant 0 : index
    %c0_47 = arith.constant 0 : index
    %33 = vector.load %arg2[%c1_45, %c0_46, %c0_47] : memref<9x4x8xf32, #tpu.memory_space<vmem>>, vector<1x4x8xf32>
    %34 = vector.shape_cast %33 : vector<1x4x8xf32> to vector<4x8xf32>
    %c0_48 = arith.constant 0 : index
    %c1_49 = arith.constant 1 : index
    %35 = vector.load %arg8[%c0_48, %c1_49] : memref<8x110xf32, #tpu.memory_space<vmem>>, vector<8x80xf32>
    %cst_50 = arith.constant dense<0.000000e+00> : vector<4x80xf32>
    %36 = tpu.matmul %34, %35, %cst_50 {dimension_numbers = #tpu.dot_dimension_numbers<[1], [0], [0], [1], [0, 0, 1, 1], [], []>} : vector<4x8xf32>, vector<8x80xf32>, vector<4x80xf32> -> vector<4x80xf32>
    %37 = arith.addf %32, %36 : vector<4x80xf32>
    %c2_51 = arith.constant 2 : index
    %c0_52 = arith.constant 0 : index
    %c0_53 = arith.constant 0 : index
    %38 = vector.load %arg2[%c2_51, %c0_52, %c0_53] : memref<9x4x8xf32, #tpu.memory_space<vmem>>, vector<1x4x8xf32>
    %39 = vector.shape_cast %38 : vector<1x4x8xf32> to vector<4x8xf32>
    %c0_54 = arith.constant 0 : index
    %c2_55 = arith.constant 2 : index
    %40 = vector.load %arg8[%c0_54, %c2_55] : memref<8x110xf32, #tpu.memory_space<vmem>>, vector<8x80xf32>
    %cst_56 = arith.constant dense<0.000000e+00> : vector<4x80xf32>
    %41 = tpu.matmul %39, %40, %cst_56 {dimension_numbers = #tpu.dot_dimension_numbers<[1], [0], [0], [1], [0, 0, 1, 1], [], []>} : vector<4x8xf32>, vector<8x80xf32>, vector<4x80xf32> -> vector<4x80xf32>
    %42 = arith.addf %37, %41 : vector<4x80xf32>
    %c3_57 = arith.constant 3 : index
    %c0_58 = arith.constant 0 : index
    %c0_59 = arith.constant 0 : index
    %43 = vector.load %arg2[%c3_57, %c0_58, %c0_59] : memref<9x4x8xf32, #tpu.memory_space<vmem>>, vector<1x4x8xf32>
    %44 = vector.shape_cast %43 : vector<1x4x8xf32> to vector<4x8xf32>
    %c0_60 = arith.constant 0 : index
    %c10 = arith.constant 10 : index
    %45 = vector.load %arg8[%c0_60, %c10] : memref<8x110xf32, #tpu.memory_space<vmem>>, vector<8x80xf32>
    %cst_61 = arith.constant dense<0.000000e+00> : vector<4x80xf32>
    %46 = tpu.matmul %44, %45, %cst_61 {dimension_numbers = #tpu.dot_dimension_numbers<[1], [0], [0], [1], [0, 0, 1, 1], [], []>} : vector<4x8xf32>, vector<8x80xf32>, vector<4x80xf32> -> vector<4x80xf32>
    %47 = arith.addf %42, %46 : vector<4x80xf32>
    %c4_62 = arith.constant 4 : index
    %c0_63 = arith.constant 0 : index
    %c0_64 = arith.constant 0 : index
    %48 = vector.load %arg2[%c4_62, %c0_63, %c0_64] : memref<9x4x8xf32, #tpu.memory_space<vmem>>, vector<1x4x8xf32>
    %49 = vector.shape_cast %48 : vector<1x4x8xf32> to vector<4x8xf32>
    %c0_65 = arith.constant 0 : index
    %c11_66 = arith.constant 11 : index
    %50 = vector.load %arg8[%c0_65, %c11_66] : memref<8x110xf32, #tpu.memory_space<vmem>>, vector<8x80xf32>
    %cst_67 = arith.constant dense<0.000000e+00> : vector<4x80xf32>
    %51 = tpu.matmul %49, %50, %cst_67 {dimension_numbers = #tpu.dot_dimension_numbers<[1], [0], [0], [1], [0, 0, 1, 1], [], []>} : vector<4x8xf32>, vector<8x80xf32>, vector<4x80xf32> -> vector<4x80xf32>
    %52 = arith.addf %47, %51 : vector<4x80xf32>
    %c5_68 = arith.constant 5 : index
    %c0_69 = arith.constant 0 : index
    %c0_70 = arith.constant 0 : index
    %53 = vector.load %arg2[%c5_68, %c0_69, %c0_70] : memref<9x4x8xf32, #tpu.memory_space<vmem>>, vector<1x4x8xf32>
    %54 = vector.shape_cast %53 : vector<1x4x8xf32> to vector<4x8xf32>
    %c0_71 = arith.constant 0 : index
    %c12 = arith.constant 12 : index
    %55 = vector.load %arg8[%c0_71, %c12] : memref<8x110xf32, #tpu.memory_space<vmem>>, vector<8x80xf32>
    %cst_72 = arith.constant dense<0.000000e+00> : vector<4x80xf32>
    %56 = tpu.matmul %54, %55, %cst_72 {dimension_numbers = #tpu.dot_dimension_numbers<[1], [0], [0], [1], [0, 0, 1, 1], [], []>} : vector<4x8xf32>, vector<8x80xf32>, vector<4x80xf32> -> vector<4x80xf32>
    %57 = arith.addf %52, %56 : vector<4x80xf32>
    %c6_73 = arith.constant 6 : index
    %c0_74 = arith.constant 0 : index
    %c0_75 = arith.constant 0 : index
    %58 = vector.load %arg2[%c6_73, %c0_74, %c0_75] : memref<9x4x8xf32, #tpu.memory_space<vmem>>, vector<1x4x8xf32>
    %59 = vector.shape_cast %58 : vector<1x4x8xf32> to vector<4x8xf32>
    %c0_76 = arith.constant 0 : index
    %c20 = arith.constant 20 : index
    %60 = vector.load %arg8[%c0_76, %c20] : memref<8x110xf32, #tpu.memory_space<vmem>>, vector<8x80xf32>
    %cst_77 = arith.constant dense<0.000000e+00> : vector<4x80xf32>
    %61 = tpu.matmul %59, %60, %cst_77 {dimension_numbers = #tpu.dot_dimension_numbers<[1], [0], [0], [1], [0, 0, 1, 1], [], []>} : vector<4x8xf32>, vector<8x80xf32>, vector<4x80xf32> -> vector<4x80xf32>
    %62 = arith.addf %57, %61 : vector<4x80xf32>
    %c7_78 = arith.constant 7 : index
    %c0_79 = arith.constant 0 : index
    %c0_80 = arith.constant 0 : index
    %63 = vector.load %arg2[%c7_78, %c0_79, %c0_80] : memref<9x4x8xf32, #tpu.memory_space<vmem>>, vector<1x4x8xf32>
    %64 = vector.shape_cast %63 : vector<1x4x8xf32> to vector<4x8xf32>
    %c0_81 = arith.constant 0 : index
    %c21_82 = arith.constant 21 : index
    %65 = vector.load %arg8[%c0_81, %c21_82] : memref<8x110xf32, #tpu.memory_space<vmem>>, vector<8x80xf32>
    %cst_83 = arith.constant dense<0.000000e+00> : vector<4x80xf32>
    %66 = tpu.matmul %64, %65, %cst_83 {dimension_numbers = #tpu.dot_dimension_numbers<[1], [0], [0], [1], [0, 0, 1, 1], [], []>} : vector<4x8xf32>, vector<8x80xf32>, vector<4x80xf32> -> vector<4x80xf32>
    %67 = arith.addf %62, %66 : vector<4x80xf32>
    %c8 = arith.constant 8 : index
    %c0_84 = arith.constant 0 : index
    %c0_85 = arith.constant 0 : index
    %68 = vector.load %arg2[%c8, %c0_84, %c0_85] : memref<9x4x8xf32, #tpu.memory_space<vmem>>, vector<1x4x8xf32>
    %69 = vector.shape_cast %68 : vector<1x4x8xf32> to vector<4x8xf32>
    %c0_86 = arith.constant 0 : index
    %c22 = arith.constant 22 : index
    %70 = vector.load %arg8[%c0_86, %c22] : memref<8x110xf32, #tpu.memory_space<vmem>>, vector<8x80xf32>
    %cst_87 = arith.constant dense<0.000000e+00> : vector<4x80xf32>
    %71 = tpu.matmul %69, %70, %cst_87 {dimension_numbers = #tpu.dot_dimension_numbers<[1], [0], [0], [1], [0, 0, 1, 1], [], []>} : vector<4x8xf32>, vector<8x80xf32>, vector<4x80xf32> -> vector<4x80xf32>
    %72 = arith.addf %67, %71 : vector<4x80xf32>
    %73 = vector.broadcast %0 : vector<1x80xf32> to vector<4x80xf32>
    %74 = arith.mulf %72, %73 : vector<4x80xf32>
    %cst_88 = arith.constant dense<0.000000e+00> : vector<4xf32>
    %75 = vector.multi_reduction <add>, %74, %cst_88 [1] : vector<4x80xf32> to vector<4xf32>
    %76 = vector.shape_cast %75 : vector<4xf32> to vector<4x1xf32>
    %cst_89 = arith.constant 6.400000e+01 : f32
    %77 = vector.broadcast %cst_89 : f32 to vector<4x1xf32>
    %78 = arith.divf %76, %77 : vector<4x1xf32>
    %79 = vector.broadcast %78 : vector<4x1xf32> to vector<4x80xf32>
    %80 = arith.subf %72, %79 : vector<4x80xf32>
    %81 = arith.mulf %80, %80 : vector<4x80xf32>
    %82 = vector.broadcast %0 : vector<1x80xf32> to vector<4x80xf32>
    %83 = arith.mulf %81, %82 : vector<4x80xf32>
    %cst_90 = arith.constant dense<0.000000e+00> : vector<4xf32>
    %84 = vector.multi_reduction <add>, %83, %cst_90 [1] : vector<4x80xf32> to vector<4xf32>
    %85 = vector.shape_cast %84 : vector<4xf32> to vector<4x1xf32>
    %cst_91 = arith.constant 6.400000e+01 : f32
    %86 = vector.broadcast %cst_91 : f32 to vector<4x1xf32>
    %87 = arith.divf %85, %86 : vector<4x1xf32>
    %cst_92 = arith.constant 9.99999974E-6 : f32
    %88 = vector.broadcast %cst_92 : f32 to vector<4x1xf32>
    %89 = arith.addf %87, %88 : vector<4x1xf32>
    %90 = math.rsqrt %89 : vector<4x1xf32>
    %91 = vector.broadcast %90 : vector<4x1xf32> to vector<4x80xf32>
    %92 = arith.mulf %80, %91 : vector<4x80xf32>
    %cst_93 = arith.constant 0.000000e+00 : f32
    %93 = vector.broadcast %cst_93 : f32 to vector<4x80xf32>
    %94 = arith.maximumf %92, %93 : vector<4x80xf32>
    %95 = vector.broadcast %0 : vector<1x80xf32> to vector<4x80xf32>
    %96 = arith.mulf %94, %95 : vector<4x80xf32>
    %c0_94 = arith.constant 0 : index
    %c11_95 = arith.constant 11 : index
    %97 = vector.load %arg9[%c0_94, %c11_95] : memref<4x110xf32, #tpu.memory_space<vmem>>, vector<4x80xf32>
    tpu.vector_store %arg9[%c0_94, %c11_95], %96 {strides = array<i32>} : memref<4x110xf32, #tpu.memory_space<vmem>>, vector<4x80xf32>,
    %c0_96 = arith.constant 0 : index
    %c0_97 = arith.constant 0 : index
    %c0_98 = arith.constant 0 : index
    %98 = vector.load %arg3[%c0_96, %c0_97, %c0_98] : memref<9x4x4xf32, #tpu.memory_space<vmem>>, vector<1x4x4xf32>
    %99 = vector.shape_cast %98 : vector<1x4x4xf32> to vector<4x4xf32>
    %c0_99 = arith.constant 0 : index
    %c0_100 = arith.constant 0 : index
    %100 = vector.load %arg9[%c0_99, %c0_100] : memref<4x110xf32, #tpu.memory_space<vmem>>, vector<4x80xf32>
    %cst_101 = arith.constant dense<0.000000e+00> : vector<4x80xf32>
    %101 = tpu.matmul %99, %100, %cst_101 {dimension_numbers = #tpu.dot_dimension_numbers<[1], [0], [0], [1], [0, 0, 1, 1], [], []>} : vector<4x4xf32>, vector<4x80xf32>, vector<4x80xf32> -> vector<4x80xf32>
    %c1_102 = arith.constant 1 : index
    %c0_103 = arith.constant 0 : index
    %c0_104 = arith.constant 0 : index
    %102 = vector.load %arg3[%c1_102, %c0_103, %c0_104] : memref<9x4x4xf32, #tpu.memory_space<vmem>>, vector<1x4x4xf32>
    %103 = vector.shape_cast %102 : vector<1x4x4xf32> to vector<4x4xf32>
    %c0_105 = arith.constant 0 : index
    %c1_106 = arith.constant 1 : index
    %104 = vector.load %arg9[%c0_105, %c1_106] : memref<4x110xf32, #tpu.memory_space<vmem>>, vector<4x80xf32>
    %cst_107 = arith.constant dense<0.000000e+00> : vector<4x80xf32>
    %105 = tpu.matmul %103, %104, %cst_107 {dimension_numbers = #tpu.dot_dimension_numbers<[1], [0], [0], [1], [0, 0, 1, 1], [], []>} : vector<4x4xf32>, vector<4x80xf32>, vector<4x80xf32> -> vector<4x80xf32>
    %106 = arith.addf %101, %105 : vector<4x80xf32>
    %c2_108 = arith.constant 2 : index
    %c0_109 = arith.constant 0 : index
    %c0_110 = arith.constant 0 : index
    %107 = vector.load %arg3[%c2_108, %c0_109, %c0_110] : memref<9x4x4xf32, #tpu.memory_space<vmem>>, vector<1x4x4xf32>
    %108 = vector.shape_cast %107 : vector<1x4x4xf32> to vector<4x4xf32>
    %c0_111 = arith.constant 0 : index
    %c2_112 = arith.constant 2 : index
    %109 = vector.load %arg9[%c0_111, %c2_112] : memref<4x110xf32, #tpu.memory_space<vmem>>, vector<4x80xf32>
    %cst_113 = arith.constant dense<0.000000e+00> : vector<4x80xf32>
    %110 = tpu.matmul %108, %109, %cst_113 {dimension_numbers = #tpu.dot_dimension_numbers<[1], [0], [0], [1], [0, 0, 1, 1], [], []>} : vector<4x4xf32>, vector<4x80xf32>, vector<4x80xf32> -> vector<4x80xf32>
    %111 = arith.addf %106, %110 : vector<4x80xf32>
    %c3_114 = arith.constant 3 : index
    %c0_115 = arith.constant 0 : index
    %c0_116 = arith.constant 0 : index
    %112 = vector.load %arg3[%c3_114, %c0_115, %c0_116] : memref<9x4x4xf32, #tpu.memory_space<vmem>>, vector<1x4x4xf32>
    %113 = vector.shape_cast %112 : vector<1x4x4xf32> to vector<4x4xf32>
    %c0_117 = arith.constant 0 : index
    %c10_118 = arith.constant 10 : index
    %114 = vector.load %arg9[%c0_117, %c10_118] : memref<4x110xf32, #tpu.memory_space<vmem>>, vector<4x80xf32>
    %cst_119 = arith.constant dense<0.000000e+00> : vector<4x80xf32>
    %115 = tpu.matmul %113, %114, %cst_119 {dimension_numbers = #tpu.dot_dimension_numbers<[1], [0], [0], [1], [0, 0, 1, 1], [], []>} : vector<4x4xf32>, vector<4x80xf32>, vector<4x80xf32> -> vector<4x80xf32>
    %116 = arith.addf %111, %115 : vector<4x80xf32>
    %c4_120 = arith.constant 4 : index
    %c0_121 = arith.constant 0 : index
    %c0_122 = arith.constant 0 : index
    %117 = vector.load %arg3[%c4_120, %c0_121, %c0_122] : memref<9x4x4xf32, #tpu.memory_space<vmem>>, vector<1x4x4xf32>
    %118 = vector.shape_cast %117 : vector<1x4x4xf32> to vector<4x4xf32>
    %c0_123 = arith.constant 0 : index
    %c11_124 = arith.constant 11 : index
    %119 = vector.load %arg9[%c0_123, %c11_124] : memref<4x110xf32, #tpu.memory_space<vmem>>, vector<4x80xf32>
    %cst_125 = arith.constant dense<0.000000e+00> : vector<4x80xf32>
    %120 = tpu.matmul %118, %119, %cst_125 {dimension_numbers = #tpu.dot_dimension_numbers<[1], [0], [0], [1], [0, 0, 1, 1], [], []>} : vector<4x4xf32>, vector<4x80xf32>, vector<4x80xf32> -> vector<4x80xf32>
    %121 = arith.addf %116, %120 : vector<4x80xf32>
    %c5_126 = arith.constant 5 : index
    %c0_127 = arith.constant 0 : index
    %c0_128 = arith.constant 0 : index
    %122 = vector.load %arg3[%c5_126, %c0_127, %c0_128] : memref<9x4x4xf32, #tpu.memory_space<vmem>>, vector<1x4x4xf32>
    %123 = vector.shape_cast %122 : vector<1x4x4xf32> to vector<4x4xf32>
    %c0_129 = arith.constant 0 : index
    %c12_130 = arith.constant 12 : index
    %124 = vector.load %arg9[%c0_129, %c12_130] : memref<4x110xf32, #tpu.memory_space<vmem>>, vector<4x80xf32>
    %cst_131 = arith.constant dense<0.000000e+00> : vector<4x80xf32>
    %125 = tpu.matmul %123, %124, %cst_131 {dimension_numbers = #tpu.dot_dimension_numbers<[1], [0], [0], [1], [0, 0, 1, 1], [], []>} : vector<4x4xf32>, vector<4x80xf32>, vector<4x80xf32> -> vector<4x80xf32>
    %126 = arith.addf %121, %125 : vector<4x80xf32>
    %c6_132 = arith.constant 6 : index
    %c0_133 = arith.constant 0 : index
    %c0_134 = arith.constant 0 : index
    %127 = vector.load %arg3[%c6_132, %c0_133, %c0_134] : memref<9x4x4xf32, #tpu.memory_space<vmem>>, vector<1x4x4xf32>
    %128 = vector.shape_cast %127 : vector<1x4x4xf32> to vector<4x4xf32>
    %c0_135 = arith.constant 0 : index
    %c20_136 = arith.constant 20 : index
    %129 = vector.load %arg9[%c0_135, %c20_136] : memref<4x110xf32, #tpu.memory_space<vmem>>, vector<4x80xf32>
    %cst_137 = arith.constant dense<0.000000e+00> : vector<4x80xf32>
    %130 = tpu.matmul %128, %129, %cst_137 {dimension_numbers = #tpu.dot_dimension_numbers<[1], [0], [0], [1], [0, 0, 1, 1], [], []>} : vector<4x4xf32>, vector<4x80xf32>, vector<4x80xf32> -> vector<4x80xf32>
    %131 = arith.addf %126, %130 : vector<4x80xf32>
    %c7_138 = arith.constant 7 : index
    %c0_139 = arith.constant 0 : index
    %c0_140 = arith.constant 0 : index
    %132 = vector.load %arg3[%c7_138, %c0_139, %c0_140] : memref<9x4x4xf32, #tpu.memory_space<vmem>>, vector<1x4x4xf32>
    %133 = vector.shape_cast %132 : vector<1x4x4xf32> to vector<4x4xf32>
    %c0_141 = arith.constant 0 : index
    %c21_142 = arith.constant 21 : index
    %134 = vector.load %arg9[%c0_141, %c21_142] : memref<4x110xf32, #tpu.memory_space<vmem>>, vector<4x80xf32>
    %cst_143 = arith.constant dense<0.000000e+00> : vector<4x80xf32>
    %135 = tpu.matmul %133, %134, %cst_143 {dimension_numbers = #tpu.dot_dimension_numbers<[1], [0], [0], [1], [0, 0, 1, 1], [], []>} : vector<4x4xf32>, vector<4x80xf32>, vector<4x80xf32> -> vector<4x80xf32>
    %136 = arith.addf %131, %135 : vector<4x80xf32>
    %c8_144 = arith.constant 8 : index
    %c0_145 = arith.constant 0 : index
    %c0_146 = arith.constant 0 : index
    %137 = vector.load %arg3[%c8_144, %c0_145, %c0_146] : memref<9x4x4xf32, #tpu.memory_space<vmem>>, vector<1x4x4xf32>
    %138 = vector.shape_cast %137 : vector<1x4x4xf32> to vector<4x4xf32>
    %c0_147 = arith.constant 0 : index
    %c22_148 = arith.constant 22 : index
    %139 = vector.load %arg9[%c0_147, %c22_148] : memref<4x110xf32, #tpu.memory_space<vmem>>, vector<4x80xf32>
    %cst_149 = arith.constant dense<0.000000e+00> : vector<4x80xf32>
    %140 = tpu.matmul %138, %139, %cst_149 {dimension_numbers = #tpu.dot_dimension_numbers<[1], [0], [0], [1], [0, 0, 1, 1], [], []>} : vector<4x4xf32>, vector<4x80xf32>, vector<4x80xf32> -> vector<4x80xf32>
    %141 = arith.addf %136, %140 : vector<4x80xf32>
    %142 = vector.broadcast %0 : vector<1x80xf32> to vector<4x80xf32>
    %143 = arith.mulf %141, %142 : vector<4x80xf32>
    %cst_150 = arith.constant dense<0.000000e+00> : vector<4xf32>
    %144 = vector.multi_reduction <add>, %143, %cst_150 [1] : vector<4x80xf32> to vector<4xf32>
    %145 = vector.shape_cast %144 : vector<4xf32> to vector<4x1xf32>
    %cst_151 = arith.constant 6.400000e+01 : f32
    %146 = vector.broadcast %cst_151 : f32 to vector<4x1xf32>
    %147 = arith.divf %145, %146 : vector<4x1xf32>
    %148 = vector.broadcast %147 : vector<4x1xf32> to vector<4x80xf32>
    %149 = arith.subf %141, %148 : vector<4x80xf32>
    %150 = arith.mulf %149, %149 : vector<4x80xf32>
    %151 = vector.broadcast %0 : vector<1x80xf32> to vector<4x80xf32>
    %152 = arith.mulf %150, %151 : vector<4x80xf32>
    %cst_152 = arith.constant dense<0.000000e+00> : vector<4xf32>
    %153 = vector.multi_reduction <add>, %152, %cst_152 [1] : vector<4x80xf32> to vector<4xf32>
    %154 = vector.shape_cast %153 : vector<4xf32> to vector<4x1xf32>
    %cst_153 = arith.constant 6.400000e+01 : f32
    %155 = vector.broadcast %cst_153 : f32 to vector<4x1xf32>
    %156 = arith.divf %154, %155 : vector<4x1xf32>
    %cst_154 = arith.constant 9.99999974E-6 : f32
    %157 = vector.broadcast %cst_154 : f32 to vector<4x1xf32>
    %158 = arith.addf %156, %157 : vector<4x1xf32>
    %159 = math.rsqrt %158 : vector<4x1xf32>
    %160 = vector.broadcast %159 : vector<4x1xf32> to vector<4x80xf32>
    %161 = arith.mulf %149, %160 : vector<4x80xf32>
    %c0_155 = arith.constant 0 : index
    %c11_156 = arith.constant 11 : index
    %162 = vector.load %arg8[%c0_155, %c11_156] : memref<8x110xf32, #tpu.memory_space<vmem>>, vector<8x80xf32>
    %c0_157 = arith.constant 0 : index
    %c0_158 = arith.constant 0 : index
    %163 = vector.load %arg5[%c0_157, %c0_158] : memref<4x8xf32, #tpu.memory_space<vmem>>, vector<4x8xf32>
    %cst_159 = arith.constant dense<0.000000e+00> : vector<4x80xf32>
    %164 = tpu.matmul %163, %162, %cst_159 {dimension_numbers = #tpu.dot_dimension_numbers<[1], [0], [0], [1], [0, 0, 1, 1], [], []>} : vector<4x8xf32>, vector<8x80xf32>, vector<4x80xf32> -> vector<4x80xf32>
    %165 = arith.addf %161, %164 : vector<4x80xf32>
    %cst_160 = arith.constant 0.000000e+00 : f32
    %166 = vector.broadcast %cst_160 : f32 to vector<4x80xf32>
    %167 = arith.maximumf %165, %166 : vector<4x80xf32>
    %168 = tpu.iota {dimensions = array<i32: 1>} : vector<8x16xi32>
    %169 = tpu.iota {dimensions = array<i32: 0>} : vector<8x16xi32>
    %c2_i32 = arith.constant 2 : i32
    %170 = vector.broadcast %c2_i32 : i32 to vector<8x16xi32>
    %171 = arith.muli %170, %169 : vector<8x16xi32>
    %172 = arith.cmpi eq, %168, %171 : vector<8x16xi32>
    %c2_i32_161 = arith.constant 2 : i32
    %173 = vector.broadcast %c2_i32_161 : i32 to vector<8x16xi32>
    %174 = arith.muli %173, %169 : vector<8x16xi32>
    %c1_i32 = arith.constant 1 : i32
    %175 = vector.broadcast %c1_i32 : i32 to vector<8x16xi32>
    %176 = arith.addi %174, %175 : vector<8x16xi32>
    %177 = arith.cmpi eq, %168, %176 : vector<8x16xi32>
    %178 = arith.ori %172, %177 : vector<8x16xi1>
    %179 = arith.extui %178 : vector<8x16xi1> to vector<8x16xi32>
    %180 = arith.sitofp %179 : vector<8x16xi32> to vector<8x16xf32>
    %181 = vector.extract_strided_slice %167 {offsets = [0, 0], sizes = [4, 8], strides = [1, 1]} : vector<4x80xf32> to vector<4x8xf32>
    %cst_162 = arith.constant dense<0.000000e+00> : vector<4x16xf32>
    %182 = tpu.matmul %181, %180, %cst_162 {dimension_numbers = #tpu.dot_dimension_numbers<[1], [0], [0], [1], [0, 0, 1, 1], [], []>} : vector<4x8xf32>, vector<8x16xf32>, vector<4x16xf32> -> vector<4x16xf32>
    %c0_163 = arith.constant 0 : index
    %c0_164 = arith.constant 0 : index
    %c0_165 = arith.constant 0 : index
    %183 = vector.load %arg6[%c0_163, %c0_164, %c0_165] : memref<1x4x288xf32, #tpu.memory_space<vmem>>, vector<1x4x16xf32>
    %184 = vector.shape_cast %183 : vector<1x4x16xf32> to vector<4x16xf32>
    %185 = arith.addf %182, %184 : vector<4x16xf32>
    %c0_166 = arith.constant 0 : index
    %c0_167 = arith.constant 0 : index
    %c0_168 = arith.constant 0 : index
    %c0_169 = arith.constant 0 : index
    %186 = vector.load %arg7[%c0_166, %c0_167, %c0_168, %c0_169] : memref<1x4x16x16xf32, #tpu.memory_space<vmem>>, vector<1x4x1x16xf32>
    %187 = vector.shape_cast %186 : vector<1x4x1x16xf32> to vector<4x16xf32>
    %188 = vector.shape_cast %185 : vector<4x16xf32> to vector<1x4x1x16xf32>
    tpu.vector_store %arg7[%c0_166, %c0_167, %c0_168, %c0_169], %188 {strides = array<i32>} : memref<1x4x16x16xf32, #tpu.memory_space<vmem>>, vector<1x4x1x16xf32>,
    %c0_170 = arith.constant 0 : index
    %c0_171 = arith.constant 0 : index
    %c18 = arith.constant 18 : index
    %189 = vector.load %arg6[%c0_170, %c0_171, %c18] : memref<1x4x288xf32, #tpu.memory_space<vmem>>, vector<1x4x16xf32>
    %190 = vector.shape_cast %189 : vector<1x4x16xf32> to vector<4x16xf32>
    %191 = arith.addf %182, %190 : vector<4x16xf32>
    %c0_172 = arith.constant 0 : index
    %c0_173 = arith.constant 0 : index
    %c1_174 = arith.constant 1 : index
    %c0_175 = arith.constant 0 : index
    %192 = vector.load %arg7[%c0_172, %c0_173, %c1_174, %c0_175] : memref<1x4x16x16xf32, #tpu.memory_space<vmem>>, vector<1x4x1x16xf32>
    %193 = vector.shape_cast %192 : vector<1x4x1x16xf32> to vector<4x16xf32>
    %194 = vector.shape_cast %191 : vector<4x16xf32> to vector<1x4x1x16xf32>
    tpu.vector_store %arg7[%c0_172, %c0_173, %c1_174, %c0_175], %194 {strides = array<i32>} : memref<1x4x16x16xf32, #tpu.memory_space<vmem>>, vector<1x4x1x16xf32>,
    %195 = vector.extract_strided_slice %167 {offsets = [0, 10], sizes = [4, 8], strides = [1, 1]} : vector<4x80xf32> to vector<4x8xf32>
    %cst_176 = arith.constant dense<0.000000e+00> : vector<4x16xf32>
    %196 = tpu.matmul %195, %180, %cst_176 {dimension_numbers = #tpu.dot_dimension_numbers<[1], [0], [0], [1], [0, 0, 1, 1], [], []>} : vector<4x8xf32>, vector<8x16xf32>, vector<4x16xf32> -> vector<4x16xf32>
    %c0_177 = arith.constant 0 : index
    %c0_178 = arith.constant 0 : index
    %c36 = arith.constant 36 : index
    %197 = vector.load %arg6[%c0_177, %c0_178, %c36] : memref<1x4x288xf32, #tpu.memory_space<vmem>>, vector<1x4x16xf32>
    %198 = vector.shape_cast %197 : vector<1x4x16xf32> to vector<4x16xf32>
    %199 = arith.addf %196, %198 : vector<4x16xf32>
    %c0_179 = arith.constant 0 : index
    %c0_180 = arith.constant 0 : index
    %c2_181 = arith.constant 2 : index
    %c0_182 = arith.constant 0 : index
    %200 = vector.load %arg7[%c0_179, %c0_180, %c2_181, %c0_182] : memref<1x4x16x16xf32, #tpu.memory_space<vmem>>, vector<1x4x1x16xf32>
    %201 = vector.shape_cast %200 : vector<1x4x1x16xf32> to vector<4x16xf32>
    %202 = vector.shape_cast %199 : vector<4x16xf32> to vector<1x4x1x16xf32>
    tpu.vector_store %arg7[%c0_179, %c0_180, %c2_181, %c0_182], %202 {strides = array<i32>} : memref<1x4x16x16xf32, #tpu.memory_space<vmem>>, vector<1x4x1x16xf32>,
    %c0_183 = arith.constant 0 : index
    %c0_184 = arith.constant 0 : index
    %c54 = arith.constant 54 : index
    %203 = vector.load %arg6[%c0_183, %c0_184, %c54] : memref<1x4x288xf32, #tpu.memory_space<vmem>>, vector<1x4x16xf32>
    %204 = vector.shape_cast %203 : vector<1x4x16xf32> to vector<4x16xf32>
    %205 = arith.addf %196, %204 : vector<4x16xf32>
    %c0_185 = arith.constant 0 : index
    %c0_186 = arith.constant 0 : index
    %c3_187 = arith.constant 3 : index
    %c0_188 = arith.constant 0 : index
    %206 = vector.load %arg7[%c0_185, %c0_186, %c3_187, %c0_188] : memref<1x4x16x16xf32, #tpu.memory_space<vmem>>, vector<1x4x1x16xf32>
    %207 = vector.shape_cast %206 : vector<1x4x1x16xf32> to vector<4x16xf32>
    %208 = vector.shape_cast %205 : vector<4x16xf32> to vector<1x4x1x16xf32>
    tpu.vector_store %arg7[%c0_185, %c0_186, %c3_187, %c0_188], %208 {strides = array<i32>} : memref<1x4x16x16xf32, #tpu.memory_space<vmem>>, vector<1x4x1x16xf32>,
    %209 = vector.extract_strided_slice %167 {offsets = [0, 20], sizes = [4, 8], strides = [1, 1]} : vector<4x80xf32> to vector<4x8xf32>
    %cst_189 = arith.constant dense<0.000000e+00> : vector<4x16xf32>
    %210 = tpu.matmul %209, %180, %cst_189 {dimension_numbers = #tpu.dot_dimension_numbers<[1], [0], [0], [1], [0, 0, 1, 1], [], []>} : vector<4x8xf32>, vector<8x16xf32>, vector<4x16xf32> -> vector<4x16xf32>
    %c0_190 = arith.constant 0 : index
    %c0_191 = arith.constant 0 : index
    %c72 = arith.constant 72 : index
    %211 = vector.load %arg6[%c0_190, %c0_191, %c72] : memref<1x4x288xf32, #tpu.memory_space<vmem>>, vector<1x4x16xf32>
    %212 = vector.shape_cast %211 : vector<1x4x16xf32> to vector<4x16xf32>
    %213 = arith.addf %210, %212 : vector<4x16xf32>
    %c0_192 = arith.constant 0 : index
    %c0_193 = arith.constant 0 : index
    %c4_194 = arith.constant 4 : index
    %c0_195 = arith.constant 0 : index
    %214 = vector.load %arg7[%c0_192, %c0_193, %c4_194, %c0_195] : memref<1x4x16x16xf32, #tpu.memory_space<vmem>>, vector<1x4x1x16xf32>
    %215 = vector.shape_cast %214 : vector<1x4x1x16xf32> to vector<4x16xf32>
    %216 = vector.shape_cast %213 : vector<4x16xf32> to vector<1x4x1x16xf32>
    tpu.vector_store %arg7[%c0_192, %c0_193, %c4_194, %c0_195], %216 {strides = array<i32>} : memref<1x4x16x16xf32, #tpu.memory_space<vmem>>, vector<1x4x1x16xf32>,
    %c0_196 = arith.constant 0 : index
    %c0_197 = arith.constant 0 : index
    %c90 = arith.constant 90 : index
    %217 = vector.load %arg6[%c0_196, %c0_197, %c90] : memref<1x4x288xf32, #tpu.memory_space<vmem>>, vector<1x4x16xf32>
    %218 = vector.shape_cast %217 : vector<1x4x16xf32> to vector<4x16xf32>
    %219 = arith.addf %210, %218 : vector<4x16xf32>
    %c0_198 = arith.constant 0 : index
    %c0_199 = arith.constant 0 : index
    %c5_200 = arith.constant 5 : index
    %c0_201 = arith.constant 0 : index
    %220 = vector.load %arg7[%c0_198, %c0_199, %c5_200, %c0_201] : memref<1x4x16x16xf32, #tpu.memory_space<vmem>>, vector<1x4x1x16xf32>
    %221 = vector.shape_cast %220 : vector<1x4x1x16xf32> to vector<4x16xf32>
    %222 = vector.shape_cast %219 : vector<4x16xf32> to vector<1x4x1x16xf32>
    tpu.vector_store %arg7[%c0_198, %c0_199, %c5_200, %c0_201], %222 {strides = array<i32>} : memref<1x4x16x16xf32, #tpu.memory_space<vmem>>, vector<1x4x1x16xf32>,
    %223 = vector.extract_strided_slice %167 {offsets = [0, 30], sizes = [4, 8], strides = [1, 1]} : vector<4x80xf32> to vector<4x8xf32>
    %cst_202 = arith.constant dense<0.000000e+00> : vector<4x16xf32>
    %224 = tpu.matmul %223, %180, %cst_202 {dimension_numbers = #tpu.dot_dimension_numbers<[1], [0], [0], [1], [0, 0, 1, 1], [], []>} : vector<4x8xf32>, vector<8x16xf32>, vector<4x16xf32> -> vector<4x16xf32>
    %c0_203 = arith.constant 0 : index
    %c0_204 = arith.constant 0 : index
    %c108 = arith.constant 108 : index
    %225 = vector.load %arg6[%c0_203, %c0_204, %c108] : memref<1x4x288xf32, #tpu.memory_space<vmem>>, vector<1x4x16xf32>
    %226 = vector.shape_cast %225 : vector<1x4x16xf32> to vector<4x16xf32>
    %227 = arith.addf %224, %226 : vector<4x16xf32>
    %c0_205 = arith.constant 0 : index
    %c0_206 = arith.constant 0 : index
    %c6_207 = arith.constant 6 : index
    %c0_208 = arith.constant 0 : index
    %228 = vector.load %arg7[%c0_205, %c0_206, %c6_207, %c0_208] : memref<1x4x16x16xf32, #tpu.memory_space<vmem>>, vector<1x4x1x16xf32>
    %229 = vector.shape_cast %228 : vector<1x4x1x16xf32> to vector<4x16xf32>
    %230 = vector.shape_cast %227 : vector<4x16xf32> to vector<1x4x1x16xf32>
    tpu.vector_store %arg7[%c0_205, %c0_206, %c6_207, %c0_208], %230 {strides = array<i32>} : memref<1x4x16x16xf32, #tpu.memory_space<vmem>>, vector<1x4x1x16xf32>,
    %c0_209 = arith.constant 0 : index
    %c0_210 = arith.constant 0 : index
    %c126 = arith.constant 126 : index
    %231 = vector.load %arg6[%c0_209, %c0_210, %c126] : memref<1x4x288xf32, #tpu.memory_space<vmem>>, vector<1x4x16xf32>
    %232 = vector.shape_cast %231 : vector<1x4x16xf32> to vector<4x16xf32>
    %233 = arith.addf %224, %232 : vector<4x16xf32>
    %c0_211 = arith.constant 0 : index
    %c0_212 = arith.constant 0 : index
    %c7_213 = arith.constant 7 : index
    %c0_214 = arith.constant 0 : index
    %234 = vector.load %arg7[%c0_211, %c0_212, %c7_213, %c0_214] : memref<1x4x16x16xf32, #tpu.memory_space<vmem>>, vector<1x4x1x16xf32>
    %235 = vector.shape_cast %234 : vector<1x4x1x16xf32> to vector<4x16xf32>
    %236 = vector.shape_cast %233 : vector<4x16xf32> to vector<1x4x1x16xf32>
    tpu.vector_store %arg7[%c0_211, %c0_212, %c7_213, %c0_214], %236 {strides = array<i32>} : memref<1x4x16x16xf32, #tpu.memory_space<vmem>>, vector<1x4x1x16xf32>,
    %237 = vector.extract_strided_slice %167 {offsets = [0, 40], sizes = [4, 8], strides = [1, 1]} : vector<4x80xf32> to vector<4x8xf32>
    %cst_215 = arith.constant dense<0.000000e+00> : vector<4x16xf32>
    %238 = tpu.matmul %237, %180, %cst_215 {dimension_numbers = #tpu.dot_dimension_numbers<[1], [0], [0], [1], [0, 0, 1, 1], [], []>} : vector<4x8xf32>, vector<8x16xf32>, vector<4x16xf32> -> vector<4x16xf32>
    %c0_216 = arith.constant 0 : index
    %c0_217 = arith.constant 0 : index
    %c144 = arith.constant 144 : index
    %239 = vector.load %arg6[%c0_216, %c0_217, %c144] : memref<1x4x288xf32, #tpu.memory_space<vmem>>, vector<1x4x16xf32>
    %240 = vector.shape_cast %239 : vector<1x4x16xf32> to vector<4x16xf32>
    %241 = arith.addf %238, %240 : vector<4x16xf32>
    %c0_218 = arith.constant 0 : index
    %c0_219 = arith.constant 0 : index
    %c8_220 = arith.constant 8 : index
    %c0_221 = arith.constant 0 : index
    %242 = vector.load %arg7[%c0_218, %c0_219, %c8_220, %c0_221] : memref<1x4x16x16xf32, #tpu.memory_space<vmem>>, vector<1x4x1x16xf32>
    %243 = vector.shape_cast %242 : vector<1x4x1x16xf32> to vector<4x16xf32>
    %244 = vector.shape_cast %241 : vector<4x16xf32> to vector<1x4x1x16xf32>
    tpu.vector_store %arg7[%c0_218, %c0_219, %c8_220, %c0_221], %244 {strides = array<i32>} : memref<1x4x16x16xf32, #tpu.memory_space<vmem>>, vector<1x4x1x16xf32>,
    %c0_222 = arith.constant 0 : index
    %c0_223 = arith.constant 0 : index
    %c162 = arith.constant 162 : index
    %245 = vector.load %arg6[%c0_222, %c0_223, %c162] : memref<1x4x288xf32, #tpu.memory_space<vmem>>, vector<1x4x16xf32>
    %246 = vector.shape_cast %245 : vector<1x4x16xf32> to vector<4x16xf32>
    %247 = arith.addf %238, %246 : vector<4x16xf32>
    %c0_224 = arith.constant 0 : index
    %c0_225 = arith.constant 0 : index
    %c9 = arith.constant 9 : index
    %c0_226 = arith.constant 0 : index
    %248 = vector.load %arg7[%c0_224, %c0_225, %c9, %c0_226] : memref<1x4x16x16xf32, #tpu.memory_space<vmem>>, vector<1x4x1x16xf32>
    %249 = vector.shape_cast %248 : vector<1x4x1x16xf32> to vector<4x16xf32>
    %250 = vector.shape_cast %247 : vector<4x16xf32> to vector<1x4x1x16xf32>
    tpu.vector_store %arg7[%c0_224, %c0_225, %c9, %c0_226], %250 {strides = array<i32>} : memref<1x4x16x16xf32, #tpu.memory_space<vmem>>, vector<1x4x1x16xf32>,
    %251 = vector.extract_strided_slice %167 {offsets = [0, 50], sizes = [4, 8], strides = [1, 1]} : vector<4x80xf32> to vector<4x8xf32>
    %cst_227 = arith.constant dense<0.000000e+00> : vector<4x16xf32>
    %252 = tpu.matmul %251, %180, %cst_227 {dimension_numbers = #tpu.dot_dimension_numbers<[1], [0], [0], [1], [0, 0, 1, 1], [], []>} : vector<4x8xf32>, vector<8x16xf32>, vector<4x16xf32> -> vector<4x16xf32>
    %c0_228 = arith.constant 0 : index
    %c0_229 = arith.constant 0 : index
    %c180 = arith.constant 180 : index
    %253 = vector.load %arg6[%c0_228, %c0_229, %c180] : memref<1x4x288xf32, #tpu.memory_space<vmem>>, vector<1x4x16xf32>
    %254 = vector.shape_cast %253 : vector<1x4x16xf32> to vector<4x16xf32>
    %255 = arith.addf %252, %254 : vector<4x16xf32>
    %c0_230 = arith.constant 0 : index
    %c0_231 = arith.constant 0 : index
    %c10_232 = arith.constant 10 : index
    %c0_233 = arith.constant 0 : index
    %256 = vector.load %arg7[%c0_230, %c0_231, %c10_232, %c0_233] : memref<1x4x16x16xf32, #tpu.memory_space<vmem>>, vector<1x4x1x16xf32>
    %257 = vector.shape_cast %256 : vector<1x4x1x16xf32> to vector<4x16xf32>
    %258 = vector.shape_cast %255 : vector<4x16xf32> to vector<1x4x1x16xf32>
    tpu.vector_store %arg7[%c0_230, %c0_231, %c10_232, %c0_233], %258 {strides = array<i32>} : memref<1x4x16x16xf32, #tpu.memory_space<vmem>>, vector<1x4x1x16xf32>,
    %c0_234 = arith.constant 0 : index
    %c0_235 = arith.constant 0 : index
    %c198 = arith.constant 198 : index
    %259 = vector.load %arg6[%c0_234, %c0_235, %c198] : memref<1x4x288xf32, #tpu.memory_space<vmem>>, vector<1x4x16xf32>
    %260 = vector.shape_cast %259 : vector<1x4x16xf32> to vector<4x16xf32>
    %261 = arith.addf %252, %260 : vector<4x16xf32>
    %c0_236 = arith.constant 0 : index
    %c0_237 = arith.constant 0 : index
    %c11_238 = arith.constant 11 : index
    %c0_239 = arith.constant 0 : index
    %262 = vector.load %arg7[%c0_236, %c0_237, %c11_238, %c0_239] : memref<1x4x16x16xf32, #tpu.memory_space<vmem>>, vector<1x4x1x16xf32>
    %263 = vector.shape_cast %262 : vector<1x4x1x16xf32> to vector<4x16xf32>
    %264 = vector.shape_cast %261 : vector<4x16xf32> to vector<1x4x1x16xf32>
    tpu.vector_store %arg7[%c0_236, %c0_237, %c11_238, %c0_239], %264 {strides = array<i32>} : memref<1x4x16x16xf32, #tpu.memory_space<vmem>>, vector<1x4x1x16xf32>,
    %265 = vector.extract_strided_slice %167 {offsets = [0, 60], sizes = [4, 8], strides = [1, 1]} : vector<4x80xf32> to vector<4x8xf32>
    %cst_240 = arith.constant dense<0.000000e+00> : vector<4x16xf32>
    %266 = tpu.matmul %265, %180, %cst_240 {dimension_numbers = #tpu.dot_dimension_numbers<[1], [0], [0], [1], [0, 0, 1, 1], [], []>} : vector<4x8xf32>, vector<8x16xf32>, vector<4x16xf32> -> vector<4x16xf32>
    %c0_241 = arith.constant 0 : index
    %c0_242 = arith.constant 0 : index
    %c216 = arith.constant 216 : index
    %267 = vector.load %arg6[%c0_241, %c0_242, %c216] : memref<1x4x288xf32, #tpu.memory_space<vmem>>, vector<1x4x16xf32>
    %268 = vector.shape_cast %267 : vector<1x4x16xf32> to vector<4x16xf32>
    %269 = arith.addf %266, %268 : vector<4x16xf32>
    %c0_243 = arith.constant 0 : index
    %c0_244 = arith.constant 0 : index
    %c12_245 = arith.constant 12 : index
    %c0_246 = arith.constant 0 : index
    %270 = vector.load %arg7[%c0_243, %c0_244, %c12_245, %c0_246] : memref<1x4x16x16xf32, #tpu.memory_space<vmem>>, vector<1x4x1x16xf32>
    %271 = vector.shape_cast %270 : vector<1x4x1x16xf32> to vector<4x16xf32>
    %272 = vector.shape_cast %269 : vector<4x16xf32> to vector<1x4x1x16xf32>
    tpu.vector_store %arg7[%c0_243, %c0_244, %c12_245, %c0_246], %272 {strides = array<i32>} : memref<1x4x16x16xf32, #tpu.memory_space<vmem>>, vector<1x4x1x16xf32>,
    %c0_247 = arith.constant 0 : index
    %c0_248 = arith.constant 0 : index
    %c234 = arith.constant 234 : index
    %273 = vector.load %arg6[%c0_247, %c0_248, %c234] : memref<1x4x288xf32, #tpu.memory_space<vmem>>, vector<1x4x16xf32>
    %274 = vector.shape_cast %273 : vector<1x4x16xf32> to vector<4x16xf32>
    %275 = arith.addf %266, %274 : vector<4x16xf32>
    %c0_249 = arith.constant 0 : index
    %c0_250 = arith.constant 0 : index
    %c13 = arith.constant 13 : index
    %c0_251 = arith.constant 0 : index
    %276 = vector.load %arg7[%c0_249, %c0_250, %c13, %c0_251] : memref<1x4x16x16xf32, #tpu.memory_space<vmem>>, vector<1x4x1x16xf32>
    %277 = vector.shape_cast %276 : vector<1x4x1x16xf32> to vector<4x16xf32>
    %278 = vector.shape_cast %275 : vector<4x16xf32> to vector<1x4x1x16xf32>
    tpu.vector_store %arg7[%c0_249, %c0_250, %c13, %c0_251], %278 {strides = array<i32>} : memref<1x4x16x16xf32, #tpu.memory_space<vmem>>, vector<1x4x1x16xf32>,
    %279 = vector.extract_strided_slice %167 {offsets = [0, 70], sizes = [4, 8], strides = [1, 1]} : vector<4x80xf32> to vector<4x8xf32>
    %cst_252 = arith.constant dense<0.000000e+00> : vector<4x16xf32>
    %280 = tpu.matmul %279, %180, %cst_252 {dimension_numbers = #tpu.dot_dimension_numbers<[1], [0], [0], [1], [0, 0, 1, 1], [], []>} : vector<4x8xf32>, vector<8x16xf32>, vector<4x16xf32> -> vector<4x16xf32>
    %c0_253 = arith.constant 0 : index
    %c0_254 = arith.constant 0 : index
    %c252 = arith.constant 252 : index
    %281 = vector.load %arg6[%c0_253, %c0_254, %c252] : memref<1x4x288xf32, #tpu.memory_space<vmem>>, vector<1x4x16xf32>
    %282 = vector.shape_cast %281 : vector<1x4x16xf32> to vector<4x16xf32>
    %283 = arith.addf %280, %282 : vector<4x16xf32>
    %c0_255 = arith.constant 0 : index
    %c0_256 = arith.constant 0 : index
    %c14 = arith.constant 14 : index
    %c0_257 = arith.constant 0 : index
    %284 = vector.load %arg7[%c0_255, %c0_256, %c14, %c0_257] : memref<1x4x16x16xf32, #tpu.memory_space<vmem>>, vector<1x4x1x16xf32>
    %285 = vector.shape_cast %284 : vector<1x4x1x16xf32> to vector<4x16xf32>
    %286 = vector.shape_cast %283 : vector<4x16xf32> to vector<1x4x1x16xf32>
    tpu.vector_store %arg7[%c0_255, %c0_256, %c14, %c0_257], %286 {strides = array<i32>} : memref<1x4x16x16xf32, #tpu.memory_space<vmem>>, vector<1x4x1x16xf32>,
    %c0_258 = arith.constant 0 : index
    %c0_259 = arith.constant 0 : index
    %c270 = arith.constant 270 : index
    %287 = vector.load %arg6[%c0_258, %c0_259, %c270] : memref<1x4x288xf32, #tpu.memory_space<vmem>>, vector<1x4x16xf32>
    %288 = vector.shape_cast %287 : vector<1x4x16xf32> to vector<4x16xf32>
    %289 = arith.addf %280, %288 : vector<4x16xf32>
    %c0_260 = arith.constant 0 : index
    %c0_261 = arith.constant 0 : index
    %c15 = arith.constant 15 : index
    %c0_262 = arith.constant 0 : index
    %290 = vector.load %arg7[%c0_260, %c0_261, %c15, %c0_262] : memref<1x4x16x16xf32, #tpu.memory_space<vmem>>, vector<1x4x1x16xf32>
    %291 = vector.shape_cast %290 : vector<1x4x1x16xf32> to vector<4x16xf32>
    %292 = vector.shape_cast %289 : vector<4x16xf32> to vector<1x4x1x16xf32>
    tpu.vector_store %arg7[%c0_260, %c0_261, %c15, %c0_262], %292 {strides = array<i32>} : memref<1x4x16x16xf32, #tpu.memory_space<vmem>>, vector<1x4x1x16xf32>,
    return
  }
  func.func @transform_0(%arg0: i32) -> (i32, i32, i32, i32) {
    %c0_i32 = arith.constant 0 : i32
    %c0_i32_0 = arith.constant 0 : i32
    %c0_i32_1 = arith.constant 0 : i32
    %c0_i32_2 = arith.constant 0 : i32
    return %arg0, %c0_i32, %c0_i32_0, %c0_i32_1 : i32, i32, i32, i32
  }
  func.func @transform_1(%arg0: i32) -> (i32, i32, i32) {
    %c0_i32 = arith.constant 0 : i32
    %c0_i32_0 = arith.constant 0 : i32
    %c0_i32_1 = arith.constant 0 : i32
    %c0_i32_2 = arith.constant 0 : i32
    return %c0_i32, %c0_i32_0, %c0_i32_1 : i32, i32, i32
  }
  func.func @transform_2(%arg0: i32) -> (i32, i32, i32) {
    %c0_i32 = arith.constant 0 : i32
    %c0_i32_0 = arith.constant 0 : i32
    %c0_i32_1 = arith.constant 0 : i32
    %c0_i32_2 = arith.constant 0 : i32
    return %c0_i32, %c0_i32_0, %c0_i32_1 : i32, i32, i32
  }
  func.func @transform_3(%arg0: i32) -> (i32, i32) {
    %c0_i32 = arith.constant 0 : i32
    %c0_i32_0 = arith.constant 0 : i32
    %c0_i32_1 = arith.constant 0 : i32
    return %c0_i32, %c0_i32_0 : i32, i32
  }
  func.func @transform_4(%arg0: i32) -> (i32, i32) {
    %c0_i32 = arith.constant 0 : i32
    %c0_i32_0 = arith.constant 0 : i32
    %c0_i32_1 = arith.constant 0 : i32
    return %c0_i32, %c0_i32_0 : i32, i32
  }
  func.func @transform_5(%arg0: i32) -> (i32, i32, i32) {
    %c0_i32 = arith.constant 0 : i32
    %c0_i32_0 = arith.constant 0 : i32
    %c0_i32_1 = arith.constant 0 : i32
    return %arg0, %c0_i32, %c0_i32_0 : i32, i32, i32
  }
  func.func @transform_6(%arg0: i32) -> (i32, i32, i32, i32) {
    %c0_i32 = arith.constant 0 : i32
    %c0_i32_0 = arith.constant 0 : i32
    %c0_i32_1 = arith.constant 0 : i32
    %c0_i32_2 = arith.constant 0 : i32
    return %arg0, %c0_i32, %c0_i32_0, %c0_i32_1 : i32, i32, i32, i32
  }
}

</mosaic_0001>

<bundles_post_ra>
// kernel: hourglass_block.8
= control target key start
LH: loop header
LB: loop body
LE: loop exit
PB: predicated region body
PF: predicated region fallthrough
CT: control target
= control target key end

     0   :  { %s1653_s0 = inlined_call_operand.hbm [shape: f32[2,8,80], index: 0, kind: input, shape index: {}]   ;;  %s1654_s1 = inlined_call_operand.hbm [shape: f32[8,2], index: 1, kind: input, shape index: {}]   ;;  %s1655_s2 = inlined_call_operand.hbm [shape: f32[2,4,80], index: 2, kind: input, shape index: {}]   ;;  %s1656_s3 = inlined_call_operand.hbm [shape: f32[8,4], index: 3, kind: input, shape index: {}]   ;;  %s1657_s4 = inlined_call_operand.hbm [shape: f32[2,8,8,8], index: 4, kind: output, shape index: {}]  }
   0x1   :  { %1666 = sst [smem:[#allocation15_spill]] %s1653_s0 }
   0x2   :  { %1667 = sst [smem:[#allocation16_spill]] %s1654_s1 }
   0x3   :  { %9 = vsyncpa [#allocation3], 0 }
   0x4   :  { %11 = vsyncpa [#allocation3 + $0x1], 0 }
   0x5   :  { %12 = vsyncpa [#allocation6], 0 }
   0x6   :  { %13 = vsyncpa [#allocation4], 0 }
   0x7   :  { %15 = vsyncpa [#allocation4 + $0x1], 0  ;;  %s1191_s15 = smov 0   ;;  %s1193_s16 = smov 0  }
   0x8   :  { %s1195_s17 = smov 0   ;;  %s1197_s18 = smov 0  }
   0x9 LB: > { %s1212_s19 = sadd.s32 4294967295, %s1144_s18   ;;  %s828_s20 = sadd.s32 4294967294, %s1144_s18   ;;  %s1144_s18 = sphi %s1197_s18, %s1698_s18   ;;  %s1140_s17 = sphi %s1195_s17, %s1697_s17   ;;  %s1136_s16 = sphi %s1193_s16, %s1696_s16   ;;  %s1132_s15 = sphi %s1191_s15, %s1695_s15  }
   0xa   : > { %p41_p0 = scmp.ne.s32.totalorder %s1136_s16, %s1132_s15  ;;  %p1658_p1 = scmp.eq.s32.totalorder %s1212_s19, 0 }
   0xb   : > { %p139_p3 = scmp.eq.s32.totalorder %s828_s20, 1  ;;  %p829_p5 = scmp.ge.s32.totalorder %s1144_s18, 1 }
   0xc   : > { %p1221_p4 = por %p1658_p1, %p41_p0  ;;  %p146_p7 = scmp.lt.s32.totalorder %s1144_s18, 3 }
   0xd   : > { %p1226_p6 = por %p139_p3, %p41_p0  ;;  %s1146_s24 = smov [#allocation5]  }
   0xe   : > { %s1668_s21 = scalar_select %p1221_p4, 1, 0 }
   0xf   : > { %s1669_s22 = scalar_select %p1226_p6, 1, 0 }
  0x10   : > { %p1231_p8 = pnand %p829_p5, %p146_p7  ;;  %s159_s25 = sshll.u32 %s1146_s24, 4  ;;  %s160_s25 = int_to_ptr.vmem [resolvable:$true] %s159_s25 }
  0x11   : > { %s1239_s26 = sadd.s32 1, %s1144_s18   ;;  %s28_s30 = sadd.s32 1, %s1140_s17 }
  0x12   : > { %s1670_s23 = scalar_select %p1231_p8, 1, 0 }
  0x13   : > { %p872_p10 = pneg %p1231_p8  ;;  %s25_s28 = ssub.s32 %s1144_s18, %s1239_s26 }
  0x14   : > { %p1249_p12 = scmp.eq.s32.totalorder %s25_s28, 0  ;;  %s1673_s1 = sld [smem:[#allocation16_spill]] }
  0x15   : > { %p1243_p11 = pnand %p872_p10, %p1658_p1 }
  0x16   : > { %s1672_s29 = scalar_select %p1249_p12, 1, 0 }
  0x17   : > { %p1661_p3 = pneg %p1243_p11 }
  0x1a   : > { %s950_s7 = scalar_lea.hbm %s1673_s1, 128 }
  0x1b   : > { %p951_p0 = scmp.ne.s32.totalorder %s1673_s1, %s950_s7  ;;  %p957_p10 = scmp.lt.u32.totalorder %s950_s7, %s1673_s1 }
  0x1d   : > { %p953_p5 = pnand %p1661_p3, %p951_p0 }
  0x1f   : > { %p954_p7 = pneg %p953_p5 }
  0x21   : > { %p959_p9 = pnand %p957_p10, %p954_p7 }
  0x23   : > { %962 = shalt.err (!%p959_p9)
}
  0x24   : > { %s963_s12 = scalar_lea.vmem %s160_s25, 128  ;;  %p971_p6 = scmp.lt.s32.totalorder %s160_s25, %s160_s25 }
  0x25   : > { %p964_p1 = scmp.ne.s32.totalorder %s160_s25, %s963_s12  ;;  %p972_p4 = scmp.lt.s32.totalorder %s963_s12, %s963_s12 }
  0x27   : > { %p966_p2 = pnand %p964_p1, %p1661_p3  ;;  %p973_p8 = por %p972_p4, %p971_p6 }
  0x29   : > { %p967_p13 = pneg %p966_p2 }
  0x2b   : > { %p974_p12 = pnand %p973_p8, %p967_p13 }
  0x2d   : > { %977 = shalt.err (!%p974_p12)
}
  0x2e   : > { %875 = dma.hbm_to_vmem [thread:$0]  (!%p1243_p11), %s1673_s1, 128, %s160_s25, [#allocation6]  }
  0x2f   : > { %p1674_p1 = scmp.ne.s32.totalorder %s1672_s29, 0  ;;  %p36_p2 = scmp.eq.s32.totalorder %s1144_s18, 0 }
  0x30   : > { %p1675_p4 = scmp.ne.s32.totalorder %s1140_s17, %s1136_s16  ;;  %p1676_p6 = scmp.eq.s32.totalorder %s1212_s19, 1 }
  0x31   : > { %s1281_s20 = scalar_select %p1674_p1, %s1140_s17, %s28_s30  }
  0x32   : > { %p1289_p8 = por %p1676_p6, %p1675_p4  ;;  %p892_p9 = scmp.lt.s32.totalorder %s1144_s18, 2 }
  0x33   : > { %s181_s28 = sand.u32 1, %s1144_s18   ;;  %p1678_p12 = pmov %p1675_p4 }
  0x34   : > { %s1677_s24 = scalar_select %p1289_p8, 1, 0 }
  0x35   : > { %p37_p13 = por %p36_p2, %p1678_p12  ;;  %s183_s5 = sand.u32 1, %s1140_s17  }
  0x36   : > { %s834_s6 = sshll.u32 %s1144_s18, 7  ;;  %s833_s7 = sshll.u32 %s183_s5, 3 }
  0x37   : > { %s1679_s0 = sld [smem:[#allocation15_spill]]  ;;  %p1305_p0 = pnand %p892_p9, %p37_p13 }
  0x38   : > { %s185_s30 = scalar_lea.vmem [#allocation2], %s833_s7  ;;  %s1309_s11 = sshll.u32 %s183_s5, 2 }
  0x39   : > { %s1680_s29 = scalar_select %p1305_p0, 1, 0 }
  0x3a   : > { %s192_s10 = sshll.u32 %s185_s30, 4  ;;  %s1313_s12 = scalar_lea.sflag [#allocation3], %s181_s28  ;;  %s1311_s10 = int_to_ptr.vmem [resolvable:$true] %s192_s10 }
  0x3b   : > { %p1663_p7 = pneg %p1305_p0 }
  0x3d   : > { %s1303_s25 = scalar_lea.hbm %s1679_s0, %s834_s6  ;;  %s983_s8 = scalar_lea.hbm %s1679_s0, 256 }
  0x3e   : > { %s978_s13 = scalar_lea.hbm %s1303_s25, 128  ;;  %p984_p2 = scmp.lt.u32.totalorder %s1303_s25, %s1679_s0 }
  0x3f   : > { %p979_p5 = scmp.ne.s32.totalorder %s1303_s25, %s978_s13  ;;  %p985_p4 = scmp.lt.u32.totalorder %s983_s8, %s978_s13 }
  0x40   : > { %p987_p9 = scmp.lt.u32.totalorder %s978_s13, %s1303_s25 }
  0x41   : > { %p981_p10 = pnand %p1663_p7, %p979_p5  ;;  %p986_p6 = por %p985_p4, %p984_p2 }
  0x43   : > { %p982_p1 = pneg %p981_p10  ;;  %p988_p12 = por %p987_p9, %p986_p6 }
  0x45   : > { %p989_p13 = pnand %p988_p12, %p982_p1 }
  0x47   : > { %992 = shalt.err (!%p989_p13)
}
  0x48   : > { %s993_s28 = scalar_lea.vmem %s1311_s10, 128  ;;  %s1147_s5 = smov [#allocation2]  }
  0x49   : > { %p994_p5 = scmp.ne.s32.totalorder %s1311_s10, %s993_s28  ;;  %s998_s30 = sshll.u32 %s1147_s5, 4  ;;  %s999_s30 = int_to_ptr.vmem [resolvable:$false] %s998_s30 }
  0x4a   : > { %s1000_s14 = scalar_lea.vmem %s999_s30, 256  ;;  %p1001_p8 = scmp.lt.s32.totalorder %s1311_s10, %s999_s30 }
  0x4b   : > { %p996_p10 = pnand %p994_p5, %p1663_p7  ;;  %p1002_p2 = scmp.lt.s32.totalorder %s1000_s14, %s993_s28 }
  0x4d   : > { %p997_p3 = pneg %p996_p10  ;;  %p1003_p4 = por %p1002_p2, %p1001_p8 }
  0x4f   : > { %p1004_p6 = pnand %p1003_p4, %p997_p3 }
  0x51   : > { %1007 = shalt.err (!%p1004_p6)
}
  0x52   : > { %882 = dma.hbm_to_vmem [thread:$0]  (!%p1305_p0), %s1303_s25, 128, %s1311_s10, %s1313_s12  }
  0x53   : > { %s1148_s13 = smov [#allocation8]   ;;  %s836_s8 = sshll.u32 %s1144_s18, 6 }
  0x54   : > { %s170_s6 = sshll.u32 %s1148_s13, 4  ;;  %s1345_s5 = scalar_lea.hbm %s1655_s2, %s836_s8  ;;  %s171_s6 = int_to_ptr.vmem [resolvable:$true] %s170_s6 }
  0x55   : > { %s1008_s14 = scalar_lea.hbm %s1656_s3, 128  ;;  %p1681_p8 = pneg %p1243_p11 }
  0x56   : > { %p1009_p3 = scmp.ne.s32.totalorder %s1656_s3, %s1008_s14  ;;  %p1015_p12 = scmp.lt.u32.totalorder %s1008_s14, %s1656_s3 }
  0x58   : > { %p1011_p1 = pnand %p1009_p3, %p1681_p8 }
  0x5a   : > { %p1012_p9 = pneg %p1011_p1 }
  0x5c   : > { %p1017_p13 = pnand %p1015_p12, %p1012_p9 }
  0x5e   : > { %1020 = shalt.err (!%p1017_p13)
}
  0x5f   : > { %s1021_s13 = scalar_lea.vmem %s171_s6, 128  ;;  %p1682_p10 = pmov %p1681_p8 }
  0x60   : > { %p1022_p5 = scmp.ne.s32.totalorder %s171_s6, %s1021_s13  ;;  %p1029_p6 = scmp.lt.s32.totalorder %s171_s6, %s171_s6 }
  0x61   : > { %p1030_p7 = scmp.lt.s32.totalorder %s1021_s13, %s1021_s13 }
  0x62   : > { %p1024_p2 = pnand %p1022_p5, %p1682_p10 }
  0x63   : > { %p1031_p0 = por %p1030_p7, %p1029_p6 }
  0x64   : > { %p1025_p4 = pneg %p1024_p2 }
  0x66   : > { %p1032_p3 = pnand %p1031_p0, %p1025_p4 }
  0x68   : > { %1035 = shalt.err (!%p1032_p3)
}
  0x69   : > { %878 = dma.hbm_to_vmem [thread:$0]  (!%p1243_p11), %s1656_s3, 128, %s171_s6, [#allocation6]  }
  0x6a   : > { %s203_s8 = scalar_lea.vmem [#allocation7], %s1309_s11  ;;  %s1036_s9 = scalar_lea.hbm %s1345_s5, 64 }
  0x6b   : > { %s210_s7 = sshll.u32 %s203_s8, 4  ;;  %p1037_p8 = scmp.ne.s32.totalorder %s1345_s5, %s1036_s9  ;;  %s211_s7 = int_to_ptr.vmem [resolvable:$true] %s210_s7 }
  0x6c   : > { %p1683_p7 = scmp.ne.s32.totalorder %s1680_s29, 0  ;;  %s1041_s30 = scalar_lea.hbm %s1655_s2, 128 }
  0x6d   : > { %p1042_p12 = scmp.lt.u32.totalorder %s1345_s5, %s1655_s2  ;;  %p1043_p13 = scmp.lt.u32.totalorder %s1041_s30, %s1036_s9 }
  0x6e   : > { %p1684_p0 = pneg %p1683_p7  ;;  %p1045_p11 = scmp.lt.u32.totalorder %s1036_s9, %s1345_s5 }
  0x6f   : > { %p1044_p5 = por %p1043_p13, %p1042_p12 }
  0x70   : > { %p1039_p1 = pnand %p1037_p8, %p1684_p0 }
  0x71   : > { %p1046_p10 = por %p1045_p11, %p1044_p5 }
  0x72   : > { %p1040_p9 = pneg %p1039_p1 }
  0x74   : > { %p1047_p2 = pnand %p1046_p10, %p1040_p9 }
  0x76   : > { %1050 = shalt.err (!%p1047_p2)
}
  0x77   : > { %s1051_s11 = scalar_lea.vmem %s211_s7, 64  ;;  %p1685_p6 = pmov %p1684_p0 }
  0x78   : > { %p1052_p4 = scmp.ne.s32.totalorder %s211_s7, %s1051_s11  ;;  %s1149_s6 = smov [#allocation7]  }
  0x79   : > { %s1056_s10 = sshll.u32 %s1149_s6, 4  ;;  %s1057_s10 = int_to_ptr.vmem [resolvable:$false] %s1056_s10 }
  0x7a   : > { %p1054_p3 = pnand %p1052_p4, %p1685_p6  ;;  %s1058_s13 = scalar_lea.vmem %s1057_s10, 128 }
  0x7b   : > { %p1059_p0 = scmp.lt.s32.totalorder %s211_s7, %s1057_s10  ;;  %p1060_p1 = scmp.lt.s32.totalorder %s1058_s13, %s1051_s11 }
  0x7c   : > { %p1055_p8 = pneg %p1054_p3 }
  0x7d   : > { %p1061_p12 = por %p1060_p1, %p1059_p0 }
  0x7f   : > { %p1062_p13 = pnand %p1061_p12, %p1055_p8 }
  0x81   : > { %1065 = shalt.err (!%p1062_p13)
}
  0x82   : > { %885 = dma.hbm_to_vmem [thread:$0]  (!%p1683_p7), %s1345_s5, 64, %s211_s7, %s1313_s12  }
  0x83   : > { %p1686_p9 = scmp.ne.s32.totalorder %s1670_s23, 0 }
  0x84   : > { %s221_s0 = sand.u32 (!%p1686_p9), 1, %s1212_s19   ;;  %s1392_s1 = sand.u32 (!%p1686_p9), 1, %s1136_s16  }
  0x85   : > { %219 = sbr.rel (%p1686_p9) target bundleno = 671 (0x29f), region = 36  ;;  %s838_s8 = sshll.u32 (!%p1686_p9), %s1392_s1, 3 }
  0x86   : > { %s222_s9 = scalar_lea.sflag (!%p1686_p9), [#allocation3], %s221_s0  ;;  %s1395_s27 = scalar_lea.vmem (!%p1686_p9), [#allocation2], %s838_s8 }
  0x87   : > { %p1687_p5 = scmp.ne.s32.totalorder (!%p1686_p9), %s1668_s21, 0 }
  0x8c   : > { %1111 = dma.done.wait (%p1687_p5), %s222_s9, 128  }
  0x8d   : > { %1113 = vsyncadd (%p1687_p5), %s222_s9, 4294967168  ;;  %p1688_p7 = scmp.eq.s32.totalorder %s1212_s19, 0 }
  0x8f   : > { %1115 = dma.done.wait (%p1688_p7), [#allocation6], 128   ;;  %p1689_p11 = pmov %p1688_p7 }
  0x90   : > { %s840_s23 = sshll.u32 %s1392_s1, 2 }
  0x91   : > { %1117 = vsyncadd (%p1689_p11), [#allocation6], 4294967168  ;;  %s238_s29 = scalar_lea.vmem [#allocation7], %s840_s23 }
  0x92   : > { %1119 = dma.done.wait (%p1687_p5), %s222_s9, 64  }
  0x93   : > { %1121 = vsyncadd (%p1687_p5), %s222_s9, 4294967232  ;;  %p1690_p10 = pmov %p1688_p7 }
  0x94   : > { %p1691_p2 = pmov %p1688_p7 }
  0x95   : > { %1123 = dma.done.wait (%p1690_p10), [#allocation6], 128  }
  0x96   : > { %1125 = vsyncadd (%p1691_p2), [#allocation6], 4294967168  ;;  %v1150_v0 = vmov 0.0   ;;  %vm1151_vm0 = vmmov 0   ;;  %vm303_vm1 = vcmask 1043456   ;;  %vm299_vm2 = vcmask 31744  }
  0x97   : > { %853 = vmatprep.subr.mxu0 %v1150_v0  ;;  %855 = vmatprep.mubr.msk.f32.mxu0 %vm1151_vm0, %v1150_v0  ;;  %v1152_v1 = vmov 0   ;;  %v1153_v2 = vmov 1   ;;  %v272_v3 = vld [vmem:[#allocation5] sm:$0xff]  ;;  %v298_v4 = vld [vmem:[%s238_s29] sm:$0xf]  ;;  %v297_v5 = vld [vmem:[#allocation8] sm:$0xff]  ;;  %v384_v19 = vlaneseq }
  0x98   : > { %945 = vset.pattern.permute.xlu0 %v1152_v1  ;;  %946 = vset.pattern.permute.xlu1 %v1153_v2  ;;  %v274_v6 = vmul.f32 0.0078125, %v272_v3  ;;  %s1154_s21 = smov 1   ;;  %v282_v15 = vld [vmem:[%s1395_s27] sm:$0xff]  ;;  %v1155_v17 = vmov 1966171168   ;;  %s842_s12 = sshll.u32 %s1392_s1, 6 }
  0x99   : > { %854 = vmatpush3.msk.msra.mxu0 %vm303_vm1, %v298_v4  ;;  %v382_v18 = vunpack.c.l.s4 %v1155_v17  ;;  %v385_v22 = vshrl.u32 %v384_v19, 7  ;;  %vm437_vm3 = vcmask 57344   ;;  %s1416_s5 = scalar_lea.vmem [#allocation9], %s842_s12  ;;  %s1156_s7 = smov 108  }
  0x9a   : > { %856 = vmatmul.mubr.msk.f32.vlgmr.msra.gmra.mrb[0].mxu0 %vm299_vm2, %v297_v5  ;;  %v275_v7 = vmul.f32 %v274_v6, %v274_v6  ;;  %s1157_s28 = smov 118   ;;  %s1158_s30 = smov 98  }
  0x9b   : > { %v383_v21 = vunpack.c.0.s8 %v382_v18  ;;  %v448_v30 = vsub.s32 0, %v385_v22  ;;  %s1159_s14 = smov 88   ;;  %s1160_s25 = smov 78  }
  0x9c   : > { %277 = vrot.lane.b32.xlu0 %v275_v7, %s1154_s21  ;;  %s1161_s11 = smov 68   ;;  %s1162_s6 = smov 58  }
  0x9d   : > { %v386_v26 = vsub.s32 %v383_v21, %v385_v22  ;;  %s850_s10 = sshll.u32 %s1212_s19, 10  ;;  %s716_s13 = sshll.u32 %s1416_s5, 4  ;;  %s1607_s13 = int_to_ptr.vmem [resolvable:$true] %s716_s13 }
  0x9e   : > { %s1605_s9 = scalar_lea.hbm %s1657_s4, %s850_s10  ;;  %s703_s27 = scalar_lea.sflag [#allocation4], %s1392_s1 }
  0x9f   : > { %s1066_s23 = scalar_lea.vmem %s1607_s13, 1024  ;;  %p1692_p6 = scmp.ne.s32.totalorder %s1677_s24, 0 }
  0xa0   : > { %285 = vperm.xlu0 %945, %v274_v6   ;;  %p1067_p4 = scmp.ne.s32.totalorder %s1607_s13, %s1066_s23  ;;  %s1163_s19 = smov [#allocation9]  }
  0xa1   : > { %s1070_s29 = sshll.u32 %s1163_s19, 4  ;;  %s1071_s29 = int_to_ptr.vmem [resolvable:$false] %s1070_s29 }
  0xa2   : > { %p1068_p3 = pnand %p1067_p4, %p1692_p6  ;;  %s1072_s21 = scalar_lea.vmem %s1071_s29, 2048 }
  0xa3   : > { %p1073_p0 = scmp.lt.s32.totalorder %s1607_s13, %s1071_s29  ;;  %p1074_p1 = scmp.lt.s32.totalorder %s1072_s21, %s1066_s23 }
  0xa4   : > { %947 = vset.pattern.permute.xlu0 %v1153_v2  ;;  %p1069_p8 = pneg %p1068_p3 }
  0xa5   : > { %p1075_p12 = por %p1074_p1, %p1073_p0 }
  0xa7   : > { %p1076_p13 = pnand %p1075_p12, %p1069_p8 }
 0x10e   : > { %v278_v8 = vpop.permute.xlu0 %277 }
 0x10f   : > { %v280_v9 = vsub.f32 %v274_v6, %v278_v8 }
 0x111   : > { %v281_v10 = vmax.f32 %v280_v9, 0.0 }
 0x113   : > { %v289_v11 = vadd.f32 1e-05, %v281_v10 }
 0x115   : > { %948 = vrsqrt.f32 %v289_v11 }
 0x11f   : > { %v949_v12 = vpop.eup %948  ;;  %v286_v16 = vpop.permute.xlu0 %285 }
 0x120   : > { %293 = vperm.xlu1 %946, %v949_v12   ;;  %v288_v20 = vsub.f32 %v282_v15, %v286_v16 }
 0x16d   : > { %v373_v13 = vpop.f32.mrb[0].mxu0 }
 0x16e   : > { %v857_v14 = vpop.f32.mrb[1].mxu0 }
 0x19f   : > { %v294_v23 = vpop.permute.xlu1 %293 }
 0x1a0   : > { %v296_v24 = vmul.f32 %v294_v23, %v288_v20 }
 0x1a2   : > { %v377_v25 = vadd.f32 %v373_v13, %v296_v24 }
 0x1a4   : > { %v378_v27 = vmax.f32 %v377_v25, 0.0 }
 0x1a6   : > { %v380_v28 = vcombine.high %v378_v27, %v378_v27  ;;  %v387_v29 = vrot.slane %v378_v27, %v386_v26 }
 0x1a8   : > { %v394_v31 = vrot.slane %v380_v28, %v386_v26  ;;  %v395_v32 = vcombine.high %v387_v29, %v387_v29  ;;  %v403_v33 = vrot.slane %v387_v29, %v386_v26 }
 0x1aa   : > { %v396_v34 = vcombine.high %v394_v31, %v394_v31  ;;  %v410_v35 = vrot.slane %v394_v31, %v386_v26  ;;  %v417_v36 = vrot.slane %v395_v32, %v386_v26  ;;  %v425_v37 = vcombine.high %v403_v33, %v403_v33  ;;  %438 = vst.msk [vmem:[%s1416_s5] sm:$0x1] %vm437_vm3, %v403_v33 }
 0x1ab   : > { %v449_v38 = vrot.slane %v403_v33, %v448_v30 }
 0x1ac   : > { %v424_v39 = vrot.slane %v396_v34, %v386_v26  ;;  %v426_v40 = vcombine.high %v410_v35, %v410_v35  ;;  %v427_v41 = vcombine.high %v417_v36, %v417_v36  ;;  %439 = vst.msk [vmem:[%s1416_s5 + $0x8] sm:$0x1] %vm437_vm3, %v417_v36  ;;  %440 = vst.msk [vmem:[%s1416_s5 + $0x10] sm:$0x1] %vm437_vm3, %v425_v37 }
 0x1ad   : > { %442 = vst.msk [vmem:[%s1416_s5 + $0x20] sm:$0x1] %vm437_vm3, %v410_v35  ;;  %510 = vrot.lane.b32.xlu0 %v449_v38, %s1156_s7  ;;  %478 = vrot.lane.b32.xlu1 %v449_v38, %s1157_s28  ;;  %v453_v44 = vrot.slane %v417_v36, %v448_v30  ;;  %v457_v46 = vrot.slane %v425_v37, %v448_v30 }
 0x1ae   : > { %v428_v42 = vcombine.high %v424_v39, %v424_v39  ;;  %441 = vst.msk [vmem:[%s1416_s5 + $0x18] sm:$0x1] %vm437_vm3, %v427_v41  ;;  %443 = vst.msk [vmem:[%s1416_s5 + $0x28] sm:$0x1] %vm437_vm3, %v424_v39  ;;  %v473_v43 = vrot.slane %v426_v40, %v448_v30  ;;  %v465_v47 = vrot.slane %v410_v35, %v448_v30 }
 0x1af   : > { %444 = vst.msk [vmem:[%s1416_s5 + $0x30] sm:$0x1] %vm437_vm3, %v426_v40  ;;  %v461_v48 = vrot.slane %v427_v41, %v448_v30  ;;  %v469_v49 = vrot.slane %v424_v39, %v448_v30 }
 0x1b0   : > { %445 = vst.msk [vmem:[%s1416_s5 + $0x38] sm:$0x1] %vm437_vm3, %v428_v42  ;;  %v477_v45 = vrot.slane %v428_v42, %v448_v30 }
 0x1b1   : > { %542 = vrot.lane.b32.xlu0 %v449_v38, %s1158_s30  ;;  %480 = vrot.lane.b32.xlu1 %v453_v44, %s1157_s28 }
 0x1b5   : > { %574 = vrot.lane.b32.xlu0 %v449_v38, %s1159_s14  ;;  %512 = vrot.lane.b32.xlu1 %v453_v44, %s1156_s7 }
 0x1b9   : > { %606 = vrot.lane.b32.xlu0 %v449_v38, %s1160_s25  ;;  %544 = vrot.lane.b32.xlu1 %v453_v44, %s1158_s30 }
 0x1bd   : > { %638 = vrot.lane.b32.xlu0 %v449_v38, %s1161_s11  ;;  %576 = vrot.lane.b32.xlu1 %v453_v44, %s1159_s14 }
 0x1c1   : > { %670 = vrot.lane.b32.xlu0 %v449_v38, %s1162_s6  ;;  %608 = vrot.lane.b32.xlu1 %v453_v44, %s1160_s25 }
 0x1c5   : > { %482 = vrot.lane.b32.xlu0 %v457_v46, %s1157_s28  ;;  %640 = vrot.lane.b32.xlu1 %v453_v44, %s1161_s11 }
 0x1c9   : > { %672 = vrot.lane.b32.xlu1 %v453_v44, %s1162_s6  ;;  %486 = vrot.lane.b32.xlu0 %v465_v47, %s1157_s28 }
 0x1cd   : > { %484 = vrot.lane.b32.xlu1 %v461_v48, %s1157_s28  ;;  %514 = vrot.lane.b32.xlu0 %v457_v46, %s1156_s7 }
 0x1d1   : > { %518 = vrot.lane.b32.xlu0 %v465_v47, %s1156_s7  ;;  %488 = vrot.lane.b32.xlu1 %v469_v49, %s1157_s28 }
 0x1d5   : > { %546 = vrot.lane.b32.xlu0 %v457_v46, %s1158_s30  ;;  %516 = vrot.lane.b32.xlu1 %v461_v48, %s1156_s7 }
 0x1d9   : > { %550 = vrot.lane.b32.xlu0 %v465_v47, %s1158_s30  ;;  %520 = vrot.lane.b32.xlu1 %v469_v49, %s1156_s7 }
 0x1dd   : > { %578 = vrot.lane.b32.xlu0 %v457_v46, %s1159_s14  ;;  %548 = vrot.lane.b32.xlu1 %v461_v48, %s1158_s30 }
 0x1e1   : > { %582 = vrot.lane.b32.xlu0 %v465_v47, %s1159_s14  ;;  %552 = vrot.lane.b32.xlu1 %v469_v49, %s1158_s30 }
 0x1e5   : > { %610 = vrot.lane.b32.xlu0 %v457_v46, %s1160_s25  ;;  %580 = vrot.lane.b32.xlu1 %v461_v48, %s1159_s14 }
 0x1e9   : > { %614 = vrot.lane.b32.xlu0 %v465_v47, %s1160_s25  ;;  %584 = vrot.lane.b32.xlu1 %v469_v49, %s1159_s14 }
 0x1ed   : > { %642 = vrot.lane.b32.xlu0 %v457_v46, %s1161_s11  ;;  %612 = vrot.lane.b32.xlu1 %v461_v48, %s1160_s25 }
 0x1f1   : > { %646 = vrot.lane.b32.xlu0 %v465_v47, %s1161_s11  ;;  %616 = vrot.lane.b32.xlu1 %v469_v49, %s1160_s25 }
 0x1f5   : > { %674 = vrot.lane.b32.xlu0 %v457_v46, %s1162_s6  ;;  %644 = vrot.lane.b32.xlu1 %v461_v48, %s1161_s11 }
 0x1f9   : > { %678 = vrot.lane.b32.xlu0 %v465_v47, %s1162_s6  ;;  %648 = vrot.lane.b32.xlu1 %v469_v49, %s1161_s11 }
 0x1fd   : > { %490 = vrot.lane.b32.xlu0 %v473_v43, %s1157_s28  ;;  %676 = vrot.lane.b32.xlu1 %v461_v48, %s1162_s6 }
 0x201   : > { %522 = vrot.lane.b32.xlu0 %v473_v43, %s1156_s7  ;;  %680 = vrot.lane.b32.xlu1 %v469_v49, %s1162_s6 }
 0x205   : > { %554 = vrot.lane.b32.xlu0 %v473_v43, %s1158_s30  ;;  %492 = vrot.lane.b32.xlu1 %v477_v45, %s1157_s28 }
 0x209   : > { %586 = vrot.lane.b32.xlu0 %v473_v43, %s1159_s14  ;;  %524 = vrot.lane.b32.xlu1 %v477_v45, %s1156_s7 }
 0x20d   : > { %618 = vrot.lane.b32.xlu0 %v473_v43, %s1160_s25  ;;  %556 = vrot.lane.b32.xlu1 %v477_v45, %s1158_s30 }
 0x211   : > { %650 = vrot.lane.b32.xlu0 %v473_v43, %s1161_s11  ;;  %588 = vrot.lane.b32.xlu1 %v477_v45, %s1159_s14 }
 0x215   : > { %682 = vrot.lane.b32.xlu0 %v473_v43, %s1162_s6  ;;  %620 = vrot.lane.b32.xlu1 %v477_v45, %s1160_s25 }
 0x219   : > { %652 = vrot.lane.b32.xlu1 %v477_v45, %s1161_s11 }
 0x21d   : > { %684 = vrot.lane.b32.xlu1 %v477_v45, %s1162_s6 }
 0x21f   : > { %v511_v50 = vpop.permute.xlu0 %510  ;;  %v479_v51 = vpop.permute.xlu1 %478 }
 0x220   : > { %534 = vst.msk [vmem:[%s1416_s5 + $0x2] sm:$0x1] %vm437_vm3, %v511_v50  ;;  %502 = vst.msk [vmem:[%s1416_s5 + $0x1] sm:$0x1] %vm437_vm3, %v479_v51 }
 0x223   : > { %v543_v52 = vpop.permute.xlu0 %542  ;;  %v481_v53 = vpop.permute.xlu1 %480 }
 0x224   : > { %566 = vst.msk [vmem:[%s1416_s5 + $0x3] sm:$0x1] %vm437_vm3, %v543_v52  ;;  %503 = vst.msk [vmem:[%s1416_s5 + $0x9] sm:$0x1] %vm437_vm3, %v481_v53 }
 0x227   : > { %v575_v54 = vpop.permute.xlu0 %574  ;;  %v513_v55 = vpop.permute.xlu1 %512 }
 0x228   : > { %598 = vst.msk [vmem:[%s1416_s5 + $0x4] sm:$0x1] %vm437_vm3, %v575_v54  ;;  %535 = vst.msk [vmem:[%s1416_s5 + $0xa] sm:$0x1] %vm437_vm3, %v513_v55 }
 0x22b   : > { %v607_v56 = vpop.permute.xlu0 %606  ;;  %v545_v57 = vpop.permute.xlu1 %544 }
 0x22c   : > { %630 = vst.msk [vmem:[%s1416_s5 + $0x5] sm:$0x1] %vm437_vm3, %v607_v56  ;;  %567 = vst.msk [vmem:[%s1416_s5 + $0xb] sm:$0x1] %vm437_vm3, %v545_v57 }
 0x22f   : > { %v639_v58 = vpop.permute.xlu0 %638  ;;  %v577_v59 = vpop.permute.xlu1 %576 }
 0x230   : > { %662 = vst.msk [vmem:[%s1416_s5 + $0x6] sm:$0x1] %vm437_vm3, %v639_v58  ;;  %599 = vst.msk [vmem:[%s1416_s5 + $0xc] sm:$0x1] %vm437_vm3, %v577_v59 }
 0x233   : > { %v671_v60 = vpop.permute.xlu0 %670  ;;  %v609_v61 = vpop.permute.xlu1 %608 }
 0x234   : > { %694 = vst.msk [vmem:[%s1416_s5 + $0x7] sm:$0x1] %vm437_vm3, %v671_v60  ;;  %631 = vst.msk [vmem:[%s1416_s5 + $0xd] sm:$0x1] %vm437_vm3, %v609_v61 }
 0x237   : > { %v483_v62 = vpop.permute.xlu0 %482  ;;  %v641_v63 = vpop.permute.xlu1 %640 }
 0x238   : > { %504 = vst.msk [vmem:[%s1416_s5 + $0x11] sm:$0x1] %vm437_vm3, %v483_v62  ;;  %663 = vst.msk [vmem:[%s1416_s5 + $0xe] sm:$0x1] %vm437_vm3, %v641_v63 }
 0x23b   : > { %v673_v0 = vpop.permute.xlu1 %672  ;;  %v487_v1 = vpop.permute.xlu0 %486 }
 0x23c   : > { %695 = vst.msk [vmem:[%s1416_s5 + $0xf] sm:$0x1] %vm437_vm3, %v673_v0  ;;  %506 = vst.msk [vmem:[%s1416_s5 + $0x21] sm:$0x1] %vm437_vm3, %v487_v1 }
 0x23f   : > { %v485_v2 = vpop.permute.xlu1 %484  ;;  %v515_v3 = vpop.permute.xlu0 %514 }
 0x240   : > { %505 = vst.msk [vmem:[%s1416_s5 + $0x19] sm:$0x1] %vm437_vm3, %v485_v2  ;;  %536 = vst.msk [vmem:[%s1416_s5 + $0x12] sm:$0x1] %vm437_vm3, %v515_v3 }
 0x243   : > { %v519_v4 = vpop.permute.xlu0 %518  ;;  %v489_v5 = vpop.permute.xlu1 %488 }
 0x244   : > { %538 = vst.msk [vmem:[%s1416_s5 + $0x22] sm:$0x1] %vm437_vm3, %v519_v4  ;;  %507 = vst.msk [vmem:[%s1416_s5 + $0x29] sm:$0x1] %vm437_vm3, %v489_v5 }
 0x247   : > { %v547_v6 = vpop.permute.xlu0 %546  ;;  %v517_v7 = vpop.permute.xlu1 %516 }
 0x248   : > { %568 = vst.msk [vmem:[%s1416_s5 + $0x13] sm:$0x1] %vm437_vm3, %v547_v6  ;;  %537 = vst.msk [vmem:[%s1416_s5 + $0x1a] sm:$0x1] %vm437_vm3, %v517_v7 }
 0x24b   : > { %v551_v8 = vpop.permute.xlu0 %550  ;;  %v521_v9 = vpop.permute.xlu1 %520 }
 0x24c   : > { %570 = vst.msk [vmem:[%s1416_s5 + $0x23] sm:$0x1] %vm437_vm3, %v551_v8  ;;  %539 = vst.msk [vmem:[%s1416_s5 + $0x2a] sm:$0x1] %vm437_vm3, %v521_v9 }
 0x24f   : > { %v579_v10 = vpop.permute.xlu0 %578  ;;  %v549_v11 = vpop.permute.xlu1 %548 }
 0x250   : > { %600 = vst.msk [vmem:[%s1416_s5 + $0x14] sm:$0x1] %vm437_vm3, %v579_v10  ;;  %569 = vst.msk [vmem:[%s1416_s5 + $0x1b] sm:$0x1] %vm437_vm3, %v549_v11 }
 0x253   : > { %v583_v12 = vpop.permute.xlu0 %582  ;;  %v553_v13 = vpop.permute.xlu1 %552 }
 0x254   : > { %602 = vst.msk [vmem:[%s1416_s5 + $0x24] sm:$0x1] %vm437_vm3, %v583_v12  ;;  %571 = vst.msk [vmem:[%s1416_s5 + $0x2b] sm:$0x1] %vm437_vm3, %v553_v13 }
 0x257   : > { %v611_v14 = vpop.permute.xlu0 %610  ;;  %v581_v15 = vpop.permute.xlu1 %580 }
 0x258   : > { %632 = vst.msk [vmem:[%s1416_s5 + $0x15] sm:$0x1] %vm437_vm3, %v611_v14  ;;  %601 = vst.msk [vmem:[%s1416_s5 + $0x1c] sm:$0x1] %vm437_vm3, %v581_v15 }
 0x25b   : > { %v615_v16 = vpop.permute.xlu0 %614  ;;  %v585_v17 = vpop.permute.xlu1 %584 }
 0x25c   : > { %634 = vst.msk [vmem:[%s1416_s5 + $0x25] sm:$0x1] %vm437_vm3, %v615_v16  ;;  %603 = vst.msk [vmem:[%s1416_s5 + $0x2c] sm:$0x1] %vm437_vm3, %v585_v17 }
 0x25f   : > { %v643_v18 = vpop.permute.xlu0 %642  ;;  %v613_v19 = vpop.permute.xlu1 %612 }
 0x260   : > { %664 = vst.msk [vmem:[%s1416_s5 + $0x16] sm:$0x1] %vm437_vm3, %v643_v18  ;;  %633 = vst.msk [vmem:[%s1416_s5 + $0x1d] sm:$0x1] %vm437_vm3, %v613_v19 }
 0x263   : > { %v647_v20 = vpop.permute.xlu0 %646  ;;  %v617_v21 = vpop.permute.xlu1 %616 }
 0x264   : > { %666 = vst.msk [vmem:[%s1416_s5 + $0x26] sm:$0x1] %vm437_vm3, %v647_v20  ;;  %635 = vst.msk [vmem:[%s1416_s5 + $0x2d] sm:$0x1] %vm437_vm3, %v617_v21 }
 0x267   : > { %v675_v22 = vpop.permute.xlu0 %674  ;;  %v645_v23 = vpop.permute.xlu1 %644 }
 0x268   : > { %696 = vst.msk [vmem:[%s1416_s5 + $0x17] sm:$0x1] %vm437_vm3, %v675_v22  ;;  %665 = vst.msk [vmem:[%s1416_s5 + $0x1e] sm:$0x1] %vm437_vm3, %v645_v23 }
 0x26b   : > { %v679_v24 = vpop.permute.xlu0 %678  ;;  %v649_v25 = vpop.permute.xlu1 %648 }
 0x26c   : > { %698 = vst.msk [vmem:[%s1416_s5 + $0x27] sm:$0x1] %vm437_vm3, %v679_v24  ;;  %667 = vst.msk [vmem:[%s1416_s5 + $0x2e] sm:$0x1] %vm437_vm3, %v649_v25 }
 0x26f   : > { %v491_v26 = vpop.permute.xlu0 %490  ;;  %v677_v27 = vpop.permute.xlu1 %676 }
 0x270   : > { %508 = vst.msk [vmem:[%s1416_s5 + $0x31] sm:$0x1] %vm437_vm3, %v491_v26  ;;  %697 = vst.msk [vmem:[%s1416_s5 + $0x1f] sm:$0x1] %vm437_vm3, %v677_v27 }
 0x273   : > { %v523_v28 = vpop.permute.xlu0 %522  ;;  %v681_v29 = vpop.permute.xlu1 %680 }
 0x274   : > { %540 = vst.msk [vmem:[%s1416_s5 + $0x32] sm:$0x1] %vm437_vm3, %v523_v28  ;;  %699 = vst.msk [vmem:[%s1416_s5 + $0x2f] sm:$0x1] %vm437_vm3, %v681_v29 }
 0x277   : > { %v555_v30 = vpop.permute.xlu0 %554  ;;  %v493_v31 = vpop.permute.xlu1 %492 }
 0x278   : > { %572 = vst.msk [vmem:[%s1416_s5 + $0x33] sm:$0x1] %vm437_vm3, %v555_v30  ;;  %509 = vst.msk [vmem:[%s1416_s5 + $0x39] sm:$0x1] %vm437_vm3, %v493_v31 }
 0x27b   : > { %v587_v32 = vpop.permute.xlu0 %586  ;;  %v525_v33 = vpop.permute.xlu1 %524 }
 0x27c   : > { %604 = vst.msk [vmem:[%s1416_s5 + $0x34] sm:$0x1] %vm437_vm3, %v587_v32  ;;  %541 = vst.msk [vmem:[%s1416_s5 + $0x3a] sm:$0x1] %vm437_vm3, %v525_v33 }
 0x27f   : > { %v619_v34 = vpop.permute.xlu0 %618  ;;  %v557_v35 = vpop.permute.xlu1 %556 }
 0x280   : > { %636 = vst.msk [vmem:[%s1416_s5 + $0x35] sm:$0x1] %vm437_vm3, %v619_v34  ;;  %573 = vst.msk [vmem:[%s1416_s5 + $0x3b] sm:$0x1] %vm437_vm3, %v557_v35 }
 0x283   : > { %v651_v36 = vpop.permute.xlu0 %650  ;;  %v589_v37 = vpop.permute.xlu1 %588 }
 0x284   : > { %668 = vst.msk [vmem:[%s1416_s5 + $0x36] sm:$0x1] %vm437_vm3, %v651_v36  ;;  %605 = vst.msk [vmem:[%s1416_s5 + $0x3c] sm:$0x1] %vm437_vm3, %v589_v37 }
 0x287   : > { %v683_v38 = vpop.permute.xlu0 %682  ;;  %v621_v39 = vpop.permute.xlu1 %620 }
 0x288   : > { %700 = vst.msk [vmem:[%s1416_s5 + $0x37] sm:$0x1] %vm437_vm3, %v683_v38  ;;  %637 = vst.msk [vmem:[%s1416_s5 + $0x3d] sm:$0x1] %vm437_vm3, %v621_v39 }
 0x28b   : > { %v653_v40 = vpop.permute.xlu1 %652 }
 0x28c   : > { %669 = vst.msk [vmem:[%s1416_s5 + $0x3e] sm:$0x1] %vm437_vm3, %v653_v40 }
 0x28f   : > { %v685_v41 = vpop.permute.xlu1 %684 }
 0x290   : > { %701 = vst.msk [vmem:[%s1416_s5 + $0x3f] sm:$0x1] %vm437_vm3, %v685_v41 }
 0x291   : > { %1079 = shalt.err (!%p1076_p13)
}
 0x292   : > { %s1080_s12 = scalar_lea.hbm %s1605_s9, 1024  ;;  %s1084_s28 = scalar_lea.hbm %s1657_s4, 2048 }
 0x293   : > { %p1081_p9 = scmp.ne.s32.totalorder %s1605_s9, %s1080_s12  ;;  %p1085_p11 = scmp.lt.u32.totalorder %s1605_s9, %s1657_s4 }
 0x294   : > { %p1086_p10 = scmp.lt.u32.totalorder %s1084_s28, %s1080_s12  ;;  %p1088_p4 = scmp.lt.u32.totalorder %s1080_s12, %s1605_s9 }
 0x295   : > { %p1082_p5 = pnand %p1081_p9, %p1692_p6 }
 0x296   : > { %p1087_p2 = por %p1086_p10, %p1085_p11 }
 0x297   : > { %p1083_p7 = pneg %p1082_p5 }
 0x298   : > { %p1089_p3 = por %p1088_p4, %p1087_p2 }
 0x29a   : > { %p1090_p8 = pnand %p1089_p3, %p1083_p7 }
 0x29c   : > { %1093 = shalt.err (!%p1090_p8)
}
 0x29d   : > { %s1164_s25 = smov 128   ;;  %s1165_s11 = smov 8  }
 0x29e   : > { %870 = dma.vmem_to_hbm [thread:$0]  (%p1692_p6), %s1607_s13, 1024, %s1605_s9, %s703_s27, %s1164_s25, %s1164_s25, %s1165_s11  }
 0x29f PF: > { %s731_s6 = sand.u32 1, %s1132_s15   ;;  %p1693_p0 = scmp.ne.s32.totalorder %s1669_s22, 0 }
 0x2a0   : > { %p1694_p1 = scmp.ge.s32.totalorder %s1144_s18, 2  ;;  %s732_s10 = scalar_lea.sflag [#allocation4], %s731_s6 }
 0x2a2   : > { %p887_p12 = pnand %p1694_p1, %p1693_p0 }
 0x2a4   : > { %1127 = dma.done.wait (!%p887_p12), %s732_s10, 1024  }
 0x2a5   : > { %1129 = vsyncadd (!%p887_p12), %s732_s10, 4294966272  ;;  %p18_p13 = scmp.ge.s32.totalorder %s1239_s26, 4   ;;  %s1695_s15 = smov %s1136_s16 }
 0x2a6   : > { %s1696_s16 = smov %s1140_s17  ;;  %s1697_s17 = smov %s1281_s20 }
 0x2a7   : > { %s1698_s18 = smov %s1239_s26  ;;  %20 = sbr.rel (!%p18_p13) target bundleno = 9 (0x9), region = 100 }
 0x2ae   :  { %737 = vsyncpa [#allocation3], 1 }
 0x2af   :  { %739 = vsyncpa [#allocation3 + $0x1], 1 }
 0x2b0   :  { %740 = vsyncpa [#allocation6], 1 }
 0x2b1   :  { %741 = vsyncpa [#allocation4], 1 }
 0x2b2   :  { %743 = vsyncpa [#allocation4 + $0x1], 1 }

// kernel: hourglass_block.7
= control target key start
LH: loop header
LB: loop body
LE: loop exit
PB: predicated region body
PF: predicated region fallthrough
CT: control target
= control target key end

     0   :  { %11 = vsyncpa [#allocation4], 0  ;;  %s2026_s0 = inlined_call_operand.hbm [shape: f32[2,8,80], index: 0, kind: input, shape index: {}]   ;;  %s2027_s1 = inlined_call_operand.hbm [shape: f32[8,2], index: 1, kind: input, shape index: {}]   ;;  %s2028_s2 = inlined_call_operand.hbm [shape: f32[9,8,8], index: 2, kind: input, shape index: {}]   ;;  %s2029_s3 = inlined_call_operand.hbm [shape: f32[1,80], index: 3, kind: input, shape index: {}]   ;;  %s2030_s4 = inlined_call_operand.hbm [shape: f32[2,8,80], index: 4, kind: output, shape index: {0}]   ;;  %s2031_s5 = inlined_call_operand.hbm [shape: f32[2,8,2], index: 5, kind: output, shape index: {1}]  }
   0x1   :  { %13 = vsyncpa [#allocation4 + $0x1], 0 }
   0x2   :  { %14 = vsyncpa [#allocation7], 0 }
   0x3   :  { %15 = vsyncpa [#allocation10], 0 }
   0x4   :  { %16 = vsyncpa [#allocation5], 0 }
   0x5   :  { %18 = vsyncpa [#allocation5 + $0x1], 0 }
   0x6   :  { %19 = vsyncpa [#allocation13], 0 }
   0x7   :  { %21 = vsyncpa [#allocation13 + $0x1], 0  ;;  %s1705_s18 = smov 0   ;;  %s1707_s19 = smov 0  }
   0x8   :  { %s1709_s20 = smov 0   ;;  %s1711_s21 = smov 0  }
   0x9 LB: > { %s1726_s22 = sadd.s32 4294967295, %s1651_s21   ;;  %s1219_s23 = sadd.s32 4294967294, %s1651_s21   ;;  %s1651_s21 = sphi %s1711_s21, %s2054_s21   ;;  %s1647_s20 = sphi %s1709_s20, %s2053_s20   ;;  %s1643_s19 = sphi %s1707_s19, %s2052_s19   ;;  %s1639_s18 = sphi %s1705_s18, %s2051_s18  }
   0xa   : > { %p47_p0 = scmp.ne.s32.totalorder %s1643_s19, %s1639_s18  ;;  %p2032_p1 = scmp.eq.s32.totalorder %s1726_s22, 0 }
   0xb   : > { %p140_p3 = scmp.eq.s32.totalorder %s1219_s23, 1  ;;  %p1220_p5 = scmp.ge.s32.totalorder %s1651_s21, 1 }
   0xc   : > { %p1735_p4 = por %p2032_p1, %p47_p0  ;;  %p173_p7 = scmp.lt.s32.totalorder %s1651_s21, 3 }
   0xd   : > { %p1740_p6 = por %p140_p3, %p47_p0  ;;  %s1653_s27 = smov [#allocation6]  }
   0xe   : > { %s2035_s24 = scalar_select %p1735_p4, 1, 0 }
   0xf   : > { %s2036_s25 = scalar_select %p1740_p6, 1, 0 }
  0x10   : > { %p1745_p8 = pnand %p1220_p5, %p173_p7  ;;  %s186_s28 = sshll.u32 %s1653_s27, 4  ;;  %s187_s28 = int_to_ptr.vmem [resolvable:$true] %s186_s28 }
  0x11   : > { %s1654_s29 = smov [#allocation8]   ;;  %s1655_s7 = smov [#allocation9]  }
  0x12   : > { %s2037_s26 = scalar_select %p1745_p8, 1, 0 }
  0x13   : > { %p1346_p10 = pneg %p1745_p8  ;;  %s196_s30 = sshll.u32 %s1654_s29, 4  ;;  %s1758_s30 = int_to_ptr.vmem [resolvable:$true] %s196_s30 }
  0x14   : > { %s1760_s8 = sshll.u32 %s1655_s7, 4  ;;  %s1431_s11 = scalar_lea.hbm %s2027_s1, 128  ;;  %s211_s8 = int_to_ptr.vmem [resolvable:$true] %s1760_s8 }
  0x15   : > { %p1754_p11 = pnand %p1346_p10, %p2032_p1  ;;  %p1432_p12 = scmp.ne.s32.totalorder %s2027_s1, %s1431_s11 }
  0x16   : > { %p1438_p5 = scmp.lt.u32.totalorder %s1431_s11, %s2027_s1 }
  0x17   : > { %p1770_p13 = pneg %p1754_p11 }
  0x19   : > { %p1434_p0 = pnand %p1770_p13, %p1432_p12 }
  0x1b   : > { %p1435_p3 = pneg %p1434_p0 }
  0x1d   : > { %p1440_p7 = pnand %p1438_p5, %p1435_p3 }
  0x1f   : > { %1443 = shalt.err (!%p1440_p7)
}
  0x20   : > { %s1444_s17 = scalar_lea.vmem %s187_s28, 128  ;;  %p1452_p2 = scmp.lt.s32.totalorder %s187_s28, %s187_s28 }
  0x21   : > { %p1445_p10 = scmp.ne.s32.totalorder %s187_s28, %s1444_s17  ;;  %p1453_p6 = scmp.lt.s32.totalorder %s1444_s17, %s1444_s17 }
  0x23   : > { %p1447_p9 = pnand %p1445_p10, %p1770_p13  ;;  %p1454_p4 = por %p1453_p6, %p1452_p2 }
  0x25   : > { %p1448_p1 = pneg %p1447_p9 }
  0x27   : > { %p1455_p8 = pnand %p1454_p4, %p1448_p1 }
  0x29   : > { %1458 = shalt.err (!%p1455_p8)
}
  0x2a   : > { %1349 = dma.hbm_to_vmem [thread:$0]  (!%p1754_p11), %s2027_s1, 128, %s187_s28, [#allocation7]  }
  0x2b   : > { %s1459_s9 = scalar_lea.hbm %s2028_s2, 1152 }
  0x2c   : > { %p1460_p9 = scmp.ne.s32.totalorder %s2028_s2, %s1459_s9  ;;  %p1466_p1 = scmp.lt.u32.totalorder %s1459_s9, %s2028_s2 }
  0x2e   : > { %p1462_p12 = pnand %p1460_p9, %p1770_p13 }
  0x30   : > { %p1463_p2 = pneg %p1462_p12 }
  0x32   : > { %p1468_p4 = pnand %p1466_p1, %p1463_p2 }
  0x34   : > { %1471 = shalt.err (!%p1468_p4)
}
  0x35   : > { %s1472_s28 = scalar_lea.vmem %s1758_s30, 1152  ;;  %p1480_p3 = scmp.lt.s32.totalorder %s1758_s30, %s1758_s30 }
  0x36   : > { %p1473_p6 = scmp.ne.s32.totalorder %s1758_s30, %s1472_s28  ;;  %p1481_p5 = scmp.lt.s32.totalorder %s1472_s28, %s1472_s28 }
  0x38   : > { %p1475_p8 = pnand %p1473_p6, %p1770_p13  ;;  %p1482_p7 = por %p1481_p5, %p1480_p3 }
  0x3a   : > { %p1476_p0 = pneg %p1475_p8 }
  0x3c   : > { %p1483_p10 = pnand %p1482_p7, %p1476_p0 }
  0x3e   : > { %1486 = shalt.err (!%p1483_p10)
}
  0x3f   : > { %s1656_s15 = smov 128   ;;  %s1657_s16 = smov 8  }
  0x40   : > { %1352 = dma.hbm_to_vmem [thread:$0]  (!%p1754_p11), %s2028_s2, 1152, %s1758_s30, [#allocation7], %s1656_s15, %s1656_s15, %s1657_s16  }
  0x41   : > { %s1487_s7 = scalar_lea.hbm %s2029_s3, 16 }
  0x42   : > { %p1488_p9 = scmp.ne.s32.totalorder %s2029_s3, %s1487_s7  ;;  %p1494_p1 = scmp.lt.u32.totalorder %s1487_s7, %s2029_s3 }
  0x44   : > { %p1490_p12 = pnand %p1488_p9, %p1770_p13 }
  0x46   : > { %p1491_p2 = pneg %p1490_p12 }
  0x48   : > { %p1496_p4 = pnand %p1494_p1, %p1491_p2 }
  0x4a   : > { %1499 = shalt.err (!%p1496_p4)
}
  0x4b   : > { %s1500_s13 = scalar_lea.vmem %s211_s8, 16  ;;  %s1507_s30 = scalar_lea.vmem %s211_s8, 32 }
  0x4c   : > { %p1501_p6 = scmp.ne.s32.totalorder %s211_s8, %s1500_s13  ;;  %p1508_p3 = scmp.lt.s32.totalorder %s211_s8, %s211_s8 }
  0x4d   : > { %p1509_p5 = scmp.lt.s32.totalorder %s1507_s30, %s1500_s13 }
  0x4e   : > { %p1503_p8 = pnand %p1501_p6, %p1770_p13 }
  0x4f   : > { %p1510_p7 = por %p1509_p5, %p1508_p3 }
  0x50   : > { %p1504_p0 = pneg %p1503_p8 }
  0x52   : > { %p1511_p10 = pnand %p1510_p7, %p1504_p0 }
  0x54   : > { %1514 = shalt.err (!%p1511_p10)
}
  0x55   : > { %1355 = dma.hbm_to_vmem [thread:$0]  (!%p1754_p11), %s2029_s3, 16, %s211_s8, [#allocation10]  }
  0x56   : > { %s1829_s14 = sadd.s32 1, %s1651_s21   ;;  %s34_s6 = sadd.s32 1, %s1647_s20 }
  0x57   : > { %s31_s16 = ssub.s32 %s1651_s21, %s1829_s14  ;;  %p41_p9 = scmp.ne.s32.totalorder %s1647_s20, %s1643_s19 }
  0x58   : > { %p32_p13 = scmp.eq.s32.totalorder %s31_s16, 0  ;;  %p42_p12 = scmp.eq.s32.totalorder %s1651_s21, 0 }
  0x59   : > { %p1370_p2 = scmp.lt.s32.totalorder %s1651_s21, 2  ;;  %p2040_p4 = scmp.eq.s32.totalorder %s1726_s22, 1 }
  0x5a   : > { %s1839_s17 = scalar_select %p32_p13, %s1647_s20, %s34_s6  }
  0x5b   : > { %p43_p1 = por %p42_p12, %p41_p9  ;;  %p1843_p6 = por %p2040_p4, %p41_p9 }
  0x5c   : > { %s221_s27 = sand.u32 1, %s1647_s20   ;;  %s1226_s29 = sshll.u32 %s1651_s21, 7 }
  0x5d   : > { %s1225_s8 = sshll.u32 %s221_s27, 3  ;;  %s1852_s10 = scalar_lea.hbm %s2026_s0, %s1226_s29 }
  0x5e   : > { %s225_s11 = scalar_lea.vmem [#allocation3], %s1225_s8  ;;  %p1854_p11 = pnand %p1370_p2, %p43_p1 }
  0x5f   : > { %s232_s12 = sshll.u32 %s225_s11, 4  ;;  %s222_s30 = scalar_lea.sflag [#allocation4], %s221_s27  ;;  %s1858_s12 = int_to_ptr.vmem [resolvable:$true] %s232_s12 }
  0x60   : > { %s1515_s28 = scalar_lea.hbm %s1852_s10, 128  ;;  %p1517_p0 = pneg %p1854_p11 }
  0x61   : > { %p1516_p8 = scmp.ne.s32.totalorder %s1852_s10, %s1515_s28  ;;  %s1520_s6 = scalar_lea.hbm %s2026_s0, 256 }
  0x62   : > { %p1521_p7 = scmp.lt.u32.totalorder %s1852_s10, %s2026_s0  ;;  %p1522_p10 = scmp.lt.u32.totalorder %s1520_s6, %s1515_s28 }
  0x63   : > { %p1518_p3 = pnand %p1517_p0, %p1516_p8  ;;  %p1524_p9 = scmp.lt.u32.totalorder %s1515_s28, %s1852_s10 }
  0x64   : > { %p1523_p13 = por %p1522_p10, %p1521_p7 }
  0x65   : > { %p1519_p5 = pneg %p1518_p3 }
  0x66   : > { %p1525_p12 = por %p1524_p9, %p1523_p13 }
  0x68   : > { %p1526_p2 = pnand %p1525_p12, %p1519_p5 }
  0x6a   : > { %1529 = shalt.err (!%p1526_p2)
}
  0x6b   : > { %s1530_s27 = scalar_lea.vmem %s1858_s12, 128  ;;  %s1658_s7 = smov [#allocation3]  }
  0x6c   : > { %p1531_p1 = scmp.ne.s32.totalorder %s1858_s12, %s1530_s27  ;;  %s1535_s9 = sshll.u32 %s1658_s7, 4  ;;  %s1536_s9 = int_to_ptr.vmem [resolvable:$false] %s1535_s9 }
  0x6d   : > { %s1537_s11 = scalar_lea.vmem %s1536_s9, 256  ;;  %p1538_p3 = scmp.lt.s32.totalorder %s1858_s12, %s1536_s9 }
  0x6e   : > { %p1533_p4 = pnand %p1531_p1, %p1517_p0  ;;  %p1539_p7 = scmp.lt.s32.totalorder %s1537_s11, %s1530_s27 }
  0x70   : > { %p1534_p8 = pneg %p1533_p4  ;;  %p1540_p10 = por %p1539_p7, %p1538_p3 }
  0x72   : > { %p1541_p13 = pnand %p1540_p10, %p1534_p8 }
  0x74   : > { %1544 = shalt.err (!%p1541_p13)
}
  0x75   : > { %1359 = dma.hbm_to_vmem [thread:$0]  (!%p1854_p11), %s1852_s10, 128, %s1858_s12, %s222_s30  }
  0x76   : > { %p2043_p5 = scmp.ne.s32.totalorder %s2037_s26, 0 }
  0x77   : > { %s1888_s28 = sand.u32 (!%p2043_p5), 1, %s1643_s19   ;;  %p2044_p0 = scmp.ne.s32.totalorder (!%p2043_p5), %s2035_s24, 0 }
  0x78   : > { %241 = sbr.rel (%p2043_p5) target bundleno = 1053 (0x41d), region = 36  ;;  %s1891_s15 = sshll.u32 (!%p2043_p5), %s1888_s28, 3 }
  0x79   : > { %s244_s16 = scalar_lea.sflag (!%p2043_p5), [#allocation4], %s1888_s28  ;;  %s247_s6 = scalar_lea.vmem (!%p2043_p5), [#allocation3], %s1891_s15 }
  0x7f   : > { %1618 = dma.done.wait (%p2044_p0), %s244_s16, 128  }
  0x80   : > { %1620 = vsyncadd (%p2044_p0), %s244_s16, 4294967168  ;;  %p2045_p11 = scmp.eq.s32.totalorder %s1726_s22, 0 }
  0x82   : > { %1622 = dma.done.wait (%p2045_p11), [#allocation7], 1280   ;;  %p2046_p9 = pmov %p2045_p11 }
  0x84   : > { %1624 = vsyncadd (%p2046_p9), [#allocation7], 4294966016  ;;  %p2047_p12 = pmov %p2046_p9 }
  0x85   : > { %p2048_p2 = pmov %p2046_p9 }
  0x86   : > { %1626 = dma.done.wait (%p2047_p12), [#allocation10], 16  }
  0x87   : > { %1628 = vsyncadd (%p2048_p2), [#allocation10], 4294967280  ;;  %v1659_v0 = vmov 0   ;;  %v1660_v1 = vmov 1   ;;  %v294_v2 = vld [vmem:[#allocation6] sm:$0xff]  ;;  %s1661_s24 = smov 1  }
  0x88   : > { %1426 = vset.pattern.permute.xlu0 %v1659_v0  ;;  %1427 = vset.pattern.permute.xlu1 %v1660_v1  ;;  %v296_v3 = vmul.f32 0.0078125, %v294_v2  ;;  %vm292_vm0 = vcmask 900096   ;;  %v1662_v10 = vmov 0.0   ;;  %v304_v11 = vld [vmem:[%s247_s6] sm:$0xff]  ;;  %s1663_s26 = smov 11   ;;  %vm1664_vm1 = vmmov 0  }
  0x89   : > { %293 = vst.msk [vmem:[#allocation2] sm:$0xff] %vm292_vm0, %v1662_v10  ;;  %1268 = vmatprep.subr.mxu1 %v1662_v10  ;;  %1288 = vmatprep.subr.mxu0 %v1662_v10  ;;  %v1910_v16 = vld [vmem:[#allocation9] ss:$0 sm:$0xff]  ;;  %vm331_vm2 = vcmask 744536   ;;  %s1665_s10 = smov 127   ;;  %s1666_s12 = smov 117  }
  0x8a   : > { %v297_v4 = vmul.f32 %v296_v3, %v296_v3  ;;  %1270 = vmatprep.mubr.msk.f32.mxu1 %vm1664_vm1, %v1662_v10  ;;  %1290 = vmatprep.mubr.msk.f32.mxu0 %vm1664_vm1, %v1662_v10  ;;  %s1667_s13 = smov 108   ;;  %s1668_s30 = smov 116   ;;  %v336_v21 = vld [vmem:[#allocation8 + $0x8] sm:$0xff]  ;;  %vm341_vm3 = vcmask 64512   ;;  %v647_v24 = vld [vmem:[#allocation8 + $0x20] sm:$0xff]  ;;  %v489_v30 = vld [vmem:[#allocation8 + $0x10] sm:$0xff] }
  0x8b   : > { %s1669_s29 = smov 107   ;;  %s1670_s8 = smov 126   ;;  %v333_v26 = vld [vmem:[#allocation8] sm:$0xff]  ;;  %v726_v28 = vld [vmem:[#allocation8 + $0x28] sm:$0xff]  ;;  %v805_v31 = vld [vmem:[#allocation8 + $0x30] sm:$0xff]  ;;  %vm1041_vm4 = vcmask 654336  }
  0x8c   : > { %299 = vrot.lane.b32.xlu0 %v297_v4, %s1661_s24  ;;  %s1671_s27 = smov 106   ;;  %s1672_s7 = smov 118   ;;  %v568_v34 = vld [vmem:[#allocation8 + $0x18] sm:$0xff]  ;;  %v963_v37 = vld [vmem:[#allocation8 + $0x40] sm:$0xff] }
  0x8d   : > { %v884_v35 = vld [vmem:[#allocation8 + $0x38] sm:$0xff]  ;;  %s283_s9 = scalar_lea.vmem [#allocation11], %s1891_s15  ;;  %s1246_s11 = sshll.u32 %s1726_s22, 7 }
  0x8e   : > { %s1956_s24 = scalar_lea.hbm %s2030_s4, %s1246_s11 }
  0x90   : > { %307 = vperm.xlu0 %1426, %v296_v3  }
  0x94   : > { %1428 = vset.pattern.permute.xlu0 %v1660_v1 }
  0xfe   : > { %v300_v5 = vpop.permute.xlu0 %299 }
  0xff   : > { %v302_v6 = vsub.f32 %v296_v3, %v300_v5 }
 0x101   : > { %v303_v7 = vmax.f32 %v302_v6, 0.0 }
 0x103   : > { %v311_v8 = vadd.f32 1e-05, %v303_v7 }
 0x105   : > { %1429 = vrsqrt.f32 %v311_v8 }
 0x10f   : > { %v1430_v9 = vpop.eup %1429  ;;  %v308_v12 = vpop.permute.xlu0 %307 }
 0x110   : > { %315 = vperm.xlu1 %1427, %v1430_v9   ;;  %v310_v13 = vsub.f32 %v304_v11, %v308_v12 }
 0x18f   : > { %v316_v14 = vpop.permute.xlu1 %315 }
 0x190   : > { %v318_v15 = vmul.f32 %v316_v14, %v310_v13 }
 0x192   : > { %v319_v17 = vmax.f32 %v318_v15, 0.0 }
 0x194   : > { %v326_v18 = vmul.f32 %v1910_v16, %v319_v17 }
 0x196   : > { %328 = vrot.lane.b32.xlu1 %v326_v18, %s1663_s26  ;;  %s1075_s26 = sshll.u32 %s283_s9, 4  ;;  %s1076_s26 = int_to_ptr.vmem [resolvable:$true] %s1075_s26 }
 0x208   : > { %v329_v19 = vpop.permute.xlu1 %328 }
 0x209   : > { %332 = vst.msk [vmem:[#allocation2] sm:$0xff] %vm331_vm2, %v329_v19 }
 0x210   : > { %v334_v20 = vld [vmem:[#allocation2] sm:$0xff] }
 0x211   : > { %338 = vrot.lane.b32.xlu0 %v334_v20, %s1665_s10  ;;  %648 = vrot.lane.b32.xlu1 %v334_v20, %s1666_s12  ;;  %s1057_s10 = scalar_lea.sflag [#allocation5], %s1888_s28  ;;  %s1545_s12 = scalar_lea.vmem %s1076_s26, 128 }
 0x212   : > { %p1546_p1 = scmp.ne.s32.totalorder %s1076_s26, %s1545_s12 }
 0x214   : > { %p1547_p4 = pnand %p1546_p1, %p1843_p6 }
 0x215   : > { %806 = vrot.lane.b32.xlu0 %v334_v20, %s1667_s13  ;;  %727 = vrot.lane.b32.xlu1 %v334_v20, %s1668_s30  ;;  %s1673_s13 = smov [#allocation11]  }
 0x216   : > { %p1548_p8 = pneg %p1547_p4  ;;  %s1549_s30 = sshll.u32 %s1673_s13, 4  ;;  %s1550_s30 = int_to_ptr.vmem [resolvable:$false] %s1549_s30 }
 0x217   : > { %p1552_p3 = scmp.lt.s32.totalorder %s1076_s26, %s1550_s30 }
 0x219   : > { %885 = vrot.lane.b32.xlu0 %v334_v20, %s1669_s29  ;;  %490 = vrot.lane.b32.xlu1 %v334_v20, %s1670_s8  ;;  %s1551_s29 = scalar_lea.vmem %s1550_s30, 256 }
 0x21a   : > { %p1553_p7 = scmp.lt.s32.totalorder %s1551_s29, %s1545_s12 }
 0x21c   : > { %p1554_p10 = por %p1553_p7, %p1552_p3 }
 0x21d   : > { %964 = vrot.lane.b32.xlu0 %v334_v20, %s1671_s27  ;;  %569 = vrot.lane.b32.xlu1 %v334_v20, %s1672_s7 }
 0x21e   : > { %p1555_p13 = pnand %p1554_p10, %p1548_p8 }
 0x283   : > { %v339_v22 = vpop.permute.xlu0 %338  ;;  %v649_v23 = vpop.permute.xlu1 %648 }
 0x284   : > { %1269 = vmatpush3.msra.mxu1 %v339_v22  ;;  %1289 = vmatpush3.msra.mxu0 %v649_v23 }
 0x285   : > { %1271 = vmatmul.mubr.msk.f32.vlgmr.msra.gmra.mrb[0].mxu1 %vm341_vm3, %v336_v21  ;;  %1273 = vmatprep.subr.mxu1 %v1662_v10 }
 0x286   : > { %1291 = vmatmul.mubr.msk.f32.vlgmr.msra.gmra.mrb[0].mxu0 %vm341_vm3, %v647_v24  ;;  %1274 = vmatpush3.msra.mxu1 %v334_v20 }
 0x287   : > { %1293 = vmatprep.subr.mxu0 %v1662_v10  ;;  %v728_v25 = vpop.permute.xlu1 %727  ;;  %1275 = vmatprep.mubr.msk.f32.mxu1 %vm1664_vm1, %v1662_v10  ;;  %v807_v29 = vpop.permute.xlu0 %806 }
 0x288   : > { %1294 = vmatpush3.msra.mxu0 %v728_v25  ;;  %1278 = vmatprep.subr.mxu1 %v1662_v10 }
 0x289   : > { %1295 = vmatprep.mubr.msk.f32.mxu0 %vm1664_vm1, %v1662_v10  ;;  %1298 = vmatprep.subr.mxu0 %v1662_v10 }
 0x28b   : > { %v491_v27 = vpop.permute.xlu1 %490  ;;  %v886_v33 = vpop.permute.xlu0 %885 }
 0x28d   : > { %1276 = vmatmul.mubr.msk.f32.vlgmr.msra.gmra.mrb[0].mxu1 %vm341_vm3, %v333_v26 }
 0x28e   : > { %1279 = vmatpush3.msra.mxu1 %v491_v27  ;;  %1296 = vmatmul.mubr.msk.f32.vlgmr.msra.gmra.mrb[0].mxu0 %vm341_vm3, %v726_v28 }
 0x28f   : > { %1299 = vmatpush3.msra.mxu0 %v807_v29  ;;  %1280 = vmatprep.mubr.msk.f32.mxu1 %vm1664_vm1, %v1662_v10  ;;  %v570_v32 = vpop.permute.xlu1 %569  ;;  %v965_v36 = vpop.permute.xlu0 %964 }
 0x290   : > { %1283 = vmatprep.subr.mxu1 %v1662_v10  ;;  %1300 = vmatprep.mubr.msk.f32.mxu0 %vm1664_vm1, %v1662_v10 }
 0x291   : > { %1303 = vmatprep.subr.mxu0 %v1662_v10 }
 0x295   : > { %1281 = vmatmul.mubr.msk.f32.vlgmr.msra.gmra.mrb[0].mxu1 %vm341_vm3, %v489_v30 }
 0x296   : > { %1284 = vmatpush3.msra.mxu1 %v570_v32  ;;  %1301 = vmatmul.mubr.msk.f32.vlgmr.msra.gmra.mrb[0].mxu0 %vm341_vm3, %v805_v31 }
 0x297   : > { %1304 = vmatpush3.msra.mxu0 %v886_v33  ;;  %1285 = vmatprep.mubr.msk.f32.mxu1 %vm1664_vm1, %v1662_v10 }
 0x298   : > { %1305 = vmatprep.mubr.msk.f32.mxu0 %vm1664_vm1, %v1662_v10  ;;  %1308 = vmatprep.subr.mxu0 %v1662_v10 }
 0x29d   : > { %1286 = vmatmul.mubr.msk.f32.vlgmr.msra.gmra.mrb[0].mxu1 %vm341_vm3, %v568_v34 }
 0x29e   : > { %1306 = vmatmul.mubr.msk.f32.vlgmr.msra.gmra.mrb[0].mxu0 %vm341_vm3, %v884_v35 }
 0x29f   : > { %1309 = vmatpush3.msra.mxu0 %v965_v36  ;;  %1310 = vmatprep.mubr.msk.f32.mxu0 %vm1664_vm1, %v1662_v10 }
 0x2a6   : > { %1311 = vmatmul.mubr.msk.f32.vlgmr.msra.gmra.mrb[0].mxu0 %vm341_vm3, %v963_v37 }
 0x370   : > { %v641_v38 = vpop.f32.mrb[0].mxu1 }
 0x371   : > { %v1287_v39 = vpop.f32.mrb[1].mxu1 }
 0x379   : > { %v1036_v40 = vpop.f32.mrb[0].mxu0 }
 0x37a   : > { %v1313_v41 = vadd.f32 %v1036_v40, %v641_v38  ;;  %v1312_v42 = vpop.f32.mrb[1].mxu0 }
 0x37c   : > { %v1043_v43 = vmul.f32 %v1313_v41, %v1910_v16  ;;  %v1049_v44 = vmul.f32 %v1313_v41, %v1313_v41  ;;  %1042 = vst.msk [vmem:[%s283_s9] sm:$0xff] %vm1041_vm4, %v1313_v41 }
 0x37e   : > { %v1044_v45 = vsel %vm1041_vm4, %v1043_v43, 0.0  ;;  %v1050_v46 = vmul.f32 %v1910_v16, %v1049_v44 }
 0x37f   : > { %1045 = vadd.xlane.f32.xlu1 %v1044_v45 }
 0x380   : > { %v1051_v47 = vsel %vm1041_vm4, %v1050_v46, 0.0 }
 0x381   : > { %1052 = vadd.xlane.f32.xlu0 %v1051_v47 }
 0x382   : > { %1558 = shalt.err (!%p1555_p13)
}
 0x383   : > { %s1559_s8 = scalar_lea.hbm %s1956_s24, 128  ;;  %s1563_s9 = scalar_lea.hbm %s2030_s4, 256 }
 0x384   : > { %p1560_p5 = scmp.ne.s32.totalorder %s1956_s24, %s1559_s8  ;;  %p1564_p9 = scmp.lt.u32.totalorder %s1956_s24, %s2030_s4 }
 0x385   : > { %p1565_p12 = scmp.lt.u32.totalorder %s1563_s9, %s1559_s8  ;;  %p1567_p1 = scmp.lt.u32.totalorder %s1559_s8, %s1956_s24 }
 0x386   : > { %p1561_p0 = pnand %p1560_p5, %p1843_p6 }
 0x387   : > { %p1566_p2 = por %p1565_p12, %p1564_p9 }
 0x388   : > { %p1562_p11 = pneg %p1561_p0 }
 0x389   : > { %p1568_p4 = por %p1567_p1, %p1566_p2 }
 0x38b   : > { %p1569_p8 = pnand %p1568_p4, %p1562_p11 }
 0x38d   : > { %1572 = shalt.err (!%p1569_p8)
}
 0x38e   : > { %1342 = dma.vmem_to_hbm [thread:$0]  (%p1843_p6), %s1076_s26, 128, %s1956_s24, %s1057_s10   ;;  %vm1047_vm5 = vcmask 7168   ;;  %vm1054_vm6 = vcmask 15368  }
 0x38f   : > { %s290_s12 = scalar_lea.vmem [#allocation12], %s1891_s15  ;;  %s1982_s8 = scalar_lea.hbm %s2031_s5, %s1246_s11 }
 0x390   : > { %s1088_s13 = sshll.u32 %s290_s12, 4  ;;  %s1062_s24 = scalar_lea.sflag [#allocation13], %s1888_s28  ;;  %s1984_s13 = int_to_ptr.vmem [resolvable:$true] %s1088_s13 }
 0x391   : > { %s1573_s26 = scalar_lea.vmem %s1984_s13, 128  ;;  %s1674_s15 = smov [#allocation12]  }
 0x392   : > { %p1574_p3 = scmp.ne.s32.totalorder %s1984_s13, %s1573_s26  ;;  %s1577_s22 = sshll.u32 %s1674_s15, 4  ;;  %s1578_s22 = int_to_ptr.vmem [resolvable:$false] %s1577_s22 }
 0x393   : > { %s1579_s10 = scalar_lea.vmem %s1578_s22, 256  ;;  %p1580_p13 = scmp.lt.s32.totalorder %s1984_s13, %s1578_s22 }
 0x394   : > { %p1575_p7 = pnand %p1574_p3, %p1843_p6  ;;  %p1581_p5 = scmp.lt.s32.totalorder %s1579_s10, %s1573_s26 }
 0x396   : > { %p1576_p10 = pneg %p1575_p7  ;;  %p1582_p0 = por %p1581_p5, %p1580_p13 }
 0x398   : > { %p1583_p11 = pnand %p1582_p0, %p1576_p10 }
 0x40c   : > { %v1046_v48 = vpop.xlane.xlu1 %1045 }
 0x40d   : > { %1048 = vst.msk [vmem:[%s290_s12] sm:$0xff] %vm1047_vm5, %v1046_v48 }
 0x40e   : > { %v1053_v49 = vpop.xlane.xlu0 %1052 }
 0x40f   : > { %1055 = vst.msk [vmem:[%s290_s12] sm:$0xff] %vm1054_vm6, %v1053_v49 }
 0x410   : > { %1586 = shalt.err (!%p1583_p11)
}
 0x411   : > { %s1587_s28 = scalar_lea.hbm %s1982_s8, 128  ;;  %s1591_s7 = scalar_lea.hbm %s2031_s5, 256 }
 0x412   : > { %p1588_p9 = scmp.ne.s32.totalorder %s1982_s8, %s1587_s28  ;;  %p1592_p1 = scmp.lt.u32.totalorder %s1982_s8, %s2031_s5 }
 0x413   : > { %p1593_p4 = scmp.lt.u32.totalorder %s1591_s7, %s1587_s28  ;;  %p1595_p3 = scmp.lt.u32.totalorder %s1587_s28, %s1982_s8 }
 0x414   : > { %p1589_p12 = pnand %p1588_p9, %p1843_p6 }
 0x415   : > { %p1594_p8 = por %p1593_p4, %p1592_p1 }
 0x416   : > { %p1590_p2 = pneg %p1589_p12 }
 0x417   : > { %p1596_p7 = por %p1595_p3, %p1594_p8 }
 0x419   : > { %p1597_p10 = pnand %p1596_p7, %p1590_p2 }
 0x41b   : > { %1600 = shalt.err (!%p1597_p10)
}
 0x41c   : > { %1343 = dma.vmem_to_hbm [thread:$0]  (%p1843_p6), %s1984_s13, 128, %s1982_s8, %s1062_s24  }
 0x41d PF: > { %s1100_s6 = sand.u32 1, %s1639_s18   ;;  %p2049_p13 = scmp.ne.s32.totalorder %s2036_s25, 0 }
 0x41e   : > { %p2050_p5 = scmp.ge.s32.totalorder %s1651_s21, 2  ;;  %s1101_s12 = scalar_lea.sflag [#allocation5], %s1100_s6 }
 0x420   : > { %p1361_p0 = pnand %p2050_p5, %p2049_p13 }
 0x422   : > { %1630 = dma.done.wait (!%p1361_p0), %s1101_s12, 128  }
 0x423   : > { %1632 = vsyncadd (!%p1361_p0), %s1101_s12, 4294967168  ;;  %s1110_s30 = scalar_lea.sflag [#allocation13], %s1100_s6 }
 0x424   : > { %1634 = dma.done.wait (!%p1361_p0), %s1110_s30, 128  }
 0x425   : > { %1636 = vsyncadd (!%p1361_p0), %s1110_s30, 4294967168  ;;  %p24_p6 = scmp.ge.s32.totalorder %s1829_s14, 4   ;;  %s2051_s18 = smov %s1643_s19 }
 0x426   : > { %s2052_s19 = smov %s1647_s20  ;;  %s2053_s20 = smov %s1839_s17 }
 0x427   : > { %s2054_s21 = smov %s1829_s14  ;;  %26 = sbr.rel (!%p24_p6) target bundleno = 9 (0x9), region = 118 }
 0x42e   :  { %1115 = vsyncpa [#allocation4], 1 }
 0x42f   :  { %1117 = vsyncpa [#allocation4 + $0x1], 1 }
 0x430   :  { %1118 = vsyncpa [#allocation7], 1 }
 0x431   :  { %1119 = vsyncpa [#allocation10], 1 }
 0x432   :  { %1120 = vsyncpa [#allocation5], 1 }
 0x433   :  { %1122 = vsyncpa [#allocation5 + $0x1], 1 }
 0x434   :  { %1123 = vsyncpa [#allocation13], 1 }
 0x435   :  { %1125 = vsyncpa [#allocation13 + $0x1], 1 }

// kernel: hourglass_block.6
= control target key start
LH: loop header
LB: loop body
LE: loop exit
PB: predicated region body
PF: predicated region fallthrough
CT: control target
= control target key end

     0   :  { %11 = vsyncpa [#allocation4], 0  ;;  %s3970_s0 = inlined_call_operand.hbm [shape: f32[2,4,16,16], index: 0, kind: input, shape index: {}]   ;;  %s3971_s1 = inlined_call_operand.hbm [shape: f32[9,8,4], index: 1, kind: input, shape index: {}]   ;;  %s3972_s2 = inlined_call_operand.hbm [shape: f32[1,80], index: 2, kind: input, shape index: {}]   ;;  %s3973_s3 = inlined_call_operand.hbm [shape: f32[2,8,80], index: 3, kind: output, shape index: {0}]   ;;  %s3974_s4 = inlined_call_operand.hbm [shape: f32[2,4,80], index: 4, kind: output, shape index: {1}]   ;;  %s3975_s5 = inlined_call_operand.hbm [shape: f32[2,8,2], index: 5, kind: output, shape index: {2}]  }
   0x1   :  { %13 = vsyncpa [#allocation4 + $0x1], 0 }
   0x2   :  { %14 = vsyncpa [#allocation7], 0 }
   0x3   :  { %15 = vsyncpa [#allocation5], 0 }
   0x4   :  { %17 = vsyncpa [#allocation5 + $0x1], 0 }
   0x5   :  { %18 = vsyncpa [#allocation11], 0 }
   0x6   :  { %20 = vsyncpa [#allocation11 + $0x1], 0  ;;  %s3386_s18 = smov 0   ;;  %s3388_s19 = smov 0  }
   0x7   :  { %s3390_s20 = smov 0   ;;  %s3392_s21 = smov 0  }
   0x8 LB: > { %s3407_s22 = sadd.s32 4294967295, %s3326_s21   ;;  %s2629_s23 = sadd.s32 4294967294, %s3326_s21   ;;  %s3326_s21 = sphi %s3392_s21, %s3999_s21   ;;  %s3322_s20 = sphi %s3390_s20, %s3998_s20   ;;  %s3318_s19 = sphi %s3388_s19, %s3997_s19   ;;  %s3314_s18 = sphi %s3386_s18, %s3996_s18  }
   0x9   : > { %p46_p0 = scmp.ne.s32.totalorder %s3318_s19, %s3314_s18  ;;  %p3976_p1 = scmp.eq.s32.totalorder %s3407_s22, 0 }
   0xa   : > { %p118_p3 = scmp.eq.s32.totalorder %s2629_s23, 1  ;;  %p2630_p5 = scmp.ge.s32.totalorder %s3326_s21, 1 }
   0xb   : > { %p3418_p4 = por %p3976_p1, %p46_p0  ;;  %p177_p7 = scmp.lt.s32.totalorder %s3326_s21, 3 }
   0xc   : > { %p3423_p6 = por %p118_p3, %p46_p0  ;;  %s3328_s27 = smov [#allocation6]  }
   0xd   : > { %s3979_s24 = scalar_select %p3418_p4, 1, 0 }
   0xe   : > { %s3980_s25 = scalar_select %p3423_p6, 1, 0 }
   0xf   : > { %p3428_p8 = pnand %p2630_p5, %p177_p7  ;;  %s189_s28 = sshll.u32 %s3328_s27, 4  ;;  %s3432_s28 = int_to_ptr.vmem [resolvable:$true] %s189_s28 }
  0x10   : > { %s3329_s30 = smov [#allocation8]   ;;  %s3110_s9 = scalar_lea.hbm %s3971_s1, 1152 }
  0x11   : > { %p3027_p9 = pneg %p3428_p8  ;;  %s203_s6 = sshll.u32 %s3329_s30, 4  ;;  %s3443_s6 = int_to_ptr.vmem [resolvable:$true] %s203_s6 }
  0x12   : > { %p3111_p12 = scmp.ne.s32.totalorder %s3971_s1, %s3110_s9  ;;  %p3117_p5 = scmp.lt.u32.totalorder %s3110_s9, %s3971_s1 }
  0x13   : > { %p3439_p11 = pnand %p3027_p9, %p3976_p1 }
  0x15   : > { %p3112_p13 = pneg %p3439_p11 }
  0x17   : > { %p3113_p0 = pnand %p3112_p13, %p3111_p12 }
  0x19   : > { %p3114_p3 = pneg %p3113_p0 }
  0x1b   : > { %p3119_p7 = pnand %p3117_p5, %p3114_p3 }
  0x1d   : > { %3122 = shalt.err (!%p3119_p7)
}
  0x1e   : > { %s3123_s14 = scalar_lea.vmem %s3432_s28, 1152  ;;  %p3131_p2 = scmp.lt.s32.totalorder %s3432_s28, %s3432_s28 }
  0x1f   : > { %p3124_p9 = scmp.ne.s32.totalorder %s3432_s28, %s3123_s14  ;;  %p3132_p12 = scmp.lt.s32.totalorder %s3123_s14, %s3123_s14 }
  0x21   : > { %p3126_p10 = pnand %p3124_p9, %p3112_p13  ;;  %p3133_p0 = por %p3132_p12, %p3131_p2 }
  0x23   : > { %p3127_p1 = pneg %p3126_p10 }
  0x25   : > { %p3134_p6 = pnand %p3133_p0, %p3127_p1 }
  0x27   : > { %3137 = shalt.err (!%p3134_p6)
}
  0x28   : > { %s3330_s15 = smov 128   ;;  %s3331_s16 = smov 8  }
  0x29   : > { %3030 = dma.hbm_to_vmem [thread:$0]  (!%p3439_p11), %s3971_s1, 1152, %s3432_s28, [#allocation7], %s3330_s15, %s3330_s15, %s3331_s16  }
  0x2a   : > { %s3138_s8 = scalar_lea.hbm %s3972_s2, 16 }
  0x2b   : > { %p3139_p1 = scmp.ne.s32.totalorder %s3972_s2, %s3138_s8  ;;  %p3145_p10 = scmp.lt.u32.totalorder %s3138_s8, %s3972_s2 }
  0x2d   : > { %p3141_p2 = pnand %p3139_p1, %p3112_p13 }
  0x2f   : > { %p3142_p6 = pneg %p3141_p2 }
  0x31   : > { %p3147_p3 = pnand %p3145_p10, %p3142_p6 }
  0x33   : > { %3150 = shalt.err (!%p3147_p3)
}
  0x34   : > { %s3151_s28 = scalar_lea.vmem %s3443_s6, 16  ;;  %s3158_s13 = scalar_lea.vmem %s3443_s6, 32 }
  0x35   : > { %p3152_p5 = scmp.ne.s32.totalorder %s3443_s6, %s3151_s28  ;;  %p3159_p12 = scmp.lt.s32.totalorder %s3443_s6, %s3443_s6 }
  0x36   : > { %p3160_p0 = scmp.lt.s32.totalorder %s3158_s13, %s3151_s28 }
  0x37   : > { %p3154_p7 = pnand %p3152_p5, %p3112_p13 }
  0x38   : > { %p3161_p1 = por %p3160_p0, %p3159_p12 }
  0x39   : > { %p3155_p9 = pneg %p3154_p7 }
  0x3b   : > { %p3162_p2 = pnand %p3161_p1, %p3155_p9 }
  0x3d   : > { %3165 = shalt.err (!%p3162_p2)
}
  0x3e   : > { %3033 = dma.hbm_to_vmem [thread:$0]  (!%p3439_p11), %s3972_s2, 16, %s3443_s6, [#allocation7]  }
  0x3f   : > { %s3502_s27 = sadd.s32 1, %s3326_s21   ;;  %s33_s29 = sadd.s32 1, %s3322_s20 }
  0x40   : > { %s30_s30 = ssub.s32 %s3326_s21, %s3502_s27  ;;  %p40_p13 = scmp.ne.s32.totalorder %s3322_s20, %s3318_s19 }
  0x41   : > { %p31_p6 = scmp.eq.s32.totalorder %s30_s30, 0  ;;  %p41_p10 = scmp.eq.s32.totalorder %s3326_s21, 0 }
  0x42   : > { %p3983_p3 = scmp.eq.s32.totalorder %s3407_s22, 1  ;;  %p3050_p7 = scmp.lt.s32.totalorder %s3326_s21, 2 }
  0x43   : > { %s3518_s8 = scalar_select %p31_p6, %s3322_s20, %s33_s29  }
  0x44   : > { %p3512_p5 = por %p3983_p3, %p40_p13  ;;  %p42_p9 = por %p41_p10, %p40_p13 }
  0x45   : > { %s214_s9 = sand.u32 1, %s3322_s20   ;;  %s2723_s6 = sshll.u32 %s3326_s21, 10 }
  0x46   : > { %s3984_s7 = scalar_select %p3512_p5, 1, 0 }
  0x47   : > { %s2634_s10 = sshll.u32 %s214_s9, 6  ;;  %s3525_s28 = scalar_lea.hbm %s3970_s0, %s2723_s6 }
  0x48   : > { %s218_s13 = scalar_lea.vmem [#allocation3], %s2634_s10  ;;  %p3529_p11 = pnand %p3050_p7, %p42_p9 }
  0x49   : > { %s225_s14 = sshll.u32 %s218_s13, 4  ;;  %s3533_s29 = scalar_lea.sflag [#allocation4], %s214_s9  ;;  %s3527_s14 = int_to_ptr.vmem [resolvable:$true] %s225_s14 }
  0x4a   : > { %s3166_s30 = scalar_lea.hbm %s3525_s28, 1024  ;;  %p3168_p0 = pneg %p3529_p11 }
  0x4b   : > { %p3167_p12 = scmp.ne.s32.totalorder %s3525_s28, %s3166_s30  ;;  %s3171_s11 = scalar_lea.hbm %s3970_s0, 2048 }
  0x4c   : > { %p3172_p13 = scmp.lt.u32.totalorder %s3525_s28, %s3970_s0  ;;  %p3173_p6 = scmp.lt.u32.totalorder %s3171_s11, %s3166_s30 }
  0x4d   : > { %p3169_p1 = pnand %p3168_p0, %p3167_p12  ;;  %p3175_p3 = scmp.lt.u32.totalorder %s3166_s30, %s3525_s28 }
  0x4e   : > { %p3174_p10 = por %p3173_p6, %p3172_p13 }
  0x4f   : > { %p3170_p2 = pneg %p3169_p1 }
  0x50   : > { %p3176_p7 = por %p3175_p3, %p3174_p10 }
  0x52   : > { %p3177_p9 = pnand %p3176_p7, %p3170_p2 }
  0x54   : > { %3180 = shalt.err (!%p3177_p9)
}
  0x55   : > { %s3181_s9 = scalar_lea.vmem %s3527_s14, 1024  ;;  %s3332_s10 = smov [#allocation3]  }
  0x56   : > { %p3182_p12 = scmp.ne.s32.totalorder %s3527_s14, %s3181_s9  ;;  %s3186_s6 = sshll.u32 %s3332_s10, 4  ;;  %s3187_s6 = int_to_ptr.vmem [resolvable:$false] %s3186_s6 }
  0x57   : > { %s3188_s12 = scalar_lea.vmem %s3187_s6, 2048  ;;  %p3189_p4 = scmp.lt.s32.totalorder %s3527_s14, %s3187_s6 }
  0x58   : > { %p3184_p1 = pnand %p3182_p12, %p3168_p0  ;;  %p3190_p13 = scmp.lt.s32.totalorder %s3188_s12, %s3181_s9 }
  0x5a   : > { %p3185_p5 = pneg %p3184_p1  ;;  %p3191_p6 = por %p3190_p13, %p3189_p4 }
  0x5c   : > { %p3192_p10 = pnand %p3191_p6, %p3185_p5 }
  0x5e   : > { %3195 = shalt.err (!%p3192_p10)
}
  0x5f   : > { %3037 = dma.hbm_to_vmem [thread:$0]  (!%p3529_p11), %s3525_s28, 1024, %s3527_s14, %s3533_s29, %s3330_s15, %s3330_s15, %s3331_s16  }
  0x60   : > { %237 = sbr.rel (%p3428_p8) target bundleno = 1082 (0x43a), region = 32  ;;  %s3567_s30 = sand.u32 (!%p3428_p8), 1, %s3318_s19  }
  0x61   : > { %s2638_s11 = sshll.u32 (!%p3428_p8), %s3567_s30, 6  ;;  %s240_s13 = scalar_lea.sflag (!%p3428_p8), [#allocation4], %s3567_s30 }
  0x62   : > { %s3571_s9 = scalar_lea.vmem (!%p3428_p8), [#allocation3], %s2638_s11  ;;  %p3986_p4 = scmp.ne.s32.totalorder (!%p3428_p8), %s3979_s24, 0 }
  0x67   : > { %3297 = dma.done.wait (%p3986_p4), %s240_s13, 1024  }
  0x68   : > { %3299 = vsyncadd (%p3986_p4), %s240_s13, 4294966272  ;;  %p3987_p5 = scmp.eq.s32.totalorder %s3407_s22, 0 }
  0x6a   : > { %3301 = dma.done.wait (%p3987_p5), [#allocation7], 1168   ;;  %p3988_p8 = pmov %p3987_p5 }
  0x6b   : > { %v291_v0 = vlaneseq  ;;  %v3333_v1 = vmov 0.0|0.0   ;;  %vm3334_vm0 = vmmov 0   ;;  %v3335_v4 = vmov 0.0   ;;  %v310_v8 = vld [vmem:[%s3571_s9] sm:$0x1]  ;;  %s3337_s24 = smov 11  }
  0x6c   : > { %3303 = vsyncadd (%p3988_p8), [#allocation7], 4294966128  ;;  %2947 = vmatprep.subr.bf16.mxu1 %v3333_v1  ;;  %2971 = vmatprep.subr.bf16.mxu0 %v3333_v1  ;;  %vm327_vm1 = vcmask 1041409   ;;  %vm330_vm4 = vcmask 1042434   ;;  %vm333_vm5 = vcmask 1043459   ;;  %vm335_vm7 = vcmask 130048  }
  0x6d   : > { %v292_v2 = vshrl.u32 %v291_v0, 7  ;;  %v295_v3 = vand.u32 127, %v291_v0  ;;  %2794 = vmatprep.mubr.msk.f32.mxu1 %vm3334_vm0, %v3335_v4  ;;  %2850 = vmatprep.mubr.msk.f32.mxu0 %vm3334_vm0, %v3335_v4  ;;  %v311_v9 = vld [vmem:[%s3571_s9 + $0x10] sm:$0x1]  ;;  %v3336_v11 = vmov 1.0|1.0  }
  0x6e   : > { %v312_v12 = vld [vmem:[%s3571_s9 + $0x20] sm:$0x1]  ;;  %v313_v13 = vld [vmem:[%s3571_s9 + $0x30] sm:$0x1]  ;;  %v314_v14 = vld [vmem:[%s3571_s9 + $0x1] sm:$0x1] }
  0x6f   : > { %v293_v5 = vadd.s32 8, %v292_v2  ;;  %v296_v6 = vmul.u32 2, %v295_v3  ;;  %v315_v15 = vld [vmem:[%s3571_s9 + $0x11] sm:$0x1]  ;;  %v316_v16 = vld [vmem:[%s3571_s9 + $0x21] sm:$0x1]  ;;  %v318_v18 = vmax.f32 %v310_v8, %v314_v14 }
  0x70   : > { %v317_v17 = vld [vmem:[%s3571_s9 + $0x31] sm:$0x1]  ;;  %v319_v19 = vmax.f32 %v311_v9, %v315_v15  ;;  %v320_v20 = vmax.f32 %v312_v12, %v316_v16  ;;  %v485_v22 = vld [vmem:[%s3571_s9 + $0x2] sm:$0x1]  ;;  %v486_v23 = vld [vmem:[%s3571_s9 + $0x12] sm:$0x1] }
  0x71   : > { %vm297_vm2 = vcmp.eq.s32.totalorder %v292_v2, %v296_v6  ;;  %vm298_vm3 = vcmp.eq.s32.totalorder %v293_v5, %v296_v6  ;;  %v303_v10 = vadd.s32 1, %v296_v6  ;;  %v321_v21 = vmax.f32 %v313_v13, %v317_v17  ;;  %v487_v24 = vld [vmem:[%s3571_s9 + $0x22] sm:$0x1]  ;;  %v488_v25 = vld [vmem:[%s3571_s9 + $0x32] sm:$0x1]  ;;  %s3338_s26 = smov 21  }
  0x72   : > { %vm3587_vm6 = vmpackc.low %vm298_vm3, %vm297_vm2  ;;  %v489_v26 = vld [vmem:[%s3571_s9 + $0x3] sm:$0x1]  ;;  %v326_v27 = vrot.slane %v319_v19, 7  ;;  %v329_v28 = vrot.slane %v320_v20, 6  ;;  %v490_v30 = vld [vmem:[%s3571_s9 + $0x13] sm:$0x1] }
  0x73   : > { %2949 = vmatpush3.bf16.msk.msra.mxu1 %vm3587_vm6, %v3336_v11  ;;  %2973 = vmatpush3.bf16.msk.msra.mxu0 %vm3587_vm6, %v3336_v11  ;;  %vm304_vm8 = vcmp.eq.s32.totalorder %v292_v2, %v303_v10  ;;  %v332_v29 = vrot.slane %v321_v21, 5  ;;  %vm305_vm9 = vcmp.eq.s32.totalorder %v293_v5, %v303_v10  ;;  %v491_v31 = vld [vmem:[%s3571_s9 + $0x23] sm:$0x1]  ;;  %v492_v32 = vld [vmem:[%s3571_s9 + $0x33] sm:$0x1]  ;;  %v493_v33 = vmax.f32 %v485_v22, %v489_v26  ;;  %s3339_s15 = smov 31  }
  0x74   : > { %2950 = vmatprep.subr.bf16.mxu1 %v3333_v1  ;;  %2977 = vmatprep.subr.bf16.mxu0 %v3333_v1  ;;  %v494_v34 = vmax.f32 %v486_v23, %v490_v30  ;;  %v656_v35 = vld [vmem:[%s3571_s9 + $0x4] sm:$0x1]  ;;  %v328_v36 = vsel %vm327_vm1, %v326_v27, %v318_v18  ;;  %v495_v37 = vmax.f32 %v487_v24, %v491_v31  ;;  %v657_v39 = vld [vmem:[%s3571_s9 + $0x14] sm:$0x1]  ;;  %vm3622_vm10 = vmpackc.low %vm305_vm9, %vm304_vm8  ;;  %vm289_vm11 = vcmask 896000   ;;  %s3340_s16 = smov 41  }
  0x75   : > { %v496_v38 = vmax.f32 %v488_v25, %v492_v32  ;;  %v658_v40 = vld [vmem:[%s3571_s9 + $0x24] sm:$0x1]  ;;  %v659_v41 = vld [vmem:[%s3571_s9 + $0x34] sm:$0x1]  ;;  %v331_v42 = vsel %vm330_vm4, %v329_v28, %v328_v36  ;;  %v660_v45 = vld [vmem:[%s3571_s9 + $0x5] sm:$0x1] }
  0x76   : > { %v501_v44 = vrot.slane %v494_v34, 7  ;;  %v661_v46 = vld [vmem:[%s3571_s9 + $0x15] sm:$0x1]  ;;  %v334_v47 = vsel %vm333_vm5, %v332_v29, %v331_v42  ;;  %v503_v48 = vrot.slane %v495_v37, 6  ;;  %v662_v49 = vld [vmem:[%s3571_s9 + $0x25] sm:$0x1]  ;;  %v664_v55 = vmax.f32 %v656_v35, %v660_v45 }
  0x77   : > { %v663_v50 = vld [vmem:[%s3571_s9 + $0x35] sm:$0x1]  ;;  %2795 = vmatmul.mubr.msk.f32.vlgmr.msra.gmra.mrb[0].mxu1 %vm335_vm7, %v334_v47  ;;  %v665_v52 = vmax.f32 %v657_v39, %v661_v46  ;;  %v666_v53 = vmax.f32 %v658_v40, %v662_v49  ;;  %v505_v54 = vrot.slane %v496_v38, 5  ;;  %v828_v57 = vld [vmem:[%s3571_s9 + $0x16] sm:$0x1]  ;;  %s3341_s28 = smov 51  }
  0x78   : > { %v502_v51 = vsel %vm327_vm1, %v501_v44, %v493_v33  ;;  %2952 = vmatpush3.bf16.msk.msra.mxu1 %vm3622_vm10, %v3336_v11  ;;  %2801 = vmatprep.mubr.msk.f32.mxu1 %vm3334_vm0, %v3335_v4  ;;  %v667_v56 = vmax.f32 %v659_v41, %v663_v50  ;;  %v829_v61 = vld [vmem:[%s3571_s9 + $0x26] sm:$0x1]  ;;  %v832_v62 = vld [vmem:[%s3571_s9 + $0x17] sm:$0x1]  ;;  %v3647_v0 = vld [vmem:[%s3571_s9 + $0x7] sm:$0x1] }
  0x79   : > { %2953 = vmatprep.subr.bf16.mxu1 %v3333_v1  ;;  %v504_v58 = vsel %vm330_vm4, %v503_v48, %v502_v51  ;;  %v672_v59 = vrot.slane %v665_v52, 7  ;;  %v674_v60 = vrot.slane %v666_v53, 6  ;;  %v3644_v63 = vld [vmem:[%s3571_s9 + $0x6] sm:$0x1]  ;;  %v833_v2 = vld [vmem:[%s3571_s9 + $0x27] sm:$0x1]  ;;  %v836_v15 = vmax.f32 %v828_v57, %v832_v62 }
  0x7a   : > { %v998_v3 = vld [vmem:[%s3571_s9 + $0x8] sm:$0x1]  ;;  %v999_v5 = vld [vmem:[%s3571_s9 + $0x18] sm:$0x1]  ;;  %v1002_v9 = vld [vmem:[%s3571_s9 + $0x9] sm:$0x1]  ;;  %v506_v10 = vsel %vm333_vm5, %v505_v54, %v504_v58  ;;  %v837_v24 = vmax.f32 %v829_v61, %v833_v2  ;;  %v835_v30 = vmax.f32 %v3644_v63, %v3647_v0 }
  0x7b   : > { %2802 = vmatmul.mubr.msk.f32.vlgmr.msra.gmra.mrb[2].mxu1 %vm335_vm7, %v334_v47  ;;  %v1000_v6 = vld [vmem:[%s3571_s9 + $0x28] sm:$0x1]  ;;  %v1001_v8 = vld [vmem:[%s3571_s9 + $0x38] sm:$0x1]  ;;  %v673_v12 = vsel %vm327_vm1, %v672_v59, %v664_v55  ;;  %v676_v13 = vrot.slane %v667_v56, 5  ;;  %v1006_v20 = vmax.f32 %v998_v3, %v1002_v9  ;;  %v843_v35 = vrot.slane %v836_v15, 7 }
  0x7c   : > { %2955 = vmatpush3.bf16.msk.msra.mxu1 %vm3587_vm6, %v3336_v11  ;;  %2808 = vmatprep.mubr.msk.f32.mxu1 %vm3334_vm0, %v3335_v4  ;;  %v3664_v14 = vld [vmem:[%s3571_s9 + $0x36] sm:$0x1]  ;;  %v1003_v16 = vld [vmem:[%s3571_s9 + $0x19] sm:$0x1]  ;;  %v1004_v17 = vld [vmem:[%s3571_s9 + $0x29] sm:$0x1]  ;;  %v675_v29 = vsel %vm330_vm4, %v674_v60, %v673_v12 }
  0x7d   : > { %2956 = vmatprep.subr.bf16.mxu1 %v3333_v1  ;;  %v3670_v18 = vld [vmem:[%s3571_s9 + $0x37] sm:$0x1]  ;;  %v1005_v19 = vld [vmem:[%s3571_s9 + $0x39] sm:$0x1]  ;;  %v1007_v21 = vmax.f32 %v999_v5, %v1003_v16  ;;  %v1008_v22 = vmax.f32 %v1000_v6, %v1004_v17  ;;  %v1169_v23 = vld [vmem:[%s3571_s9 + $0xa] sm:$0x1]  ;;  %v677_v49 = vsel %vm333_vm5, %v676_v13, %v675_v29  ;;  %v844_v12 = vsel %vm327_vm1, %v843_v35, %v835_v30 }
  0x7e   : > { %v1009_v25 = vmax.f32 %v1001_v8, %v1005_v19  ;;  %v1170_v26 = vld [vmem:[%s3571_s9 + $0x1a] sm:$0x1]  ;;  %v1171_v27 = vld [vmem:[%s3571_s9 + $0x2a] sm:$0x1]  ;;  %v1173_v33 = vld [vmem:[%s3571_s9 + $0xb] sm:$0x1]  ;;  %v838_v41 = vmax.f32 %v3664_v14, %v3670_v18 }
  0x7f   : > { %v1172_v28 = vld [vmem:[%s3571_s9 + $0x3a] sm:$0x1]  ;;  %2809 = vmatmul.mubr.msk.f32.vlgmr.msra.gmra.mrb[4].mxu1 %vm335_vm7, %v506_v10  ;;  %v1014_v31 = vrot.slane %v1007_v21, 7  ;;  %v1016_v32 = vrot.slane %v1008_v22, 6  ;;  %v1174_v34 = vld [vmem:[%s3571_s9 + $0x1b] sm:$0x1]  ;;  %v1177_v39 = vmax.f32 %v1169_v23, %v1173_v33 }
  0x80   : > { %2958 = vmatpush3.bf16.msk.msra.mxu1 %vm3622_vm10, %v3336_v11  ;;  %2815 = vmatprep.mubr.msk.f32.mxu1 %vm3334_vm0, %v3335_v4  ;;  %v1018_v36 = vrot.slane %v1009_v25, 5  ;;  %v1175_v37 = vld [vmem:[%s3571_s9 + $0x2b] sm:$0x1]  ;;  %v1176_v38 = vld [vmem:[%s3571_s9 + $0x3b] sm:$0x1]  ;;  %v1178_v40 = vmax.f32 %v1170_v26, %v1174_v34  ;;  %v845_v50 = vrot.slane %v837_v24, 6 }
  0x81   : > { %2959 = vmatprep.subr.bf16.mxu1 %v3333_v1  ;;  %v1015_v42 = vsel %vm327_vm1, %v1014_v31, %v1006_v20  ;;  %v1179_v44 = vmax.f32 %v1171_v27, %v1175_v37  ;;  %v1180_v45 = vmax.f32 %v1172_v28, %v1176_v38  ;;  %v1340_v46 = vld [vmem:[%s3571_s9 + $0xc] sm:$0x1]  ;;  %v1341_v47 = vld [vmem:[%s3571_s9 + $0x1c] sm:$0x1]  ;;  %v1344_v54 = vld [vmem:[%s3571_s9 + $0xd] sm:$0x1] }
  0x82   : > { %v1342_v48 = vld [vmem:[%s3571_s9 + $0x2c] sm:$0x1]  ;;  %v1017_v51 = vsel %vm330_vm4, %v1016_v32, %v1015_v42  ;;  %v1185_v52 = vrot.slane %v1178_v40, 7  ;;  %v1343_v53 = vld [vmem:[%s3571_s9 + $0x3c] sm:$0x1]  ;;  %v1348_v60 = vmax.f32 %v1340_v46, %v1344_v54  ;;  %v847_v23 = vrot.slane %v838_v41, 5 }
  0x83   : > { %2816 = vmatmul.mubr.msk.f32.vlgmr.msra.gmra.mrb[6].mxu1 %vm335_vm7, %v506_v10  ;;  %v3703_v55 = vsel %vm333_vm5, %v1018_v36, %v1017_v51  ;;  %v1187_v56 = vrot.slane %v1179_v44, 6  ;;  %v1189_v57 = vrot.slane %v1180_v45, 5  ;;  %v1345_v58 = vld [vmem:[%s3571_s9 + $0x1d] sm:$0x1]  ;;  %v1346_v59 = vld [vmem:[%s3571_s9 + $0x2d] sm:$0x1]  ;;  %v846_v26 = vsel %vm330_vm4, %v845_v50, %v844_v12 }
  0x84   : > { %2961 = vmatpush3.bf16.msk.msra.mxu1 %vm3587_vm6, %v3336_v11  ;;  %2822 = vmatprep.mubr.msk.f32.mxu1 %vm3334_vm0, %v3335_v4  ;;  %v1186_v61 = vsel %vm327_vm1, %v1185_v52, %v1177_v39  ;;  %v1347_v62 = vld [vmem:[%s3571_s9 + $0x3d] sm:$0x1]  ;;  %v1349_v63 = vmax.f32 %v1341_v47, %v1345_v58  ;;  %v1350_v0 = vmax.f32 %v1342_v48, %v1346_v59  ;;  %v1511_v2 = vld [vmem:[%s3571_s9 + $0xe] sm:$0x1]  ;;  %v1512_v3 = vld [vmem:[%s3571_s9 + $0x1e] sm:$0x1] }
  0x85   : > { %2962 = vmatprep.subr.bf16.mxu1 %v3333_v1  ;;  %2851 = vmatmul.mubr.msk.f32.vlgmr.msra.gmra.mrb[0].mxu0 %vm335_vm7, %v3703_v55  ;;  %v1188_v5 = vsel %vm330_vm4, %v1187_v56, %v1186_v61  ;;  %v1351_v6 = vmax.f32 %v1343_v53, %v1347_v62  ;;  %v1513_v8 = vld [vmem:[%s3571_s9 + $0x2e] sm:$0x1]  ;;  %v1514_v9 = vld [vmem:[%s3571_s9 + $0x3e] sm:$0x1]  ;;  %v1515_v10 = vld [vmem:[%s3571_s9 + $0xf] sm:$0x1]  ;;  %v848_v33 = vsel %vm333_vm5, %v847_v23, %v846_v26 }
  0x86   : > { %2979 = vmatpush3.bf16.msk.msra.mxu0 %vm3587_vm6, %v3336_v11  ;;  %2864 = vmatprep.mubr.msk.f32.mxu0 %vm3334_vm0, %v3335_v4  ;;  %v1190_v13 = vsel %vm333_vm5, %v1189_v57, %v1188_v5  ;;  %v1356_v14 = vrot.slane %v1349_v63, 7  ;;  %v1358_v15 = vrot.slane %v1350_v0, 6  ;;  %v1516_v16 = vld [vmem:[%s3571_s9 + $0x1f] sm:$0x1]  ;;  %v1517_v17 = vld [vmem:[%s3571_s9 + $0x2f] sm:$0x1]  ;;  %v1519_v20 = vmax.f32 %v1511_v2, %v1515_v10 }
  0x87   : > { %2823 = vmatmul.mubr.msk.f32.vlgmr.msra.gmra.mrb[8].mxu1 %vm335_vm7, %v677_v49  ;;  %2983 = vmatprep.subr.bf16.mxu0 %v3333_v1  ;;  %v1360_v18 = vrot.slane %v1351_v6, 5  ;;  %v1518_v19 = vld [vmem:[%s3571_s9 + $0x3f] sm:$0x1]  ;;  %v1520_v21 = vmax.f32 %v1512_v3, %v1516_v16  ;;  %v1521_v22 = vmax.f32 %v1513_v8, %v1517_v17  ;;  %290 = vst.msk [vmem:[#allocation2] sm:$0xf] %vm289_vm11, %v3335_v4  ;;  %s3342_s14 = smov 61  }
  0x88   : > { %2964 = vmatpush3.bf16.msk.msra.mxu1 %vm3622_vm10, %v3336_v11  ;;  %2829 = vmatprep.mubr.msk.f32.mxu1 %vm3334_vm0, %v3335_v4  ;;  %v1357_v24 = vsel %vm327_vm1, %v1356_v14, %v1348_v60  ;;  %v1522_v25 = vmax.f32 %v1514_v9, %v1518_v19  ;;  %s3343_s17 = smov 71   ;;  %s3344_s29 = smov 81   ;;  %vm483_vm12 = vcmask 150616   ;;  %vm654_vm13 = vcmask 232616   ;;  %v1849_v26 = vld [vmem:[#allocation6 + $0x10] sm:$0xff] }
  0x89   : > { %2965 = vmatprep.subr.bf16.mxu1 %v3333_v1  ;;  %2865 = vmatmul.mubr.msk.f32.vlgmr.msra.gmra.mrb[2].mxu0 %vm335_vm7, %v1190_v13  ;;  %v1359_v27 = vsel %vm330_vm4, %v1358_v15, %v1357_v24  ;;  %v1527_v28 = vrot.slane %v1520_v21, 7  ;;  %v1529_v29 = vrot.slane %v1521_v22, 6  ;;  %vm825_vm14 = vcmask 314616   ;;  %s3345_s10 = smov 126   ;;  %s3346_s6 = smov 127   ;;  %v1692_v22 = vld [vmem:[#allocation6 + $0x8] sm:$0xff] }
  0x8a   : > { %2985 = vmatpush3.bf16.msk.msra.mxu0 %vm3587_vm6, %v3336_v11  ;;  %2878 = vmatprep.mubr.msk.f32.mxu0 %vm3334_vm0, %v3335_v4  ;;  %v1361_v30 = vsel %vm333_vm5, %v1360_v18, %v1359_v27  ;;  %v1531_v31 = vrot.slane %v1522_v25, 5  ;;  %vm996_vm15 = vcmask 396616   ;;  %vm1338_vm2 = vcmask 560616   ;;  %s3347_s12 = smov 117   ;;  %s3348_s11 = smov 118   ;;  %v1689_v24 = vld [vmem:[#allocation6] sm:$0xff] }
  0x8b   : > { %2830 = vmatmul.mubr.msk.f32.vlgmr.msra.gmra.mrb[10].mxu1 %vm335_vm7, %v677_v49  ;;  %2989 = vmatprep.subr.bf16.mxu0 %v3333_v1  ;;  %v1528_v32 = vsel %vm327_vm1, %v1527_v28, %v1519_v20  ;;  %vm1167_vm1 = vcmask 478616   ;;  %vm1509_vm3 = vcmask 642616   ;;  %s3349_s13 = smov 108   ;;  %s3350_s9 = smov 116   ;;  %v1929_v28 = vld [vmem:[#allocation6 + $0x18] sm:$0xff] }
  0x8c   : > { %2967 = vmatpush3.bf16.msk.msra.mxu1 %vm3587_vm6, %v3336_v11  ;;  %2836 = vmatprep.mubr.msk.f32.mxu1 %vm3334_vm0, %v3335_v4  ;;  %v1530_v34 = vsel %vm330_vm4, %v1529_v29, %v1528_v32  ;;  %vm1680_vm4 = vcmask 724616   ;;  %v2089_v32 = vld [vmem:[#allocation6 + $0x28] sm:$0xff]  ;;  %p3993_p0 = scmp.ne.s32.totalorder %s3984_s7, 0 }
  0x8d   : > { %2968 = vmatprep.subr.bf16.mxu1 %v3333_v1  ;;  %2879 = vmatmul.mubr.msk.f32.vlgmr.msra.gmra.mrb[4].mxu0 %vm335_vm7, %v1361_v30  ;;  %v1532_v35 = vsel %vm333_vm5, %v1531_v31, %v1530_v34  ;;  %vm1700_vm5 = vcmask 1043456   ;;  %v2169_v34 = vld [vmem:[#allocation6 + $0x30] sm:$0xff] }
  0x8e   : > { %2991 = vmatpush3.bf16.msk.msra.mxu0 %vm3587_vm6, %v3336_v11  ;;  %2892 = vmatprep.mubr.msk.f32.mxu0 %vm3334_vm0, %v3335_v4  ;;  %vm1696_vm6 = vcmask 31744  }
  0x8f   : > { %2837 = vmatmul.mubr.msk.f32.vlgmr.msra.gmra.mrb[12].mxu1 %vm335_vm7, %v848_v33  ;;  %2902 = vmatprep.subr.mxu0 %v3335_v4 }
  0x90   : > { %2970 = vmatpush3.bf16.msk.msra.mxu1 %vm3622_vm10, %v3336_v11  ;;  %2843 = vmatprep.mubr.msk.f32.mxu1 %vm3334_vm0, %v3335_v4 }
  0x91   : > { %2974 = vmatprep.subr.bf16.mxu1 %v3333_v1  ;;  %2893 = vmatmul.mubr.msk.f32.vlgmr.msra.gmra.mrb[6].mxu0 %vm335_vm7, %v1532_v35 }
  0x92   : > { %2904 = vmatprep.mubr.msk.f32.mxu0 %vm3334_vm0, %v3335_v4 }
  0x93   : > { %2844 = vmatmul.mubr.msk.f32.vlgmr.msra.gmra.mrb[14].mxu1 %vm335_vm7, %v848_v33 }
  0x94   : > { %2976 = vmatpush3.bf16.msk.msra.mxu1 %vm3622_vm10, %v3336_v11  ;;  %2857 = vmatprep.mubr.msk.f32.mxu1 %vm3334_vm0, %v3335_v4 }
  0x95   : > { %2980 = vmatprep.subr.bf16.mxu1 %v3333_v1 }
  0x97   : > { %2858 = vmatmul.mubr.msk.f32.vlgmr.msra.gmra.mrb[16].mxu1 %vm335_vm7, %v3703_v55 }
  0x98   : > { %2982 = vmatpush3.bf16.msk.msra.mxu1 %vm3622_vm10, %v3336_v11  ;;  %2871 = vmatprep.mubr.msk.f32.mxu1 %vm3334_vm0, %v3335_v4 }
  0x99   : > { %2986 = vmatprep.subr.bf16.mxu1 %v3333_v1 }
  0x9b   : > { %2872 = vmatmul.mubr.msk.f32.vlgmr.msra.gmra.mrb[18].mxu1 %vm335_vm7, %v1190_v13 }
  0x9c   : > { %2988 = vmatpush3.bf16.msk.msra.mxu1 %vm3622_vm10, %v3336_v11  ;;  %2885 = vmatprep.mubr.msk.f32.mxu1 %vm3334_vm0, %v3335_v4 }
  0x9d   : > { %2992 = vmatprep.subr.bf16.mxu1 %v3333_v1 }
  0x9f   : > { %2886 = vmatmul.mubr.msk.f32.vlgmr.msra.gmra.mrb[20].mxu1 %vm335_vm7, %v1361_v30  ;;  %v2009_v30 = vld [vmem:[#allocation6 + $0x20] sm:$0xff] }
  0xa0   : > { %2994 = vmatpush3.bf16.msk.msra.mxu1 %vm3622_vm10, %v3336_v11  ;;  %2899 = vmatprep.mubr.msk.f32.mxu1 %vm3334_vm0, %v3335_v4 }
  0xa3   : > { %2900 = vmatmul.mubr.msk.f32.vlgmr.msra.gmra.mrb[22].mxu1 %vm335_vm7, %v1532_v35  ;;  %vm2408_vm7 = vcmask 654336  }
 0x14a   : > { %v404_v7 = vpop.f32.mrb[0].mxu1 }
 0x14b   : > { %v2796_v36 = vpop.f32.mrb[1].mxu1 }
 0x14e   : > { %v474_v37 = vpop.f32.mrb[2].mxu1 }
 0x14f   : > { %v478_v38 = vmax.f32 %v404_v7, %v474_v37  ;;  %v2803_v39 = vpop.f32.mrb[3].mxu1  ;;  %v2249_v7 = vld [vmem:[#allocation6 + $0x38] sm:$0xff]  ;;  %v2329_v37 = vld [vmem:[#allocation6 + $0x40] sm:$0xff] }
 0x151   : > { %480 = vrot.lane.b32.xlu0 %v478_v38, %s3337_s24  ;;  %s3351_s24 = smov 106   ;;  %v2714_v38 = vld [vmem:[#allocation8] ss:$0 sm:$0xff] }
 0x152   : > { %v575_v1 = vpop.f32.mrb[4].mxu1 }
 0x153   : > { %v2810_v40 = vpop.f32.mrb[5].mxu1 }
 0x156   : > { %v645_v41 = vpop.f32.mrb[6].mxu1 }
 0x157   : > { %v649_v43 = vmax.f32 %v575_v1, %v645_v41  ;;  %v2817_v11 = vpop.f32.mrb[7].mxu1 }
 0x158   : > { %v1088_v42 = vpop.f32.mrb[0].mxu0 }
 0x159   : > { %651 = vrot.lane.b32.xlu0 %v649_v43, %s3338_s26  ;;  %v2852_v44 = vpop.f32.mrb[1].mxu0  ;;  %s3352_s26 = smov 107  }
 0x15a   : > { %v746_v45 = vpop.f32.mrb[8].mxu1 }
 0x15b   : > { %v2824_v46 = vpop.f32.mrb[9].mxu1 }
 0x15c   : > { %v1259_v47 = vpop.f32.mrb[2].mxu0 }
 0x15d   : > { %v2866_v48 = vpop.f32.mrb[3].mxu0 }
 0x15e   : > { %v816_v49 = vpop.f32.mrb[10].mxu1 }
 0x15f   : > { %v820_v50 = vmax.f32 %v746_v45, %v816_v49  ;;  %v2831_v51 = vpop.f32.mrb[11].mxu1 }
 0x160   : > { %v1430_v52 = vpop.f32.mrb[4].mxu0 }
 0x161   : > { %822 = vrot.lane.b32.xlu1 %v820_v50, %s3339_s15  ;;  %v2880_v53 = vpop.f32.mrb[5].mxu0  ;;  %s2641_s15 = sshll.u32 %s3567_s30, 3 }
 0x162   : > { %v917_v54 = vpop.f32.mrb[12].mxu1 }
 0x163   : > { %v2838_v55 = vpop.f32.mrb[13].mxu1 }
 0x164   : > { %v1601_v56 = vpop.f32.mrb[6].mxu0 }
 0x165   : > { %v2894_v57 = vpop.f32.mrb[7].mxu0 }
 0x166   : > { %v987_v58 = vpop.f32.mrb[14].mxu1 }
 0x167   : > { %v991_v59 = vmax.f32 %v917_v54, %v987_v58  ;;  %v2845_v60 = vpop.f32.mrb[15].mxu1 }
 0x169   : > { %993 = vrot.lane.b32.xlu1 %v991_v59, %s3340_s16  ;;  %s273_s16 = scalar_lea.vmem [#allocation9], %s2641_s15 }
 0x16a   : > { %v1158_v61 = vpop.f32.mrb[16].mxu1 }
 0x16b   : > { %v1162_v62 = vmax.f32 %v1088_v42, %v1158_v61  ;;  %v2859_v63 = vpop.f32.mrb[17].mxu1 }
 0x16d   : > { %1164 = vrot.lane.b32.xlu0 %v1162_v62, %s3341_s28  ;;  %s2718_s28 = sshll.u32 %s3407_s22, 7 }
 0x16e   : > { %v1329_v0 = vpop.f32.mrb[18].mxu1 }
 0x16f   : > { %v1333_v2 = vmax.f32 %v1259_v47, %v1329_v0  ;;  %v2873_v3 = vpop.f32.mrb[19].mxu1 }
 0x171   : > { %1335 = vrot.lane.b32.xlu1 %v1333_v2, %s3342_s14 }
 0x172   : > { %v1500_v5 = vpop.f32.mrb[20].mxu1 }
 0x173   : > { %v1504_v6 = vmax.f32 %v1430_v52, %v1500_v5  ;;  %v2887_v8 = vpop.f32.mrb[21].mxu1 }
 0x175   : > { %1506 = vrot.lane.b32.xlu0 %v1504_v6, %s3343_s17 }
 0x176   : > { %v1671_v9 = vpop.f32.mrb[22].mxu1 }
 0x177   : > { %v1675_v10 = vmax.f32 %v1601_v56, %v1671_v9  ;;  %v2901_v12 = vpop.f32.mrb[23].mxu1 }
 0x179   : > { %1677 = vrot.lane.b32.xlu1 %v1675_v10, %s3344_s29  ;;  %s3863_s29 = scalar_lea.hbm %s3973_s3, %s2718_s28 }
 0x1c3   : > { %v481_v13 = vpop.permute.xlu0 %480 }
 0x1c4   : > { %484 = vst.msk [vmem:[#allocation2] sm:$0xf] %vm483_vm12, %v481_v13 }
 0x1cb   : > { %v652_v14 = vpop.permute.xlu0 %651 }
 0x1cc   : > { %655 = vst.msk [vmem:[#allocation2] sm:$0xf] %vm654_vm13, %v652_v14 }
 0x1d3   : > { %v823_v15 = vpop.permute.xlu1 %822 }
 0x1d4   : > { %826 = vst.msk [vmem:[#allocation2] sm:$0xf] %vm825_vm14, %v823_v15 }
 0x1db   : > { %v994_v16 = vpop.permute.xlu1 %993 }
 0x1dc   : > { %997 = vst.msk [vmem:[#allocation2] sm:$0xf] %vm996_vm15, %v994_v16 }
 0x1df   : > { %v1165_v17 = vpop.permute.xlu0 %1164 }
 0x1e0   : > { %1168 = vst.msk [vmem:[#allocation2] sm:$0xf] %vm1167_vm1, %v1165_v17 }
 0x1e3   : > { %v1336_v18 = vpop.permute.xlu1 %1335 }
 0x1e4   : > { %1339 = vst.msk [vmem:[#allocation2] sm:$0xf] %vm1338_vm2, %v1336_v18 }
 0x1e7   : > { %v1507_v19 = vpop.permute.xlu0 %1506 }
 0x1e8   : > { %1510 = vst.msk [vmem:[#allocation2] sm:$0xf] %vm1509_vm3, %v1507_v19 }
 0x1eb   : > { %v1678_v20 = vpop.permute.xlu1 %1677 }
 0x1ec   : > { %1681 = vst.msk [vmem:[#allocation2] sm:$0xf] %vm1680_vm4, %v1678_v20 }
 0x1f3   : > { %v1690_v21 = vld [vmem:[#allocation2] sm:$0xf] }
 0x1f4   : > { %1850 = vrot.lane.b32.xlu1 %v1690_v21, %s3345_s10  ;;  %1694 = vrot.lane.b32.xlu0 %v1690_v21, %s3346_s6  ;;  %v1682_v42 = vld [vmem:[#allocation2] sm:$0xf]  ;;  %s2453_s10 = sshll.u32 %s273_s16, 4  ;;  %s2430_s6 = scalar_lea.sflag [#allocation5], %s3567_s30  ;;  %s2454_s10 = int_to_ptr.vmem [resolvable:$true] %s2453_s10 }
 0x1f8   : > { %2010 = vrot.lane.b32.xlu1 %v1690_v21, %s3347_s12  ;;  %1930 = vrot.lane.b32.xlu0 %v1690_v21, %s3348_s11  ;;  %s3196_s11 = scalar_lea.vmem %s2454_s10, 128 }
 0x1f9   : > { %p3197_p11 = scmp.ne.s32.totalorder %s2454_s10, %s3196_s11 }
 0x1fb   : > { %p3198_p2 = pnand %p3197_p11, %p3993_p0 }
 0x1fc   : > { %2170 = vrot.lane.b32.xlu1 %v1690_v21, %s3349_s13  ;;  %2090 = vrot.lane.b32.xlu0 %v1690_v21, %s3350_s9  ;;  %s3353_s13 = smov [#allocation9]  }
 0x1fd   : > { %p3199_p3 = pneg %p3198_p2  ;;  %s3200_s9 = sshll.u32 %s3353_s13, 4  ;;  %s3201_s9 = int_to_ptr.vmem [resolvable:$false] %s3200_s9 }
 0x1fe   : > { %p3203_p7 = scmp.lt.s32.totalorder %s2454_s10, %s3201_s9 }
 0x200   : > { %2330 = vrot.lane.b32.xlu1 %v1690_v21, %s3351_s24  ;;  %2250 = vrot.lane.b32.xlu0 %v1690_v21, %s3352_s26  ;;  %s3202_s24 = scalar_lea.vmem %s3201_s9, 256 }
 0x201   : > { %p3204_p9 = scmp.lt.s32.totalorder %s3202_s24, %s3196_s11 }
 0x203   : > { %p3205_p12 = por %p3204_p9, %p3203_p7 }
 0x205   : > { %p3206_p1 = pnand %p3205_p12, %p3199_p3 }
 0x266   : > { %v1695_v23 = vpop.permute.xlu0 %1694  ;;  %v1851_v25 = vpop.permute.xlu1 %1850 }
 0x267   : > { %2903 = vmatpush3.msk.msra.mxu0 %vm1700_vm5, %v1695_v23 }
 0x268   : > { %2905 = vmatmul.mubr.msk.f32.vlgmr.msra.gmra.mrb[8].mxu0 %vm1696_vm6, %v1692_v22  ;;  %2907 = vmatprep.subr.mxu0 %v3335_v4 }
 0x269   : > { %2908 = vmatpush3.msk.msra.mxu0 %vm1700_vm5, %v1690_v21  ;;  %2909 = vmatprep.mubr.msk.f32.mxu0 %vm3334_vm0, %v3335_v4 }
 0x26a   : > { %2912 = vmatprep.subr.mxu0 %v3335_v4  ;;  %v1931_v27 = vpop.permute.xlu0 %1930  ;;  %v2011_v29 = vpop.permute.xlu1 %2010 }
 0x26e   : > { %v2091_v31 = vpop.permute.xlu0 %2090  ;;  %v2171_v33 = vpop.permute.xlu1 %2170 }
 0x270   : > { %2910 = vmatmul.mubr.msk.f32.vlgmr.msra.gmra.mrb[8].mxu0 %vm1696_vm6, %v1689_v24 }
 0x271   : > { %2913 = vmatpush3.msk.msra.mxu0 %vm1700_vm5, %v1851_v25  ;;  %2914 = vmatprep.mubr.msk.f32.mxu0 %vm3334_vm0, %v3335_v4 }
 0x272   : > { %2917 = vmatprep.subr.mxu0 %v3335_v4  ;;  %v2251_v35 = vpop.permute.xlu0 %2250  ;;  %v2331_v36 = vpop.permute.xlu1 %2330 }
 0x278   : > { %2915 = vmatmul.mubr.msk.f32.vlgmr.msra.gmra.mrb[8].mxu0 %vm1696_vm6, %v1849_v26 }
 0x279   : > { %2918 = vmatpush3.msk.msra.mxu0 %vm1700_vm5, %v1931_v27  ;;  %2919 = vmatprep.mubr.msk.f32.mxu0 %vm3334_vm0, %v3335_v4 }
 0x27a   : > { %2922 = vmatprep.subr.mxu0 %v3335_v4 }
 0x280   : > { %2920 = vmatmul.mubr.msk.f32.vlgmr.msra.gmra.mrb[8].mxu0 %vm1696_vm6, %v1929_v28 }
 0x281   : > { %2923 = vmatpush3.msk.msra.mxu0 %vm1700_vm5, %v2011_v29  ;;  %2924 = vmatprep.mubr.msk.f32.mxu0 %vm3334_vm0, %v3335_v4 }
 0x282   : > { %2927 = vmatprep.subr.mxu0 %v3335_v4 }
 0x288   : > { %2925 = vmatmul.mubr.msk.f32.vlgmr.msra.gmra.mrb[8].mxu0 %vm1696_vm6, %v2009_v30 }
 0x289   : > { %2928 = vmatpush3.msk.msra.mxu0 %vm1700_vm5, %v2091_v31  ;;  %2929 = vmatprep.mubr.msk.f32.mxu0 %vm3334_vm0, %v3335_v4 }
 0x28a   : > { %2932 = vmatprep.subr.mxu0 %v3335_v4 }
 0x290   : > { %2930 = vmatmul.mubr.msk.f32.vlgmr.msra.gmra.mrb[8].mxu0 %vm1696_vm6, %v2089_v32 }
 0x291   : > { %2933 = vmatpush3.msk.msra.mxu0 %vm1700_vm5, %v2171_v33  ;;  %2934 = vmatprep.mubr.msk.f32.mxu0 %vm3334_vm0, %v3335_v4 }
 0x292   : > { %2937 = vmatprep.subr.mxu0 %v3335_v4 }
 0x298   : > { %2935 = vmatmul.mubr.msk.f32.vlgmr.msra.gmra.mrb[8].mxu0 %vm1696_vm6, %v2169_v34 }
 0x299   : > { %2938 = vmatpush3.msk.msra.mxu0 %vm1700_vm5, %v2251_v35  ;;  %2939 = vmatprep.mubr.msk.f32.mxu0 %vm3334_vm0, %v3335_v4 }
 0x29a   : > { %2942 = vmatprep.subr.mxu0 %v3335_v4 }
 0x2a0   : > { %2940 = vmatmul.mubr.msk.f32.vlgmr.msra.gmra.mrb[8].mxu0 %vm1696_vm6, %v2249_v7 }
 0x2a1   : > { %2943 = vmatpush3.msk.msra.mxu0 %vm1700_vm5, %v2331_v36  ;;  %2944 = vmatprep.mubr.msk.f32.mxu0 %vm3334_vm0, %v3335_v4 }
 0x2a8   : > { %2945 = vmatmul.mubr.msk.f32.vlgmr.msra.gmra.mrb[8].mxu0 %vm1696_vm6, %v2329_v37 }
 0x37b   : > { %v2403_v39 = vpop.f32.mrb[8].mxu0 }
 0x37c   : > { %v2422_v1 = vmul.f32 %v2403_v39, %v2403_v39  ;;  %v2946_v40 = vpop.f32.mrb[9].mxu0  ;;  %v2416_v41 = vmul.f32 %v2714_v38, %v2403_v39  ;;  %2409 = vst.msk [vmem:[%s273_s16] sm:$0xff] %vm2408_vm7, %v2403_v39 }
 0x37e   : > { %v2417_v43 = vsel %vm2408_vm7, %v2416_v41, 0.0  ;;  %v2423_v11 = vmul.f32 %v2714_v38, %v2422_v1 }
 0x37f   : > { %2418 = vadd.xlane.f32.xlu0 %v2417_v43 }
 0x380   : > { %v2424_v4 = vsel %vm2408_vm7, %v2423_v11, 0.0 }
 0x381   : > { %2425 = vadd.xlane.f32.xlu1 %v2424_v4 }
 0x395   : > { %1684 = vrot.lane.b32.xlu0 %v1682_v42, %s3347_s12 }
 0x396   : > { %3209 = shalt.err (!%p3206_p1)
}
 0x397   : > { %s3210_s12 = scalar_lea.hbm %s3863_s29, 128  ;;  %s3214_s14 = scalar_lea.hbm %s3973_s3, 256 }
 0x398   : > { %p3211_p13 = scmp.ne.s32.totalorder %s3863_s29, %s3210_s12  ;;  %p3215_p4 = scmp.lt.u32.totalorder %s3863_s29, %s3973_s3 }
 0x399   : > { %p3216_p5 = scmp.lt.u32.totalorder %s3214_s14, %s3210_s12  ;;  %p3218_p11 = scmp.lt.u32.totalorder %s3210_s12, %s3863_s29 }
 0x39a   : > { %p3212_p6 = pnand %p3211_p13, %p3993_p0 }
 0x39b   : > { %p3217_p8 = por %p3216_p5, %p3215_p4 }
 0x39c   : > { %p3213_p10 = pneg %p3212_p6 }
 0x39d   : > { %p3219_p2 = por %p3218_p11, %p3217_p8 }
 0x39f   : > { %p3220_p3 = pnand %p3219_p2, %p3213_p10 }
 0x3a1   : > { %3223 = shalt.err (!%p3220_p3)
}
 0x3a2   : > { %3021 = dma.vmem_to_hbm [thread:$0]  (%p3993_p0), %s2454_s10, 128, %s3863_s29, %s2430_s6   ;;  %vm2420_vm0 = vcmask 7168   ;;  %vm2427_vm8 = vcmask 15368   ;;  %vm1687_vm9 = vcmask 650240  }
 0x3a3   : > { %s2642_s11 = sshll.u32 %s3567_s30, 2  ;;  %s2434_s9 = sand.u32 1, %s3407_s22  }
 0x3a4   : > { %s2719_s24 = sshll.u32 %s3407_s22, 6  ;;  %s280_s26 = scalar_lea.vmem [#allocation10], %s2642_s11 }
 0x3a5   : > { %s2466_s12 = sshll.u32 %s280_s26, 4  ;;  %s287_s16 = scalar_lea.vmem [#allocation12], %s2641_s15  ;;  %s3893_s12 = int_to_ptr.vmem [resolvable:$true] %s2466_s12 }
 0x3a6   : > { %s2479_s14 = sshll.u32 %s287_s16, 4  ;;  %s3891_s29 = scalar_lea.hbm %s3974_s4, %s2719_s24  ;;  %s3902_s14 = int_to_ptr.vmem [resolvable:$true] %s2479_s14 }
 0x3a7   : > { %s3900_s15 = scalar_lea.hbm %s3975_s5, %s2718_s28  ;;  %s3904_s6 = scalar_lea.sflag [#allocation11], %s2434_s9 }
 0x3a8   : > { %s3224_s11 = scalar_lea.vmem %s3893_s12, 64  ;;  %s3354_s24 = smov [#allocation10]  }
 0x3a9   : > { %p3225_p7 = scmp.ne.s32.totalorder %s3893_s12, %s3224_s11 }
 0x3ab   : > { %p3226_p9 = pnand %p3225_p7, %p3993_p0 }
 0x3ad   : > { %p3227_p12 = pneg %p3226_p9 }
 0x40c   : > { %v2419_v44 = vpop.xlane.xlu0 %2418 }
 0x40d   : > { %2421 = vst.msk [vmem:[%s287_s16] sm:$0xff] %vm2420_vm0, %v2419_v44 }
 0x40e   : > { %v2426_v45 = vpop.xlane.xlu1 %2425 }
 0x40f   : > { %2428 = vst.msk [vmem:[%s287_s16] sm:$0xff] %vm2427_vm8, %v2426_v45  ;;  %s3228_s16 = sshll.u32 %s3354_s24, 4  ;;  %s3229_s16 = int_to_ptr.vmem [resolvable:$false] %s3228_s16 }
 0x410   : > { %v1685_v46 = vpop.permute.xlu0 %1684  ;;  %s3230_s17 = scalar_lea.vmem %s3229_s16, 128  ;;  %p3231_p1 = scmp.lt.s32.totalorder %s3893_s12, %s3229_s16 }
 0x411   : > { %1688 = vst.msk [vmem:[%s280_s26] sm:$0xf] %vm1687_vm9, %v1685_v46  ;;  %p3232_p13 = scmp.lt.s32.totalorder %s3230_s17, %s3224_s11 }
 0x413   : > { %p3233_p6 = por %p3232_p13, %p3231_p1 }
 0x415   : > { %p3234_p10 = pnand %p3233_p6, %p3227_p12 }
 0x417   : > { %3237 = shalt.err (!%p3234_p10)
}
 0x418   : > { %s3238_s22 = scalar_lea.hbm %s3891_s29, 64  ;;  %s3242_s26 = scalar_lea.hbm %s3974_s4, 128 }
 0x419   : > { %p3239_p4 = scmp.ne.s32.totalorder %s3891_s29, %s3238_s22  ;;  %p3243_p11 = scmp.lt.u32.totalorder %s3891_s29, %s3974_s4 }
 0x41a   : > { %p3244_p2 = scmp.lt.u32.totalorder %s3242_s26, %s3238_s22  ;;  %p3246_p7 = scmp.lt.u32.totalorder %s3238_s22, %s3891_s29 }
 0x41b   : > { %p3240_p5 = pnand %p3239_p4, %p3993_p0 }
 0x41c   : > { %p3245_p3 = por %p3244_p2, %p3243_p11 }
 0x41d   : > { %p3241_p8 = pneg %p3240_p5 }
 0x41e   : > { %p3247_p9 = por %p3246_p7, %p3245_p3 }
 0x420   : > { %p3248_p12 = pnand %p3247_p9, %p3241_p8 }
 0x422   : > { %3251 = shalt.err (!%p3248_p12)
}
 0x423   : > { %3022 = dma.vmem_to_hbm [thread:$0]  (%p3993_p0), %s3893_s12, 64, %s3891_s29, %s3904_s6  }
 0x424   : > { %s3252_s10 = scalar_lea.vmem %s3902_s14, 128  ;;  %s3355_s11 = smov [#allocation12]  }
 0x425   : > { %p3253_p1 = scmp.ne.s32.totalorder %s3902_s14, %s3252_s10  ;;  %s3256_s24 = sshll.u32 %s3355_s11, 4  ;;  %s3257_s24 = int_to_ptr.vmem [resolvable:$false] %s3256_s24 }
 0x426   : > { %s3258_s16 = scalar_lea.vmem %s3257_s24, 256  ;;  %p3259_p10 = scmp.lt.s32.totalorder %s3902_s14, %s3257_s24 }
 0x427   : > { %p3254_p13 = pnand %p3253_p1, %p3993_p0  ;;  %p3260_p4 = scmp.lt.s32.totalorder %s3258_s16, %s3252_s10 }
 0x429   : > { %p3255_p6 = pneg %p3254_p13  ;;  %p3261_p5 = por %p3260_p4, %p3259_p10 }
 0x42b   : > { %p3262_p8 = pnand %p3261_p5, %p3255_p6 }
 0x42d   : > { %3265 = shalt.err (!%p3262_p8)
}
 0x42e   : > { %s3266_s12 = scalar_lea.hbm %s3900_s15, 128  ;;  %s3270_s22 = scalar_lea.hbm %s3975_s5, 256 }
 0x42f   : > { %p3267_p11 = scmp.ne.s32.totalorder %s3900_s15, %s3266_s12  ;;  %p3271_p7 = scmp.lt.u32.totalorder %s3900_s15, %s3975_s5 }
 0x430   : > { %p3272_p9 = scmp.lt.u32.totalorder %s3270_s22, %s3266_s12  ;;  %p3274_p1 = scmp.lt.u32.totalorder %s3266_s12, %s3900_s15 }
 0x431   : > { %p3268_p2 = pnand %p3267_p11, %p3993_p0 }
 0x432   : > { %p3273_p12 = por %p3272_p9, %p3271_p7 }
 0x433   : > { %p3269_p3 = pneg %p3268_p2 }
 0x434   : > { %p3275_p13 = por %p3274_p1, %p3273_p12 }
 0x436   : > { %p3276_p6 = pnand %p3275_p13, %p3269_p3 }
 0x438   : > { %3279 = shalt.err (!%p3276_p6)
}
 0x439   : > { %3023 = dma.vmem_to_hbm [thread:$0]  (%p3993_p0), %s3902_s14, 128, %s3900_s15, %s3904_s6  }
 0x43a PF: > { %s2491_s26 = sand.u32 1, %s3314_s18   ;;  %p3994_p10 = scmp.ne.s32.totalorder %s3980_s25, 0 }
 0x43b   : > { %p3995_p4 = scmp.ge.s32.totalorder %s3326_s21, 2  ;;  %s2492_s13 = scalar_lea.sflag [#allocation5], %s2491_s26 }
 0x43d   : > { %p3039_p5 = pnand %p3995_p4, %p3994_p10 }
 0x43f   : > { %3305 = dma.done.wait (!%p3039_p5), %s2492_s13, 128  }
 0x440   : > { %3307 = vsyncadd (!%p3039_p5), %s2492_s13, 4294967168  ;;  %s2500_s30 = sand.u32 1, %s2629_s23  }
 0x441   : > { %s2501_s10 = scalar_lea.sflag [#allocation11], %s2500_s30 }
 0x442   : > { %3309 = dma.done.wait (!%p3039_p5), %s2501_s10, 192  }
 0x443   : > { %3311 = vsyncadd (!%p3039_p5), %s2501_s10, 4294967104  ;;  %p23_p0 = scmp.ge.s32.totalorder %s3502_s27, 4   ;;  %s3996_s18 = smov %s3318_s19 }
 0x444   : > { %s3997_s19 = smov %s3322_s20  ;;  %s3998_s20 = smov %s3518_s8 }
 0x445   : > { %s3999_s21 = smov %s3502_s27  ;;  %25 = sbr.rel (!%p23_p0) target bundleno = 8 (0x8), region = 125 }
 0x44c   :  { %2515 = vsyncpa [#allocation4], 1 }
 0x44d   :  { %2517 = vsyncpa [#allocation4 + $0x1], 1 }
 0x44e   :  { %2518 = vsyncpa [#allocation7], 1 }
 0x44f   :  { %2519 = vsyncpa [#allocation5], 1 }
 0x450   :  { %2521 = vsyncpa [#allocation5 + $0x1], 1 }
 0x451   :  { %2522 = vsyncpa [#allocation11], 1 }
 0x452   :  { %2524 = vsyncpa [#allocation11 + $0x1], 1 }

// kernel: hourglass_block.5
= control target key start
LH: loop header
LB: loop body
LE: loop exit
PB: predicated region body
PF: predicated region fallthrough
CT: control target
= control target key end

     0   :  { %9 = vsyncpa [#allocation5], 0  ;;  %s5272_s0 = inlined_call_operand.hbm [shape: f32[2,4,16,16], index: 0, kind: input, shape index: {}]   ;;  %s5273_s1 = inlined_call_operand.hbm [shape: f32[9,4,4], index: 1, kind: input, shape index: {}]   ;;  %s5274_s2 = inlined_call_operand.hbm [shape: f32[9,4,4], index: 2, kind: input, shape index: {}]   ;;  %s5275_s3 = inlined_call_operand.hbm [shape: f32[1,288], index: 3, kind: input, shape index: {}]   ;;  %s5276_s4 = inlined_call_operand.hbm [shape: f32[2,4,288], index: 4, kind: output, shape index: {}]  }
   0x1   :  { %11 = vsyncpa [#allocation5 + $0x1], 0 }
   0x2   :  { %12 = vsyncpa [#allocation8], 0 }
   0x3   :  { %13 = vsyncpa [#allocation11], 0 }
   0x4   :  { %14 = vsyncpa [#allocation6], 0 }
   0x5   :  { %16 = vsyncpa [#allocation6 + $0x1], 0  ;;  %s4534_s15 = smov 0   ;;  %s4536_s16 = smov 0  }
   0x6   :  { %s4538_s17 = smov 0   ;;  %s4540_s18 = smov 0  }
   0x7 LB: > { %s4555_s19 = sadd.s32 4294967295, %s4475_s18   ;;  %s3877_s20 = sadd.s32 4294967294, %s4475_s18   ;;  %s4475_s18 = sphi %s4540_s18, %s5303_s18   ;;  %s4471_s17 = sphi %s4538_s17, %s5302_s17   ;;  %s4467_s16 = sphi %s4536_s16, %s5301_s16   ;;  %s4463_s15 = sphi %s4534_s15, %s5300_s15  }
   0x8   : > { %p42_p0 = scmp.ne.s32.totalorder %s4467_s16, %s4463_s15  ;;  %p5277_p1 = scmp.eq.s32.totalorder %s4555_s19, 0 }
   0x9   : > { %p135_p3 = scmp.eq.s32.totalorder %s3877_s20, 1  ;;  %p3878_p5 = scmp.ge.s32.totalorder %s4475_s18, 1 }
   0xa   : > { %p4564_p4 = por %p5277_p1, %p42_p0  ;;  %p142_p7 = scmp.lt.s32.totalorder %s4475_s18, 3 }
   0xb   : > { %p4569_p6 = por %p135_p3, %p42_p0  ;;  %s4477_s24 = smov [#allocation7]  }
   0xc   : > { %s5281_s21 = scalar_select %p4564_p4, 1, 0 }
   0xd   : > { %s5282_s22 = scalar_select %p4569_p6, 1, 0 }
   0xe   : > { %p4574_p8 = pnand %p3878_p5, %p142_p7  ;;  %s154_s25 = sshll.u32 %s4477_s24, 4  ;;  %s4578_s25 = int_to_ptr.vmem [resolvable:$true] %s154_s25 }
   0xf   : > { %s4478_s27 = smov [#allocation9]   ;;  %s4479_s29 = smov [#allocation10]  }
  0x10   : > { %s5283_s23 = scalar_select %p4574_p8, 1, 0 }
  0x11   : > { %p4193_p9 = pneg %p4574_p8  ;;  %s167_s28 = sshll.u32 %s4478_s27, 4  ;;  %s4589_s28 = int_to_ptr.vmem [resolvable:$true] %s167_s28 }
  0x12   : > { %s4591_s30 = sshll.u32 %s4479_s29, 4  ;;  %s4287_s7 = scalar_lea.hbm %s5273_s1, 576  ;;  %s182_s30 = int_to_ptr.vmem [resolvable:$true] %s4591_s30 }
  0x13   : > { %p4585_p11 = pnand %p4193_p9, %p5277_p1  ;;  %p4288_p12 = scmp.ne.s32.totalorder %s5273_s1, %s4287_s7 }
  0x14   : > { %p4294_p5 = scmp.lt.u32.totalorder %s4287_s7, %s5273_s1 }
  0x15   : > { %p4601_p13 = pneg %p4585_p11 }
  0x17   : > { %p4290_p0 = pnand %p4601_p13, %p4288_p12 }
  0x19   : > { %p4291_p3 = pneg %p4290_p0 }
  0x1b   : > { %p4296_p7 = pnand %p4294_p5, %p4291_p3 }
  0x1d   : > { %4299 = shalt.err (!%p4296_p7)
}
  0x1e   : > { %s4300_s13 = scalar_lea.vmem %s4578_s25, 576  ;;  %p4308_p2 = scmp.lt.s32.totalorder %s4578_s25, %s4578_s25 }
  0x1f   : > { %p4301_p9 = scmp.ne.s32.totalorder %s4578_s25, %s4300_s13  ;;  %p4309_p6 = scmp.lt.s32.totalorder %s4300_s13, %s4300_s13 }
  0x21   : > { %p4303_p10 = pnand %p4301_p9, %p4601_p13  ;;  %p4310_p12 = por %p4309_p6, %p4308_p2 }
  0x23   : > { %p4304_p1 = pneg %p4303_p10 }
  0x25   : > { %p4311_p0 = pnand %p4310_p12, %p4304_p1 }
  0x27   : > { %4314 = shalt.err (!%p4311_p0)
}
  0x28   : > { %s4480_s14 = smov 64   ;;  %s4481_s20 = smov 4  }
  0x29   : > { %4196 = dma.hbm_to_vmem [thread:$0]  (!%p4585_p11), %s5273_s1, 576, %s4578_s25, [#allocation8], %s4480_s14, %s4480_s14, %s4481_s20  }
  0x2a   : > { %s4315_s6 = scalar_lea.hbm %s5274_s2, 576 }
  0x2b   : > { %p4316_p2 = scmp.ne.s32.totalorder %s5274_s2, %s4315_s6  ;;  %p4322_p10 = scmp.lt.u32.totalorder %s4315_s6, %s5274_s2 }
  0x2d   : > { %p4318_p1 = pnand %p4316_p2, %p4601_p13 }
  0x2f   : > { %p4319_p6 = pneg %p4318_p1 }
  0x31   : > { %p4324_p3 = pnand %p4322_p10, %p4319_p6 }
  0x33   : > { %4327 = shalt.err (!%p4324_p3)
}
  0x34   : > { %s4328_s25 = scalar_lea.vmem %s4589_s28, 576  ;;  %p4336_p12 = scmp.lt.s32.totalorder %s4589_s28, %s4589_s28 }
  0x35   : > { %p4329_p5 = scmp.ne.s32.totalorder %s4589_s28, %s4328_s25  ;;  %p4337_p0 = scmp.lt.s32.totalorder %s4328_s25, %s4328_s25 }
  0x37   : > { %p4331_p7 = pnand %p4329_p5, %p4601_p13  ;;  %p4338_p2 = por %p4337_p0, %p4336_p12 }
  0x39   : > { %p4332_p9 = pneg %p4331_p7 }
  0x3b   : > { %p4339_p1 = pnand %p4338_p2, %p4332_p9 }
  0x3d   : > { %4342 = shalt.err (!%p4339_p1)
}
  0x3e   : > { %4199 = dma.hbm_to_vmem [thread:$0]  (!%p4585_p11), %s5274_s2, 576, %s4589_s28, [#allocation8], %s4480_s14, %s4480_s14, %s4481_s20  }
  0x3f   : > { %s4343_s29 = scalar_lea.hbm %s5275_s3, 48 }
  0x40   : > { %p4344_p6 = scmp.ne.s32.totalorder %s5275_s3, %s4343_s29  ;;  %p4350_p5 = scmp.lt.u32.totalorder %s4343_s29, %s5275_s3 }
  0x42   : > { %p4346_p10 = pnand %p4344_p6, %p4601_p13 }
  0x44   : > { %p4347_p3 = pneg %p4346_p10 }
  0x46   : > { %p4352_p7 = pnand %p4350_p5, %p4347_p3 }
  0x48   : > { %4355 = shalt.err (!%p4352_p7)
}
  0x49   : > { %s4356_s9 = scalar_lea.vmem %s182_s30, 48  ;;  %s4363_s28 = scalar_lea.vmem %s182_s30, 64 }
  0x4a   : > { %p4357_p9 = scmp.ne.s32.totalorder %s182_s30, %s4356_s9  ;;  %p4364_p2 = scmp.lt.s32.totalorder %s182_s30, %s182_s30 }
  0x4b   : > { %p4365_p1 = scmp.lt.s32.totalorder %s4363_s28, %s4356_s9 }
  0x4c   : > { %p4359_p12 = pnand %p4357_p9, %p4601_p13 }
  0x4d   : > { %p4366_p4 = por %p4365_p1, %p4364_p2 }
  0x4e   : > { %p4360_p0 = pneg %p4359_p12 }
  0x50   : > { %p4367_p8 = pnand %p4366_p4, %p4360_p0 }
  0x52   : > { %4370 = shalt.err (!%p4367_p8)
}
  0x53   : > { %4202 = dma.hbm_to_vmem [thread:$0]  (!%p4585_p11), %s5275_s3, 48, %s182_s30, [#allocation11]  }
  0x54   : > { %s4665_s10 = sadd.s32 1, %s4475_s18   ;;  %s29_s26 = sadd.s32 1, %s4471_s17 }
  0x55   : > { %s26_s11 = ssub.s32 %s4475_s18, %s4665_s10  ;;  %p36_p8 = scmp.ne.s32.totalorder %s4471_s17, %s4467_s16 }
  0x56   : > { %p27_p4 = scmp.eq.s32.totalorder %s26_s11, 0  ;;  %p37_p13 = scmp.eq.s32.totalorder %s4475_s18, 0 }
  0x57   : > { %p4214_p6 = scmp.lt.s32.totalorder %s4475_s18, 2  ;;  %p5286_p3 = scmp.eq.s32.totalorder %s4555_s19, 1 }
  0x58   : > { %s4675_s25 = scalar_select %p27_p4, %s4471_s17, %s29_s26  }
  0x59   : > { %p38_p10 = por %p37_p13, %p36_p8  ;;  %p4679_p5 = por %p5286_p3, %p36_p8 }
  0x5a   : > { %s192_s13 = sand.u32 1, %s4471_s17   ;;  %s3984_s24 = sshll.u32 %s4475_s18, 10 }
  0x5b   : > { %s3883_s30 = sshll.u32 %s192_s13, 6  ;;  %s4688_s5 = scalar_lea.hbm %s5272_s0, %s3984_s24 }
  0x5c   : > { %s196_s6 = scalar_lea.vmem [#allocation4], %s3883_s30  ;;  %p4690_p11 = pnand %p4214_p6, %p38_p10 }
  0x5d   : > { %s203_s7 = sshll.u32 %s196_s6, 4  ;;  %s4696_s9 = scalar_lea.sflag [#allocation5], %s192_s13  ;;  %s4694_s7 = int_to_ptr.vmem [resolvable:$true] %s203_s7 }
  0x5e   : > { %s4371_s28 = scalar_lea.hbm %s4688_s5, 1024  ;;  %p4373_p9 = pneg %p4690_p11 }
  0x5f   : > { %p4372_p7 = scmp.ne.s32.totalorder %s4688_s5, %s4371_s28  ;;  %s4376_s11 = scalar_lea.hbm %s5272_s0, 2048 }
  0x60   : > { %p4377_p2 = scmp.lt.u32.totalorder %s4688_s5, %s5272_s0  ;;  %p4378_p1 = scmp.lt.u32.totalorder %s4376_s11, %s4371_s28 }
  0x61   : > { %p4374_p12 = pnand %p4373_p9, %p4372_p7  ;;  %p4380_p8 = scmp.lt.u32.totalorder %s4371_s28, %s4688_s5 }
  0x62   : > { %p4379_p4 = por %p4378_p1, %p4377_p2 }
  0x63   : > { %p4375_p0 = pneg %p4374_p12 }
  0x64   : > { %p4381_p13 = por %p4380_p8, %p4379_p4 }
  0x66   : > { %p4382_p6 = pnand %p4381_p13, %p4375_p0 }
  0x68   : > { %4385 = shalt.err (!%p4382_p6)
}
  0x69   : > { %s4386_s13 = scalar_lea.vmem %s4694_s7, 1024  ;;  %s4482_s30 = smov [#allocation4]  }
  0x6a   : > { %p4387_p10 = scmp.ne.s32.totalorder %s4694_s7, %s4386_s13  ;;  %s4391_s27 = sshll.u32 %s4482_s30, 4  ;;  %s4392_s27 = int_to_ptr.vmem [resolvable:$false] %s4391_s27 }
  0x6b   : > { %s4393_s29 = scalar_lea.vmem %s4392_s27, 2048  ;;  %p4394_p12 = scmp.lt.s32.totalorder %s4694_s7, %s4392_s27 }
  0x6c   : > { %p4389_p3 = pnand %p4387_p10, %p4373_p9  ;;  %p4395_p2 = scmp.lt.s32.totalorder %s4393_s29, %s4386_s13 }
  0x6e   : > { %p4390_p7 = pneg %p4389_p3  ;;  %p4396_p1 = por %p4395_p2, %p4394_p12 }
  0x70   : > { %p4397_p4 = pnand %p4396_p1, %p4390_p7 }
  0x72   : > { %4400 = shalt.err (!%p4397_p4)
}
  0x73   : > { %s4483_s6 = smov 128   ;;  %s4484_s28 = smov 8  }
  0x74   : > { %4206 = dma.hbm_to_vmem [thread:$0]  (!%p4690_p11), %s4688_s5, 1024, %s4694_s7, %s4696_s9, %s4483_s6, %s4483_s6, %s4484_s28  }
  0x75   : > { %p5289_p9 = scmp.ne.s32.totalorder %s5283_s23, 0 }
  0x76   : > { %s4727_s14 = sand.u32 (!%p5289_p9), 1, %s4467_s16   ;;  %p5290_p0 = scmp.ne.s32.totalorder (!%p5289_p9), %s5281_s21, 0 }
  0x77   : > { %215 = sbr.rel (%p5289_p9) target bundleno = 1891 (0x763), region = 36  ;;  %s3887_s20 = sshll.u32 (!%p5289_p9), %s4727_s14, 6 }
  0x78   : > { %s218_s11 = scalar_lea.sflag (!%p5289_p9), [#allocation5], %s4727_s14  ;;  %s4731_s26 = scalar_lea.vmem (!%p5289_p9), [#allocation4], %s3887_s20 }
  0x7e   : > { %4446 = dma.done.wait (%p5290_p0), %s218_s11, 1024  }
  0x7f   : > { %4448 = vsyncadd (%p5290_p0), %s218_s11, 4294966272  ;;  %p5291_p11 = scmp.eq.s32.totalorder %s4555_s19, 0 }
  0x81   : > { %4450 = dma.done.wait (%p5291_p11), [#allocation8], 1152   ;;  %p5292_p8 = pmov %p5291_p11 }
  0x83   : > { %4452 = vsyncadd (%p5292_p8), [#allocation8], 4294966144  ;;  %p5293_p13 = pmov %p5292_p8 }
  0x84   : > { %p5294_p6 = pmov %p5292_p8 }
  0x85   : > { %4454 = dma.done.wait (%p5293_p13), [#allocation11], 48  }
  0x86   : > { %4456 = vsyncadd (%p5294_p6), [#allocation11], 4294967248  ;;  %v4485_v0 = vmov 0.0   ;;  %vm273_vm0 = vcmask 1041409   ;;  %vm275_vm1 = vcmask 1045509   ;;  %vm278_vm2 = vcmask 1042434  }
  0x87   : > { %259 = vst [vmem:[#allocation2] sm:$0xff] %v4485_v0  ;;  %262 = vst [vmem:[#allocation3] sm:$0xff] %v4485_v0  ;;  %4021 = vmatprep.subr.mxu1 %v4485_v0  ;;  %723 = vmatprep.mubr.f32.mxu0 %v4485_v0  ;;  %vm280_vm3 = vcmask 1046534   ;;  %v314_v1 = vld [vmem:[%s4731_s26 + $0x2] sm:$0x1]  ;;  %vm283_vm4 = vcmask 1043459  }
  0x88   : > { %v315_v2 = vld [vmem:[%s4731_s26 + $0x12] sm:$0x1]  ;;  %v316_v3 = vld [vmem:[%s4731_s26 + $0x22] sm:$0x1]  ;;  %v264_v7 = vld [vmem:[%s4731_s26] sm:$0x1] }
  0x89   : > { %v317_v4 = vld [vmem:[%s4731_s26 + $0x32] sm:$0x1]  ;;  %v322_v5 = vrot.slane %v315_v2, 7  ;;  %v325_v6 = vrot.slane %v316_v3, 6  ;;  %v265_v9 = vld [vmem:[%s4731_s26 + $0x10] sm:$0x1] }
  0x8a   : > { %v328_v8 = vrot.slane %v317_v4, 5  ;;  %v266_v10 = vld [vmem:[%s4731_s26 + $0x20] sm:$0x1]  ;;  %v267_v12 = vld [vmem:[%s4731_s26 + $0x30] sm:$0x1]  ;;  %v272_v13 = vrot.slane %v265_v9, 7 }
  0x8b   : > { %v323_v11 = vsel %vm273_vm0, %v322_v5, %v314_v1  ;;  %v277_v14 = vrot.slane %v266_v10, 6  ;;  %v336_v15 = vld [vmem:[%s4731_s26 + $0x3] sm:$0x1]  ;;  %vm285_vm5 = vcmask 1047559   ;;  %v282_v17 = vrot.slane %v267_v12, 5  ;;  %s4486_s21 = smov 55  }
  0x8c   : > { %v324_v16 = vsel %vm275_vm1, %v322_v5, %v323_v11  ;;  %v337_v18 = vld [vmem:[%s4731_s26 + $0x13] sm:$0x1]  ;;  %v338_v19 = vld [vmem:[%s4731_s26 + $0x23] sm:$0x1]  ;;  %v274_v21 = vsel %vm273_vm0, %v272_v13, %v264_v7  ;;  %v292_v25 = vld [vmem:[%s4731_s26 + $0x1] sm:$0x1] }
  0x8d   : > { %v326_v20 = vsel %vm278_vm2, %v325_v6, %v324_v16  ;;  %v339_v22 = vld [vmem:[%s4731_s26 + $0x33] sm:$0x1]  ;;  %v344_v23 = vrot.slane %v337_v18, 7  ;;  %v347_v24 = vrot.slane %v338_v19, 6  ;;  %v276_v27 = vsel %vm275_vm1, %v272_v13, %v274_v21  ;;  %v293_v29 = vld [vmem:[%s4731_s26 + $0x11] sm:$0x1] }
  0x8e   : > { %v327_v26 = vsel %vm280_vm3, %v325_v6, %v326_v20  ;;  %v350_v28 = vrot.slane %v339_v22, 5  ;;  %v294_v30 = vld [vmem:[%s4731_s26 + $0x21] sm:$0x1]  ;;  %v279_v32 = vsel %vm278_vm2, %v277_v14, %v276_v27  ;;  %v295_v34 = vld [vmem:[%s4731_s26 + $0x31] sm:$0x1]  ;;  %v300_v35 = vrot.slane %v293_v29, 7 }
  0x8f   : > { %v329_v31 = vsel %vm283_vm4, %v328_v8, %v327_v26  ;;  %v345_v33 = vsel %vm273_vm0, %v344_v23, %v336_v15  ;;  %v281_v37 = vsel %vm280_vm3, %v277_v14, %v279_v32  ;;  %v303_v39 = vrot.slane %v294_v30, 6  ;;  %v359_v40 = vld [vmem:[%s4731_s26 + $0x14] sm:$0x1]  ;;  %v360_v41 = vld [vmem:[%s4731_s26 + $0x24] sm:$0x1]  ;;  %s4487_s23 = smov 19  }
  0x90   : > { %v330_v36 = vsel %vm285_vm5, %v328_v8, %v329_v31  ;;  %v346_v38 = vsel %vm275_vm1, %v344_v23, %v345_v33  ;;  %v284_v42 = vsel %vm283_vm4, %v282_v17, %v281_v37  ;;  %v301_v44 = vsel %vm273_vm0, %v300_v35, %v292_v25  ;;  %v358_v46 = vld [vmem:[%s4731_s26 + $0x4] sm:$0x1]  ;;  %v361_v47 = vld [vmem:[%s4731_s26 + $0x34] sm:$0x1]  ;;  %v403_v52 = vld [vmem:[%s4731_s26 + $0x16] sm:$0x1] }
  0x91   : > { %331 = vrot.lane.b32.xlu1 %v330_v36, %s4486_s21  ;;  %v348_v43 = vsel %vm278_vm2, %v347_v24, %v346_v38  ;;  %v306_v45 = vrot.slane %v295_v34, 5  ;;  %v286_v48 = vsel %vm285_vm5, %v282_v17, %v284_v42  ;;  %v302_v50 = vsel %vm275_vm1, %v300_v35, %v301_v44  ;;  %v404_v53 = vld [vmem:[%s4731_s26 + $0x26] sm:$0x1]  ;;  %v405_v59 = vld [vmem:[%s4731_s26 + $0x36] sm:$0x1]  ;;  %s4488_s5 = smov 73  }
  0x92   : > { %v349_v49 = vsel %vm280_vm3, %v347_v24, %v348_v43  ;;  %v366_v51 = vrot.slane %v359_v40, 7  ;;  %287 = vrot.lane.b32.xlu0 %v286_v48, %s4487_s23  ;;  %v304_v55 = vsel %vm278_vm2, %v303_v39, %v302_v50  ;;  %v369_v56 = vrot.slane %v360_v41, 6  ;;  %v402_v58 = vld [vmem:[%s4731_s26 + $0x6] sm:$0x1]  ;;  %v430_v1 = vld [vmem:[%s4731_s26 + $0x17] sm:$0x1] }
  0x93   : > { %v351_v54 = vsel %vm283_vm4, %v350_v28, %v349_v49  ;;  %v372_v57 = vrot.slane %v361_v47, 5  ;;  %v305_v61 = vsel %vm280_vm3, %v303_v39, %v304_v55  ;;  %v410_v63 = vrot.slane %v403_v52, 7  ;;  %v431_v2 = vld [vmem:[%s4731_s26 + $0x27] sm:$0x1]  ;;  %v432_v8 = vld [vmem:[%s4731_s26 + $0x37] sm:$0x1] }
  0x94   : > { %v352_v60 = vsel %vm285_vm5, %v350_v28, %v351_v54  ;;  %v367_v62 = vsel %vm273_vm0, %v366_v51, %v358_v46  ;;  %v307_v3 = vsel %vm283_vm4, %v306_v45, %v305_v61  ;;  %v413_v5 = vrot.slane %v404_v53, 6  ;;  %v429_v7 = vld [vmem:[%s4731_s26 + $0x7] sm:$0x1]  ;;  %v381_v13 = vld [vmem:[%s4731_s26 + $0x15] sm:$0x1]  ;;  %s4489_s7 = smov 37  }
  0x95   : > { %353 = vrot.lane.b32.xlu1 %v352_v60, %s4488_s5  ;;  %v368_v4 = vsel %vm275_vm1, %v366_v51, %v367_v62  ;;  %v416_v6 = vrot.slane %v405_v59, 5  ;;  %v308_v9 = vsel %vm285_vm5, %v306_v45, %v307_v3  ;;  %v411_v11 = vsel %vm273_vm0, %v410_v63, %v402_v58  ;;  %v382_v14 = vld [vmem:[%s4731_s26 + $0x25] sm:$0x1]  ;;  %v383_v20 = vld [vmem:[%s4731_s26 + $0x35] sm:$0x1]  ;;  %s4490_s8 = smov 91  }
  0x96   : > { %v370_v10 = vsel %vm278_vm2, %v369_v56, %v368_v4  ;;  %v437_v12 = vrot.slane %v430_v1, 7  ;;  %309 = vrot.lane.b32.xlu0 %v308_v9, %s4489_s7  ;;  %v412_v16 = vsel %vm275_vm1, %v410_v63, %v411_v11  ;;  %v440_v17 = vrot.slane %v431_v2, 6  ;;  %v380_v19 = vld [vmem:[%s4731_s26 + $0x5] sm:$0x1]  ;;  %v474_v25 = vld [vmem:[%s4731_s26 + $0x19] sm:$0x1] }
  0x97   : > { %v371_v15 = vsel %vm280_vm3, %v369_v56, %v370_v10  ;;  %v443_v18 = vrot.slane %v432_v8, 5  ;;  %v414_v22 = vsel %vm278_vm2, %v413_v5, %v412_v16  ;;  %v388_v24 = vrot.slane %v381_v13, 7  ;;  %v475_v30 = vld [vmem:[%s4731_s26 + $0x29] sm:$0x1]  ;;  %v476_v31 = vld [vmem:[%s4731_s26 + $0x39] sm:$0x1] }
  0x98   : > { %v373_v21 = vsel %vm283_vm4, %v372_v57, %v371_v15  ;;  %v438_v23 = vsel %vm273_vm0, %v437_v12, %v429_v7  ;;  %v415_v27 = vsel %vm280_vm3, %v413_v5, %v414_v22  ;;  %v391_v29 = vrot.slane %v382_v14, 6  ;;  %v473_v36 = vld [vmem:[%s4731_s26 + $0x9] sm:$0x1]  ;;  %v452_v37 = vld [vmem:[%s4731_s26 + $0x18] sm:$0x1]  ;;  %s4491_s9 = smov 127  }
  0x99   : > { %v374_v26 = vsel %vm285_vm5, %v372_v57, %v373_v21  ;;  %v439_v28 = vsel %vm275_vm1, %v437_v12, %v438_v23  ;;  %v417_v32 = vsel %vm283_vm4, %v416_v6, %v415_v27  ;;  %v389_v34 = vsel %vm273_vm0, %v388_v24, %v380_v19  ;;  %v453_v42 = vld [vmem:[%s4731_s26 + $0x28] sm:$0x1]  ;;  %v454_v43 = vld [vmem:[%s4731_s26 + $0x38] sm:$0x1]  ;;  %v562_v49 = vld [vmem:[%s4731_s26 + $0x1d] sm:$0x1] }
  0x9a   : > { %375 = vrot.lane.b32.xlu1 %v374_v26, %s4490_s8  ;;  %v441_v33 = vsel %vm278_vm2, %v440_v17, %v439_v28  ;;  %v394_v35 = vrot.slane %v383_v20, 5  ;;  %v418_v38 = vsel %vm285_vm5, %v416_v6, %v417_v32  ;;  %v390_v40 = vsel %vm275_vm1, %v388_v24, %v389_v34  ;;  %v451_v48 = vld [vmem:[%s4731_s26 + $0x8] sm:$0x1]  ;;  %v563_v54 = vld [vmem:[%s4731_s26 + $0x2d] sm:$0x1]  ;;  %s4492_s24 = smov 17  }
  0x9b   : > { %v442_v39 = vsel %vm280_vm3, %v440_v17, %v441_v33  ;;  %v481_v41 = vrot.slane %v474_v25, 7  ;;  %419 = vrot.lane.b32.xlu0 %v418_v38, %s4491_s9  ;;  %v392_v45 = vsel %vm278_vm2, %v391_v29, %v390_v40  ;;  %v484_v46 = vrot.slane %v475_v30, 6  ;;  %v564_v55 = vld [vmem:[%s4731_s26 + $0x3d] sm:$0x1]  ;;  %v561_v60 = vld [vmem:[%s4731_s26 + $0xd] sm:$0x1] }
  0x9c   : > { %v444_v44 = vsel %vm283_vm4, %v443_v18, %v442_v39  ;;  %v487_v47 = vrot.slane %v476_v31, 5  ;;  %v393_v51 = vsel %vm280_vm3, %v391_v29, %v392_v45  ;;  %v459_v53 = vrot.slane %v452_v37, 7  ;;  %v496_v61 = vld [vmem:[%s4731_s26 + $0x1a] sm:$0x1]  ;;  %v497_v3 = vld [vmem:[%s4731_s26 + $0x2a] sm:$0x1] }
  0x9d   : > { %v445_v50 = vsel %vm285_vm5, %v443_v18, %v444_v44  ;;  %v482_v52 = vsel %vm273_vm0, %v481_v41, %v473_v36  ;;  %v395_v56 = vsel %vm283_vm4, %v394_v35, %v393_v51  ;;  %v462_v58 = vrot.slane %v453_v42, 6  ;;  %s4493_s13 = smov 109   ;;  %v495_v8 = vld [vmem:[%s4731_s26 + $0xa] sm:$0x1]  ;;  %v498_v9 = vld [vmem:[%s4731_s26 + $0x3a] sm:$0x1] }
  0x9e   : > { %446 = vrot.lane.b32.xlu1 %v445_v50, %s4492_s24  ;;  %v483_v57 = vsel %vm275_vm1, %v481_v41, %v482_v52  ;;  %v465_v59 = vrot.slane %v454_v43, 5  ;;  %v396_v62 = vsel %vm285_vm5, %v394_v35, %v395_v56  ;;  %v460_v1 = vsel %vm273_vm0, %v459_v53, %v451_v48  ;;  %v518_v14 = vld [vmem:[%s4731_s26 + $0x1b] sm:$0x1]  ;;  %v519_v19 = vld [vmem:[%s4731_s26 + $0x2b] sm:$0x1]  ;;  %s4494_s30 = smov 53  }
  0x9f   : > { %v485_v63 = vsel %vm278_vm2, %v484_v46, %v483_v57  ;;  %v569_v2 = vrot.slane %v562_v49, 7  ;;  %397 = vrot.lane.b32.xlu0 %v396_v62, %s4493_s13  ;;  %v461_v5 = vsel %vm275_vm1, %v459_v53, %v460_v1  ;;  %v572_v6 = vrot.slane %v563_v54, 6  ;;  %v520_v20 = vld [vmem:[%s4731_s26 + $0x3b] sm:$0x1]  ;;  %v517_v25 = vld [vmem:[%s4731_s26 + $0xb] sm:$0x1] }
  0xa0   : > { %v486_v4 = vsel %vm280_vm3, %v484_v46, %v485_v63  ;;  %v575_v7 = vrot.slane %v564_v55, 5  ;;  %v463_v11 = vsel %vm278_vm2, %v462_v58, %v461_v5  ;;  %v503_v13 = vrot.slane %v496_v61, 7  ;;  %v540_v26 = vld [vmem:[%s4731_s26 + $0x1c] sm:$0x1]  ;;  %v541_v31 = vld [vmem:[%s4731_s26 + $0x2c] sm:$0x1] }
  0xa1   : > { %v488_v10 = vsel %vm283_vm4, %v487_v47, %v486_v4  ;;  %v570_v12 = vsel %vm273_vm0, %v569_v2, %v561_v60  ;;  %v464_v16 = vsel %vm280_vm3, %v462_v58, %v463_v11  ;;  %v506_v18 = vrot.slane %v497_v3, 6  ;;  %v542_v32 = vld [vmem:[%s4731_s26 + $0x3c] sm:$0x1]  ;;  %s4495_s27 = smov 35   ;;  %v539_v37 = vld [vmem:[%s4731_s26 + $0xc] sm:$0x1] }
  0xa2   : > { %v489_v15 = vsel %vm285_vm5, %v487_v47, %v488_v10  ;;  %v571_v17 = vsel %vm275_vm1, %v569_v2, %v570_v12  ;;  %v466_v21 = vsel %vm283_vm4, %v465_v59, %v464_v16  ;;  %v504_v23 = vsel %vm273_vm0, %v503_v13, %v495_v8  ;;  %v589_v38 = vld [vmem:[%s4731_s26 + $0x1e] sm:$0x1]  ;;  %v590_v43 = vld [vmem:[%s4731_s26 + $0x2e] sm:$0x1]  ;;  %s4496_s29 = smov 125   ;;  %s4497_s6 = smov 71  }
  0xa3   : > { %490 = vrot.lane.b32.xlu1 %v489_v15, %s4494_s30  ;;  %v573_v22 = vsel %vm278_vm2, %v572_v6, %v571_v17  ;;  %v509_v24 = vrot.slane %v498_v9, 5  ;;  %v467_v27 = vsel %vm285_vm5, %v465_v59, %v466_v21  ;;  %v505_v29 = vsel %vm275_vm1, %v503_v13, %v504_v23  ;;  %v591_v44 = vld [vmem:[%s4731_s26 + $0x3e] sm:$0x1]  ;;  %v588_v49 = vld [vmem:[%s4731_s26 + $0xe] sm:$0x1]  ;;  %s4498_s28 = smov 89  }
  0xa4   : > { %v574_v28 = vsel %vm280_vm3, %v572_v6, %v573_v22  ;;  %v525_v30 = vrot.slane %v518_v14, 7  ;;  %468 = vrot.lane.b32.xlu0 %v467_v27, %s4495_s27  ;;  %v507_v34 = vsel %vm278_vm2, %v506_v18, %v505_v29  ;;  %v528_v35 = vrot.slane %v519_v19, 6  ;;  %v611_v50 = vld [vmem:[%s4731_s26 + $0x1f] sm:$0x1]  ;;  %v612_v55 = vld [vmem:[%s4731_s26 + $0x2f] sm:$0x1] }
  0xa5   : > { %v576_v33 = vsel %vm283_vm4, %v575_v7, %v574_v28  ;;  %v531_v36 = vrot.slane %v520_v20, 5  ;;  %v508_v40 = vsel %vm280_vm3, %v506_v18, %v507_v34  ;;  %v547_v42 = vrot.slane %v540_v26, 7  ;;  %v610_v60 = vld [vmem:[%s4731_s26 + $0xf] sm:$0x1]  ;;  %v613_v61 = vld [vmem:[%s4731_s26 + $0x3f] sm:$0x1] }
  0xa6   : > { %v577_v39 = vsel %vm285_vm5, %v575_v7, %v576_v33  ;;  %v526_v41 = vsel %vm273_vm0, %v525_v30, %v517_v25  ;;  %v510_v45 = vsel %vm283_vm4, %v509_v24, %v508_v40  ;;  %v550_v47 = vrot.slane %v541_v31, 6  ;;  %s4499_s20 = smov 107   ;;  %s4500_s11 = smov 15  }
  0xa7   : > { %578 = vrot.lane.b32.xlu1 %v577_v39, %s4496_s29  ;;  %v527_v46 = vsel %vm275_vm1, %v525_v30, %v526_v41  ;;  %v553_v48 = vrot.slane %v542_v32, 5  ;;  %v511_v51 = vsel %vm285_vm5, %v509_v24, %v510_v45  ;;  %v548_v53 = vsel %vm273_vm0, %v547_v42, %v539_v37  ;;  %s4501_s26 = smov 33   ;;  %s4503_s21 = smov 126  }
  0xa8   : > { %v529_v52 = vsel %vm278_vm2, %v528_v35, %v527_v46  ;;  %v596_v54 = vrot.slane %v589_v38, 7  ;;  %512 = vrot.lane.b32.xlu0 %v511_v51, %s4497_s6  ;;  %v549_v57 = vsel %vm275_vm1, %v547_v42, %v548_v53  ;;  %v599_v58 = vrot.slane %v590_v43, 6  ;;  %s4504_s5 = smov 110   ;;  %s4505_s7 = smov 108   ;;  %v636_v51 = vld [vmem:[#allocation7 + $0x4] sm:$0xf] }
  0xa9   : > { %v530_v56 = vsel %vm280_vm3, %v528_v35, %v529_v52  ;;  %v602_v59 = vrot.slane %v591_v44, 5  ;;  %v551_v63 = vsel %vm278_vm2, %v550_v47, %v549_v57  ;;  %v618_v2 = vrot.slane %v611_v50, 7  ;;  %s4506_s24 = smov 92   ;;  %s4507_s30 = smov 90  }
  0xaa   : > { %v532_v62 = vsel %vm283_vm4, %v531_v36, %v530_v56  ;;  %v597_v1 = vsel %vm273_vm0, %v596_v54, %v588_v49  ;;  %v552_v4 = vsel %vm280_vm3, %v550_v47, %v551_v63  ;;  %v621_v6 = vrot.slane %v612_v55, 6 }
  0xab   : > { %v533_v3 = vsel %vm285_vm5, %v531_v36, %v532_v62  ;;  %v598_v5 = vsel %vm275_vm1, %v596_v54, %v597_v1  ;;  %v554_v7 = vsel %vm283_vm4, %v553_v48, %v552_v4  ;;  %v619_v9 = vsel %vm273_vm0, %v618_v2, %v610_v60 }
  0xac   : > { %v600_v8 = vsel %vm278_vm2, %v599_v58, %v598_v5  ;;  %v624_v10 = vrot.slane %v613_v61, 5  ;;  %534 = vrot.lane.b32.xlu0 %v533_v3, %s4498_s28  ;;  %v555_v11 = vsel %vm285_vm5, %v553_v48, %v554_v7  ;;  %v620_v13 = vsel %vm275_vm1, %v618_v2, %v619_v9  ;;  %v951_v3 = vld [vmem:[#allocation7 + $0x8] sm:$0xf] }
  0xad   : > { %v601_v12 = vsel %vm280_vm3, %v599_v58, %v600_v8  ;;  %556 = vrot.lane.b32.xlu1 %v555_v11, %s4499_s20  ;;  %v622_v15 = vsel %vm278_vm2, %v621_v6, %v620_v13  ;;  %vm260_vm6 = vcmask 699392   ;;  %vm290_vm7 = vcmask 281752   ;;  %v632_v58 = vld [vmem:[#allocation7] sm:$0xf]  ;;  %s4508_s20 = smov [#allocation12]  }
  0xae   : > { %v603_v14 = vsel %vm283_vm4, %v602_v59, %v601_v12  ;;  %v623_v17 = vsel %vm280_vm3, %v621_v6, %v622_v15  ;;  %261 = vst.msk [vmem:[#allocation2 + $0x8] sm:$0xf] %vm260_vm6, %v4485_v0  ;;  %263 = vst.msk [vmem:[#allocation3 + $0x8] sm:$0xf] %vm260_vm6, %v4485_v0  ;;  %vm312_vm8 = vcmask 429352   ;;  %vm334_vm9 = vcmask 576952  }
  0xaf   : > { %v604_v16 = vsel %vm285_vm5, %v602_v59, %v603_v14  ;;  %v625_v18 = vsel %vm283_vm4, %v624_v10, %v623_v17  ;;  %vm356_vm10 = vcmask 724552   ;;  %vm378_vm11 = vcmask 872152   ;;  %v1289_v15 = vld [vmem:[#allocation7 + $0x10] sm:$0xf] }
  0xb0   : > { %605 = vrot.lane.b32.xlu0 %v604_v16, %s4500_s11  ;;  %v626_v19 = vsel %vm285_vm5, %v624_v10, %v625_v18  ;;  %vm425_vm12 = vcmask 1044472   ;;  %vm426_vm13 = vcmask 121860   ;;  %vm422_vm14 = vcmask 1039360   ;;  %v1120_v10 = vld [vmem:[#allocation7 + $0xc] sm:$0xf]  ;;  %s4405_s11 = sshll.u32 %s4508_s20, 4  ;;  %s4406_s11 = int_to_ptr.vmem [resolvable:$false] %s4405_s11 }
  0xb1   : > { %627 = vrot.lane.b32.xlu1 %v626_v19, %s4501_s26  ;;  %vm400_vm15 = vcmask 1019752   ;;  %vm427_vm0 = vmor %vm426_vm13, %vm425_vm12  ;;  %vm449_vm1 = vcmask 265352   ;;  %vm471_vm2 = vcmask 412952   ;;  %vm493_vm3 = vcmask 560552   ;;  %s4407_s26 = scalar_lea.vmem %s4406_s11, 384 }
  0xb2   : > { %vm515_vm4 = vcmask 708152   ;;  %vm584_vm5 = vcmask 1044456   ;;  %vm585_vm6 = vcmask 105476   ;;  %vm608_vm12 = vcmask 248952  }
  0xb3   : > { %vm630_vm13 = vcmask 396552  }
 0x103   : > { %v332_v20 = vpop.permute.xlu1 %331 }
 0x104   : > { %v288_v21 = vpop.permute.xlu0 %287 }
 0x105   : > { %291 = vst.msk [vmem:[#allocation2] sm:$0xf] %vm290_vm7, %v288_v21  ;;  %vm537_vm7 = vcmask 855752   ;;  %v1458_v21 = vld [vmem:[#allocation7 + $0x14] sm:$0xf] }
 0x107   : > { %v354_v22 = vpop.permute.xlu1 %353 }
 0x108   : > { %v310_v23 = vpop.permute.xlu0 %309 }
 0x109   : > { %313 = vst.msk [vmem:[#allocation2] sm:$0xf] %vm312_vm8, %v310_v23  ;;  %vm581_vm8 = vcmask 1022976  }
 0x10a   : > { %335 = vst.msk [vmem:[#allocation2] sm:$0xf] %vm334_vm9, %v332_v20  ;;  %vm559_vm9 = vcmask 1003352  }
 0x10b   : > { %357 = vst.msk [vmem:[#allocation2] sm:$0xf] %vm356_vm10, %v354_v22  ;;  %vm586_vm10 = vmor %vm585_vm6, %vm584_vm5  ;;  %vm1639_vm5 = vcmask 752640   ;;  %vm1808_vm6 = vcmask 744448  }
 0x10c   : > { %v376_v24 = vpop.permute.xlu1 %375 }
 0x10d   : > { %379 = vst.msk [vmem:[#allocation2] sm:$0xf] %vm378_vm11, %v376_v24  ;;  %v420_v25 = vpop.permute.xlu0 %419  ;;  %vm4502_vm11 = vmmov 0  }
 0x10e   : > { %v421_v26 = vrot.slane %v420_v25, 4  ;;  %4023 = vmatprep.mubr.msk.f32.mxu1 %vm4502_vm11, %v4485_v0 }
 0x110   : > { %v447_v27 = vpop.permute.xlu1 %446  ;;  %v423_v29 = vsel %vm422_vm14, %v421_v26, %v420_v25 }
 0x111   : > { %v398_v28 = vpop.permute.xlu0 %397 }
 0x112   : > { %401 = vst.msk [vmem:[#allocation2] sm:$0xf] %vm400_vm15, %v398_v28  ;;  %vm652_vm15 = vcmask 1043456  }
 0x113   : > { %428 = vst.msk [vmem:[#allocation2] sm:$0xff] %vm427_vm0, %v423_v29  ;;  %vm648_vm0 = vcmask 31744  }
 0x114   : > { %450 = vst.msk [vmem:[#allocation2 + $0x4] sm:$0xf] %vm449_vm1, %v447_v27  ;;  %vm963_vm1 = vcmask 1031168   ;;  %v1627_v27 = vld [vmem:[#allocation7 + $0x18] sm:$0xf] }
 0x115   : > { %v491_v30 = vpop.permute.xlu1 %490 }
 0x116   : > { %v469_v31 = vpop.permute.xlu0 %468 }
 0x117   : > { %472 = vst.msk [vmem:[#allocation2 + $0x4] sm:$0xf] %vm471_vm2, %v469_v31  ;;  %vm1132_vm2 = vcmask 900096  }
 0x118   : > { %494 = vst.msk [vmem:[#allocation2 + $0x4] sm:$0xf] %vm493_vm3, %v491_v30  ;;  %vm1301_vm3 = vcmask 891904  }
 0x119   : > { %v579_v32 = vpop.permute.xlu1 %578 }
 0x11a   : > { %v513_v33 = vpop.permute.xlu0 %512  ;;  %v580_v34 = vrot.slane %v579_v32, 4 }
 0x11b   : > { %516 = vst.msk [vmem:[#allocation2 + $0x4] sm:$0xf] %vm515_vm4, %v513_v33  ;;  %vm1470_vm4 = vcmask 883712  }
 0x11c   : > { %v582_v37 = vsel %vm581_vm8, %v580_v34, %v579_v32  ;;  %v1796_v32 = vld [vmem:[#allocation7 + $0x1c] sm:$0xf]  ;;  %vm5280_vm8 = vcmask 257024  }
 0x11e   : > { %v535_v35 = vpop.permute.xlu0 %534 }
 0x11f   : > { %538 = vst.msk [vmem:[#allocation2 + $0x4] sm:$0xf] %vm537_vm7, %v535_v35  ;;  %v557_v36 = vpop.permute.xlu1 %556  ;;  %vm1977_vm7 = vcmask 736256   ;;  %v1965_v35 = vld [vmem:[#allocation7 + $0x20] sm:$0xf] }
 0x120   : > { %560 = vst.msk [vmem:[#allocation2 + $0x4] sm:$0xf] %vm559_vm9, %v557_v36  ;;  %v2134_v36 = vlaneseq  ;;  %vm2204_vm9 = vcmask 1043608  }
 0x121   : > { %587 = vst.msk [vmem:[#allocation2 + $0x4] sm:$0xff] %vm586_vm10, %v582_v37  ;;  %vm2205_vm10 = vcmask 1047556  }
 0x122   : > { %v606_v38 = vpop.permute.xlu0 %605  ;;  %v2135_v37 = vshrl.u32 %v2134_v36, 7 }
 0x123   : > { %609 = vst.msk [vmem:[#allocation2 + $0x8] sm:$0xf] %vm608_vm12, %v606_v38  ;;  %v628_v39 = vpop.permute.xlu1 %627  ;;  %vm2199_vm12 = vcmask 154624  }
 0x124   : > { %631 = vst.msk [vmem:[#allocation2 + $0x8] sm:$0xf] %vm630_vm13, %v628_v39  ;;  %v2136_v38 = vsub.s32 0, %v2135_v37  ;;  %v2144_v39 = vsub.s32 2, %v2135_v37  ;;  %vm2206_vm13 = vmor %vm2205_vm10, %vm2204_vm9 }
 0x128   : > { %v4918_v40 = vld [vmem:[#allocation2] sm:$0xff] }
 0x129   : > { %v4922_v41 = vcombine.high %v4918_v40, %v4918_v40 }
 0x12b   : > { %642 = vrot.lane.b32.xlu0 %v4922_v41, %s4491_s9  ;;  %v634_v42 = vld [vmem:[#allocation2 + $0x8] sm:$0xf] }
 0x12c   : > { %644 = vrot.lane.b32.xlu1 %v634_v42, %s4491_s9  ;;  %v953_v43 = vld [vmem:[#allocation2 + $0x8] sm:$0xf] }
 0x12d   : > { %v1122_v44 = vld [vmem:[#allocation2 + $0x8] sm:$0xf] }
 0x12e   : > { %v1291_v45 = vld [vmem:[#allocation2 + $0x8] sm:$0xf] }
 0x12f   : > { %640 = vrot.lane.b32.xlu0 %v4918_v40, %s4491_s9  ;;  %v1460_v46 = vld [vmem:[#allocation2 + $0x8] sm:$0xf] }
 0x130   : > { %959 = vrot.lane.b32.xlu1 %v4922_v41, %s4503_s21  ;;  %v1629_v47 = vld [vmem:[#allocation2 + $0x8] sm:$0xf] }
 0x131   : > { %v1798_v48 = vld [vmem:[#allocation2 + $0x8] sm:$0xf] }
 0x132   : > { %v1967_v49 = vld [vmem:[#allocation2 + $0x8] sm:$0xf] }
 0x133   : > { %961 = vrot.lane.b32.xlu0 %v953_v43, %s4503_s21  ;;  %v258_v43 = vld [vmem:[#allocation10] sm:$0x7] }
 0x134   : > { %957 = vrot.lane.b32.xlu1 %v4918_v40, %s4503_s21 }
 0x137   : > { %1128 = vrot.lane.b32.xlu0 %v4922_v41, %s4504_s5 }
 0x138   : > { %1130 = vrot.lane.b32.xlu1 %v1122_v44, %s4504_s5 }
 0x13b   : > { %1126 = vrot.lane.b32.xlu0 %v4918_v40, %s4504_s5 }
 0x13c   : > { %1297 = vrot.lane.b32.xlu1 %v4922_v41, %s4493_s13 }
 0x13f   : > { %1299 = vrot.lane.b32.xlu0 %v1291_v45, %s4493_s13 }
 0x140   : > { %1295 = vrot.lane.b32.xlu1 %v4918_v40, %s4493_s13 }
 0x143   : > { %1466 = vrot.lane.b32.xlu0 %v4922_v41, %s4505_s7 }
 0x144   : > { %1468 = vrot.lane.b32.xlu1 %v1460_v46, %s4505_s7  ;;  %v5063_v46 = vrot.slane %v258_v43, %v2136_v38 }
 0x147   : > { %1464 = vrot.lane.b32.xlu0 %v4918_v40, %s4505_s7 }
 0x148   : > { %1635 = vrot.lane.b32.xlu1 %v4922_v41, %s4506_s24 }
 0x14b   : > { %1637 = vrot.lane.b32.xlu0 %v1629_v47, %s4506_s24  ;;  %v5065_v47 = vrot.slane %v258_v43, %v2144_v39 }
 0x14c   : > { %1633 = vrot.lane.b32.xlu1 %v4918_v40, %s4506_s24 }
 0x14f   : > { %1804 = vrot.lane.b32.xlu0 %v4922_v41, %s4490_s8 }
 0x150   : > { %1806 = vrot.lane.b32.xlu1 %v1798_v48, %s4490_s8 }
 0x153   : > { %1802 = vrot.lane.b32.xlu0 %v4918_v40, %s4490_s8 }
 0x154   : > { %1973 = vrot.lane.b32.xlu1 %v4922_v41, %s4507_s30 }
 0x157   : > { %1975 = vrot.lane.b32.xlu0 %v1967_v49, %s4507_s30 }
 0x158   : > { %1971 = vrot.lane.b32.xlu1 %v4918_v40, %s4507_s30 }
 0x19d   : > { %v643_v50 = vpop.permute.xlu0 %642 }
 0x19e   : > { %v645_v52 = vpop.permute.xlu1 %644 }
 0x19f   : > { %4022 = vmatpush3.msk.msra.mxu1 %vm652_vm15, %v645_v52  ;;  %v647_v53 = vsel %vm422_vm14, %v643_v50, %v645_v52 }
 0x1a0   : > { %3891 = vmatprep.subr.msk.mxu0 %vm652_vm15, %v647_v53  ;;  %4024 = vmatmul.mubr.msk.f32.vlgmr.msra.gmra.mrb[0].mxu1 %vm648_vm0, %v636_v51 }
 0x1a1   : > { %4026 = vmatprep.subr.mxu1 %v4485_v0  ;;  %v641_v54 = vpop.permute.xlu0 %640  ;;  %4028 = vmatprep.mubr.msk.f32.mxu1 %vm4502_vm11, %v4485_v0 }
 0x1a2   : > { %4027 = vmatpush3.msk.msra.mxu1 %vm652_vm15, %v634_v42  ;;  %v960_v55 = vpop.permute.xlu1 %959  ;;  %v646_v56 = vsel %vm422_vm14, %v641_v54, %v643_v50  ;;  %v2140_v42 = vsub.s32 1, %v2135_v37 }
 0x1a3   : > { %3892 = vmatpush1.msk.msra.mxu0 %vm652_vm15, %v646_v56  ;;  %4031 = vmatprep.subr.mxu1 %v4485_v0 }
 0x1a4   : > { %3893 = vmatmul.mubr.msk.f32.vlgmr.msra.gmra.mrb[0].mxu0 %vm648_vm0, %v636_v51  ;;  %3896 = vmatprep.subr.msk.mxu0 %vm652_vm15, %v4922_v41  ;;  %v5067_v48 = vrot.slane %v258_v43, %v2140_v42  ;;  %v2214_v43 = vld [vmem:[#allocation9 + $0x4] sm:$0xf] }
 0x1a5   : > { %v962_v57 = vpop.permute.xlu0 %961  ;;  %3897 = vmatpush1.msk.msra.mxu0 %vm652_vm15, %v4918_v40  ;;  %873 = vmatprep.mubr.f32.mxu0 %v4485_v0 }
 0x1a6   : > { %v965_v59 = vsel %vm963_vm1, %v960_v55, %v962_v57  ;;  %v958_v60 = vpop.permute.xlu1 %957 }
 0x1a7   : > { %3901 = vmatprep.subr.msk.mxu0 %vm652_vm15, %v965_v59  ;;  %v964_v1 = vsel %vm963_vm1, %v958_v60, %v960_v55 }
 0x1a8   : > { %4029 = vmatmul.mubr.msk.f32.vlgmr.msra.gmra.mrb[0].mxu1 %vm648_vm0, %v632_v58 }
 0x1a9   : > { %4032 = vmatpush3.msk.msra.mxu1 %vm652_vm15, %v962_v57  ;;  %v1129_v61 = vpop.permute.xlu0 %1128  ;;  %4033 = vmatprep.mubr.msk.f32.mxu1 %vm4502_vm11, %v4485_v0 }
 0x1aa   : > { %v1131_v62 = vpop.permute.xlu1 %1130  ;;  %4036 = vmatprep.subr.mxu1 %v4485_v0 }
 0x1ab   : > { %v1134_v63 = vsel %vm1132_vm2, %v1129_v61, %v1131_v62 }
 0x1ac   : > { %3898 = vmatmul.mubr.msk.f32.vlgmr.msra.gmra.mrb[0].mxu0 %vm648_vm0, %v632_v58 }
 0x1ad   : > { %3902 = vmatpush1.msk.msra.mxu0 %vm652_vm15, %v964_v1  ;;  %v1127_v2 = vpop.permute.xlu0 %1126  ;;  %1039 = vmatprep.mubr.f32.mxu0 %v4485_v0 }
 0x1ae   : > { %3906 = vmatprep.subr.msk.mxu0 %vm652_vm15, %v1134_v63  ;;  %v1298_v4 = vpop.permute.xlu1 %1297  ;;  %v1133_v7 = vsel %vm1132_vm2, %v1127_v2, %v1129_v61 }
 0x1b0   : > { %4034 = vmatmul.mubr.msk.f32.vlgmr.msra.gmra.mrb[0].mxu1 %vm648_vm0, %v951_v3 }
 0x1b1   : > { %4037 = vmatpush3.msk.msra.mxu1 %vm652_vm15, %v1131_v62  ;;  %v1300_v5 = vpop.permute.xlu0 %1299  ;;  %4038 = vmatprep.mubr.msk.f32.mxu1 %vm4502_vm11, %v4485_v0 }
 0x1b2   : > { %v1296_v6 = vpop.permute.xlu1 %1295  ;;  %4041 = vmatprep.subr.mxu1 %v4485_v0  ;;  %v1303_v8 = vsel %vm1301_vm3, %v1298_v4, %v1300_v5 }
 0x1b3   : > { %v1302_v13 = vsel %vm1301_vm3, %v1296_v6, %v1298_v4 }
 0x1b4   : > { %3903 = vmatmul.mubr.msk.f32.vlgmr.msra.gmra.mrb[0].mxu0 %vm648_vm0, %v951_v3 }
 0x1b5   : > { %3907 = vmatpush1.msk.msra.mxu0 %vm652_vm15, %v1133_v7  ;;  %v1467_v9 = vpop.permute.xlu0 %1466  ;;  %1208 = vmatprep.mubr.f32.mxu0 %v4485_v0 }
 0x1b6   : > { %3911 = vmatprep.subr.msk.mxu0 %vm652_vm15, %v1303_v8  ;;  %v1469_v11 = vpop.permute.xlu1 %1468 }
 0x1b7   : > { %v1472_v14 = vsel %vm1470_vm4, %v1467_v9, %v1469_v11 }
 0x1b8   : > { %4039 = vmatmul.mubr.msk.f32.vlgmr.msra.gmra.mrb[0].mxu1 %vm648_vm0, %v1120_v10 }
 0x1b9   : > { %4042 = vmatpush3.msk.msra.mxu1 %vm652_vm15, %v1300_v5  ;;  %4043 = vmatprep.mubr.msk.f32.mxu1 %vm4502_vm11, %v4485_v0  ;;  %v1465_v12 = vpop.permute.xlu0 %1464 }
 0x1ba   : > { %4046 = vmatprep.subr.mxu1 %v4485_v0  ;;  %v1636_v16 = vpop.permute.xlu1 %1635  ;;  %v1471_v18 = vsel %vm1470_vm4, %v1465_v12, %v1467_v9 }
 0x1bc   : > { %3908 = vmatmul.mubr.msk.f32.vlgmr.msra.gmra.mrb[0].mxu0 %vm648_vm0, %v1120_v10 }
 0x1bd   : > { %3912 = vmatpush1.msk.msra.mxu0 %vm652_vm15, %v1302_v13  ;;  %1377 = vmatprep.mubr.f32.mxu0 %v4485_v0  ;;  %v1638_v17 = vpop.permute.xlu0 %1637 }
 0x1be   : > { %3916 = vmatprep.subr.msk.mxu0 %vm652_vm15, %v1472_v14  ;;  %v1634_v19 = vpop.permute.xlu1 %1633  ;;  %v1641_v20 = vsel %vm1639_vm5, %v1636_v16, %v1638_v17 }
 0x1bf   : > { %v1640_v24 = vsel %vm1639_vm5, %v1634_v19, %v1636_v16 }
 0x1c0   : > { %4044 = vmatmul.mubr.msk.f32.vlgmr.msra.gmra.mrb[0].mxu1 %vm648_vm0, %v1289_v15 }
 0x1c1   : > { %4047 = vmatpush3.msk.msra.mxu1 %vm652_vm15, %v1469_v11  ;;  %4048 = vmatprep.mubr.msk.f32.mxu1 %vm4502_vm11, %v4485_v0  ;;  %v1805_v22 = vpop.permute.xlu0 %1804 }
 0x1c2   : > { %4051 = vmatprep.subr.mxu1 %v4485_v0  ;;  %v1807_v23 = vpop.permute.xlu1 %1806 }
 0x1c3   : > { %v1810_v26 = vsel %vm1808_vm6, %v1805_v22, %v1807_v23 }
 0x1c4   : > { %3913 = vmatmul.mubr.msk.f32.vlgmr.msra.gmra.mrb[0].mxu0 %vm648_vm0, %v1289_v15 }
 0x1c5   : > { %3917 = vmatpush1.msk.msra.mxu0 %vm652_vm15, %v1471_v18  ;;  %1546 = vmatprep.mubr.f32.mxu0 %v4485_v0  ;;  %v1803_v25 = vpop.permute.xlu0 %1802 }
 0x1c6   : > { %3921 = vmatprep.subr.msk.mxu0 %vm652_vm15, %v1641_v20  ;;  %v1974_v29 = vpop.permute.xlu1 %1973  ;;  %v1809_v30 = vsel %vm1808_vm6, %v1803_v25, %v1805_v22 }
 0x1c8   : > { %4049 = vmatmul.mubr.msk.f32.vlgmr.msra.gmra.mrb[0].mxu1 %vm648_vm0, %v1458_v21 }
 0x1c9   : > { %4052 = vmatpush3.msk.msra.mxu1 %vm652_vm15, %v1638_v17  ;;  %4053 = vmatprep.mubr.msk.f32.mxu1 %vm4502_vm11, %v4485_v0  ;;  %v1976_v28 = vpop.permute.xlu0 %1975 }
 0x1ca   : > { %4056 = vmatprep.subr.mxu1 %v4485_v0  ;;  %v1979_v31 = vsel %vm1977_vm7, %v1974_v29, %v1976_v28  ;;  %v1972_v33 = vpop.permute.xlu1 %1971 }
 0x1cb   : > { %v1978_v34 = vsel %vm1977_vm7, %v1972_v33, %v1974_v29 }
 0x1cc   : > { %3918 = vmatmul.mubr.msk.f32.vlgmr.msra.gmra.mrb[0].mxu0 %vm648_vm0, %v1458_v21 }
 0x1cd   : > { %3922 = vmatpush1.msk.msra.mxu0 %vm652_vm15, %v1640_v24  ;;  %1715 = vmatprep.mubr.f32.mxu0 %v4485_v0 }
 0x1ce   : > { %3926 = vmatprep.subr.msk.mxu0 %vm652_vm15, %v1810_v26 }
 0x1d0   : > { %4054 = vmatmul.mubr.msk.f32.vlgmr.msra.gmra.mrb[0].mxu1 %vm648_vm0, %v1627_v27 }
 0x1d1   : > { %4057 = vmatpush3.msk.msra.mxu1 %vm652_vm15, %v1807_v23  ;;  %4058 = vmatprep.mubr.msk.f32.mxu1 %vm4502_vm11, %v4485_v0 }
 0x1d2   : > { %4061 = vmatprep.subr.mxu1 %v4485_v0 }
 0x1d4   : > { %3923 = vmatmul.mubr.msk.f32.vlgmr.msra.gmra.mrb[0].mxu0 %vm648_vm0, %v1627_v27 }
 0x1d5   : > { %3927 = vmatpush1.msk.msra.mxu0 %vm652_vm15, %v1809_v30  ;;  %1884 = vmatprep.mubr.f32.mxu0 %v4485_v0 }
 0x1d6   : > { %3931 = vmatprep.subr.msk.mxu0 %vm652_vm15, %v1979_v31 }
 0x1d8   : > { %4059 = vmatmul.mubr.msk.f32.vlgmr.msra.gmra.mrb[0].mxu1 %vm648_vm0, %v1796_v32 }
 0x1d9   : > { %4062 = vmatpush3.msk.msra.mxu1 %vm652_vm15, %v1976_v28  ;;  %4063 = vmatprep.mubr.msk.f32.mxu1 %vm4502_vm11, %v4485_v0 }
 0x1da   : > { %4066 = vmatprep.subr.mxu1 %v4485_v0 }
 0x1dc   : > { %3928 = vmatmul.mubr.msk.f32.vlgmr.msra.gmra.mrb[0].mxu0 %vm648_vm0, %v1796_v32 }
 0x1dd   : > { %3932 = vmatpush1.msk.msra.mxu0 %vm652_vm15, %v1978_v34  ;;  %2053 = vmatprep.mubr.f32.mxu0 %v4485_v0 }
 0x1e0   : > { %4064 = vmatmul.mubr.msk.f32.vlgmr.msra.gmra.mrb[0].mxu1 %vm648_vm0, %v1965_v35 }
 0x1e1   : > { %4068 = vmatprep.mubr.msk.f32.mxu1 %vm4502_vm11, %v4485_v0 }
 0x1e4   : > { %3933 = vmatmul.mubr.msk.f32.vlgmr.msra.gmra.mrb[0].mxu0 %vm648_vm0, %v1965_v35 }
 0x1e5   : > { %2299 = vmatprep.mubr.f32.mxu0 %v4485_v0 }
 0x2b3   : > { %v2126_v44 = vpop.f32.mrb[0].mxu1 }
 0x2b4   : > { %v4065_v45 = vpop.f32.mrb[1].mxu1  ;;  %v2151_v52 = vmul.f32 %v5065_v47, %v2126_v44 }
 0x2b6   : > { %v2156_v57 = vsel %vm5280_vm8, %v2151_v52, 0.0 }
 0x2b7   : > { %v2055_v49 = vpop.f32.mrb[0].mxu0 }
 0x2b8   : > { %v2149_v50 = vmul.f32 %v5063_v46, %v2055_v49  ;;  %v2057_v51 = vpop.f32.mrb[1].mxu0 }
 0x2b9   : > { %v2150_v53 = vmul.f32 %v5067_v48, %v2057_v51 }
 0x2ba   : > { %v2152_v54 = vsel %vm652_vm15, %v2149_v50, 0.0 }
 0x2bb   : > { %v2153_v55 = vsel %vm652_vm15, %v2150_v53, 0.0  ;;  %v2210_v53 = vld [vmem:[#allocation9] sm:$0xf] }
 0x2bc   : > { %v2154_v56 = vadd.f32 %v2153_v55, %v2152_v54 }
 0x2be   : > { %v2157_v58 = vadd.f32 %v2156_v57, %v2154_v56 }
 0x2c0   : > { %2158 = vadd.xlane.f32.xlu0 %v2157_v58 }
 0x34d   : > { %v2159_v59 = vpop.xlane.xlu0 %2158 }
 0x34e   : > { %v2161_v60 = vmul.f32 0.00390625, %v2159_v59  ;;  %v2527_v59 = vld [vmem:[#allocation9 + $0x8] sm:$0xf] }
 0x350   : > { %v2162_v61 = vsub.f32 %v2055_v49, %v2161_v60  ;;  %v2163_v62 = vsub.f32 %v2057_v51, %v2161_v60  ;;  %v2164_v63 = vsub.f32 %v2126_v44, %v2161_v60 }
 0x352   : > { %v2165_v1 = vmul.f32 %v2162_v61, %v2162_v61  ;;  %v2166_v2 = vmul.f32 %v2163_v62, %v2163_v62  ;;  %v2167_v3 = vmul.f32 %v2164_v63, %v2164_v63 }
 0x354   : > { %v2168_v4 = vmul.f32 %v2165_v1, %v5063_v46  ;;  %v2169_v5 = vmul.f32 %v2166_v2, %v5067_v48  ;;  %v2170_v6 = vmul.f32 %v2167_v3, %v5065_v47  ;;  %v2695_v2 = vld [vmem:[#allocation9 + $0xc] sm:$0xf] }
 0x356   : > { %v2171_v7 = vsel %vm652_vm15, %v2168_v4, 0.0  ;;  %v2172_v8 = vsel %vm652_vm15, %v2169_v5, 0.0  ;;  %v2174_v10 = vsel %vm5280_vm8, %v2170_v6, 0.0  ;;  %vm2208_vm8 = vcmask 412672  }
 0x357   : > { %v2173_v9 = vadd.f32 %v2172_v8, %v2171_v7 }
 0x359   : > { %v2175_v11 = vadd.f32 %v2174_v10, %v2173_v9  ;;  %v2863_v9 = vld [vmem:[#allocation9 + $0x10] sm:$0xf] }
 0x35b   : > { %2176 = vadd.xlane.f32.xlu1 %v2175_v11 }
 0x3e8   : > { %v2177_v12 = vpop.xlane.xlu1 %2176 }
 0x3e9   : > { %v2178_v13 = vmul.f32 0.00390625, %v2177_v12 }
 0x3eb   : > { %v2179_v14 = vadd.f32 1e-05, %v2178_v13 }
 0x3ed   : > { %4283 = vrsqrt.f32 %v2179_v14  ;;  %v3031_v14 = vld [vmem:[#allocation9 + $0x14] sm:$0xf] }
 0x3f7   : > { %v4284_v15 = vpop.eup %4283 }
 0x3f8   : > { %v2183_v16 = vmul.f32 %v4284_v15, %v2164_v63  ;;  %v2181_v17 = vmul.f32 %v4284_v15, %v2162_v61  ;;  %v2182_v18 = vmul.f32 %v4284_v15, %v2163_v62 }
 0x3fa   : > { %v2186_v19 = vmax.f32 %v2183_v16, 0.0  ;;  %v2184_v20 = vmax.f32 %v2181_v17, 0.0  ;;  %v2185_v21 = vmax.f32 %v2182_v18, 0.0 }
 0x3fc   : > { %v2189_v22 = vmul.f32 %v2186_v19, %v5065_v47  ;;  %v2187_v23 = vmul.f32 %v2184_v20, %v5063_v46  ;;  %v2188_v24 = vmul.f32 %v2185_v21, %v5067_v48  ;;  %v3199_v19 = vld [vmem:[#allocation9 + $0x18] sm:$0xf] }
 0x3fe   : > { %2196 = vrot.lane.b32.xlu1 %v2189_v22, %s4487_s23  ;;  %v2193_v25 = vcombine.low %v2187_v23, %v2188_v24 }
 0x400   : > { %2194 = vrot.lane.b32.xlu0 %v2193_v25, %s4487_s23  ;;  %v3367_v25 = vld [vmem:[#allocation9 + $0x1c] sm:$0xf]  ;;  %s4175_s23 = smul.u32 12, %s4727_s14 }
 0x470   : > { %v2197_v28 = vpop.permute.xlu1 %2196 }
 0x472   : > { %v2195_v26 = vpop.permute.xlu0 %2194 }
 0x473   : > { %v2198_v27 = vrot.slane %v2195_v26, 4 }
 0x475   : > { %v2200_v29 = vsel %vm2199_vm12, %v2198_v27, %v2195_v26  ;;  %v2201_v30 = vsel %vm2199_vm12, %v2198_v27, %v2197_v28 }
 0x476   : > { %2207 = vst.msk [vmem:[#allocation3] sm:$0xff] %vm2206_vm13, %v2200_v29 }
 0x477   : > { %2209 = vst.msk [vmem:[#allocation3 + $0x8] sm:$0xf] %vm2208_vm8, %v2201_v30  ;;  %v3535_v30 = vld [vmem:[#allocation9 + $0x20] sm:$0xf] }
 0x47d   : > { %v2211_v32 = vld [vmem:[#allocation3] sm:$0xff] }
 0x47e   : > { %v2212_v31 = vld [vmem:[#allocation3 + $0x8] sm:$0xf]  ;;  %v2217_v33 = vcombine.high %v2211_v32, %v2211_v32 }
 0x47f   : > { %2222 = vrot.lane.b32.xlu1 %v2212_v31, %s4491_s9  ;;  %v2529_v34 = vld [vmem:[#allocation3 + $0x8] sm:$0xf] }
 0x480   : > { %2220 = vrot.lane.b32.xlu0 %v2217_v33, %s4491_s9  ;;  %v2697_v35 = vld [vmem:[#allocation3 + $0x8] sm:$0xf] }
 0x481   : > { %v2865_v36 = vld [vmem:[#allocation3 + $0x8] sm:$0xf] }
 0x482   : > { %v3033_v37 = vld [vmem:[#allocation3 + $0x8] sm:$0xf] }
 0x483   : > { %2535 = vrot.lane.b32.xlu1 %v2217_v33, %s4503_s21  ;;  %v3201_v38 = vld [vmem:[#allocation3 + $0x8] sm:$0xf] }
 0x484   : > { %2218 = vrot.lane.b32.xlu0 %v2211_v32, %s4491_s9  ;;  %v3369_v39 = vld [vmem:[#allocation3 + $0x8] sm:$0xf]  ;;  %s257_s9 = scalar_lea.vmem [#allocation12], %s4175_s23 }
 0x485   : > { %v3537_v42 = vld [vmem:[#allocation3 + $0x8] sm:$0xf] }
 0x487   : > { %2533 = vrot.lane.b32.xlu1 %v2211_v32, %s4503_s21 }
 0x488   : > { %2537 = vrot.lane.b32.xlu0 %v2529_v34, %s4503_s21 }
 0x48b   : > { %2705 = vrot.lane.b32.xlu1 %v2697_v35, %s4504_s5 }
 0x48c   : > { %2703 = vrot.lane.b32.xlu0 %v2217_v33, %s4504_s5 }
 0x48f   : > { %2871 = vrot.lane.b32.xlu1 %v2217_v33, %s4493_s13 }
 0x490   : > { %2701 = vrot.lane.b32.xlu0 %v2211_v32, %s4504_s5 }
 0x493   : > { %2869 = vrot.lane.b32.xlu1 %v2211_v32, %s4493_s13 }
 0x494   : > { %2873 = vrot.lane.b32.xlu0 %v2865_v36, %s4493_s13 }
 0x497   : > { %3041 = vrot.lane.b32.xlu1 %v3033_v37, %s4505_s7 }
 0x498   : > { %3039 = vrot.lane.b32.xlu0 %v2217_v33, %s4505_s7 }
 0x49b   : > { %3207 = vrot.lane.b32.xlu1 %v2217_v33, %s4506_s24 }
 0x49c   : > { %3037 = vrot.lane.b32.xlu0 %v2211_v32, %s4505_s7 }
 0x49f   : > { %3205 = vrot.lane.b32.xlu1 %v2211_v32, %s4506_s24 }
 0x4a0   : > { %3209 = vrot.lane.b32.xlu0 %v3201_v38, %s4506_s24 }
 0x4a3   : > { %3377 = vrot.lane.b32.xlu1 %v3369_v39, %s4490_s8 }
 0x4a4   : > { %3375 = vrot.lane.b32.xlu0 %v2217_v33, %s4490_s8 }
 0x4a7   : > { %3543 = vrot.lane.b32.xlu1 %v2217_v33, %s4507_s30 }
 0x4a8   : > { %3373 = vrot.lane.b32.xlu0 %v2211_v32, %s4490_s8  ;;  %s4176_s8 = smul.u32 192, %s4555_s19  ;;  %s3764_s19 = scalar_lea.sflag [#allocation6], %s4727_s14 }
 0x4aa   : > { %s5228_s6 = scalar_lea.hbm %s5276_s4, %s4176_s8 }
 0x4ab   : > { %3541 = vrot.lane.b32.xlu1 %v2211_v32, %s4507_s30 }
 0x4ac   : > { %3545 = vrot.lane.b32.xlu0 %v3537_v42, %s4507_s30 }
 0x4f1   : > { %v2223_v44 = vpop.permute.xlu1 %2222 }
 0x4f2   : > { %4067 = vmatpush3.msk.msra.mxu1 %vm652_vm15, %v2223_v44  ;;  %v2221_v45 = vpop.permute.xlu0 %2220 }
 0x4f3   : > { %4069 = vmatmul.mubr.msk.f32.vlgmr.msra.gmra.mrb[2].mxu1 %vm648_vm0, %v2214_v43  ;;  %4071 = vmatprep.subr.mxu1 %v4485_v0  ;;  %v2225_v49 = vsel %vm422_vm14, %v2221_v45, %v2223_v44 }
 0x4f4   : > { %4072 = vmatpush3.msk.msra.mxu1 %vm652_vm15, %v2212_v31  ;;  %4073 = vmatprep.mubr.msk.f32.mxu1 %vm4502_vm11, %v4485_v0 }
 0x4f5   : > { %v2536_v50 = vpop.permute.xlu1 %2535  ;;  %3936 = vmatprep.subr.msk.mxu0 %vm652_vm15, %v2225_v49  ;;  %4076 = vmatprep.subr.mxu1 %v4485_v0 }
 0x4f6   : > { %v2219_v51 = vpop.permute.xlu0 %2218 }
 0x4f7   : > { %v2224_v52 = vsel %vm422_vm14, %v2219_v51, %v2221_v45  ;;  %vm5295_vm14 = vcmask 257024   ;;  %v3736_v45 = vld [vmem:[#allocation2 + $0x8] sm:$0xf] }
 0x4f8   : > { %3937 = vmatpush1.msk.msra.mxu0 %vm652_vm15, %v2224_v52 }
 0x4f9   : > { %v2534_v54 = vpop.permute.xlu1 %2533  ;;  %3938 = vmatmul.mubr.msk.f32.vlgmr.msra.gmra.mrb[2].mxu0 %vm648_vm0, %v2214_v43  ;;  %3941 = vmatprep.subr.msk.mxu0 %vm652_vm15, %v2217_v33 }
 0x4fa   : > { %3942 = vmatpush1.msk.msra.mxu0 %vm652_vm15, %v2211_v32  ;;  %v2538_v55 = vpop.permute.xlu0 %2537  ;;  %2449 = vmatprep.mubr.f32.mxu0 %v4485_v0  ;;  %v2539_v60 = vsel %vm963_vm1, %v2534_v54, %v2536_v50 }
 0x4fb   : > { %4074 = vmatmul.mubr.msk.f32.vlgmr.msra.gmra.mrb[2].mxu1 %vm648_vm0, %v2210_v53  ;;  %v2540_v56 = vsel %vm963_vm1, %v2536_v50, %v2538_v55 }
 0x4fc   : > { %4077 = vmatpush3.msk.msra.mxu1 %vm652_vm15, %v2538_v55  ;;  %3946 = vmatprep.subr.msk.mxu0 %vm652_vm15, %v2540_v56 }
 0x4fd   : > { %4078 = vmatprep.mubr.msk.f32.mxu1 %vm4502_vm11, %v4485_v0  ;;  %v2706_v57 = vpop.permute.xlu1 %2705  ;;  %4081 = vmatprep.subr.mxu1 %v4485_v0 }
 0x4fe   : > { %v2704_v58 = vpop.permute.xlu0 %2703 }
 0x4ff   : > { %v2708_v61 = vsel %vm1132_vm2, %v2704_v58, %v2706_v57 }
 0x501   : > { %3943 = vmatmul.mubr.msk.f32.vlgmr.msra.gmra.mrb[2].mxu0 %vm648_vm0, %v2210_v53  ;;  %v2872_v63 = vpop.permute.xlu1 %2871 }
 0x502   : > { %3947 = vmatpush1.msk.msra.mxu0 %vm652_vm15, %v2539_v60  ;;  %v2702_v62 = vpop.permute.xlu0 %2701  ;;  %2614 = vmatprep.mubr.f32.mxu0 %v4485_v0 }
 0x503   : > { %4079 = vmatmul.mubr.msk.f32.vlgmr.msra.gmra.mrb[2].mxu1 %vm648_vm0, %v2527_v59  ;;  %3951 = vmatprep.subr.msk.mxu0 %vm652_vm15, %v2708_v61  ;;  %v2707_v3 = vsel %vm1132_vm2, %v2702_v62, %v2704_v58 }
 0x504   : > { %4082 = vmatpush3.msk.msra.mxu1 %vm652_vm15, %v2706_v57  ;;  %4083 = vmatprep.mubr.msk.f32.mxu1 %vm4502_vm11, %v4485_v0 }
 0x505   : > { %4086 = vmatprep.subr.mxu1 %v4485_v0  ;;  %v2870_v4 = vpop.permute.xlu1 %2869 }
 0x506   : > { %v2874_v1 = vpop.permute.xlu0 %2873  ;;  %v2875_v10 = vsel %vm1301_vm3, %v2870_v4, %v2872_v63 }
 0x507   : > { %v2876_v5 = vsel %vm1301_vm3, %v2872_v63, %v2874_v1 }
 0x509   : > { %3948 = vmatmul.mubr.msk.f32.vlgmr.msra.gmra.mrb[2].mxu0 %vm648_vm0, %v2527_v59  ;;  %v3042_v7 = vpop.permute.xlu1 %3041 }
 0x50a   : > { %3952 = vmatpush1.msk.msra.mxu0 %vm652_vm15, %v2707_v3  ;;  %v3040_v6 = vpop.permute.xlu0 %3039  ;;  %2782 = vmatprep.mubr.f32.mxu0 %v4485_v0 }
 0x50b   : > { %4084 = vmatmul.mubr.msk.f32.vlgmr.msra.gmra.mrb[2].mxu1 %vm648_vm0, %v2695_v2  ;;  %3956 = vmatprep.subr.msk.mxu0 %vm652_vm15, %v2876_v5  ;;  %v3044_v11 = vsel %vm1470_vm4, %v3040_v6, %v3042_v7 }
 0x50c   : > { %4087 = vmatpush3.msk.msra.mxu1 %vm652_vm15, %v2874_v1  ;;  %4088 = vmatprep.mubr.msk.f32.mxu1 %vm4502_vm11, %v4485_v0 }
 0x50d   : > { %4091 = vmatprep.subr.mxu1 %v4485_v0  ;;  %v3208_v12 = vpop.permute.xlu1 %3207 }
 0x50e   : > { %v3038_v8 = vpop.permute.xlu0 %3037 }
 0x50f   : > { %v3043_v15 = vsel %vm1470_vm4, %v3038_v8, %v3040_v6 }
 0x511   : > { %3953 = vmatmul.mubr.msk.f32.vlgmr.msra.gmra.mrb[2].mxu0 %vm648_vm0, %v2695_v2  ;;  %v3206_v17 = vpop.permute.xlu1 %3205 }
 0x512   : > { %3957 = vmatpush1.msk.msra.mxu0 %vm652_vm15, %v2875_v10  ;;  %2950 = vmatprep.mubr.f32.mxu0 %v4485_v0  ;;  %v3210_v13 = vpop.permute.xlu0 %3209  ;;  %v3211_v20 = vsel %vm1639_vm5, %v3206_v17, %v3208_v12 }
 0x513   : > { %4089 = vmatmul.mubr.msk.f32.vlgmr.msra.gmra.mrb[2].mxu1 %vm648_vm0, %v2863_v9  ;;  %3961 = vmatprep.subr.msk.mxu0 %vm652_vm15, %v3044_v11  ;;  %v3212_v16 = vsel %vm1639_vm5, %v3208_v12, %v3210_v13 }
 0x514   : > { %4092 = vmatpush3.msk.msra.mxu1 %vm652_vm15, %v3042_v7  ;;  %4093 = vmatprep.mubr.msk.f32.mxu1 %vm4502_vm11, %v4485_v0 }
 0x515   : > { %4096 = vmatprep.subr.mxu1 %v4485_v0  ;;  %v3378_v21 = vpop.permute.xlu1 %3377 }
 0x516   : > { %v3376_v18 = vpop.permute.xlu0 %3375 }
 0x517   : > { %v3380_v23 = vsel %vm1808_vm6, %v3376_v18, %v3378_v21 }
 0x519   : > { %3958 = vmatmul.mubr.msk.f32.vlgmr.msra.gmra.mrb[2].mxu0 %vm648_vm0, %v2863_v9  ;;  %v3544_v26 = vpop.permute.xlu1 %3543 }
 0x51a   : > { %3962 = vmatpush1.msk.msra.mxu0 %vm652_vm15, %v3043_v15  ;;  %3118 = vmatprep.mubr.f32.mxu0 %v4485_v0  ;;  %v3374_v22 = vpop.permute.xlu0 %3373 }
 0x51b   : > { %4094 = vmatmul.mubr.msk.f32.vlgmr.msra.gmra.mrb[2].mxu1 %vm648_vm0, %v3031_v14  ;;  %3966 = vmatprep.subr.msk.mxu0 %vm652_vm15, %v3212_v16  ;;  %v3379_v27 = vsel %vm1808_vm6, %v3374_v22, %v3376_v18 }
 0x51c   : > { %4097 = vmatpush3.msk.msra.mxu1 %vm652_vm15, %v3210_v13  ;;  %4098 = vmatprep.mubr.msk.f32.mxu1 %vm4502_vm11, %v4485_v0 }
 0x51d   : > { %4101 = vmatprep.subr.mxu1 %v4485_v0  ;;  %v3542_v29 = vpop.permute.xlu1 %3541 }
 0x51e   : > { %v3546_v24 = vpop.permute.xlu0 %3545  ;;  %v3547_v31 = vsel %vm1977_vm7, %v3542_v29, %v3544_v26 }
 0x51f   : > { %v3548_v28 = vsel %vm1977_vm7, %v3544_v26, %v3546_v24 }
 0x521   : > { %3963 = vmatmul.mubr.msk.f32.vlgmr.msra.gmra.mrb[2].mxu0 %vm648_vm0, %v3031_v14 }
 0x522   : > { %3967 = vmatpush1.msk.msra.mxu0 %vm652_vm15, %v3211_v20  ;;  %3286 = vmatprep.mubr.f32.mxu0 %v4485_v0 }
 0x523   : > { %4099 = vmatmul.mubr.msk.f32.vlgmr.msra.gmra.mrb[2].mxu1 %vm648_vm0, %v3199_v19  ;;  %3971 = vmatprep.subr.msk.mxu0 %vm652_vm15, %v3380_v23 }
 0x524   : > { %4102 = vmatpush3.msk.msra.mxu1 %vm652_vm15, %v3378_v21  ;;  %4103 = vmatprep.mubr.msk.f32.mxu1 %vm4502_vm11, %v4485_v0 }
 0x525   : > { %4106 = vmatprep.subr.mxu1 %v4485_v0 }
 0x529   : > { %3968 = vmatmul.mubr.msk.f32.vlgmr.msra.gmra.mrb[2].mxu0 %vm648_vm0, %v3199_v19 }
 0x52a   : > { %3972 = vmatpush1.msk.msra.mxu0 %vm652_vm15, %v3379_v27  ;;  %3454 = vmatprep.mubr.f32.mxu0 %v4485_v0 }
 0x52b   : > { %4104 = vmatmul.mubr.msk.f32.vlgmr.msra.gmra.mrb[2].mxu1 %vm648_vm0, %v3367_v25  ;;  %3976 = vmatprep.subr.msk.mxu0 %vm652_vm15, %v3548_v28 }
 0x52c   : > { %4107 = vmatpush3.msk.msra.mxu1 %vm652_vm15, %v3546_v24  ;;  %4108 = vmatprep.mubr.msk.f32.mxu1 %vm4502_vm11, %v4485_v0  ;;  %vm5296_vm11 = vmmov %vm5295_vm14 }
 0x531   : > { %3973 = vmatmul.mubr.msk.f32.vlgmr.msra.gmra.mrb[2].mxu0 %vm648_vm0, %v3367_v25 }
 0x532   : > { %3977 = vmatpush1.msk.msra.mxu0 %vm652_vm15, %v3547_v31  ;;  %3622 = vmatprep.mubr.f32.mxu0 %v4485_v0 }
 0x533   : > { %4109 = vmatmul.mubr.msk.f32.vlgmr.msra.gmra.mrb[2].mxu1 %vm648_vm0, %v3535_v30 }
 0x539   : > { %3978 = vmatmul.mubr.msk.f32.vlgmr.msra.gmra.mrb[2].mxu0 %vm648_vm0, %v3535_v30 }
 0x606   : > { %v3695_v32 = vpop.f32.mrb[2].mxu1 }
 0x607   : > { %v4110_v33 = vpop.f32.mrb[3].mxu1  ;;  %v3704_v37 = vmul.f32 %v3695_v32, %v5065_v47 }
 0x609   : > { %v3708_v44 = vsel %vm5295_vm14, %v3704_v37, 0.0 }
 0x60c   : > { %v3624_v34 = vpop.f32.mrb[2].mxu0 }
 0x60d   : > { %v3702_v35 = vmul.f32 %v3624_v34, %v5063_v46  ;;  %v3626_v36 = vpop.f32.mrb[3].mxu0 }
 0x60e   : > { %v3703_v38 = vmul.f32 %v3626_v36, %v5067_v48 }
 0x60f   : > { %v3705_v39 = vsel %vm652_vm15, %v3702_v35, 0.0 }
 0x610   : > { %v3706_v42 = vsel %vm652_vm15, %v3703_v38, 0.0 }
 0x611   : > { %v3707_v43 = vadd.f32 %v3706_v42, %v3705_v39 }
 0x613   : > { %v3709_v0 = vadd.f32 %v3708_v44, %v3707_v43 }
 0x615   : > { %3710 = vadd.xlane.f32.xlu0 %v3709_v0 }
 0x62b   : > { %3740 = vrot.lane.b32.xlu0 %v4918_v40, %s4493_s13 }
 0x62f   : > { %3744 = vrot.lane.b32.xlu0 %v3736_v45, %s4493_s13 }
 0x6a2   : > { %v3711_v49 = vpop.xlane.xlu0 %3710 }
 0x6a3   : > { %v3712_v50 = vmul.f32 0.00390625, %v3711_v49 }
 0x6a5   : > { %v3713_v51 = vsub.f32 %v3624_v34, %v3712_v50  ;;  %v3714_v52 = vsub.f32 %v3626_v36, %v3712_v50  ;;  %v3715_v53 = vsub.f32 %v3695_v32, %v3712_v50 }
 0x6a7   : > { %v3716_v54 = vmul.f32 %v3713_v51, %v3713_v51  ;;  %v3717_v55 = vmul.f32 %v3714_v52, %v3714_v52  ;;  %v3718_v56 = vmul.f32 %v3715_v53, %v3715_v53 }
 0x6a9   : > { %v3719_v57 = vmul.f32 %v3716_v54, %v5063_v46  ;;  %v3720_v58 = vmul.f32 %v3717_v55, %v5067_v48  ;;  %v3721_v59 = vmul.f32 %v3718_v56, %v5065_v47  ;;  %v3741_v48 = vpop.permute.xlu0 %3740 }
 0x6ab   : > { %v3722_v40 = vsel %vm652_vm15, %v3719_v57, 0.0  ;;  %v3723_v60 = vsel %vm652_vm15, %v3720_v58, 0.0  ;;  %v3725_v62 = vsel %vm5296_vm11, %v3721_v59, 0.0  ;;  %vm5297_vm15 = vmmov %vm5296_vm11 }
 0x6ac   : > { %v3724_v61 = vadd.f32 %v3723_v60, %v3722_v40 }
 0x6ad   : > { %v3745_v4 = vpop.permute.xlu0 %3744 }
 0x6ae   : > { %v3726_v63 = vadd.f32 %v3725_v62, %v3724_v61 }
 0x6b0   : > { %3727 = vadd.xlane.f32.xlu1 %v3726_v63 }
 0x6c1   : > { %3742 = vrot.lane.b32.xlu1 %v4922_v41, %s4493_s13  ;;  %s3778_s13 = sshll.u32 %s257_s9, 4  ;;  %s5230_s13 = int_to_ptr.vmem [resolvable:$true] %s3778_s13 }
 0x6c2   : > { %s4401_s28 = scalar_lea.vmem %s5230_s13, 192  ;;  %p4408_p12 = scmp.lt.s32.totalorder %s5230_s13, %s4406_s11 }
 0x6c3   : > { %p4402_p10 = scmp.ne.s32.totalorder %s5230_s13, %s4401_s28  ;;  %p4409_p2 = scmp.lt.s32.totalorder %s4407_s26, %s4401_s28 }
 0x6c5   : > { %p4403_p3 = pnand %p4402_p10, %p4679_p5  ;;  %p4410_p1 = por %p4409_p2, %p4408_p12 }
 0x6c7   : > { %p4404_p7 = pneg %p4403_p3 }
 0x6c9   : > { %p4411_p4 = pnand %p4410_p1, %p4404_p7 }
 0x73d   : > { %v3728_v1 = vpop.xlane.xlu1 %3727 }
 0x73e   : > { %v3729_v2 = vmul.f32 0.00390625, %v3728_v1 }
 0x740   : > { %v3730_v46 = vadd.f32 1e-05, %v3729_v2 }
 0x741   : > { %v3743_v47 = vpop.permute.xlu1 %3742 }
 0x742   : > { %4285 = vrsqrt.f32 %v3730_v46  ;;  %v3746_v8 = vsel %vm1301_vm3, %v3741_v48, %v3743_v47  ;;  %v3747_v9 = vsel %vm1301_vm3, %v3743_v47, %v3745_v4 }
 0x74c   : > { %v4286_v3 = vpop.eup %4285 }
 0x74d   : > { %v3732_v5 = vmul.f32 %v4286_v3, %v3713_v51  ;;  %v3733_v6 = vmul.f32 %v4286_v3, %v3714_v52  ;;  %v3734_v7 = vmul.f32 %v4286_v3, %v3715_v53 }
 0x74f   : > { %v3751_v10 = vadd.f32 %v3746_v8, %v3732_v5  ;;  %v3752_v41 = vadd.f32 %v3747_v9, %v3733_v6  ;;  %v3753_v11 = vadd.f32 %v3745_v4, %v3734_v7 }
 0x751   : > { %v3754_v12 = vmax.f32 %v3751_v10, 0.0  ;;  %v3755_v13 = vmax.f32 %v3752_v41, 0.0  ;;  %v3756_v14 = vmax.f32 %v3753_v11, 0.0 }
 0x753   : > { %v3759_v15 = vcombine.low %v3754_v12, %v3755_v13  ;;  %3762 = vst.msk [vmem:[%s257_s9 + $0x8] sm:$0xf] %vm5297_vm15, %v3756_v14 }
 0x755   : > { %3761 = vst [vmem:[%s257_s9] sm:$0xff] %v3759_v15 }
 0x756   : > { %4414 = shalt.err (!%p4411_p4)
}
 0x757   : > { %s4415_s14 = scalar_lea.hbm %s5228_s6, 192  ;;  %s4419_s7 = scalar_lea.hbm %s5276_s4, 384 }
 0x758   : > { %p4416_p9 = scmp.ne.s32.totalorder %s5228_s6, %s4415_s14  ;;  %p4420_p8 = scmp.lt.u32.totalorder %s5228_s6, %s5276_s4 }
 0x759   : > { %p4421_p13 = scmp.lt.u32.totalorder %s4419_s7, %s4415_s14  ;;  %p4423_p10 = scmp.lt.u32.totalorder %s4415_s14, %s5228_s6 }
 0x75a   : > { %p4417_p0 = pnand %p4416_p9, %p4679_p5 }
 0x75b   : > { %p4422_p6 = por %p4421_p13, %p4420_p8 }
 0x75c   : > { %p4418_p11 = pneg %p4417_p0 }
 0x75d   : > { %p4424_p3 = por %p4423_p10, %p4422_p6 }
 0x75f   : > { %p4425_p7 = pnand %p4424_p3, %p4418_p11 }
 0x761   : > { %4428 = shalt.err (!%p4425_p7)
}
 0x762   : > { %4191 = dma.vmem_to_hbm [thread:$0]  (%p4679_p5), %s5230_s13, 192, %s5228_s6, %s3764_s19  }
 0x763 PF: > { %s3790_s23 = sand.u32 1, %s4463_s15   ;;  %p5298_p12 = scmp.ne.s32.totalorder %s5282_s22, 0 }
 0x764   : > { %p5299_p2 = scmp.ge.s32.totalorder %s4475_s18, 2  ;;  %s3791_s8 = scalar_lea.sflag [#allocation6], %s3790_s23 }
 0x766   : > { %p4208_p1 = pnand %p5299_p2, %p5298_p12 }
 0x768   : > { %4458 = dma.done.wait (!%p4208_p1), %s3791_s8, 192  }
 0x769   : > { %4460 = vsyncadd (!%p4208_p1), %s3791_s8, 4294967104  ;;  %p19_p4 = scmp.ge.s32.totalorder %s4665_s10, 4   ;;  %s5300_s15 = smov %s4467_s16 }
 0x76a   : > { %s5301_s16 = smov %s4471_s17  ;;  %s5302_s17 = smov %s4675_s25 }
 0x76b   : > { %s5303_s18 = smov %s4665_s10  ;;  %21 = sbr.rel (!%p19_p4) target bundleno = 7 (0x7), region = 109 }
 0x772   :  { %3796 = vsyncpa [#allocation5], 1 }
 0x773   :  { %3798 = vsyncpa [#allocation5 + $0x1], 1 }
 0x774   :  { %3799 = vsyncpa [#allocation8], 1 }
 0x775   :  { %3800 = vsyncpa [#allocation11], 1 }
 0x776   :  { %3801 = vsyncpa [#allocation6], 1 }
 0x777   :  { %3803 = vsyncpa [#allocation6 + $0x1], 1 }

// kernel: hourglass_block.9
= control target key start
LH: loop header
LB: loop body
LE: loop exit
PB: predicated region body
PF: predicated region fallthrough
CT: control target
= control target key end

     0   :  { %s5227_s0 = inlined_call_operand.hbm [shape: f32[2,8,8,8], index: 0, kind: input, shape index: {}]   ;;  %s5228_s1 = inlined_call_operand.hbm [shape: f32[9,4,8], index: 1, kind: input, shape index: {}]   ;;  %s5229_s2 = inlined_call_operand.hbm [shape: f32[9,4,4], index: 2, kind: input, shape index: {}]   ;;  %s5230_s3 = inlined_call_operand.hbm [shape: f32[1,80], index: 3, kind: input, shape index: {}]   ;;  %s5231_s4 = inlined_call_operand.hbm [shape: f32[4,8], index: 4, kind: input, shape index: {}]   ;;  %s5232_s5 = inlined_call_operand.hbm [shape: f32[2,4,288], index: 5, kind: input, shape index: {}]   ;;  %s5233_s6 = inlined_call_operand.hbm [shape: f32[2,4,16,16], index: 6, kind: output, shape index: {}]  }
   0x1   :  { %5238 = sst [smem:[#allocation21_spill]] %s5227_s0 }
   0x2   :  { %5239 = sst [smem:[#allocation22_spill]] %s5228_s1 }
   0x3   :  { %5240 = sst [smem:[#allocation23_spill]] %s5229_s2 }
   0x4   :  { %11 = vsyncpa [#allocation5], 0 }
   0x5   :  { %13 = vsyncpa [#allocation5 + $0x1], 0 }
   0x6   :  { %14 = vsyncpa [#allocation8], 0 }
   0x7   :  { %15 = vsyncpa [#allocation11], 0 }
   0x8   :  { %16 = vsyncpa [#allocation14], 0 }
   0x9   :  { %18 = vsyncpa [#allocation14 + $0x1], 0 }
   0xa   :  { %19 = vsyncpa [#allocation6], 0 }
   0xb   :  { %21 = vsyncpa [#allocation6 + $0x1], 0  ;;  %s4365_s21 = smov 0   ;;  %s4367_s22 = smov 0  }
   0xc   :  { %s4369_s23 = smov 0   ;;  %s4371_s24 = smov 0  }
   0xd LB: > { %s4386_s25 = sadd.s32 4294967295, %s4276_s24   ;;  %s3588_s26 = sadd.s32 4294967294, %s4276_s24   ;;  %s4276_s24 = sphi %s4371_s24, %s5266_s24   ;;  %s4272_s23 = sphi %s4369_s23, %s5265_s23   ;;  %s4268_s22 = sphi %s4367_s22, %s5264_s22   ;;  %s4264_s21 = sphi %s4365_s21, %s5263_s21  }
   0xe   : > { %p47_p0 = scmp.ne.s32.totalorder %s4268_s22, %s4264_s21  ;;  %p5234_p1 = scmp.eq.s32.totalorder %s4386_s25, 0 }
   0xf   : > { %p187_p3 = scmp.eq.s32.totalorder %s3588_s26, 1  ;;  %p3589_p5 = scmp.ge.s32.totalorder %s4276_s24, 1 }
  0x10   : > { %p4395_p4 = por %p5234_p1, %p47_p0  ;;  %p194_p7 = scmp.lt.s32.totalorder %s4276_s24, 3 }
  0x11   : > { %p4400_p6 = por %p187_p3, %p47_p0  ;;  %s4278_s30 = smov [#allocation7]  }
  0x12   : > { %s5241_s27 = scalar_select %p4395_p4, 1, 0 }
  0x13   : > { %s5242_s28 = scalar_select %p4400_p6, 1, 0 }
  0x14   : > { %p4405_p8 = pnand %p3589_p5, %p194_p7  ;;  %s206_s7 = sshll.u32 %s4278_s30, 4  ;;  %s4409_s7 = int_to_ptr.vmem [resolvable:$true] %s206_s7 }
  0x15   : > { %s4279_s9 = smov [#allocation10]   ;;  %s4280_s11 = smov [#allocation9]  }
  0x16   : > { %s5243_s29 = scalar_select %p4405_p8, 1, 0 }
  0x17   : > { %p3905_p9 = pneg %p4405_p8  ;;  %s233_s10 = sshll.u32 %s4279_s9, 4  ;;  %s4420_s10 = int_to_ptr.vmem [resolvable:$true] %s233_s10 }
  0x18   : > { %s4422_s12 = sshll.u32 %s4280_s11, 4  ;;  %s5245_s1 = sld [smem:[#allocation22_spill]]  ;;  %s220_s12 = int_to_ptr.vmem [resolvable:$true] %s4422_s12 }
  0x19   : > { %p4416_p11 = pnand %p3905_p9, %p5234_p1 }
  0x1b   : > { %p4432_p13 = pneg %p4416_p11 }
  0x1e   : > { %s4026_s15 = scalar_lea.hbm %s5245_s1, 576 }
  0x1f   : > { %p4027_p12 = scmp.ne.s32.totalorder %s5245_s1, %s4026_s15  ;;  %p4033_p5 = scmp.lt.u32.totalorder %s4026_s15, %s5245_s1 }
  0x21   : > { %p4029_p0 = pnand %p4432_p13, %p4027_p12 }
  0x23   : > { %p4030_p3 = pneg %p4029_p0 }
  0x25   : > { %p4035_p7 = pnand %p4033_p5, %p4030_p3 }
  0x27   : > { %4038 = shalt.err (!%p4035_p7)
}
  0x28   : > { %s4039_s26 = scalar_lea.vmem %s4409_s7, 576  ;;  %p4047_p2 = scmp.lt.s32.totalorder %s4409_s7, %s4409_s7 }
  0x29   : > { %p4040_p9 = scmp.ne.s32.totalorder %s4409_s7, %s4039_s26  ;;  %p4048_p6 = scmp.lt.s32.totalorder %s4039_s26, %s4039_s26 }
  0x2b   : > { %p4042_p10 = pnand %p4040_p9, %p4432_p13  ;;  %p4049_p12 = por %p4048_p6, %p4047_p2 }
  0x2d   : > { %p4043_p1 = pneg %p4042_p10 }
  0x2f   : > { %p4050_p0 = pnand %p4049_p12, %p4043_p1 }
  0x31   : > { %4053 = shalt.err (!%p4050_p0)
}
  0x32   : > { %s4281_s30 = smov 64   ;;  %s4282_s9 = smov 4  }
  0x33   : > { %3908 = dma.hbm_to_vmem [thread:$0]  (!%p4416_p11), %s5245_s1, 576, %s4409_s7, [#allocation8], %s4281_s30, %s4281_s30, %s4282_s9  }
  0x34   : > { %s4054_s16 = scalar_lea.hbm %s5230_s3, 16 }
  0x35   : > { %p4055_p1 = scmp.ne.s32.totalorder %s5230_s3, %s4054_s16  ;;  %p4061_p10 = scmp.lt.u32.totalorder %s4054_s16, %s5230_s3 }
  0x37   : > { %p4057_p2 = pnand %p4055_p1, %p4432_p13 }
  0x39   : > { %p4058_p6 = pneg %p4057_p2 }
  0x3b   : > { %p4063_p3 = pnand %p4061_p10, %p4058_p6 }
  0x3d   : > { %4066 = shalt.err (!%p4063_p3)
}
  0x3e   : > { %s4067_s7 = scalar_lea.vmem %s4420_s10, 16  ;;  %s4074_s11 = scalar_lea.vmem %s4420_s10, 32 }
  0x3f   : > { %p4068_p5 = scmp.ne.s32.totalorder %s4420_s10, %s4067_s7  ;;  %p4075_p12 = scmp.lt.s32.totalorder %s4420_s10, %s4420_s10 }
  0x40   : > { %p4076_p0 = scmp.lt.s32.totalorder %s4074_s11, %s4067_s7 }
  0x41   : > { %p4070_p7 = pnand %p4068_p5, %p4432_p13 }
  0x42   : > { %p4077_p1 = por %p4076_p0, %p4075_p12 }
  0x43   : > { %p4071_p9 = pneg %p4070_p7 }
  0x45   : > { %p4078_p2 = pnand %p4077_p1, %p4071_p9 }
  0x47   : > { %4081 = shalt.err (!%p4078_p2)
}
  0x48   : > { %3914 = dma.hbm_to_vmem [thread:$0]  (!%p4416_p11), %s5230_s3, 16, %s4420_s10, [#allocation11]  }
  0x49   : > { %s5247_s2 = sld [smem:[#allocation23_spill]] }
  0x4f   : > { %s4082_s17 = scalar_lea.hbm %s5247_s2, 576 }
  0x50   : > { %p4083_p6 = scmp.ne.s32.totalorder %s5247_s2, %s4082_s17  ;;  %p4089_p5 = scmp.lt.u32.totalorder %s4082_s17, %s5247_s2 }
  0x52   : > { %p4085_p10 = pnand %p4083_p6, %p4432_p13 }
  0x54   : > { %p4086_p3 = pneg %p4085_p10 }
  0x56   : > { %p4091_p7 = pnand %p4089_p5, %p4086_p3 }
  0x58   : > { %4094 = shalt.err (!%p4091_p7)
}
  0x59   : > { %s4095_s11 = scalar_lea.vmem %s220_s12, 576  ;;  %p4103_p1 = scmp.lt.s32.totalorder %s220_s12, %s220_s12 }
  0x5a   : > { %p4096_p9 = scmp.ne.s32.totalorder %s220_s12, %s4095_s11  ;;  %p4104_p2 = scmp.lt.s32.totalorder %s4095_s11, %s4095_s11 }
  0x5c   : > { %p4098_p12 = pnand %p4096_p9, %p4432_p13  ;;  %p4105_p4 = por %p4104_p2, %p4103_p1 }
  0x5e   : > { %p4099_p0 = pneg %p4098_p12 }
  0x60   : > { %p4106_p8 = pnand %p4105_p4, %p4099_p0 }
  0x62   : > { %4109 = shalt.err (!%p4106_p8)
}
  0x63   : > { %3911 = dma.hbm_to_vmem [thread:$0]  (!%p4416_p11), %s5247_s2, 576, %s220_s12, [#allocation8], %s4281_s30, %s4281_s30, %s4282_s9  }
  0x64   : > { %s4283_s14 = smov [#allocation12]   ;;  %s4110_s19 = scalar_lea.hbm %s5231_s4, 64 }
  0x65   : > { %s244_s15 = sshll.u32 %s4283_s14, 4  ;;  %p4111_p4 = scmp.ne.s32.totalorder %s5231_s4, %s4110_s19  ;;  %s245_s15 = int_to_ptr.vmem [resolvable:$true] %s244_s15 }
  0x66   : > { %p4117_p10 = scmp.lt.u32.totalorder %s4110_s19, %s5231_s4 }
  0x67   : > { %p4113_p8 = pnand %p4111_p4, %p4432_p13 }
  0x69   : > { %p4114_p6 = pneg %p4113_p8 }
  0x6b   : > { %p4119_p3 = pnand %p4117_p10, %p4114_p6 }
  0x6d   : > { %4122 = shalt.err (!%p4119_p3)
}
  0x6e   : > { %s4123_s12 = scalar_lea.vmem %s245_s15, 64  ;;  %p4131_p12 = scmp.lt.s32.totalorder %s245_s15, %s245_s15 }
  0x6f   : > { %p4124_p5 = scmp.ne.s32.totalorder %s245_s15, %s4123_s12  ;;  %p4132_p0 = scmp.lt.s32.totalorder %s4123_s12, %s4123_s12 }
  0x71   : > { %p4126_p7 = pnand %p4124_p5, %p4432_p13  ;;  %p4133_p1 = por %p4132_p0, %p4131_p12 }
  0x73   : > { %p4127_p9 = pneg %p4126_p7 }
  0x75   : > { %p4134_p2 = pnand %p4133_p1, %p4127_p9 }
  0x77   : > { %4137 = shalt.err (!%p4134_p2)
}
  0x78   : > { %3917 = dma.hbm_to_vmem [thread:$0]  (!%p4416_p11), %s5231_s4, 64, %s245_s15, [#allocation11]  }
  0x79   : > { %s4521_s18 = sadd.s32 1, %s4276_s24   ;;  %s34_s10 = sadd.s32 1, %s4272_s23 }
  0x7a   : > { %s31_s8 = ssub.s32 %s4276_s24, %s4521_s18  ;;  %p41_p13 = scmp.ne.s32.totalorder %s4272_s23, %s4268_s22 }
  0x7b   : > { %p32_p4 = scmp.eq.s32.totalorder %s31_s8, 0  ;;  %p42_p8 = scmp.eq.s32.totalorder %s4276_s24, 0 }
  0x7c   : > { %p5248_p6 = scmp.eq.s32.totalorder %s4386_s25, 1  ;;  %p3933_p3 = scmp.lt.s32.totalorder %s4276_s24, 2 }
  0x7d   : > { %s4537_s14 = scalar_select %p32_p4, %s4272_s23, %s34_s10  }
  0x7e   : > { %p4531_p10 = por %p5248_p6, %p41_p13  ;;  %p43_p5 = por %p42_p8, %p41_p13 }
  0x7f   : > { %s4540_s16 = sand.u32 1, %s4272_s23   ;;  %s3657_s17 = sshll.u32 %s4276_s24, 10 }
  0x80   : > { %s5249_s13 = scalar_select %p4531_p10, 1, 0 }
  0x81   : > { %s3595_s15 = sshll.u32 %s4540_s16, 6  ;;  %s5250_s0 = sld [smem:[#allocation21_spill]] }
  0x82   : > { %s259_s7 = scalar_lea.vmem [#allocation4], %s3595_s15  ;;  %p4551_p11 = pnand %p3933_p3, %p43_p5 }
  0x83   : > { %s266_s11 = sshll.u32 %s259_s7, 4  ;;  %s256_s30 = scalar_lea.sflag [#allocation5], %s4540_s16  ;;  %s4549_s11 = int_to_ptr.vmem [resolvable:$true] %s266_s11 }
  0x84   : > { %p4140_p9 = pneg %p4551_p11 }
  0x87   : > { %s4547_s26 = scalar_lea.hbm %s5250_s0, %s3657_s17  ;;  %s4143_s15 = scalar_lea.hbm %s5250_s0, 2048 }
  0x88   : > { %s4138_s9 = scalar_lea.hbm %s4547_s26, 1024  ;;  %p4144_p1 = scmp.lt.u32.totalorder %s4547_s26, %s5250_s0 }
  0x89   : > { %p4139_p7 = scmp.ne.s32.totalorder %s4547_s26, %s4138_s9  ;;  %p4145_p2 = scmp.lt.u32.totalorder %s4143_s15, %s4138_s9 }
  0x8a   : > { %p4147_p4 = scmp.lt.u32.totalorder %s4138_s9, %s4547_s26 }
  0x8b   : > { %p4141_p12 = pnand %p4140_p9, %p4139_p7  ;;  %p4146_p13 = por %p4145_p2, %p4144_p1 }
  0x8d   : > { %p4142_p0 = pneg %p4141_p12  ;;  %p4148_p8 = por %p4147_p4, %p4146_p13 }
  0x8f   : > { %p4149_p6 = pnand %p4148_p8, %p4142_p0 }
  0x91   : > { %4152 = shalt.err (!%p4149_p6)
}
  0x92   : > { %s4153_s20 = scalar_lea.vmem %s4549_s11, 1024  ;;  %s4284_s7 = smov [#allocation4]  }
  0x93   : > { %p4154_p3 = scmp.ne.s32.totalorder %s4549_s11, %s4153_s20  ;;  %s4158_s10 = sshll.u32 %s4284_s7, 4  ;;  %s4159_s10 = int_to_ptr.vmem [resolvable:$false] %s4158_s10 }
  0x94   : > { %s4160_s8 = scalar_lea.vmem %s4159_s10, 2048  ;;  %p4161_p12 = scmp.lt.s32.totalorder %s4549_s11, %s4159_s10 }
  0x95   : > { %p4156_p5 = pnand %p4154_p3, %p4140_p9  ;;  %p4162_p1 = scmp.lt.s32.totalorder %s4160_s8, %s4153_s20 }
  0x97   : > { %p4157_p7 = pneg %p4156_p5  ;;  %p4163_p2 = por %p4162_p1, %p4161_p12 }
  0x99   : > { %p4164_p13 = pnand %p4163_p2, %p4157_p7 }
  0x9b   : > { %4167 = shalt.err (!%p4164_p13)
}
  0x9c   : > { %s4285_s9 = smov 128   ;;  %s4286_s15 = smov 8  }
  0x9d   : > { %3921 = dma.hbm_to_vmem [thread:$0]  (!%p4551_p11), %s4547_s26, 1024, %s4549_s11, %s256_s30, %s4285_s9, %s4285_s9, %s4286_s15  }
  0x9e   : > { %s3880_s17 = smul.u32 12, %s4540_s16  ;;  %s277_s1 = scalar_lea.sflag [#allocation14], %s4540_s16 }
  0x9f   : > { %s3881_s19 = smul.u32 192, %s4276_s24  ;;  %s4173_s30 = scalar_lea.hbm %s5232_s5, 384 }
  0xa0   : > { %s280_s8 = scalar_lea.vmem [#allocation13], %s3880_s17 }
  0xa1   : > { %s4588_s10 = scalar_lea.hbm %s5232_s5, %s3881_s19  ;;  %s288_s0 = sshll.u32 %s280_s8, 4  ;;  %s289_s0 = int_to_ptr.vmem [resolvable:$true] %s288_s0 }
  0xa2   : > { %s4168_s2 = scalar_lea.hbm %s4588_s10, 192  ;;  %p4174_p6 = scmp.lt.u32.totalorder %s4588_s10, %s5232_s5 }
  0xa3   : > { %p4169_p0 = scmp.ne.s32.totalorder %s4588_s10, %s4168_s2  ;;  %p4175_p3 = scmp.lt.u32.totalorder %s4173_s30, %s4168_s2 }
  0xa4   : > { %p4177_p7 = scmp.lt.u32.totalorder %s4168_s2, %s4588_s10 }
  0xa5   : > { %p4171_p4 = pnand %p4169_p0, %p4140_p9  ;;  %p4176_p5 = por %p4175_p3, %p4174_p6 }
  0xa7   : > { %p4172_p8 = pneg %p4171_p4  ;;  %p4178_p12 = por %p4177_p7, %p4176_p5 }
  0xa9   : > { %p4179_p1 = pnand %p4178_p12, %p4172_p8 }
  0xab   : > { %4182 = shalt.err (!%p4179_p1)
}
  0xac   : > { %s4183_s16 = scalar_lea.vmem %s289_s0, 192  ;;  %s4287_s17 = smov [#allocation13]  }
  0xad   : > { %p4184_p2 = scmp.ne.s32.totalorder %s289_s0, %s4183_s16  ;;  %s4188_s19 = sshll.u32 %s4287_s17, 4  ;;  %s4189_s19 = int_to_ptr.vmem [resolvable:$false] %s4188_s19 }
  0xae   : > { %s4190_s7 = scalar_lea.vmem %s4189_s19, 384  ;;  %p4191_p4 = scmp.lt.s32.totalorder %s289_s0, %s4189_s19 }
  0xaf   : > { %p4186_p13 = pnand %p4184_p2, %p4140_p9  ;;  %p4192_p10 = scmp.lt.s32.totalorder %s4190_s7, %s4183_s16 }
  0xb1   : > { %p4187_p0 = pneg %p4186_p13  ;;  %p4193_p3 = por %p4192_p10, %p4191_p4 }
  0xb3   : > { %p4194_p6 = pnand %p4193_p3, %p4187_p0 }
  0xb5   : > { %4197 = shalt.err (!%p4194_p6)
}
  0xb6   : > { %3924 = dma.hbm_to_vmem [thread:$0]  (!%p4551_p11), %s4588_s10, 192, %s289_s0, %s277_s1  }
  0xb7   : > { %p5252_p8 = scmp.ne.s32.totalorder %s5243_s29, 0 }
  0xb8   : > { %s4613_s2 = sand.u32 (!%p5252_p8), 1, %s4268_s22   ;;  %p5253_p10 = scmp.ne.s32.totalorder (!%p5252_p8), %s5241_s27, 0 }
  0xb9   : > { %297 = sbr.rel (%p5252_p8) target bundleno = 2288 (0x8f0), region = 44  ;;  %s3600_s20 = sshll.u32 (!%p5252_p8), %s4613_s2, 6 }
  0xba   : > { %s300_s8 = scalar_lea.sflag (!%p5252_p8), [#allocation5], %s4613_s2  ;;  %s4619_s26 = scalar_lea.vmem (!%p5252_p8), [#allocation4], %s3600_s20 }
  0xc0   : > { %4243 = dma.done.wait (%p5253_p10), %s300_s8, 1024  }
  0xc1   : > { %4245 = vsyncadd (%p5253_p10), %s300_s8, 4294966272  ;;  %p5254_p11 = scmp.eq.s32.totalorder %s4386_s25, 0 }
  0xc3   : > { %4247 = dma.done.wait (%p5254_p11), [#allocation8], 1152   ;;  %p5255_p9 = pmov %p5254_p11 }
  0xc5   : > { %4249 = vsyncadd (%p5255_p9), [#allocation8], 4294966144  ;;  %p5256_p5 = pmov %p5255_p9 }
  0xc7   : > { %4251 = dma.done.wait (%p5256_p5), [#allocation11], 80   ;;  %p5257_p7 = pmov %p5256_p5 }
  0xc8   : > { %s3882_s0 = smul.u32 12, %s4613_s2  ;;  %s325_s1 = scalar_lea.sflag [#allocation14], %s4613_s2 }
  0xc9   : > { %4253 = vsyncadd (%p5257_p7), [#allocation11], 4294967216 }
  0xca   : > { %s4635_s29 = scalar_lea.vmem [#allocation13], %s3882_s0 }
  0xcb   : > { %4255 = dma.done.wait (%p5253_p10), %s325_s1, 192  }
  0xcc   : > { %4257 = vsyncadd (%p5253_p10), %s325_s1, 4294967104  ;;  %vm363_vm0 = vcmask 900096   ;;  %v4288_v0 = vmov 0.0   ;;  %vm384_vm1 = vcmask 1041409   ;;  %vm387_vm2 = vcmask 1042434   ;;  %s4289_s27 = smov 11  }
  0xcd   : > { %364 = vst.msk [vmem:[#allocation2] sm:$0xff] %vm363_vm0, %v4288_v0  ;;  %3713 = vmatprep.subr.mxu0 %v4288_v0  ;;  %3758 = vmatprep.subr.mxu1 %v4288_v0  ;;  %vm390_vm3 = vcmask 1043459   ;;  %vm393_vm4 = vcmask 1044484   ;;  %vm396_vm5 = vcmask 1045509   ;;  %vm399_vm6 = vcmask 1046534   ;;  %s4290_s12 = smov 31  }
  0xce   : > { %v367_v1 = vld [vmem:[%s4619_s26] sm:$0x1]  ;;  %v368_v2 = vld [vmem:[%s4619_s26 + $0x8] sm:$0x1]  ;;  %v369_v3 = vld [vmem:[%s4619_s26 + $0x10] sm:$0x1] }
  0xcf   : > { %v370_v4 = vld [vmem:[%s4619_s26 + $0x18] sm:$0x1]  ;;  %v371_v5 = vld [vmem:[%s4619_s26 + $0x20] sm:$0x1]  ;;  %v372_v6 = vld [vmem:[%s4619_s26 + $0x28] sm:$0x1] }
  0xd0   : > { %v373_v7 = vld [vmem:[%s4619_s26 + $0x30] sm:$0x1]  ;;  %v374_v8 = vld [vmem:[%s4619_s26 + $0x38] sm:$0x1]  ;;  %v383_v9 = vrot.slane %v368_v2, 7  ;;  %v386_v10 = vrot.slane %v369_v3, 6 }
  0xd1   : > { %v389_v11 = vrot.slane %v370_v4, 5  ;;  %v392_v12 = vrot.slane %v371_v5, 4  ;;  %v395_v13 = vrot.slane %v372_v6, 3  ;;  %vm402_vm7 = vcmask 1047559   ;;  %v444_v14 = vld [vmem:[%s4619_s26 + $0x2] sm:$0x1] }
  0xd2   : > { %v385_v15 = vsel %vm384_vm1, %v383_v9, %v367_v1  ;;  %v398_v16 = vrot.slane %v373_v7, 2  ;;  %v401_v17 = vrot.slane %v374_v8, 1  ;;  %v445_v18 = vld [vmem:[%s4619_s26 + $0xa] sm:$0x1]  ;;  %v446_v19 = vld [vmem:[%s4619_s26 + $0x12] sm:$0x1] }
  0xd3   : > { %v388_v20 = vsel %vm387_vm2, %v386_v10, %v385_v15  ;;  %v447_v21 = vld [vmem:[%s4619_s26 + $0x1a] sm:$0x1]  ;;  %v448_v22 = vld [vmem:[%s4619_s26 + $0x22] sm:$0x1]  ;;  %v449_v23 = vld [vmem:[%s4619_s26 + $0x2a] sm:$0x1] }
  0xd4   : > { %v391_v24 = vsel %vm390_vm3, %v389_v11, %v388_v20  ;;  %v450_v25 = vld [vmem:[%s4619_s26 + $0x32] sm:$0x1]  ;;  %v451_v26 = vld [vmem:[%s4619_s26 + $0x3a] sm:$0x1]  ;;  %v460_v27 = vrot.slane %v445_v18, 7  ;;  %v462_v28 = vrot.slane %v446_v19, 6 }
  0xd5   : > { %v394_v29 = vsel %vm393_vm4, %v392_v12, %v391_v24  ;;  %v464_v30 = vrot.slane %v447_v21, 5  ;;  %v466_v31 = vrot.slane %v448_v22, 4  ;;  %v468_v32 = vrot.slane %v449_v23, 3  ;;  %v409_v33 = vld [vmem:[%s4619_s26 + $0x1] sm:$0x1]  ;;  %s4291_s10 = smov 21  }
  0xd6   : > { %v397_v34 = vsel %vm396_vm5, %v395_v13, %v394_v29  ;;  %v461_v35 = vsel %vm384_vm1, %v460_v27, %v444_v14  ;;  %v470_v36 = vrot.slane %v450_v25, 2  ;;  %v472_v37 = vrot.slane %v451_v26, 1  ;;  %v410_v38 = vld [vmem:[%s4619_s26 + $0x9] sm:$0x1]  ;;  %v411_v39 = vld [vmem:[%s4619_s26 + $0x11] sm:$0x1] }
  0xd7   : > { %v400_v40 = vsel %vm399_vm6, %v398_v16, %v397_v34  ;;  %v463_v41 = vsel %vm387_vm2, %v462_v28, %v461_v35  ;;  %v412_v42 = vld [vmem:[%s4619_s26 + $0x19] sm:$0x1]  ;;  %v413_v43 = vld [vmem:[%s4619_s26 + $0x21] sm:$0x1]  ;;  %v414_v44 = vld [vmem:[%s4619_s26 + $0x29] sm:$0x1] }
  0xd8   : > { %v403_v45 = vsel %vm402_vm7, %v401_v17, %v400_v40  ;;  %v465_v46 = vsel %vm390_vm3, %v464_v30, %v463_v41  ;;  %v415_v47 = vld [vmem:[%s4619_s26 + $0x31] sm:$0x1]  ;;  %v416_v48 = vld [vmem:[%s4619_s26 + $0x39] sm:$0x1]  ;;  %v425_v49 = vrot.slane %v410_v38, 7  ;;  %v427_v50 = vrot.slane %v411_v39, 6 }
  0xd9   : > { %404 = vrot.lane.b32.xlu0 %v403_v45, %s4289_s27  ;;  %v467_v51 = vsel %vm393_vm4, %v466_v31, %v465_v46  ;;  %v429_v52 = vrot.slane %v412_v42, 5  ;;  %v431_v53 = vrot.slane %v413_v43, 4  ;;  %v433_v54 = vrot.slane %v414_v44, 3  ;;  %v479_v55 = vld [vmem:[%s4619_s26 + $0x3] sm:$0x1]  ;;  %s4292_s11 = smov 41  }
  0xda   : > { %v469_v56 = vsel %vm396_vm5, %v468_v32, %v467_v51  ;;  %v426_v57 = vsel %vm384_vm1, %v425_v49, %v409_v33  ;;  %v435_v58 = vrot.slane %v415_v47, 2  ;;  %v437_v59 = vrot.slane %v416_v48, 1  ;;  %v480_v60 = vld [vmem:[%s4619_s26 + $0xb] sm:$0x1]  ;;  %v481_v61 = vld [vmem:[%s4619_s26 + $0x13] sm:$0x1] }
  0xdb   : > { %v471_v62 = vsel %vm399_vm6, %v470_v36, %v469_v56  ;;  %v428_v63 = vsel %vm387_vm2, %v427_v50, %v426_v57  ;;  %v482_v1 = vld [vmem:[%s4619_s26 + $0x1b] sm:$0x1]  ;;  %v483_v2 = vld [vmem:[%s4619_s26 + $0x23] sm:$0x1]  ;;  %v484_v3 = vld [vmem:[%s4619_s26 + $0x2b] sm:$0x1] }
  0xdc   : > { %v473_v4 = vsel %vm402_vm7, %v472_v37, %v471_v62  ;;  %v430_v5 = vsel %vm390_vm3, %v429_v52, %v428_v63  ;;  %v485_v6 = vld [vmem:[%s4619_s26 + $0x33] sm:$0x1]  ;;  %v486_v7 = vld [vmem:[%s4619_s26 + $0x3b] sm:$0x1]  ;;  %v495_v8 = vrot.slane %v480_v60, 7  ;;  %v497_v9 = vrot.slane %v481_v61, 6 }
  0xdd   : > { %474 = vrot.lane.b32.xlu1 %v473_v4, %s4290_s12  ;;  %v432_v10 = vsel %vm393_vm4, %v431_v53, %v430_v5  ;;  %v499_v11 = vrot.slane %v482_v1, 5  ;;  %v501_v12 = vrot.slane %v483_v2, 4  ;;  %v503_v13 = vrot.slane %v484_v3, 3  ;;  %v514_v14 = vld [vmem:[%s4619_s26 + $0x4] sm:$0x1]  ;;  %s4293_s30 = smov 51  }
  0xde   : > { %v434_v15 = vsel %vm396_vm5, %v433_v54, %v432_v10  ;;  %v496_v16 = vsel %vm384_vm1, %v495_v8, %v479_v55  ;;  %v505_v17 = vrot.slane %v485_v6, 2  ;;  %v507_v18 = vrot.slane %v486_v7, 1  ;;  %v515_v19 = vld [vmem:[%s4619_s26 + $0xc] sm:$0x1]  ;;  %v516_v20 = vld [vmem:[%s4619_s26 + $0x14] sm:$0x1] }
  0xdf   : > { %v436_v21 = vsel %vm399_vm6, %v435_v58, %v434_v15  ;;  %v498_v22 = vsel %vm387_vm2, %v497_v9, %v496_v16  ;;  %v517_v23 = vld [vmem:[%s4619_s26 + $0x1c] sm:$0x1]  ;;  %v518_v24 = vld [vmem:[%s4619_s26 + $0x24] sm:$0x1]  ;;  %v519_v25 = vld [vmem:[%s4619_s26 + $0x2c] sm:$0x1] }
  0xe0   : > { %v438_v26 = vsel %vm402_vm7, %v437_v59, %v436_v21  ;;  %v500_v27 = vsel %vm390_vm3, %v499_v11, %v498_v22  ;;  %v520_v28 = vld [vmem:[%s4619_s26 + $0x34] sm:$0x1]  ;;  %v521_v29 = vld [vmem:[%s4619_s26 + $0x3c] sm:$0x1]  ;;  %v530_v30 = vrot.slane %v515_v19, 7  ;;  %v532_v31 = vrot.slane %v516_v20, 6 }
  0xe1   : > { %439 = vrot.lane.b32.xlu0 %v438_v26, %s4291_s10  ;;  %v502_v32 = vsel %vm393_vm4, %v501_v12, %v500_v27  ;;  %v534_v33 = vrot.slane %v517_v23, 5  ;;  %v536_v34 = vrot.slane %v518_v24, 4  ;;  %v538_v35 = vrot.slane %v519_v25, 3  ;;  %v549_v36 = vld [vmem:[%s4619_s26 + $0x5] sm:$0x1]  ;;  %s4294_s9 = smov 61  }
  0xe2   : > { %v504_v37 = vsel %vm396_vm5, %v503_v13, %v502_v32  ;;  %v531_v38 = vsel %vm384_vm1, %v530_v30, %v514_v14  ;;  %v540_v39 = vrot.slane %v520_v28, 2  ;;  %v542_v40 = vrot.slane %v521_v29, 1  ;;  %v550_v41 = vld [vmem:[%s4619_s26 + $0xd] sm:$0x1]  ;;  %v551_v42 = vld [vmem:[%s4619_s26 + $0x15] sm:$0x1] }
  0xe3   : > { %v506_v43 = vsel %vm399_vm6, %v505_v17, %v504_v37  ;;  %v533_v44 = vsel %vm387_vm2, %v532_v31, %v531_v38  ;;  %v552_v45 = vld [vmem:[%s4619_s26 + $0x1d] sm:$0x1]  ;;  %v553_v46 = vld [vmem:[%s4619_s26 + $0x25] sm:$0x1]  ;;  %v554_v47 = vld [vmem:[%s4619_s26 + $0x2d] sm:$0x1] }
  0xe4   : > { %v508_v48 = vsel %vm402_vm7, %v507_v18, %v506_v43  ;;  %v535_v49 = vsel %vm390_vm3, %v534_v33, %v533_v44  ;;  %v555_v50 = vld [vmem:[%s4619_s26 + $0x35] sm:$0x1]  ;;  %v556_v51 = vld [vmem:[%s4619_s26 + $0x3d] sm:$0x1]  ;;  %v565_v52 = vrot.slane %v550_v41, 7  ;;  %v567_v53 = vrot.slane %v551_v42, 6 }
  0xe5   : > { %509 = vrot.lane.b32.xlu1 %v508_v48, %s4292_s11  ;;  %v537_v54 = vsel %vm393_vm4, %v536_v34, %v535_v49  ;;  %v569_v55 = vrot.slane %v552_v45, 5  ;;  %v571_v56 = vrot.slane %v553_v46, 4  ;;  %v573_v57 = vrot.slane %v554_v47, 3  ;;  %v584_v58 = vld [vmem:[%s4619_s26 + $0x6] sm:$0x1]  ;;  %s4295_s15 = smov 71  }
  0xe6   : > { %v539_v59 = vsel %vm396_vm5, %v538_v35, %v537_v54  ;;  %v566_v60 = vsel %vm384_vm1, %v565_v52, %v549_v36  ;;  %v575_v61 = vrot.slane %v555_v50, 2  ;;  %v577_v62 = vrot.slane %v556_v51, 1  ;;  %v585_v63 = vld [vmem:[%s4619_s26 + $0xe] sm:$0x1]  ;;  %v586_v1 = vld [vmem:[%s4619_s26 + $0x16] sm:$0x1] }
  0xe7   : > { %v541_v2 = vsel %vm399_vm6, %v540_v39, %v539_v59  ;;  %v568_v3 = vsel %vm387_vm2, %v567_v53, %v566_v60  ;;  %v587_v4 = vld [vmem:[%s4619_s26 + $0x1e] sm:$0x1]  ;;  %v588_v5 = vld [vmem:[%s4619_s26 + $0x26] sm:$0x1]  ;;  %v589_v6 = vld [vmem:[%s4619_s26 + $0x2e] sm:$0x1] }
  0xe8   : > { %v543_v7 = vsel %vm402_vm7, %v542_v40, %v541_v2  ;;  %v570_v8 = vsel %vm390_vm3, %v569_v55, %v568_v3  ;;  %v590_v9 = vld [vmem:[%s4619_s26 + $0x36] sm:$0x1]  ;;  %v591_v10 = vld [vmem:[%s4619_s26 + $0x3e] sm:$0x1]  ;;  %v600_v11 = vrot.slane %v585_v63, 7  ;;  %v602_v12 = vrot.slane %v586_v1, 6 }
  0xe9   : > { %544 = vrot.lane.b32.xlu0 %v543_v7, %s4293_s30  ;;  %v572_v13 = vsel %vm393_vm4, %v571_v56, %v570_v8  ;;  %v604_v14 = vrot.slane %v587_v4, 5  ;;  %v606_v15 = vrot.slane %v588_v5, 4  ;;  %v608_v16 = vrot.slane %v589_v6, 3  ;;  %v619_v17 = vld [vmem:[%s4619_s26 + $0x7] sm:$0x1]  ;;  %s4296_s16 = smov 81  }
  0xea   : > { %v574_v18 = vsel %vm396_vm5, %v573_v57, %v572_v13  ;;  %v601_v19 = vsel %vm384_vm1, %v600_v11, %v584_v58  ;;  %v610_v20 = vrot.slane %v590_v9, 2  ;;  %v612_v21 = vrot.slane %v591_v10, 1  ;;  %v620_v22 = vld [vmem:[%s4619_s26 + $0xf] sm:$0x1]  ;;  %v621_v23 = vld [vmem:[%s4619_s26 + $0x17] sm:$0x1] }
  0xeb   : > { %v576_v24 = vsel %vm399_vm6, %v575_v61, %v574_v18  ;;  %v603_v25 = vsel %vm387_vm2, %v602_v12, %v601_v19  ;;  %v622_v26 = vld [vmem:[%s4619_s26 + $0x1f] sm:$0x1]  ;;  %v623_v27 = vld [vmem:[%s4619_s26 + $0x27] sm:$0x1]  ;;  %v624_v28 = vld [vmem:[%s4619_s26 + $0x2f] sm:$0x1] }
  0xec   : > { %v578_v29 = vsel %vm402_vm7, %v577_v62, %v576_v24  ;;  %v605_v30 = vsel %vm390_vm3, %v604_v14, %v603_v25  ;;  %v625_v31 = vld [vmem:[%s4619_s26 + $0x37] sm:$0x1]  ;;  %v635_v32 = vrot.slane %v620_v22, 7  ;;  %v637_v33 = vrot.slane %v621_v23, 6  ;;  %v626_v35 = vld [vmem:[%s4619_s26 + $0x3f] sm:$0x1] }
  0xed   : > { %579 = vrot.lane.b32.xlu1 %v578_v29, %s4294_s9  ;;  %v607_v34 = vsel %vm393_vm4, %v606_v15, %v605_v30  ;;  %v639_v36 = vrot.slane %v622_v26, 5  ;;  %v641_v37 = vrot.slane %v623_v27, 4  ;;  %v643_v40 = vrot.slane %v624_v28, 3  ;;  %s4298_s17 = smov 126   ;;  %s4299_s19 = smov 127  }
  0xee   : > { %v609_v38 = vsel %vm396_vm5, %v608_v16, %v607_v34  ;;  %v636_v39 = vsel %vm384_vm1, %v635_v32, %v619_v17  ;;  %v645_v43 = vrot.slane %v625_v31, 2  ;;  %v647_v46 = vrot.slane %v626_v35, 1  ;;  %s4300_s7 = smov 117   ;;  %s4301_s8 = smov 118   ;;  %v657_v60 = vld [vmem:[#allocation7 + $0x4] sm:$0xf] }
  0xef   : > { %v611_v41 = vsel %vm399_vm6, %v610_v20, %v609_v38  ;;  %v638_v42 = vsel %vm387_vm2, %v637_v33, %v636_v39  ;;  %vm407_vm8 = vcmask 154712   ;;  %vm442_vm9 = vcmask 236712   ;;  %s4302_s26 = smov 108   ;;  %s4303_s0 = smov 116   ;;  %v654_v62 = vld [vmem:[#allocation7] sm:$0xf] }
  0xf0   : > { %v613_v44 = vsel %vm402_vm7, %v612_v21, %v611_v41  ;;  %v640_v45 = vsel %vm390_vm3, %v639_v36, %v638_v42  ;;  %vm477_vm10 = vcmask 318712   ;;  %vm512_vm11 = vcmask 400712   ;;  %s4304_s1 = smov 106   ;;  %s4305_s12 = smov 107   ;;  %v810_v1 = vld [vmem:[#allocation7 + $0x8] sm:$0xf] }
  0xf1   : > { %614 = vrot.lane.b32.xlu0 %v613_v44, %s4295_s15  ;;  %v642_v47 = vsel %vm393_vm4, %v641_v37, %v640_v45  ;;  %vm547_vm12 = vcmask 482712   ;;  %vm582_vm13 = vcmask 564712   ;;  %vm617_vm14 = vcmask 646712   ;;  %v889_v3 = vld [vmem:[#allocation7 + $0xc] sm:$0xf]  ;;  %s4308_s10 = smov 98  }
  0xf2   : > { %v644_v48 = vsel %vm396_vm5, %v643_v40, %v642_v47  ;;  %vm4297_vm15 = vmmov 0   ;;  %vm652_vm0 = vcmask 728712   ;;  %vm662_vm1 = vcmask 64512   ;;  %v968_v5 = vld [vmem:[#allocation7 + $0x10] sm:$0xf]  ;;  %s4309_s11 = smov 68  }
  0xf3   : > { %v646_v49 = vsel %vm399_vm6, %v645_v43, %v644_v48  ;;  %3715 = vmatprep.mubr.msk.f32.mxu0 %vm4297_vm15, %v4288_v0  ;;  %3760 = vmatprep.mubr.msk.f32.mxu1 %vm4297_vm15, %v4288_v0  ;;  %v1047_v7 = vld [vmem:[#allocation7 + $0x14] sm:$0xf]  ;;  %v1126_v9 = vld [vmem:[#allocation7 + $0x18] sm:$0xf]  ;;  %v1205_v11 = vld [vmem:[#allocation7 + $0x1c] sm:$0xf] }
  0xf4   : > { %v648_v50 = vsel %vm402_vm7, %v647_v46, %v646_v49  ;;  %v1284_v13 = vld [vmem:[#allocation7 + $0x20] sm:$0xf]  ;;  %v4824_v14 = vld [vmem:[#allocation10] ss:$0 sm:$0xff]  ;;  %vm1369_vm2 = vcmask 650240   ;;  %vm365_vm3 = vcmask 896000  }
  0xf5   : > { %649 = vrot.lane.b32.xlu1 %v648_v50, %s4296_s16  ;;  %366 = vst.msk [vmem:[#allocation3] sm:$0xf] %vm365_vm3, %v4288_v0  ;;  %vm1391_vm4 = vcmask 740440   ;;  %vm1404_vm5 = vcmask 1043456   ;;  %v1396_v34 = vld [vmem:[#allocation9 + $0x4] sm:$0xf] }
  0xf6   : > { %vm1400_vm6 = vcmask 31744   ;;  %v1393_v37 = vld [vmem:[#allocation9] sm:$0xf]  ;;  %v1553_v41 = vld [vmem:[#allocation9 + $0x8] sm:$0xf]  ;;  %s4310_s30 = smov 78  }
  0xf7   : > { %v1633_v43 = vld [vmem:[#allocation9 + $0xc] sm:$0xf]  ;;  %v1713_v45 = vld [vmem:[#allocation9 + $0x10] sm:$0xf]  ;;  %v1793_v46 = vld [vmem:[#allocation9 + $0x14] sm:$0xf] }
  0xf8   : > { %v1873_v48 = vld [vmem:[#allocation9 + $0x18] sm:$0xf]  ;;  %v1953_v49 = vld [vmem:[#allocation9 + $0x1c] sm:$0xf]  ;;  %s4311_s9 = smov 58   ;;  %s4312_s15 = smov 2  }
  0xf9   : > { %s4313_s16 = smov 4   ;;  %p5260_p1 = scmp.ne.s32.totalorder %s5249_s13, 0 }
 0x14b   : > { %v405_v51 = vpop.permute.xlu0 %404 }
 0x14c   : > { %408 = vst.msk [vmem:[#allocation2] sm:$0xff] %vm407_vm8, %v405_v51  ;;  %v2033_v51 = vld [vmem:[#allocation9 + $0x20] sm:$0xf] }
 0x14f   : > { %v475_v52 = vpop.permute.xlu1 %474 }
 0x153   : > { %v440_v53 = vpop.permute.xlu0 %439 }
 0x154   : > { %443 = vst.msk [vmem:[#allocation2] sm:$0xff] %vm442_vm9, %v440_v53 }
 0x155   : > { %478 = vst.msk [vmem:[#allocation2] sm:$0xff] %vm477_vm10, %v475_v52  ;;  %v2128_v52 = vld [vmem:[#allocation12] sm:$0xf]  ;;  %vm2323_vm10 = vcmask 122880  }
 0x157   : > { %v510_v54 = vpop.permute.xlu1 %509 }
 0x158   : > { %513 = vst.msk [vmem:[#allocation2] sm:$0xff] %vm512_vm11, %v510_v54  ;;  %vm2791_vm11 = vcmask 15360  }
 0x15b   : > { %v545_v55 = vpop.permute.xlu0 %544 }
 0x15c   : > { %548 = vst.msk [vmem:[#allocation2] sm:$0xff] %vm547_vm12, %v545_v55 }
 0x15f   : > { %v580_v56 = vpop.permute.xlu1 %579 }
 0x160   : > { %583 = vst.msk [vmem:[#allocation2] sm:$0xff] %vm582_vm13, %v580_v56 }
 0x163   : > { %v615_v57 = vpop.permute.xlu0 %614 }
 0x164   : > { %618 = vst.msk [vmem:[#allocation2] sm:$0xff] %vm617_vm14, %v615_v57 }
 0x167   : > { %v650_v58 = vpop.permute.xlu1 %649 }
 0x168   : > { %653 = vst.msk [vmem:[#allocation2] sm:$0xff] %vm652_vm0, %v650_v58 }
 0x16f   : > { %v4769_v59 = vld [vmem:[#allocation2] sm:$0xff] }
 0x170   : > { %811 = vrot.lane.b32.xlu1 %v4769_v59, %s4298_s17  ;;  %659 = vrot.lane.b32.xlu0 %v4769_v59, %s4299_s19 }
 0x174   : > { %969 = vrot.lane.b32.xlu1 %v4769_v59, %s4300_s7  ;;  %890 = vrot.lane.b32.xlu0 %v4769_v59, %s4301_s8 }
 0x178   : > { %1127 = vrot.lane.b32.xlu1 %v4769_v59, %s4302_s26  ;;  %1048 = vrot.lane.b32.xlu0 %v4769_v59, %s4303_s0 }
 0x17c   : > { %1285 = vrot.lane.b32.xlu1 %v4769_v59, %s4304_s1  ;;  %1206 = vrot.lane.b32.xlu0 %v4769_v59, %s4305_s12 }
 0x1e2   : > { %v660_v61 = vpop.permute.xlu0 %659  ;;  %v812_v63 = vpop.permute.xlu1 %811 }
 0x1e3   : > { %3714 = vmatpush3.msra.mxu0 %v660_v61 }
 0x1e4   : > { %3716 = vmatmul.mubr.msk.f32.vlgmr.msra.gmra.mrb[0].mxu0 %vm662_vm1, %v657_v60  ;;  %3718 = vmatprep.subr.mxu0 %v4288_v0 }
 0x1e5   : > { %3719 = vmatpush3.msra.mxu0 %v4769_v59  ;;  %3720 = vmatprep.mubr.msk.f32.mxu0 %vm4297_vm15, %v4288_v0 }
 0x1e6   : > { %3723 = vmatprep.subr.mxu0 %v4288_v0  ;;  %v891_v2 = vpop.permute.xlu0 %890  ;;  %v970_v4 = vpop.permute.xlu1 %969 }
 0x1ea   : > { %v1049_v6 = vpop.permute.xlu0 %1048  ;;  %v1128_v8 = vpop.permute.xlu1 %1127 }
 0x1ec   : > { %3721 = vmatmul.mubr.msk.f32.vlgmr.msra.gmra.mrb[0].mxu0 %vm662_vm1, %v654_v62 }
 0x1ed   : > { %3724 = vmatpush3.msra.mxu0 %v812_v63  ;;  %3725 = vmatprep.mubr.msk.f32.mxu0 %vm4297_vm15, %v4288_v0  ;;  %v2208_v63 = vlaneseq }
 0x1ee   : > { %3728 = vmatprep.subr.mxu0 %v4288_v0  ;;  %v1207_v10 = vpop.permute.xlu0 %1206  ;;  %v1286_v12 = vpop.permute.xlu1 %1285 }
 0x1f4   : > { %3726 = vmatmul.mubr.msk.f32.vlgmr.msra.gmra.mrb[0].mxu0 %vm662_vm1, %v810_v1  ;;  %v4896_v1 = vshrl.u32 %v2208_v63, 7 }
 0x1f5   : > { %3729 = vmatpush3.msra.mxu0 %v891_v2  ;;  %3730 = vmatprep.mubr.msk.f32.mxu0 %vm4297_vm15, %v4288_v0 }
 0x1f6   : > { %3733 = vmatprep.subr.mxu0 %v4288_v0 }
 0x1fc   : > { %3731 = vmatmul.mubr.msk.f32.vlgmr.msra.gmra.mrb[0].mxu0 %vm662_vm1, %v889_v3  ;;  %v2212_v3 = vmul.u32 2, %v4896_v1 }
 0x1fd   : > { %3734 = vmatpush3.msra.mxu0 %v970_v4  ;;  %3735 = vmatprep.mubr.msk.f32.mxu0 %vm4297_vm15, %v4288_v0 }
 0x1fe   : > { %3738 = vmatprep.subr.mxu0 %v4288_v0 }
 0x204   : > { %3736 = vmatmul.mubr.msk.f32.vlgmr.msra.gmra.mrb[0].mxu0 %vm662_vm1, %v968_v5  ;;  %v2209_v5 = vand.u32 127, %v2208_v63 }
 0x205   : > { %3739 = vmatpush3.msra.mxu0 %v1049_v6  ;;  %3740 = vmatprep.mubr.msk.f32.mxu0 %vm4297_vm15, %v4288_v0  ;;  %v2214_v6 = vadd.s32 1, %v2212_v3 }
 0x206   : > { %3743 = vmatprep.subr.mxu0 %v4288_v0  ;;  %vm2213_vm7 = vcmp.eq.s32.totalorder %v2209_v5, %v2212_v3 }
 0x207   : > { %vm2215_vm8 = vcmp.eq.s32.totalorder %v2209_v5, %v2214_v6 }
 0x208   : > { %vm4899_vm9 = vmor %vm2213_vm7, %vm2215_vm8 }
 0x20c   : > { %3741 = vmatmul.mubr.msk.f32.vlgmr.msra.gmra.mrb[0].mxu0 %vm662_vm1, %v1047_v7 }
 0x20d   : > { %3744 = vmatpush3.msra.mxu0 %v1128_v8  ;;  %3745 = vmatprep.mubr.msk.f32.mxu0 %vm4297_vm15, %v4288_v0  ;;  %v4306_v8 = vmov 1.0  }
 0x20e   : > { %3748 = vmatprep.subr.mxu0 %v4288_v0 }
 0x214   : > { %3746 = vmatmul.mubr.msk.f32.vlgmr.msra.gmra.mrb[0].mxu0 %vm662_vm1, %v1126_v9 }
 0x215   : > { %3749 = vmatpush3.msra.mxu0 %v1207_v10  ;;  %3750 = vmatprep.mubr.msk.f32.mxu0 %vm4297_vm15, %v4288_v0 }
 0x216   : > { %3753 = vmatprep.subr.mxu0 %v4288_v0 }
 0x21c   : > { %3751 = vmatmul.mubr.msk.f32.vlgmr.msra.gmra.mrb[0].mxu0 %vm662_vm1, %v1205_v11 }
 0x21d   : > { %3754 = vmatpush3.msra.mxu0 %v1286_v12  ;;  %3755 = vmatprep.mubr.msk.f32.mxu0 %vm4297_vm15, %v4288_v0 }
 0x21e   : > { %3803 = vmatprep.subr.mxu0 %v4288_v0 }
 0x224   : > { %3756 = vmatmul.mubr.msk.f32.vlgmr.msra.gmra.mrb[0].mxu0 %vm662_vm1, %v1284_v13 }
 0x225   : > { %3805 = vmatprep.mubr.msk.f32.mxu0 %vm4297_vm15, %v4288_v0 }
 0x2f7   : > { %v1357_v15 = vpop.f32.mrb[0].mxu0 }
 0x2f8   : > { %v1368_v16 = vmul.f32 %v4824_v14, %v1357_v15  ;;  %v3757_v17 = vpop.f32.mrb[1].mxu0 }
 0x2fa   : > { %v1370_v18 = vsel %vm1369_vm2, %v1368_v16, 0.0  ;;  %v2784_v16 = vld [vmem:[%s4635_s29] sm:$0xff] }
 0x2fb   : > { %1371 = vadd.xlane.f32.xlu0 %v1370_v18  ;;  %v2786_v17 = vcombine.high %v2784_v16, %v2784_v16  ;;  %v3358_v18 = vld [vmem:[%s4635_s29 + $0x4] sm:$0xff] }
 0x388   : > { %v1372_v19 = vpop.xlane.xlu0 %1371 }
 0x389   : > { %v1374_v20 = vmul.f32 0.015625, %v1372_v19  ;;  %v3360_v19 = vcombine.high %v3358_v18, %v3358_v18 }
 0x38b   : > { %v1375_v21 = vsub.f32 %v1357_v15, %v1374_v20  ;;  %v2328_v20 = vld [vmem:[%s4635_s29] sm:$0xf] }
 0x38d   : > { %v1376_v22 = vmul.f32 %v1375_v21, %v1375_v21 }
 0x38f   : > { %v1377_v23 = vmul.f32 %v4824_v14, %v1376_v22  ;;  %v2480_v22 = vld [vmem:[%s4635_s29] sm:$0xf] }
 0x391   : > { %v1378_v24 = vsel %vm1369_vm2, %v1377_v23, 0.0  ;;  %v2593_v23 = vld [vmem:[%s4635_s29] sm:$0xf] }
 0x392   : > { %1379 = vadd.xlane.f32.xlu1 %v1378_v24  ;;  %v2632_v24 = vld [vmem:[%s4635_s29] sm:$0xf] }
 0x41f   : > { %v1380_v25 = vpop.xlane.xlu1 %1379 }
 0x420   : > { %v1381_v26 = vmul.f32 0.015625, %v1380_v25  ;;  %v2745_v25 = vld [vmem:[%s4635_s29] sm:$0xf] }
 0x422   : > { %v1382_v27 = vadd.f32 1e-05, %v1381_v26  ;;  %v2902_v26 = vld [vmem:[%s4635_s29 + $0x4] sm:$0xf] }
 0x424   : > { %4022 = vrsqrt.f32 %v1382_v27  ;;  %v2941_v27 = vld [vmem:[%s4635_s29 + $0x4] sm:$0xf] }
 0x42e   : > { %v4023_v28 = vpop.eup %4022 }
 0x42f   : > { %v1384_v29 = vmul.f32 %v4023_v28, %v1375_v21  ;;  %v2441_v21 = vld [vmem:[%s4635_s29] sm:$0xf]  ;;  %v3054_v28 = vld [vmem:[%s4635_s29 + $0x4] sm:$0xf] }
 0x431   : > { %v1385_v30 = vmax.f32 %v1384_v29, 0.0  ;;  %v3093_v29 = vld [vmem:[%s4635_s29 + $0x4] sm:$0xf] }
 0x433   : > { %v1386_v31 = vmul.f32 %v4824_v14, %v1385_v30  ;;  %v3206_v30 = vld [vmem:[%s4635_s29 + $0x4] sm:$0xf] }
 0x435   : > { %1388 = vrot.lane.b32.xlu0 %v1386_v31, %s4289_s27  ;;  %s4307_s27 = smov 88   ;;  %v3245_v31 = vld [vmem:[%s4635_s29 + $0x4] sm:$0xf] }
 0x4a7   : > { %v1389_v32 = vpop.permute.xlu0 %1388 }
 0x4a8   : > { %1392 = vst.msk [vmem:[#allocation3] sm:$0xf] %vm1391_vm4, %v1389_v32  ;;  %v3401_v32 = vld [vmem:[%s4635_s29 + $0x8] sm:$0xf] }
 0x4af   : > { %v1394_v33 = vld [vmem:[#allocation3] sm:$0xf] }
 0x4b0   : > { %1554 = vrot.lane.b32.xlu0 %v1394_v33, %s4298_s17  ;;  %1398 = vrot.lane.b32.xlu1 %v1394_v33, %s4299_s19  ;;  %s4314_s17 = smov 110   ;;  %s4315_s19 = smov 92  }
 0x4b4   : > { %1714 = vrot.lane.b32.xlu0 %v1394_v33, %s4300_s7  ;;  %1634 = vrot.lane.b32.xlu1 %v1394_v33, %s4301_s8 }
 0x4b8   : > { %1874 = vrot.lane.b32.xlu0 %v1394_v33, %s4302_s26  ;;  %1794 = vrot.lane.b32.xlu1 %v1394_v33, %s4303_s0  ;;  %s4319_s0 = smov 20  }
 0x4bc   : > { %2034 = vrot.lane.b32.xlu0 %v1394_v33, %s4304_s1  ;;  %1954 = vrot.lane.b32.xlu1 %v1394_v33, %s4305_s12  ;;  %s4320_s1 = smov 112   ;;  %s4321_s12 = smov 94  }
 0x4c0   : > { %2130 = vrot.lane.b32.xlu1 %v4769_v59, %s4300_s7  ;;  %s4316_s7 = smov 74  }
 0x522   : > { %v1399_v35 = vpop.permute.xlu1 %1398  ;;  %v1555_v39 = vpop.permute.xlu0 %1554 }
 0x523   : > { %3759 = vmatpush3.msk.msra.mxu1 %vm1404_vm5, %v1399_v35 }
 0x524   : > { %3761 = vmatmul.mubr.msk.f32.vlgmr.msra.gmra.mrb[0].mxu1 %vm1400_vm6, %v1396_v34  ;;  %3763 = vmatprep.subr.mxu1 %v4288_v0 }
 0x525   : > { %3764 = vmatpush3.msk.msra.mxu1 %vm1404_vm5, %v1394_v33  ;;  %3765 = vmatprep.mubr.msk.f32.mxu1 %vm4297_vm15, %v4288_v0 }
 0x526   : > { %v1635_v36 = vpop.permute.xlu1 %1634  ;;  %3768 = vmatprep.subr.mxu1 %v4288_v0  ;;  %v1715_v44 = vpop.permute.xlu0 %1714 }
 0x52a   : > { %v1795_v38 = vpop.permute.xlu1 %1794  ;;  %v1875_v47 = vpop.permute.xlu0 %1874 }
 0x52c   : > { %3766 = vmatmul.mubr.msk.f32.vlgmr.msra.gmra.mrb[0].mxu1 %vm1400_vm6, %v1393_v37 }
 0x52d   : > { %3769 = vmatpush3.msk.msra.mxu1 %vm1404_vm5, %v1555_v39  ;;  %3770 = vmatprep.mubr.msk.f32.mxu1 %vm4297_vm15, %v4288_v0 }
 0x52e   : > { %v1955_v40 = vpop.permute.xlu1 %1954  ;;  %3773 = vmatprep.subr.mxu1 %v4288_v0  ;;  %v2035_v50 = vpop.permute.xlu0 %2034 }
 0x532   : > { %v2131_v42 = vpop.permute.xlu1 %2130 }
 0x533   : > { %3804 = vmatpush3.msra.mxu0 %v2131_v42 }
 0x534   : > { %3771 = vmatmul.mubr.msk.f32.vlgmr.msra.gmra.mrb[0].mxu1 %vm1400_vm6, %v1553_v41  ;;  %3813 = vmatprep.subr.mxu0 %v4288_v0  ;;  %v4326_v41 = vmov 1966171168  }
 0x535   : > { %3774 = vmatpush3.msk.msra.mxu1 %vm1404_vm5, %v1635_v36  ;;  %3775 = vmatprep.mubr.msk.f32.mxu1 %vm4297_vm15, %v4288_v0  ;;  %v2296_v42 = vunpack.c.l.s4 %v4326_v41 }
 0x536   : > { %3778 = vmatprep.subr.mxu1 %v4288_v0  ;;  %3806 = vmatmul.mubr.msk.f32.vlgmr.msra.gmra.mrb[2].mxu0 %vm662_vm1, %v2128_v52 }
 0x537   : > { %3815 = vmatprep.mubr.msk.f32.mxu0 %vm4297_vm15, %v4288_v0  ;;  %3814 = vmatpush3.msk.msra.mxu0 %vm4899_vm9, %v4306_v8 }
 0x538   : > { %3823 = vmatprep.subr.mxu0 %v4288_v0 }
 0x53c   : > { %3776 = vmatmul.mubr.msk.f32.vlgmr.msra.gmra.mrb[0].mxu1 %vm1400_vm6, %v1633_v43 }
 0x53d   : > { %3779 = vmatpush3.msk.msra.mxu1 %vm1404_vm5, %v1715_v44  ;;  %3780 = vmatprep.mubr.msk.f32.mxu1 %vm4297_vm15, %v4288_v0  ;;  %v2297_v44 = vunpack.c.0.s8 %v2296_v42 }
 0x53e   : > { %3783 = vmatprep.subr.mxu1 %v4288_v0 }
 0x544   : > { %3781 = vmatmul.mubr.msk.f32.vlgmr.msra.gmra.mrb[0].mxu1 %vm1400_vm6, %v1713_v45 }
 0x545   : > { %3784 = vmatpush3.msk.msra.mxu1 %vm1404_vm5, %v1795_v38  ;;  %3785 = vmatprep.mubr.msk.f32.mxu1 %vm4297_vm15, %v4288_v0 }
 0x546   : > { %3788 = vmatprep.subr.mxu1 %v4288_v0 }
 0x54c   : > { %3786 = vmatmul.mubr.msk.f32.vlgmr.msra.gmra.mrb[0].mxu1 %vm1400_vm6, %v1793_v46  ;;  %v2292_v46 = vld [vmem:[%s4635_s29] sm:$0xf]  ;;  %s4983_s29 = scalar_lea.vmem [#allocation15], %s3600_s20  ;;  %s3658_s20 = sshll.u32 %s4386_s25, 10 }
 0x54d   : > { %3789 = vmatpush3.msk.msra.mxu1 %vm1404_vm5, %v1875_v47  ;;  %3790 = vmatprep.mubr.msk.f32.mxu1 %vm4297_vm15, %v4288_v0  ;;  %v4974_v47 = vsub.s32 %v2297_v44, %v4896_v1  ;;  %s3441_s25 = scalar_lea.sflag [#allocation6], %s4613_s2 }
 0x54e   : > { %3793 = vmatprep.subr.mxu1 %v4288_v0 }
 0x554   : > { %3791 = vmatmul.mubr.msk.f32.vlgmr.msra.gmra.mrb[0].mxu1 %vm1400_vm6, %v1873_v48 }
 0x555   : > { %3794 = vmatpush3.msk.msra.mxu1 %vm1404_vm5, %v1955_v40  ;;  %3795 = vmatprep.mubr.msk.f32.mxu1 %vm4297_vm15, %v4288_v0 }
 0x556   : > { %3798 = vmatprep.subr.mxu1 %v4288_v0 }
 0x55c   : > { %3796 = vmatmul.mubr.msk.f32.vlgmr.msra.gmra.mrb[0].mxu1 %vm1400_vm6, %v1953_v49 }
 0x55d   : > { %3799 = vmatpush3.msk.msra.mxu1 %vm1404_vm5, %v2035_v50  ;;  %3800 = vmatprep.mubr.msk.f32.mxu1 %vm4297_vm15, %v4288_v0 }
 0x55e   : > { %3808 = vmatprep.subr.mxu1 %v4288_v0 }
 0x564   : > { %3801 = vmatmul.mubr.msk.f32.vlgmr.msra.gmra.mrb[0].mxu1 %vm1400_vm6, %v2033_v51 }
 0x565   : > { %3810 = vmatprep.mubr.msk.f32.mxu1 %vm4297_vm15, %v4288_v0  ;;  %3809 = vmatpush3.msk.msra.mxu1 %vm4899_vm9, %v4306_v8 }
 0x566   : > { %3818 = vmatprep.subr.mxu1 %v4288_v0 }
 0x609   : > { %v2202_v2 = vpop.f32.mrb[2].mxu0 }
 0x60a   : > { %v3807_v4 = vpop.f32.mrb[3].mxu0 }
 0x637   : > { %v2107_v53 = vpop.f32.mrb[0].mxu1 }
 0x638   : > { %v2112_v54 = vmul.f32 %v4824_v14, %v2107_v53  ;;  %v3802_v55 = vpop.f32.mrb[1].mxu1 }
 0x63a   : > { %v2113_v56 = vsel %vm1369_vm2, %v2112_v54, 0.0 }
 0x63b   : > { %2114 = vadd.xlane.f32.xlu0 %v2113_v56 }
 0x6c8   : > { %v2115_v57 = vpop.xlane.xlu0 %2114 }
 0x6c9   : > { %v2116_v58 = vmul.f32 0.015625, %v2115_v57 }
 0x6cb   : > { %v2117_v59 = vsub.f32 %v2107_v53, %v2116_v58 }
 0x6cd   : > { %v2118_v60 = vmul.f32 %v2117_v59, %v2117_v59 }
 0x6cf   : > { %v2119_v61 = vmul.f32 %v4824_v14, %v2118_v60 }
 0x6d1   : > { %v2120_v62 = vsel %vm1369_vm2, %v2119_v61, 0.0 }
 0x6d2   : > { %2121 = vadd.xlane.f32.xlu1 %v2120_v62 }
 0x75f   : > { %v2122_v9 = vpop.xlane.xlu1 %2121 }
 0x760   : > { %v2123_v10 = vmul.f32 0.015625, %v2122_v9 }
 0x762   : > { %v2124_v11 = vadd.f32 1e-05, %v2123_v10 }
 0x764   : > { %4024 = vrsqrt.f32 %v2124_v11 }
 0x76e   : > { %v4025_v12 = vpop.eup %4024 }
 0x76f   : > { %v2126_v13 = vmul.f32 %v4025_v12, %v2117_v59 }
 0x771   : > { %v2206_v14 = vadd.f32 %v2202_v2, %v2126_v13 }
 0x773   : > { %v2207_v15 = vmax.f32 %v2206_v14, 0.0 }
 0x775   : > { %2519 = vrot.lane.b32.xlu1 %v2207_v15, %s4302_s26  ;;  %2367 = vrot.lane.b32.xlu0 %v2207_v15, %s4301_s8  ;;  %s4317_s8 = smov 56   ;;  %s4318_s26 = smov 38  }
 0x776   : > { %3811 = vmatmul.mubr.msk.f32.vlgmr.msra.gmra.mrb[2].mxu1 %vm662_vm1, %v2207_v15 }
 0x777   : > { %3819 = vmatpush3.msk.msra.mxu1 %vm4899_vm9, %v4306_v8  ;;  %3820 = vmatprep.mubr.msk.f32.mxu1 %vm4297_vm15, %v4288_v0 }
 0x778   : > { %3828 = vmatprep.subr.mxu1 %v4288_v0 }
 0x779   : > { %2828 = vrot.lane.b32.xlu1 %v2207_v15, %s4307_s27  ;;  %2671 = vrot.lane.b32.xlu0 %v2207_v15, %s4308_s10  ;;  %s4322_s27 = smov 76   ;;  %s4323_s10 = smov 40  }
 0x77d   : > { %3132 = vrot.lane.b32.xlu1 %v2207_v15, %s4309_s11  ;;  %2980 = vrot.lane.b32.xlu0 %v2207_v15, %s4310_s30  ;;  %s4324_s11 = smov 22   ;;  %s4325_s30 = smov 114  }
 0x781   : > { %3284 = vrot.lane.b32.xlu0 %v2207_v15, %s4311_s9  ;;  %2787 = vrot.lane.b32.xlu1 %v2784_v16, %s4312_s15 }
 0x785   : > { %3361 = vrot.lane.b32.xlu1 %v3358_v18, %s4313_s16  ;;  %2789 = vrot.lane.b32.xlu0 %v2786_v17, %s4312_s15 }
 0x789   : > { %2330 = vrot.lane.b32.xlu1 %v2328_v20, %s4314_s17  ;;  %3363 = vrot.lane.b32.xlu0 %v3360_v19, %s4313_s16  ;;  %s5169_s17 = scalar_lea.hbm %s5233_s6, %s3658_s20 }
 0x78d   : > { %2443 = vrot.lane.b32.xlu0 %v2441_v21, %s4315_s19  ;;  %2482 = vrot.lane.b32.xlu1 %v2480_v22, %s4316_s7  ;;  %s4327_s7 = smov [#allocation15]  }
 0x791   : > { %2595 = vrot.lane.b32.xlu0 %v2593_v23, %s4317_s8  ;;  %2634 = vrot.lane.b32.xlu1 %v2632_v24, %s4318_s26  ;;  %s4202_s8 = sshll.u32 %s4327_s7, 4  ;;  %s4203_s8 = int_to_ptr.vmem [resolvable:$false] %s4202_s8 }
 0x792   : > { %s4204_s26 = scalar_lea.vmem %s4203_s8, 2048 }
 0x795   : > { %2747 = vrot.lane.b32.xlu0 %v2745_v25, %s4319_s0  ;;  %2904 = vrot.lane.b32.xlu1 %v2902_v26, %s4320_s1 }
 0x799   : > { %2943 = vrot.lane.b32.xlu0 %v2941_v27, %s4321_s12  ;;  %3056 = vrot.lane.b32.xlu1 %v3054_v28, %s4322_s27 }
 0x79d   : > { %3095 = vrot.lane.b32.xlu0 %v3093_v29, %s4311_s9  ;;  %3208 = vrot.lane.b32.xlu1 %v3206_v30, %s4323_s10  ;;  %s3454_s9 = sshll.u32 %s4983_s29, 4  ;;  %s5171_s9 = int_to_ptr.vmem [resolvable:$true] %s3454_s9 }
 0x79e   : > { %s4198_s19 = scalar_lea.vmem %s5171_s9, 1024  ;;  %p4205_p0 = scmp.lt.s32.totalorder %s5171_s9, %s4203_s8 }
 0x79f   : > { %p4199_p12 = scmp.ne.s32.totalorder %s5171_s9, %s4198_s19  ;;  %p4206_p4 = scmp.lt.s32.totalorder %s4204_s26, %s4198_s19 }
 0x7a1   : > { %3247 = vrot.lane.b32.xlu0 %v3245_v31, %s4324_s11  ;;  %3403 = vrot.lane.b32.xlu1 %v3401_v32, %s4325_s30  ;;  %p4200_p2 = pnand %p4199_p12, %p5260_p1  ;;  %p4207_p3 = por %p4206_p4, %p4205_p0 }
 0x7a3   : > { %p4201_p13 = pneg %p4200_p2 }
 0x7a5   : > { %p4208_p6 = pnand %p4207_p3, %p4201_p13 }
 0x7e7   : > { %v2520_v33 = vpop.permute.xlu1 %2519  ;;  %v2368_v34 = vpop.permute.xlu0 %2367 }
 0x7e8   : > { %3816 = vmatmul.mubr.msk.f32.vlgmr.msra.gmra.mrb[4].mxu0 %vm662_vm1, %v2368_v34  ;;  %3821 = vmatmul.mubr.msk.f32.vlgmr.msra.gmra.mrb[4].mxu1 %vm662_vm1, %v2520_v33 }
 0x7e9   : > { %3824 = vmatpush3.msk.msra.mxu0 %vm4899_vm9, %v4306_v8  ;;  %3825 = vmatprep.mubr.msk.f32.mxu0 %vm4297_vm15, %v4288_v0 }
 0x7ea   : > { %3829 = vmatpush3.msk.msra.mxu1 %vm4899_vm9, %v4306_v8  ;;  %3830 = vmatprep.mubr.msk.f32.mxu1 %vm4297_vm15, %v4288_v0 }
 0x7eb   : > { %v2829_v35 = vpop.permute.xlu1 %2828  ;;  %v2672_v36 = vpop.permute.xlu0 %2671  ;;  %3833 = vmatprep.subr.mxu0 %v4288_v0  ;;  %3838 = vmatprep.subr.mxu1 %v4288_v0 }
 0x7ec   : > { %3826 = vmatmul.mubr.msk.f32.vlgmr.msra.gmra.mrb[6].mxu0 %vm662_vm1, %v2672_v36  ;;  %3831 = vmatmul.mubr.msk.f32.vlgmr.msra.gmra.mrb[6].mxu1 %vm662_vm1, %v2829_v35 }
 0x7ed   : > { %3834 = vmatpush3.msk.msra.mxu0 %vm4899_vm9, %v4306_v8  ;;  %3835 = vmatprep.mubr.msk.f32.mxu0 %vm4297_vm15, %v4288_v0 }
 0x7ee   : > { %3839 = vmatpush3.msk.msra.mxu1 %vm4899_vm9, %v4306_v8  ;;  %3840 = vmatprep.mubr.msk.f32.mxu1 %vm4297_vm15, %v4288_v0 }
 0x7ef   : > { %v3133_v37 = vpop.permute.xlu1 %3132  ;;  %v2981_v38 = vpop.permute.xlu0 %2980  ;;  %3843 = vmatprep.subr.mxu0 %v4288_v0 }
 0x7f0   : > { %3836 = vmatmul.mubr.msk.f32.vlgmr.msra.gmra.mrb[8].mxu0 %vm662_vm1, %v2981_v38  ;;  %3841 = vmatmul.mubr.msk.f32.vlgmr.msra.gmra.mrb[8].mxu1 %vm662_vm1, %v3133_v37 }
 0x7f1   : > { %3844 = vmatpush3.msk.msra.mxu0 %vm4899_vm9, %v4306_v8  ;;  %3845 = vmatprep.mubr.msk.f32.mxu0 %vm4297_vm15, %v4288_v0 }
 0x7f3   : > { %v3285_v39 = vpop.permute.xlu0 %3284  ;;  %v2788_v40 = vpop.permute.xlu1 %2787 }
 0x7f4   : > { %3846 = vmatmul.mubr.msk.f32.vlgmr.msra.gmra.mrb[10].mxu0 %vm662_vm1, %v3285_v39 }
 0x7f7   : > { %v3362_v43 = vpop.permute.xlu1 %3361  ;;  %v2790_v63 = vpop.permute.xlu0 %2789 }
 0x7f8   : > { %v2792_v23 = vsel %vm2791_vm11, %v2788_v40, %v2790_v63 }
 0x7fb   : > { %v2331_v45 = vpop.permute.xlu1 %2330  ;;  %v3364_v1 = vpop.permute.xlu0 %3363 }
 0x7fc   : > { %v5015_v24 = vsel %vm1400_vm6, %v3362_v43, %v3364_v1 }
 0x7ff   : > { %v2444_v2 = vpop.permute.xlu0 %2443  ;;  %v2483_v3 = vpop.permute.xlu1 %2482 }
 0x803   : > { %v2596_v4 = vpop.permute.xlu0 %2595  ;;  %v2635_v5 = vpop.permute.xlu1 %2634 }
 0x807   : > { %v2748_v6 = vpop.permute.xlu0 %2747  ;;  %v5002_v7 = vpop.permute.xlu1 %2904 }
 0x80b   : > { %v5004_v8 = vpop.permute.xlu0 %2943  ;;  %v5006_v9 = vpop.permute.xlu1 %3056 }
 0x80f   : > { %v5008_v10 = vpop.permute.xlu0 %3095  ;;  %v3209_v41 = vpop.permute.xlu1 %3208 }
 0x813   : > { %v3248_v42 = vpop.permute.xlu0 %3247 }
 0x849   : > { %v2288_v48 = vpop.f32.mrb[2].mxu1 }
 0x84a   : > { %v2293_v49 = vadd.f32 %v2292_v46, %v2288_v48  ;;  %v2333_v50 = vadd.f32 %v2331_v45, %v2288_v48  ;;  %v3812_v51 = vpop.f32.mrb[3].mxu1 }
 0x84c   : > { %v2301_v0 = vrot.slane %v2293_v49, %v4974_v47  ;;  %v2341_v52 = vrot.slane %v2333_v50, %v4974_v47 }
 0x84e   : > { %v2302_v53 = vcombine.high %v2301_v0, %v2301_v0  ;;  %v2309_v54 = vrot.slane %v2301_v0, %v4974_v47  ;;  %v2342_v55 = vcombine.high %v2341_v52, %v2341_v52  ;;  %v2349_v56 = vrot.slane %v2341_v52, %v4974_v47 }
 0x850   : > { %v2316_v57 = vrot.slane %v2302_v53, %v4974_v47  ;;  %v2317_v58 = vcombine.high %v2309_v54, %v2309_v54  ;;  %2324 = vst.msk [vmem:[%s4983_s29] sm:$0x1] %vm2323_vm10, %v2309_v54  ;;  %v2356_v59 = vrot.slane %v2342_v55, %v4974_v47  ;;  %v2357_v60 = vcombine.high %v2349_v56, %v2349_v56 }
 0x851   : > { %2363 = vst.msk [vmem:[%s4983_s29 + $0x1] sm:$0x1] %vm2323_vm10, %v2349_v56 }
 0x852   : > { %v2318_v61 = vcombine.high %v2316_v57, %v2316_v57  ;;  %2325 = vst.msk [vmem:[%s4983_s29 + $0x10] sm:$0x1] %vm2323_vm10, %v2316_v57  ;;  %2326 = vst.msk [vmem:[%s4983_s29 + $0x20] sm:$0x1] %vm2323_vm10, %v2317_v58  ;;  %v2358_v62 = vcombine.high %v2356_v59, %v2356_v59 }
 0x853   : > { %2364 = vst.msk [vmem:[%s4983_s29 + $0x11] sm:$0x1] %vm2323_vm10, %v2356_v59  ;;  %2365 = vst.msk [vmem:[%s4983_s29 + $0x21] sm:$0x1] %vm2323_vm10, %v2357_v60 }
 0x854   : > { %2327 = vst.msk [vmem:[%s4983_s29 + $0x30] sm:$0x1] %vm2323_vm10, %v2318_v61  ;;  %2366 = vst.msk [vmem:[%s4983_s29 + $0x31] sm:$0x1] %vm2323_vm10, %v2358_v62 }
 0x8bb   : > { %v2437_v11 = vpop.f32.mrb[4].mxu0  ;;  %v2589_v12 = vpop.f32.mrb[4].mxu1 }
 0x8bc   : > { %v2446_v13 = vadd.f32 %v2444_v2, %v2437_v11  ;;  %v2485_v14 = vadd.f32 %v2483_v3, %v2437_v11  ;;  %v2598_v15 = vadd.f32 %v2596_v4, %v2589_v12  ;;  %v2637_v16 = vadd.f32 %v2635_v5, %v2589_v12  ;;  %v3817_v17 = vpop.f32.mrb[5].mxu0  ;;  %v3822_v18 = vpop.f32.mrb[5].mxu1 }
 0x8be   : > { %v2454_v19 = vrot.slane %v2446_v13, %v4974_v47  ;;  %v2493_v20 = vrot.slane %v2485_v14, %v4974_v47  ;;  %v2606_v21 = vrot.slane %v2598_v15, %v4974_v47  ;;  %v2645_v22 = vrot.slane %v2637_v16, %v4974_v47 }
 0x8bf   : > { %v2741_v25 = vpop.f32.mrb[6].mxu0  ;;  %v2898_v26 = vpop.f32.mrb[6].mxu1 }
 0x8c0   : > { %v2455_v27 = vcombine.high %v2454_v19, %v2454_v19  ;;  %v2462_v28 = vrot.slane %v2454_v19, %v4974_v47  ;;  %v2494_v29 = vcombine.high %v2493_v20, %v2493_v20  ;;  %v2501_v30 = vrot.slane %v2493_v20, %v4974_v47  ;;  %v3827_v31 = vpop.f32.mrb[7].mxu0  ;;  %v3832_v32 = vpop.f32.mrb[7].mxu1 }
 0x8c1   : > { %v2607_v33 = vcombine.high %v2606_v21, %v2606_v21  ;;  %v2614_v34 = vrot.slane %v2606_v21, %v4974_v47  ;;  %v2646_v35 = vcombine.high %v2645_v22, %v2645_v22  ;;  %v2653_v36 = vrot.slane %v2645_v22, %v4974_v47 }
 0x8c2   : > { %v2469_v37 = vrot.slane %v2455_v27, %v4974_v47  ;;  %v2470_v38 = vcombine.high %v2462_v28, %v2462_v28  ;;  %2476 = vst.msk [vmem:[%s4983_s29 + $0x2] sm:$0x1] %vm2323_vm10, %v2462_v28  ;;  %v2508_v39 = vrot.slane %v2494_v29, %v4974_v47  ;;  %v2509_v40 = vcombine.high %v2501_v30, %v2501_v30 }
 0x8c3   : > { %2515 = vst.msk [vmem:[%s4983_s29 + $0x3] sm:$0x1] %vm2323_vm10, %v2501_v30  ;;  %v2621_v43 = vrot.slane %v2607_v33, %v4974_v47  ;;  %v2622_v44 = vcombine.high %v2614_v34, %v2614_v34  ;;  %2628 = vst.msk [vmem:[%s4983_s29 + $0x4] sm:$0x1] %vm2323_vm10, %v2614_v34  ;;  %v2660_v45 = vrot.slane %v2646_v35, %v4974_v47  ;;  %v3050_v48 = vpop.f32.mrb[8].mxu0  ;;  %v3202_v49 = vpop.f32.mrb[8].mxu1 }
 0x8c4   : > { %v2661_v46 = vcombine.high %v2653_v36, %v2653_v36  ;;  %2667 = vst.msk [vmem:[%s4983_s29 + $0x5] sm:$0x1] %vm2323_vm10, %v2653_v36  ;;  %v2471_v50 = vcombine.high %v2469_v37, %v2469_v37  ;;  %2477 = vst.msk [vmem:[%s4983_s29 + $0x12] sm:$0x1] %vm2323_vm10, %v2469_v37  ;;  %v2510_v51 = vcombine.high %v2508_v39, %v2508_v39  ;;  %v3837_v53 = vpop.f32.mrb[9].mxu0  ;;  %v3842_v54 = vpop.f32.mrb[9].mxu1 }
 0x8c5   : > { %2478 = vst.msk [vmem:[%s4983_s29 + $0x22] sm:$0x1] %vm2323_vm10, %v2470_v38  ;;  %2516 = vst.msk [vmem:[%s4983_s29 + $0x13] sm:$0x1] %vm2323_vm10, %v2508_v39  ;;  %v2750_v0 = vadd.f32 %v2748_v6, %v2741_v25  ;;  %v2794_v52 = vadd.f32 %v2792_v23, %v2741_v25  ;;  %v2623_v55 = vcombine.high %v2621_v43, %v2621_v43  ;;  %v3404_v39 = vpop.permute.xlu1 %3403 }
 0x8c6   : > { %2517 = vst.msk [vmem:[%s4983_s29 + $0x23] sm:$0x1] %vm2323_vm10, %v2509_v40  ;;  %2629 = vst.msk [vmem:[%s4983_s29 + $0x14] sm:$0x1] %vm2323_vm10, %v2621_v43  ;;  %v2662_v56 = vcombine.high %v2660_v45, %v2660_v45  ;;  %v2907_v57 = vadd.f32 %v5002_v7, %v2898_v26  ;;  %v2946_v58 = vadd.f32 %v5004_v8, %v2898_v26 }
 0x8c7   : > { %2630 = vst.msk [vmem:[%s4983_s29 + $0x24] sm:$0x1] %vm2323_vm10, %v2622_v44  ;;  %2668 = vst.msk [vmem:[%s4983_s29 + $0x15] sm:$0x1] %vm2323_vm10, %v2660_v45  ;;  %v2758_v59 = vrot.slane %v2750_v0, %v4974_v47  ;;  %v2802_v60 = vrot.slane %v2794_v52, %v4974_v47  ;;  %v3059_v61 = vadd.f32 %v5006_v9, %v3050_v48  ;;  %v5065_v4 = vpop.f32.mrb[10].mxu0 }
 0x8c8   : > { %2669 = vst.msk [vmem:[%s4983_s29 + $0x25] sm:$0x1] %vm2323_vm10, %v2661_v46  ;;  %2479 = vst.msk [vmem:[%s4983_s29 + $0x32] sm:$0x1] %vm2323_vm10, %v2471_v50  ;;  %v3098_v62 = vadd.f32 %v5008_v10, %v3050_v48  ;;  %v2915_v63 = vrot.slane %v2907_v57, %v4974_v47  ;;  %v2954_v1 = vrot.slane %v2946_v58, %v4974_v47  ;;  %v3847_v9 = vpop.f32.mrb[11].mxu0 }
 0x8c9   : > { %2518 = vst.msk [vmem:[%s4983_s29 + $0x33] sm:$0x1] %vm2323_vm10, %v2510_v51  ;;  %2631 = vst.msk [vmem:[%s4983_s29 + $0x34] sm:$0x1] %vm2323_vm10, %v2623_v55  ;;  %v3211_v2 = vadd.f32 %v3209_v41, %v3202_v49  ;;  %v3250_v3 = vadd.f32 %v3248_v42, %v3202_v49  ;;  %v2759_v5 = vcombine.high %v2758_v59, %v2758_v59 }
 0x8ca   : > { %2670 = vst.msk [vmem:[%s4983_s29 + $0x35] sm:$0x1] %vm2323_vm10, %v2662_v56  ;;  %v2766_v6 = vrot.slane %v2758_v59, %v4974_v47  ;;  %v2803_v7 = vcombine.high %v2802_v60, %v2802_v60  ;;  %v2810_v8 = vrot.slane %v2802_v60, %v4974_v47  ;;  %v2916_v10 = vcombine.high %v2915_v63, %v2915_v63 }
 0x8cb   : > { %v2923_v11 = vrot.slane %v2915_v63, %v4974_v47  ;;  %v2955_v12 = vcombine.high %v2954_v1, %v2954_v1  ;;  %v2962_v13 = vrot.slane %v2954_v1, %v4974_v47  ;;  %v2773_v14 = vrot.slane %v2759_v5, %v4974_v47 }
 0x8cc   : > { %v2774_v15 = vcombine.high %v2766_v6, %v2766_v6  ;;  %2780 = vst.msk [vmem:[%s4983_s29 + $0x6] sm:$0x1] %vm2323_vm10, %v2766_v6  ;;  %v2817_v16 = vrot.slane %v2803_v7, %v4974_v47  ;;  %v2818_v17 = vcombine.high %v2810_v8, %v2810_v8  ;;  %2824 = vst.msk [vmem:[%s4983_s29 + $0x7] sm:$0x1] %vm2323_vm10, %v2810_v8 }
 0x8cd   : > { %v2930_v18 = vrot.slane %v2916_v10, %v4974_v47  ;;  %v2931_v19 = vcombine.high %v2923_v11, %v2923_v11  ;;  %2937 = vst.msk [vmem:[%s4983_s29 + $0x8] sm:$0x1] %vm2323_vm10, %v2923_v11  ;;  %v2969_v20 = vrot.slane %v2955_v12, %v4974_v47  ;;  %v2970_v21 = vcombine.high %v2962_v13, %v2962_v13 }
 0x8ce   : > { %2976 = vst.msk [vmem:[%s4983_s29 + $0x9] sm:$0x1] %vm2323_vm10, %v2962_v13  ;;  %v2775_v22 = vcombine.high %v2773_v14, %v2773_v14  ;;  %2781 = vst.msk [vmem:[%s4983_s29 + $0x16] sm:$0x1] %vm2323_vm10, %v2773_v14  ;;  %v2819_v23 = vcombine.high %v2817_v16, %v2817_v16  ;;  %v3067_v25 = vrot.slane %v3059_v61, %v4974_v47 }
 0x8cf   : > { %2782 = vst.msk [vmem:[%s4983_s29 + $0x26] sm:$0x1] %vm2323_vm10, %v2774_v15  ;;  %2825 = vst.msk [vmem:[%s4983_s29 + $0x17] sm:$0x1] %vm2323_vm10, %v2817_v16  ;;  %v3106_v26 = vrot.slane %v3098_v62, %v4974_v47  ;;  %v2932_v27 = vcombine.high %v2930_v18, %v2930_v18  ;;  %v2971_v28 = vcombine.high %v2969_v20, %v2969_v20 }
 0x8d0   : > { %2826 = vst.msk [vmem:[%s4983_s29 + $0x27] sm:$0x1] %vm2323_vm10, %v2818_v17  ;;  %2938 = vst.msk [vmem:[%s4983_s29 + $0x18] sm:$0x1] %vm2323_vm10, %v2930_v18  ;;  %v3219_v29 = vrot.slane %v3211_v2, %v4974_v47  ;;  %v3258_v30 = vrot.slane %v3250_v3, %v4974_v47  ;;  %v3068_v31 = vcombine.high %v3067_v25, %v3067_v25 }
 0x8d1   : > { %2939 = vst.msk [vmem:[%s4983_s29 + $0x28] sm:$0x1] %vm2323_vm10, %v2931_v19  ;;  %2977 = vst.msk [vmem:[%s4983_s29 + $0x19] sm:$0x1] %vm2323_vm10, %v2969_v20  ;;  %v3075_v32 = vrot.slane %v3067_v25, %v4974_v47  ;;  %v3107_v33 = vcombine.high %v3106_v26, %v3106_v26  ;;  %v3114_v34 = vrot.slane %v3106_v26, %v4974_v47 }
 0x8d2   : > { %2978 = vst.msk [vmem:[%s4983_s29 + $0x29] sm:$0x1] %vm2323_vm10, %v2970_v21  ;;  %2783 = vst.msk [vmem:[%s4983_s29 + $0x36] sm:$0x1] %vm2323_vm10, %v2775_v22  ;;  %v3220_v35 = vcombine.high %v3219_v29, %v3219_v29  ;;  %v3227_v36 = vrot.slane %v3219_v29, %v4974_v47  ;;  %v3259_v37 = vcombine.high %v3258_v30, %v3258_v30 }
 0x8d3   : > { %2827 = vst.msk [vmem:[%s4983_s29 + $0x37] sm:$0x1] %vm2323_vm10, %v2819_v23  ;;  %2940 = vst.msk [vmem:[%s4983_s29 + $0x38] sm:$0x1] %vm2323_vm10, %v2932_v27  ;;  %v3266_v38 = vrot.slane %v3258_v30, %v4974_v47  ;;  %v3082_v40 = vrot.slane %v3068_v31, %v4974_v47  ;;  %v3083_v41 = vcombine.high %v3075_v32, %v3075_v32 }
 0x8d4   : > { %2979 = vst.msk [vmem:[%s4983_s29 + $0x39] sm:$0x1] %vm2323_vm10, %v2971_v28  ;;  %3089 = vst.msk [vmem:[%s4983_s29 + $0xa] sm:$0x1] %vm2323_vm10, %v3075_v32  ;;  %v3121_v42 = vrot.slane %v3107_v33, %v4974_v47  ;;  %v3122_v43 = vcombine.high %v3114_v34, %v3114_v34  ;;  %v3234_v44 = vrot.slane %v3220_v35, %v4974_v47 }
 0x8d5   : > { %3128 = vst.msk [vmem:[%s4983_s29 + $0xb] sm:$0x1] %vm2323_vm10, %v3114_v34  ;;  %v3235_v45 = vcombine.high %v3227_v36, %v3227_v36  ;;  %3241 = vst.msk [vmem:[%s4983_s29 + $0xc] sm:$0x1] %vm2323_vm10, %v3227_v36  ;;  %v3273_v46 = vrot.slane %v3259_v37, %v4974_v47  ;;  %v3274_v48 = vcombine.high %v3266_v38, %v3266_v38 }
 0x8d6   : > { %3280 = vst.msk [vmem:[%s4983_s29 + $0xd] sm:$0x1] %vm2323_vm10, %v3266_v38  ;;  %v3084_v49 = vcombine.high %v3082_v40, %v3082_v40  ;;  %3090 = vst.msk [vmem:[%s4983_s29 + $0x1a] sm:$0x1] %vm2323_vm10, %v3082_v40  ;;  %v3123_v50 = vcombine.high %v3121_v42, %v3121_v42  ;;  %v3367_v51 = vadd.f32 %v5015_v24, %v5065_v4 }
 0x8d7   : > { %3091 = vst.msk [vmem:[%s4983_s29 + $0x2a] sm:$0x1] %vm2323_vm10, %v3083_v41  ;;  %3129 = vst.msk [vmem:[%s4983_s29 + $0x1b] sm:$0x1] %vm2323_vm10, %v3121_v42  ;;  %v3406_v0 = vadd.f32 %v3404_v39, %v5065_v4  ;;  %v3236_v52 = vcombine.high %v3234_v44, %v3234_v44  ;;  %v3275_v53 = vcombine.high %v3273_v46, %v3273_v46 }
 0x8d8   : > { %3130 = vst.msk [vmem:[%s4983_s29 + $0x2b] sm:$0x1] %vm2323_vm10, %v3122_v43  ;;  %3242 = vst.msk [vmem:[%s4983_s29 + $0x1c] sm:$0x1] %vm2323_vm10, %v3234_v44  ;;  %v3375_v24 = vrot.slane %v3367_v51, %v4974_v47 }
 0x8d9   : > { %3243 = vst.msk [vmem:[%s4983_s29 + $0x2c] sm:$0x1] %vm2323_vm10, %v3235_v45  ;;  %3281 = vst.msk [vmem:[%s4983_s29 + $0x1d] sm:$0x1] %vm2323_vm10, %v3273_v46  ;;  %v3414_v54 = vrot.slane %v3406_v0, %v4974_v47 }
 0x8da   : > { %3282 = vst.msk [vmem:[%s4983_s29 + $0x2d] sm:$0x1] %vm2323_vm10, %v3274_v48  ;;  %3092 = vst.msk [vmem:[%s4983_s29 + $0x3a] sm:$0x1] %vm2323_vm10, %v3084_v49  ;;  %v3376_v55 = vcombine.high %v3375_v24, %v3375_v24  ;;  %v3383_v56 = vrot.slane %v3375_v24, %v4974_v47 }
 0x8db   : > { %3131 = vst.msk [vmem:[%s4983_s29 + $0x3b] sm:$0x1] %vm2323_vm10, %v3123_v50  ;;  %3244 = vst.msk [vmem:[%s4983_s29 + $0x3c] sm:$0x1] %vm2323_vm10, %v3236_v52  ;;  %v3415_v57 = vcombine.high %v3414_v54, %v3414_v54  ;;  %v3422_v58 = vrot.slane %v3414_v54, %v4974_v47 }
 0x8dc   : > { %3283 = vst.msk [vmem:[%s4983_s29 + $0x3d] sm:$0x1] %vm2323_vm10, %v3275_v53  ;;  %v3390_v59 = vrot.slane %v3376_v55, %v4974_v47  ;;  %v3391_v60 = vcombine.high %v3383_v56, %v3383_v56  ;;  %3397 = vst.msk [vmem:[%s4983_s29 + $0xe] sm:$0x1] %vm2323_vm10, %v3383_v56 }
 0x8dd   : > { %v3429_v61 = vrot.slane %v3415_v57, %v4974_v47  ;;  %v3430_v62 = vcombine.high %v3422_v58, %v3422_v58  ;;  %3436 = vst.msk [vmem:[%s4983_s29 + $0xf] sm:$0x1] %vm2323_vm10, %v3422_v58 }
 0x8de   : > { %v3392_v63 = vcombine.high %v3390_v59, %v3390_v59  ;;  %3398 = vst.msk [vmem:[%s4983_s29 + $0x1e] sm:$0x1] %vm2323_vm10, %v3390_v59  ;;  %3399 = vst.msk [vmem:[%s4983_s29 + $0x2e] sm:$0x1] %vm2323_vm10, %v3391_v60 }
 0x8df   : > { %v3431_v47 = vcombine.high %v3429_v61, %v3429_v61  ;;  %3437 = vst.msk [vmem:[%s4983_s29 + $0x1f] sm:$0x1] %vm2323_vm10, %v3429_v61  ;;  %3438 = vst.msk [vmem:[%s4983_s29 + $0x2f] sm:$0x1] %vm2323_vm10, %v3430_v62 }
 0x8e0   : > { %3400 = vst.msk [vmem:[%s4983_s29 + $0x3e] sm:$0x1] %vm2323_vm10, %v3392_v63 }
 0x8e1   : > { %3439 = vst.msk [vmem:[%s4983_s29 + $0x3f] sm:$0x1] %vm2323_vm10, %v3431_v47 }
 0x8e2   : > { %4211 = shalt.err (!%p4208_p6)
}
 0x8e3   : > { %s4212_s0 = scalar_lea.hbm %s5169_s17, 1024  ;;  %s4216_s27 = scalar_lea.hbm %s5233_s6, 2048 }
 0x8e4   : > { %p4213_p8 = scmp.ne.s32.totalorder %s5169_s17, %s4212_s0  ;;  %p4217_p9 = scmp.lt.u32.totalorder %s5169_s17, %s5233_s6 }
 0x8e5   : > { %p4218_p5 = scmp.lt.u32.totalorder %s4216_s27, %s4212_s0  ;;  %p4220_p12 = scmp.lt.u32.totalorder %s4212_s0, %s5169_s17 }
 0x8e6   : > { %p4214_p10 = pnand %p4213_p8, %p5260_p1 }
 0x8e7   : > { %p4219_p7 = por %p4218_p5, %p4217_p9 }
 0x8e8   : > { %p4215_p11 = pneg %p4214_p10 }
 0x8e9   : > { %p4221_p2 = por %p4220_p12, %p4219_p7 }
 0x8eb   : > { %p4222_p13 = pnand %p4221_p2, %p4215_p11 }
 0x8ed   : > { %4225 = shalt.err (!%p4222_p13)
}
 0x8ee   : > { %s4328_s30 = smov 128   ;;  %s4329_s29 = smov 8  }
 0x8ef   : > { %3903 = dma.vmem_to_hbm [thread:$0]  (%p5260_p1), %s5171_s9, 1024, %s5169_s17, %s3441_s25, %s4328_s30, %s4328_s30, %s4329_s29  }
 0x8f0 PF: > { %s3469_s20 = sand.u32 1, %s4264_s21   ;;  %p5261_p0 = scmp.ne.s32.totalorder %s5242_s28, 0 }
 0x8f1   : > { %p5262_p4 = scmp.ge.s32.totalorder %s4276_s24, 2  ;;  %s3470_s15 = scalar_lea.sflag [#allocation6], %s3469_s20 }
 0x8f3   : > { %p3926_p3 = pnand %p5262_p4, %p5261_p0 }
 0x8f5   : > { %4259 = dma.done.wait (!%p3926_p3), %s3470_s15, 1024  }
 0x8f6   : > { %4261 = vsyncadd (!%p3926_p3), %s3470_s15, 4294966272  ;;  %p24_p6 = scmp.ge.s32.totalorder %s4521_s18, 4   ;;  %s5263_s21 = smov %s4268_s22 }
 0x8f7   : > { %s5264_s22 = smov %s4272_s23  ;;  %s5265_s23 = smov %s4537_s14 }
 0x8f8   : > { %s5266_s24 = smov %s4521_s18  ;;  %26 = sbr.rel (!%p24_p6) target bundleno = 13 (0xd), region = 134 }
 0x8ff   :  { %3475 = vsyncpa [#allocation5], 1 }
 0x900   :  { %3477 = vsyncpa [#allocation5 + $0x1], 1 }
 0x901   :  { %3478 = vsyncpa [#allocation8], 1 }
 0x902   :  { %3479 = vsyncpa [#allocation11], 1 }
 0x903   :  { %3480 = vsyncpa [#allocation14], 1 }
 0x904   :  { %3482 = vsyncpa [#allocation14 + $0x1], 1 }
 0x905   :  { %3483 = vsyncpa [#allocation6], 1 }
 0x906   :  { %3485 = vsyncpa [#allocation6 + $0x1], 1 }

</bundles_post_ra>
